<compile_context>
chip_gen: v5e
topology: v5e:2x2
jax: 0.10.0
libtpu: 0.0.40
codegen_flags: <defaults>
</compile_context>

<pallas_src>
import jax
import jax.numpy as jnp
from jax import lax
from jax.experimental import pallas as pl
from jax.experimental.pallas import tpu as pltpu

D_IN = 2048
D_HID = 2048
D_OUT = 1
TK = 1024  # reduction tile for layer_1 (2 steps over the 2048-wide K)


def mlp_kernel(x_ref, w1_ref, b1_ref, w2_ref, b2_ref, o_ref, acc_ref):
    """Grid axis 0 tiles the layer_1 reduction dim; hidden acts accumulate in f32 VMEM.

    On the last step the bias/ReLU is applied and the (2048 -> 1) projection is
    computed as a VPU multiply + lane reduction (keeps w2 lane-dense, skips an
    N=1 MXU matmul).
    """
    k = pl.program_id(0)

    @pl.when(k == 0)
    def _():
        acc_ref[...] = jnp.zeros_like(acc_ref)

    # x tile (B, TK) f32 -> bf16 (cheap VPU cast; x traffic is negligible);
    # w1 tile (D_HID, TK) bf16 in native [out, in] layout.
    # Contract x dim 1 with w1 dim 1 (== x @ w1.T), accumulate in f32 on the MXU.
    acc_ref[...] += lax.dot_general(
        x_ref[...].astype(jnp.bfloat16),
        w1_ref[...],
        dimension_numbers=(((1,), (1,)), ((), ())),
        preferred_element_type=jnp.float32,
    )

    @pl.when(k == pl.num_programs(0) - 1)
    def _():
        h = jnp.maximum(acc_ref[...] + b1_ref[...], 0.0)  # bias + ReLU
        # TODO(synk): nn.Dropout(0.1) is identity in eval mode; training-mode dropout
        # would use pltpu.prng_seed / pltpu.prng_random_bits to build a keep-mask.
        out = jnp.sum(h * w2_ref[...], axis=-1, keepdims=True) + b2_ref[...]
        o_ref[...] = out.astype(o_ref.dtype)


def binary_classifier(x, w1_bf16, b1, w2, b2):
    """Forward pass.

    x:        (B, 2048) f32
    w1_bf16:  (2048, 2048) bf16, native PyTorch [out, in] layout (cast offline, once)
    b1:       (2048,) f32
    w2:       (1, 2048) f32 (native [out, in] layout; kept lane-dense as-is)
    b2:       (1,) f32
    returns:  (B, 1) f32
    """
    B = x.shape[0]
    b1r = b1.reshape(1, D_HID)   # (1, 2048)
    b2r = b2.reshape(1, D_OUT)   # (1, 1)

    grid = (D_IN // TK,)

    # TODO(synk): on v7x (2 TensorCores) add a leading "parallel" axis splitting
    # D_HID across cores (each core writes a distinct partial output block).
    return pl.pallas_call(
        mlp_kernel,
        out_shape=jax.ShapeDtypeStruct((B, D_OUT), jnp.float32),
        grid_spec=pltpu.PrefetchScalarGridSpec(
            num_scalar_prefetch=0,
            grid=grid,
            in_specs=[
                pl.BlockSpec((B, TK), lambda k: (0, k)),        # x tile (f32)
                pl.BlockSpec((D_HID, TK), lambda k: (0, k)),    # W1 tile (bf16, [out,in])
                pl.BlockSpec((1, D_HID), lambda k: (0, 0)),     # b1
                pl.BlockSpec((1, D_HID), lambda k: (0, 0)),     # w2 (lane-dense)
                pl.BlockSpec((1, D_OUT), lambda k: (0, 0)),     # b2
            ],
            out_specs=pl.BlockSpec((B, D_OUT), lambda k: (0, 0)),
            scratch_shapes=[pltpu.VMEM((B, D_HID), jnp.float32)],
        ),
        compiler_params=pltpu.CompilerParams(
            dimension_semantics=("arbitrary",),   # K axis is a reduction
            vmem_limit_bytes=32 << 20,            # actual footprint ~8 MiB
        ),
    )(x, w1_bf16, b1r, w2, b2r)


def reference(x, w1, b1, w2, b2):
    h = jnp.maximum(x @ w1.T + b1, 0.0)
    return h @ w2.T + b2


if __name__ == "__main__":
    key = jax.random.PRNGKey(0)
    kx, k1, k2, k3, k4 = jax.random.split(key, 5)

    B = 8  # small batch; feature dims are fixed at 2048 by the module
    x = jax.random.normal(kx, (B, D_IN), dtype=jnp.float32)

    # Synthetic parameters with nn.Linear shapes: layer_1 (2048,2048)+(2048,), layer_2 (1,2048)+(1,).
    w1 = jax.random.normal(k1, (D_HID, D_IN), dtype=jnp.float32) * 0.02
    b1 = jax.random.normal(k2, (D_HID,), dtype=jnp.float32) * 0.02
    w2 = jax.random.normal(k3, (D_OUT, D_HID), dtype=jnp.float32) * 0.02
    b2 = jax.random.normal(k4, (D_OUT,), dtype=jnp.float32) * 0.02

    # "Offline" one-time weight cast (not on the per-call path).
    w1_bf16 = w1.astype(jnp.bfloat16)

    out = binary_classifier(x, w1_bf16, b1, w2, b2)
    jax.block_until_ready(out)
    assert out.shape == (B, 1)

    # Tight check against the exact math the kernel performs (bf16 layer-1 weights/acts).
    ref_bf16 = reference(
        x.astype(jnp.bfloat16).astype(jnp.float32),
        w1_bf16.astype(jnp.float32),
        b1, w2, b2,
    )
    assert jnp.allclose(out, ref_bf16, atol=1e-3, rtol=1e-3)

    # Loose sanity check against the original full-f32 module semantics.
    ref_f32 = reference(x, w1, b1, w2, b2)
    assert jnp.allclose(out, ref_f32, atol=5e-2, rtol=5e-2)

    print("KERNEL_OK")
</pallas_src>

<mosaic_0001>
module attributes {stable_mosaic.version = 11 : i64} {
  func.func @mlp_kernel(%arg0: i32, %arg1: memref<8x1024xf32, #tpu.memory_space<vmem>>, %arg2: memref<2048x1024xbf16, #tpu.memory_space<vmem>>, %arg3: memref<1x2048xf32, #tpu.memory_space<vmem>>, %arg4: memref<1x2048xf32, #tpu.memory_space<vmem>>, %arg5: memref<1x1xf32, #tpu.memory_space<vmem>>, %arg6: memref<8x1xf32, #tpu.memory_space<vmem>>, %arg7: memref<8x2048xf32, #tpu.memory_space<vmem>>) attributes {dimension_semantics = [#tpu.dimension_semantics<arbitrary>], iteration_bounds = array<i64: 2>, scalar_prefetch = 0 : i64, scratch_operands = 1 : i64, tpu.core_type = #tpu.core_type<tc>, window_params = [{transform_indices = @transform_0, window_bounds = array<i64: 8, 1024>}, {transform_indices = @transform_1, window_bounds = array<i64: 2048, 1024>}, {pipeline_mode = #tpu.pipeline_mode<synchronous>, transform_indices = @transform_2, window_bounds = array<i64: 1, 2048>}, {pipeline_mode = #tpu.pipeline_mode<synchronous>, transform_indices = @transform_3, window_bounds = array<i64: 1, 2048>}, {pipeline_mode = #tpu.pipeline_mode<synchronous>, transform_indices = @transform_4, window_bounds = array<i64: 1, 1>}, {pipeline_mode = #tpu.pipeline_mode<synchronous>, transform_indices = @transform_5, window_bounds = array<i64: 8, 1>}]} {
    %c0_i32 = arith.constant 0 : i32
    %0 = arith.cmpi eq, %arg0, %c0_i32 : i32
    %1 = arith.extui %0 : i1 to i32
    %c0_i32_0 = arith.constant 0 : i32
    %2 = arith.cmpi ne, %1, %c0_i32_0 : i32
    scf.if %2 {
      %cst_9 = arith.constant 0.000000e+00 : f32
      %13 = vector.broadcast %cst_9 : f32 to vector<8x2048xf32>
      %c0_10 = arith.constant 0 : index
      %c0_11 = arith.constant 0 : index
      %14 = vector.load %arg7[%c0_10, %c0_11] : memref<8x2048xf32, #tpu.memory_space<vmem>>, vector<8x2048xf32>
      tpu.vector_store %arg7[%c0_10, %c0_11], %13 {strides = array<i32>} : memref<8x2048xf32, #tpu.memory_space<vmem>>, vector<8x2048xf32>,
    } else {
    }
    %c0 = arith.constant 0 : index
    %c0_1 = arith.constant 0 : index
    %3 = vector.load %arg7[%c0, %c0_1] : memref<8x2048xf32, #tpu.memory_space<vmem>>, vector<8x2048xf32>
    %c0_2 = arith.constant 0 : index
    %c0_3 = arith.constant 0 : index
    %4 = vector.load %arg1[%c0_2, %c0_3] : memref<8x1024xf32, #tpu.memory_space<vmem>>, vector<8x1024xf32>
    %5 = arith.truncf %4 : vector<8x1024xf32> to vector<8x1024xbf16>
    %c0_4 = arith.constant 0 : index
    %c0_5 = arith.constant 0 : index
    %6 = vector.load %arg2[%c0_4, %c0_5] : memref<2048x1024xbf16, #tpu.memory_space<vmem>>, vector<2048x1024xbf16>
    %cst = arith.constant dense<0.000000e+00> : vector<8x2048xf32>
    %7 = tpu.matmul %5, %6, %cst {dimension_numbers = #tpu.dot_dimension_numbers<[1], [1], [0], [0], [0, 0, 1, 0], [], []>} : vector<8x1024xbf16>, vector<2048x1024xbf16>, vector<8x2048xf32> -> vector<8x2048xf32>
    %8 = arith.addf %3, %7 : vector<8x2048xf32>
    %c0_6 = arith.constant 0 : index
    %c0_7 = arith.constant 0 : index
    %9 = vector.load %arg7[%c0_6, %c0_7] : memref<8x2048xf32, #tpu.memory_space<vmem>>, vector<8x2048xf32>
    tpu.vector_store %arg7[%c0_6, %c0_7], %8 {strides = array<i32>} : memref<8x2048xf32, #tpu.memory_space<vmem>>, vector<8x2048xf32>,
    %c1_i32 = arith.constant 1 : i32
    %10 = arith.cmpi eq, %arg0, %c1_i32 : i32
    %11 = arith.extui %10 : i1 to i32
    %c0_i32_8 = arith.constant 0 : i32
    %12 = arith.cmpi ne, %11, %c0_i32_8 : i32
    scf.if %12 {
      %c0_9 = arith.constant 0 : index
      %c0_10 = arith.constant 0 : index
      %13 = vector.load %arg7[%c0_9, %c0_10] : memref<8x2048xf32, #tpu.memory_space<vmem>>, vector<8x2048xf32>
      %c0_11 = arith.constant 0 : index
      %c0_12 = arith.constant 0 : index
      %14 = vector.load %arg3[%c0_11, %c0_12] : memref<1x2048xf32, #tpu.memory_space<vmem>>, vector<1x2048xf32>
      %15 = vector.broadcast %14 : vector<1x2048xf32> to vector<8x2048xf32>
      %16 = arith.addf %13, %15 : vector<8x2048xf32>
      %cst_13 = arith.constant 0.000000e+00 : f32
      %17 = vector.broadcast %cst_13 : f32 to vector<8x2048xf32>
      %18 = arith.maximumf %16, %17 : vector<8x2048xf32>
      %c0_14 = arith.constant 0 : index
      %c0_15 = arith.constant 0 : index
      %19 = vector.load %arg4[%c0_14, %c0_15] : memref<1x2048xf32, #tpu.memory_space<vmem>>, vector<1x2048xf32>
      %20 = vector.broadcast %19 : vector<1x2048xf32> to vector<8x2048xf32>
      %21 = arith.mulf %18, %20 : vector<8x2048xf32>
      %cst_16 = arith.constant dense<0.000000e+00> : vector<8xf32>
      %22 = vector.multi_reduction <add>, %21, %cst_16 [1] : vector<8x2048xf32> to vector<8xf32>
      %23 = vector.shape_cast %22 : vector<8xf32> to vector<8x1xf32>
      %c0_17 = arith.constant 0 : index
      %c0_18 = arith.constant 0 : index
      %24 = vector.load %arg5[%c0_17, %c0_18] : memref<1x1xf32, #tpu.memory_space<vmem>>, vector<1x1xf32>
      %25 = vector.broadcast %24 : vector<1x1xf32> to vector<8x1xf32>
      %26 = arith.addf %23, %25 : vector<8x1xf32>
      %c0_19 = arith.constant 0 : index
      %c0_20 = arith.constant 0 : index
      %27 = vector.load %arg6[%c0_19, %c0_20] : memref<8x1xf32, #tpu.memory_space<vmem>>, vector<8x1xf32>
      tpu.vector_store %arg6[%c0_19, %c0_20], %26 {strides = array<i32>} : memref<8x1xf32, #tpu.memory_space<vmem>>, vector<8x1xf32>,
    } else {
    }
    return
  }
  func.func @transform_0(%arg0: i32) -> (i32, i32) {
    %c0_i32 = arith.constant 0 : i32
    %c0_i32_0 = arith.constant 0 : i32
    return %c0_i32, %arg0 : i32, i32
  }
  func.func @transform_1(%arg0: i32) -> (i32, i32) {
    %c0_i32 = arith.constant 0 : i32
    %c0_i32_0 = arith.constant 0 : i32
    return %c0_i32, %arg0 : i32, i32
  }
  func.func @transform_2(%arg0: i32) -> (i32, i32) {
    %c0_i32 = arith.constant 0 : i32
    %c0_i32_0 = arith.constant 0 : i32
    %c0_i32_1 = arith.constant 0 : i32
    return %c0_i32, %c0_i32_0 : i32, i32
  }
  func.func @transform_3(%arg0: i32) -> (i32, i32) {
    %c0_i32 = arith.constant 0 : i32
    %c0_i32_0 = arith.constant 0 : i32
    %c0_i32_1 = arith.constant 0 : i32
    return %c0_i32, %c0_i32_0 : i32, i32
  }
  func.func @transform_4(%arg0: i32) -> (i32, i32) {
    %c0_i32 = arith.constant 0 : i32
    %c0_i32_0 = arith.constant 0 : i32
    %c0_i32_1 = arith.constant 0 : i32
    return %c0_i32, %c0_i32_0 : i32, i32
  }
  func.func @transform_5(%arg0: i32) -> (i32, i32) {
    %c0_i32 = arith.constant 0 : i32
    %c0_i32_0 = arith.constant 0 : i32
    %c0_i32_1 = arith.constant 0 : i32
    return %c0_i32, %c0_i32_0 : i32, i32
  }
}

</mosaic_0001>

<bundles_post_ra>
// kernel: tpu_custom_call.1
= control target key start
LH: loop header
LB: loop body
LE: loop exit
PB: predicated region body
PF: predicated region fallthrough
CT: control target
= control target key end

     0   :  { %s16400_s0 = inlined_call_operand.hbm [shape: f32[8,2048], index: 0, kind: input, shape index: {}]   ;;  %s16401_s1 = inlined_call_operand.hbm [shape: bf16[2048,2048], index: 1, kind: input, shape index: {}]   ;;  %s16402_s2 = inlined_call_operand.hbm [shape: f32[1,2048], index: 2, kind: input, shape index: {}]   ;;  %s16403_s3 = inlined_call_operand.hbm [shape: f32[1,2048], index: 3, kind: input, shape index: {}]   ;;  %s16404_s4 = inlined_call_operand.<no memory space> [shape: f32[1,1], index: 4, kind: input, shape index: {}]   ;;  %s16405_s5 = inlined_call_operand.vmem [shape: f32[8,1], index: 5, kind: output, shape index: {}]  }
   0x1   :  { %v10_v0 = vstv %s16404_s4 }
   0x2   :  { %11 = vst [vmem:[#allocation3] sm:$0x1] %v10_v0 }
   0x3   :  { %12 = vsyncpa [#allocation5], 0 }
   0x4   :  { %14 = vsyncpa [#allocation5 + $0x1], 0 }
   0x5   :  { %15 = vsyncpa [#allocation7], 0 }
   0x6   :  { %17 = vsyncpa [#allocation7 + $0x1], 0 }
   0x7   :  { %18 = vsyncpa [#allocation10], 0  ;;  %s13861_s20 = smov 0   ;;  %s13863_s21 = smov 0  }
   0x8   :  { %s13865_s22 = smov 0   ;;  %s13867_s23 = smov 0  }
   0x9 LB: > { %s13880_s4 = sadd.s32 4294967295, %s13820_s23   ;;  %p44_p0 = scmp.ne.s32.totalorder %s13812_s21, %s13808_s20  ;;  %s13820_s23 = sphi %s13867_s23, %s16412_s23   ;;  %s13816_s22 = sphi %s13865_s22, %s16411_s22   ;;  %s13812_s21 = sphi %s13863_s21, %s16410_s21   ;;  %s13808_s20 = sphi %s13861_s20, %s16409_s20  }
   0xa   : > { %p45_p1 = scmp.eq.s32.totalorder %s13880_s4, 0  ;;  %p8443_p2 = scmp.ge.s32.totalorder %s13820_s23, 1 }
   0xb   : > { %p165_p3 = scmp.lt.s32.totalorder %s13820_s23, 3  ;;  %p8444_p4 = scmp.ne.s32.totalorder %s13880_s4, 0 }
   0xc   : > { %p13889_p5 = por %p45_p1, %p44_p0  ;;  %s177_s27 = sshll.u32 %s16402_s2, 4  ;;  %s178_s27 = int_to_ptr.hbm [resolvable:$true] %s177_s27 }
   0xd   : > { %p13896_p6 = pnand %p8443_p2, %p165_p3  ;;  %s13822_s29 = smov [#allocation8]  }
   0xe   : > { %s179_s30 = sshll.u32 %s13822_s29, 4  ;;  %s189_s8 = sshll.u32 %s16403_s3, 4  ;;  %s180_s30 = int_to_ptr.vmem [resolvable:$true] %s179_s30  ;;  %s190_s8 = int_to_ptr.hbm [resolvable:$true] %s189_s8 }
   0xf   : > { %p13596_p7 = pneg %p13896_p6  ;;  %s13823_s9 = smov [#allocation9]  }
  0x10   : > { %s191_s10 = sshll.u32 %s13823_s9, 4  ;;  %s13908_s11 = sadd.s32 1, %s13820_s23   ;;  %s192_s10 = int_to_ptr.vmem [resolvable:$true] %s191_s10 }
  0x11   : > { %p13597_p8 = pnand %p13596_p7, %p45_p1  ;;  %s31_s12 = sadd.s32 1, %s13816_s22 }
  0x12   : > { %s28_s13 = ssub.s32 %s13820_s23, %s13908_s11  ;;  %p38_p9 = scmp.ne.s32.totalorder %s13816_s22, %s13812_s21 }
  0x13   : > { %13599 = dma.hbm_to_vmem [thread:$0]  (!%p13597_p8), %s178_s27, 256, %s180_s30, [#allocation7]  }
  0x14   : > { %13602 = dma.hbm_to_vmem [thread:$0]  (!%p13597_p8), %s190_s8, 256, %s192_s10, [#allocation10]  }
  0x15   : > { %p29_p10 = scmp.eq.s32.totalorder %s28_s13, 0  ;;  %p39_p11 = scmp.eq.s32.totalorder %s13820_s23, 0 }
  0x16   : > { %p13612_p12 = scmp.lt.s32.totalorder %s13820_s23, 2  ;;  %s13918_s14 = sand.u32 1, %s13816_s22  }
  0x17   : > { %s13921_s15 = scalar_select %p29_p10, %s13816_s22, %s31_s12  }
  0x18   : > { %p40_p13 = por %p39_p11, %p38_p9  ;;  %s8447_s16 = sshll.u32 %s13918_s14, 6 }
  0x19   : > { %s12558_s17 = sshll.u32 %s13820_s23, 6  ;;  %s209_s26 = scalar_lea.vmem [#allocation4], %s8447_s16 }
  0x1a   : > { %s214_s20 = scalar_lea.hbm %s16400_s0, %s12558_s17  ;;  %s218_s27 = sshll.u32 %s209_s26, 4  ;;  %s219_s27 = int_to_ptr.vmem [resolvable:$true] %s218_s27 }
  0x1b   : > { %s216_s25 = sshll.u32 %s214_s20, 4  ;;  %p13928_p0 = pnand %p13612_p12, %p40_p13  ;;  %s217_s25 = int_to_ptr.hbm [resolvable:$true] %s216_s25 }
  0x1c   : > { %s8450_s30 = sshll.u32 %s13918_s14, 13  ;;  %s225_s6 = sand.u32 1, %s13820_s23  }
  0x1d   : > { %s229_s7 = scalar_lea.vmem [#allocation6], %s8450_s30  ;;  %s206_s9 = scalar_lea.sflag [#allocation5], %s13918_s14 }
  0x1e   : > { %s237_s8 = sshll.u32 %s229_s7, 4  ;;  %s13714_s10 = sshra.s32 %s217_s25, 4  ;;  %s13715_s10 = int_to_ptr.hbm [resolvable:$true] %s13714_s10  ;;  %s238_s8 = int_to_ptr.vmem [resolvable:$true] %s237_s8 }
  0x1f   : > { %s13716_s12 = scalar_lea.hbm %s13715_s10, 64  ;;  %p13718_p3 = pneg %p13928_p0 }
  0x20   : > { %p13717_p2 = scmp.ne.s32.totalorder %s13715_s10, %s13716_s12  ;;  %s13721_s17 = scalar_lea.hbm %s16400_s0, 128 }
  0x21   : > { %p13722_p9 = scmp.lt.s32.totalorder %s13715_s10, %s16400_s0  ;;  %p13723_p10 = scmp.lt.s32.totalorder %s13721_s17, %s13716_s12 }
  0x22   : > { %p13719_p7 = pnand %p13718_p3, %p13717_p2 }
  0x23   : > { %p13724_p11 = por %p13723_p10, %p13722_p9 }
  0x24   : > { %p13720_p8 = pneg %p13719_p7 }
  0x26   : > { %p13725_p12 = pnand %p13724_p11, %p13720_p8 }
  0x28   : > { %13728 = shalt.err (!%p13725_p12)
}
  0x29   : > { %13606 = dma.hbm_to_vmem [thread:$0]  (!%p13928_p0), %s217_s25, 1024, %s219_s27, %s206_s9  }
  0x2a   : > { %s12559_s14 = sshll.u32 %s13820_s23, 5  ;;  %s226_s13 = scalar_lea.sflag [#allocation7], %s225_s6 }
  0x2b   : > { %s234_s30 = scalar_lea.hbm %s16401_s1, %s12559_s14  ;;  %s13751_s25 = scalar_lea.hbm %s16401_s1, 16384 }
  0x2c   : > { %s235_s7 = sshll.u32 %s234_s30, 4  ;;  %s236_s7 = int_to_ptr.hbm [resolvable:$true] %s235_s7 }
  0x2d   : > { %s13744_s16 = sshra.s32 %s236_s7, 4  ;;  %s13745_s16 = int_to_ptr.hbm [resolvable:$true] %s13744_s16 }
  0x2e   : > { %s13746_s10 = scalar_lea.hbm %s13745_s16, 8192  ;;  %p13752_p8 = scmp.lt.s32.totalorder %s13745_s16, %s16401_s1 }
  0x2f   : > { %p13747_p13 = scmp.ne.s32.totalorder %s13745_s16, %s13746_s10  ;;  %p13753_p9 = scmp.lt.s32.totalorder %s13751_s25, %s13746_s10 }
  0x31   : > { %p13749_p2 = pnand %p13747_p13, %p13718_p3  ;;  %p13754_p10 = por %p13753_p9, %p13752_p8 }
  0x33   : > { %p13750_p7 = pneg %p13749_p2 }
  0x35   : > { %p13755_p11 = pnand %p13754_p10, %p13750_p7 }
  0x37   : > { %13758 = shalt.err (!%p13755_p11)
}
  0x38   : > { %s13824_s6 = smov 1024   ;;  %s13825_s9 = smov 512  }
  0x39   : > { %s13826_s18 = smov 32   ;;  %249 = sbr.rel (%p13896_p6) target bundleno = 2443 (0x98b), region = 40 }
  0x3a   : > { %13609 = dma.hbm_to_vmem [thread:$0]  (!%p13928_p0), %s236_s7, 131072, %s238_s8, %s226_s13, %s13824_s6, %s13825_s9, %s13826_s18  }
  0x3b   : > { %s251_s19 = sand.u32 (!%p13896_p6), 1, %s13812_s21  }
  0x3c   : > { %s8454_s14 = sshll.u32 (!%p13896_p6), %s251_s19, 6  ;;  %s252_s20 = scalar_lea.sflag (!%p13896_p6), [#allocation5], %s251_s19 }
  0x3d   : > { %s13966_s26 = scalar_lea.vmem (!%p13896_p6), [#allocation4], %s8454_s14 }
  0x3e   : > { %13791 = dma.done.wait (%p13889_p5), %s252_s20, 1024  }
  0x3f   : > { %13793 = vsyncadd (%p13889_p5), %s252_s20, 4294966272  ;;  %s261_s30 = sand.u32 1, %s13880_s4   ;;  %s8455_s29 = sshll.u32 %s251_s19, 13 }
  0x40   : > { %s262_s8 = scalar_lea.sflag [#allocation7], %s261_s30  ;;  %s13973_s7 = scalar_lea.vmem [#allocation6], %s8455_s29 }
  0x41   : > { %13795 = dma.done.wait (%p13889_p5), %s262_s8, 131072  }
  0x42   : > { %13797 = vsyncadd (%p13889_p5), %s262_s8, 4294836224 }
  0x43   : > { %13799 = dma.done.wait (%p45_p1), [#allocation7], 256  }
  0x44   : > { %13801 = vsyncadd (%p45_p1), [#allocation7], 4294967040 }
  0x45   : > { %13803 = dma.done.wait (%p45_p1), [#allocation10], 256  }
  0x46   : > { %13805 = vsyncadd (%p45_p1), [#allocation10], 4294967040  ;;  %308 = sbr.rel (%p8444_p4) target bundleno = 92 (0x5c), region = 60 }
  0x4b   : > { %v13827_v1 = vmov 0.0  }
  0x4c   : > { %309 = vst [vmem:[#allocation2 + $0x30] sm:$0xff] %v13827_v1 }
  0x4d   : > { %310 = vst [vmem:[#allocation2] sm:$0xff] %v13827_v1 }
  0x4e   : > { %311 = vst [vmem:[#allocation2 + $0x58] sm:$0xff] %v13827_v1 }
  0x4f   : > { %312 = vst [vmem:[#allocation2 + $0x18] sm:$0xff] %v13827_v1 }
  0x50   : > { %313 = vst [vmem:[#allocation2 + $0x50] sm:$0xff] %v13827_v1 }
  0x51   : > { %314 = vst [vmem:[#allocation2 + $0x68] sm:$0xff] %v13827_v1 }
  0x52   : > { %315 = vst [vmem:[#allocation2 + $0x8] sm:$0xff] %v13827_v1 }
  0x53   : > { %316 = vst [vmem:[#allocation2 + $0x48] sm:$0xff] %v13827_v1 }
  0x54   : > { %317 = vst [vmem:[#allocation2 + $0x40] sm:$0xff] %v13827_v1 }
  0x55   : > { %318 = vst [vmem:[#allocation2 + $0x20] sm:$0xff] %v13827_v1 }
  0x56   : > { %319 = vst [vmem:[#allocation2 + $0x10] sm:$0xff] %v13827_v1 }
  0x57   : > { %320 = vst [vmem:[#allocation2 + $0x38] sm:$0xff] %v13827_v1 }
  0x58   : > { %321 = vst [vmem:[#allocation2 + $0x60] sm:$0xff] %v13827_v1 }
  0x59   : > { %322 = vst [vmem:[#allocation2 + $0x70] sm:$0xff] %v13827_v1 }
  0x5a   : > { %323 = vst [vmem:[#allocation2 + $0x78] sm:$0xff] %v13827_v1 }
  0x5b   : > { %324 = vst [vmem:[#allocation2 + $0x28] sm:$0xff] %v13827_v1 }
  0x5c PF: > { %v8685_v2 = vld [vmem:[%s13973_s7 + $0x1c0] sm:$0xf]  ;;  %v12616_v4 = vld [vmem:[%s13973_s7 + $0x1c4] sm:$0xf]  ;;  %v8693_v7 = vld [vmem:[%s13973_s7 + $0x1c8] sm:$0xf] }
  0x5d   : > { %v12620_v3 = vld [vmem:[%s13973_s7 + $0x1dc] sm:$0xf0]  ;;  %v8687_v6 = vld [vmem:[%s13973_s7 + $0x1e0] sm:$0xf0]  ;;  %v12621_v8 = vld [vmem:[%s13973_s7 + $0x1e4] sm:$0xf0] }
  0x5e   : > { %v8686_v5 = vor.u32 %v12620_v3, %v8685_v2  ;;  %v8690_v9 = vor.u32 %v12616_v4, %v8687_v6  ;;  %v8694_v10 = vor.u32 %v12621_v8, %v8693_v7  ;;  %v12617_v11 = vld [vmem:[%s13973_s7 + $0x1cc] sm:$0xf]  ;;  %v8653_v14 = vld [vmem:[%s13973_s7 + $0x180] sm:$0xf]  ;;  %v12608_v16 = vld [vmem:[%s13973_s7 + $0x184] sm:$0xf] }
  0x5f   : > { %v8695_v12 = vld [vmem:[%s13973_s7 + $0x1e8] sm:$0xf0]  ;;  %v12612_v15 = vld [vmem:[%s13973_s7 + $0x19c] sm:$0xf0]  ;;  %v8655_v17 = vld [vmem:[%s13973_s7 + $0x1a0] sm:$0xf0] }
  0x60   : > { %6501 = vmatpush.bf16.xpose.msra.mxu0 %v8686_v5  ;;  %v8698_v13 = vor.u32 %v12617_v11, %v8695_v12  ;;  %6514 = vmatpush.bf16.xpose.msra.mxu1 %v8690_v9  ;;  %v8661_v18 = vld [vmem:[%s13973_s7 + $0x188] sm:$0xf]  ;;  %v12609_v20 = vld [vmem:[%s13973_s7 + $0x18c] sm:$0xf]  ;;  %v8654_v22 = vor.u32 %v12612_v15, %v8653_v14  ;;  %v8658_v23 = vor.u32 %v12608_v16, %v8655_v17  ;;  %v8621_v26 = vld [vmem:[%s13973_s7 + $0x140] sm:$0xf] }
  0x61   : > { %6527 = vmatpush.bf16.xpose.msra.mxu2 %v8694_v10  ;;  %v12613_v19 = vld [vmem:[%s13973_s7 + $0x1a4] sm:$0xf0]  ;;  %v8663_v21 = vld [vmem:[%s13973_s7 + $0x1a8] sm:$0xf0]  ;;  %v12604_v27 = vld [vmem:[%s13973_s7 + $0x15c] sm:$0xf0] }
  0x62   : > { %6540 = vmatpush.bf16.xpose.msra.mxu3 %v8698_v13  ;;  %v8662_v24 = vor.u32 %v12613_v19, %v8661_v18  ;;  %v8666_v25 = vor.u32 %v12609_v20, %v8663_v21  ;;  %v12600_v28 = vld [vmem:[%s13973_s7 + $0x144] sm:$0xf]  ;;  %v8629_v30 = vld [vmem:[%s13973_s7 + $0x148] sm:$0xf]  ;;  %v12601_v32 = vld [vmem:[%s13973_s7 + $0x14c] sm:$0xf]  ;;  %v8622_v34 = vor.u32 %v12604_v27, %v8621_v26 }
  0x63   : > { %v8623_v29 = vld [vmem:[%s13973_s7 + $0x160] sm:$0xf0]  ;;  %v12605_v31 = vld [vmem:[%s13973_s7 + $0x164] sm:$0xf0]  ;;  %v8631_v33 = vld [vmem:[%s13973_s7 + $0x168] sm:$0xf0] }
  0x64   : > { %v8626_v35 = vor.u32 %v12600_v28, %v8623_v29  ;;  %v8630_v36 = vor.u32 %v12605_v31, %v8629_v30  ;;  %v8634_v37 = vor.u32 %v12601_v32, %v8631_v33  ;;  %v8589_v38 = vld [vmem:[%s13973_s7 + $0x100] sm:$0xf]  ;;  %v12592_v40 = vld [vmem:[%s13973_s7 + $0x104] sm:$0xf]  ;;  %v8597_v42 = vld [vmem:[%s13973_s7 + $0x108] sm:$0xf] }
  0x65   : > { %v12596_v39 = vld [vmem:[%s13973_s7 + $0x11c] sm:$0xf0]  ;;  %v8591_v41 = vld [vmem:[%s13973_s7 + $0x120] sm:$0xf0]  ;;  %v12597_v43 = vld [vmem:[%s13973_s7 + $0x124] sm:$0xf0] }
  0x66   : > { %v12593_v44 = vld [vmem:[%s13973_s7 + $0x10c] sm:$0xf]  ;;  %v8590_v46 = vor.u32 %v12596_v39, %v8589_v38  ;;  %v8594_v47 = vor.u32 %v12592_v40, %v8591_v41  ;;  %v8598_v48 = vor.u32 %v12597_v43, %v8597_v42  ;;  %v8557_v50 = vld [vmem:[%s13973_s7 + $0xc0] sm:$0xf]  ;;  %v12584_v52 = vld [vmem:[%s13973_s7 + $0xc4] sm:$0xf] }
  0x67   : > { %v8599_v45 = vld [vmem:[%s13973_s7 + $0x128] sm:$0xf0]  ;;  %v12588_v51 = vld [vmem:[%s13973_s7 + $0xdc] sm:$0xf0]  ;;  %v8559_v53 = vld [vmem:[%s13973_s7 + $0xe0] sm:$0xf0] }
  0x68   : > { %6502 = vmatpush.bf16.xpose.msra.mxu0 %v8654_v22  ;;  %6515 = vmatpush.bf16.xpose.msra.mxu1 %v8658_v23  ;;  %v8602_v49 = vor.u32 %v12593_v44, %v8599_v45  ;;  %v8565_v54 = vld [vmem:[%s13973_s7 + $0xc8] sm:$0xf]  ;;  %v12585_v56 = vld [vmem:[%s13973_s7 + $0xcc] sm:$0xf]  ;;  %v8558_v58 = vor.u32 %v12588_v51, %v8557_v50  ;;  %v8562_v59 = vor.u32 %v12584_v52, %v8559_v53  ;;  %v8525_v62 = vld [vmem:[%s13973_s7 + $0x80] sm:$0xf] }
  0x69   : > { %6528 = vmatpush.bf16.xpose.msra.mxu2 %v8662_v24  ;;  %v12589_v55 = vld [vmem:[%s13973_s7 + $0xe4] sm:$0xf0]  ;;  %v8567_v57 = vld [vmem:[%s13973_s7 + $0xe8] sm:$0xf0]  ;;  %v12580_v63 = vld [vmem:[%s13973_s7 + $0x9c] sm:$0xf0] }
  0x6a   : > { %6541 = vmatpush.bf16.xpose.msra.mxu3 %v8666_v25  ;;  %v8566_v60 = vor.u32 %v12589_v55, %v8565_v54  ;;  %v8570_v61 = vor.u32 %v12585_v56, %v8567_v57  ;;  %v12576_v0 = vld [vmem:[%s13973_s7 + $0x84] sm:$0xf]  ;;  %v8533_v2 = vld [vmem:[%s13973_s7 + $0x88] sm:$0xf]  ;;  %v12577_v4 = vld [vmem:[%s13973_s7 + $0x8c] sm:$0xf]  ;;  %v8526_v6 = vor.u32 %v12580_v63, %v8525_v62 }
  0x6b   : > { %v8527_v1 = vld [vmem:[%s13973_s7 + $0xa0] sm:$0xf0]  ;;  %v12581_v3 = vld [vmem:[%s13973_s7 + $0xa4] sm:$0xf0]  ;;  %v8535_v5 = vld [vmem:[%s13973_s7 + $0xa8] sm:$0xf0] }
  0x6c   : > { %v8530_v7 = vor.u32 %v12576_v0, %v8527_v1  ;;  %v8534_v8 = vor.u32 %v12581_v3, %v8533_v2  ;;  %v8538_v9 = vor.u32 %v12577_v4, %v8535_v5  ;;  %v8493_v10 = vld [vmem:[%s13973_s7 + $0x40] sm:$0xf]  ;;  %v12568_v12 = vld [vmem:[%s13973_s7 + $0x44] sm:$0xf]  ;;  %v8501_v14 = vld [vmem:[%s13973_s7 + $0x48] sm:$0xf] }
  0x6d   : > { %v12572_v11 = vld [vmem:[%s13973_s7 + $0x5c] sm:$0xf0]  ;;  %v8495_v13 = vld [vmem:[%s13973_s7 + $0x60] sm:$0xf0]  ;;  %v12573_v15 = vld [vmem:[%s13973_s7 + $0x64] sm:$0xf0] }
  0x6e   : > { %v12569_v16 = vld [vmem:[%s13973_s7 + $0x4c] sm:$0xf]  ;;  %v8494_v18 = vor.u32 %v12572_v11, %v8493_v10  ;;  %v8498_v19 = vor.u32 %v12568_v12, %v8495_v13  ;;  %v8502_v20 = vor.u32 %v12573_v15, %v8501_v14  ;;  %v8461_v22 = vld [vmem:[%s13973_s7] sm:$0xf]  ;;  %v12560_v24 = vld [vmem:[%s13973_s7 + $0x4] sm:$0xf] }
  0x6f   : > { %v8503_v17 = vld [vmem:[%s13973_s7 + $0x68] sm:$0xf0]  ;;  %v12564_v23 = vld [vmem:[%s13973_s7 + $0x1c] sm:$0xf0]  ;;  %v8463_v25 = vld [vmem:[%s13973_s7 + $0x20] sm:$0xf0] }
  0x70   : > { %6503 = vmatpush.bf16.xpose.msra.mxu0 %v8622_v34  ;;  %6516 = vmatpush.bf16.xpose.msra.mxu1 %v8626_v35  ;;  %v8506_v21 = vor.u32 %v12569_v16, %v8503_v17  ;;  %v8469_v26 = vld [vmem:[%s13973_s7 + $0x8] sm:$0xf]  ;;  %v12561_v28 = vld [vmem:[%s13973_s7 + $0xc] sm:$0xf]  ;;  %v8701_v30 = vld [vmem:[%s13973_s7 + $0x1d0] sm:$0xf]  ;;  %v8462_v33 = vor.u32 %v12564_v23, %v8461_v22 }
  0x71   : > { %6529 = vmatpush.bf16.xpose.msra.mxu2 %v8630_v36  ;;  %v12565_v27 = vld [vmem:[%s13973_s7 + $0x24] sm:$0xf0]  ;;  %v8471_v29 = vld [vmem:[%s13973_s7 + $0x28] sm:$0xf0]  ;;  %v12622_v31 = vld [vmem:[%s13973_s7 + $0x1ec] sm:$0xf0] }
  0x72   : > { %6542 = vmatpush.bf16.xpose.msra.mxu3 %v8634_v37  ;;  %v12618_v32 = vld [vmem:[%s13973_s7 + $0x1d4] sm:$0xf]  ;;  %v8709_v35 = vld [vmem:[%s13973_s7 + $0x1d8] sm:$0xf]  ;;  %v8466_v37 = vor.u32 %v12560_v24, %v8463_v25  ;;  %v8470_v38 = vor.u32 %v12565_v27, %v8469_v26  ;;  %v12619_v39 = vld [vmem:[%s13973_s7 + $0x1dc] sm:$0xf]  ;;  %v8474_v41 = vor.u32 %v12561_v28, %v8471_v29  ;;  %v8702_v42 = vor.u32 %v12622_v31, %v8701_v30 }
  0x73   : > { %v8703_v34 = vld [vmem:[%s13973_s7 + $0x1f0] sm:$0xf0]  ;;  %v12623_v36 = vld [vmem:[%s13973_s7 + $0x1f4] sm:$0xf0]  ;;  %v8711_v40 = vld [vmem:[%s13973_s7 + $0x1f8] sm:$0xf0] }
  0x74   : > { %v8706_v43 = vor.u32 %v12618_v32, %v8703_v34  ;;  %v8710_v44 = vor.u32 %v12623_v36, %v8709_v35  ;;  %v8714_v45 = vor.u32 %v12619_v39, %v8711_v40  ;;  %v8677_v50 = vld [vmem:[%s13973_s7 + $0x198] sm:$0xf]  ;;  %v12611_v52 = vld [vmem:[%s13973_s7 + $0x19c] sm:$0xf]  ;;  %v343_v0 = vld [vmem:[%s13966_s26 + $0x10] sm:$0xff]  ;;  %p12555_p1 = scmp.ne.s32.totalorder %s13880_s4, 1 }
  0x75   : > { %v12615_v51 = vld [vmem:[%s13973_s7 + $0x1b4] sm:$0xf0]  ;;  %v8679_v53 = vld [vmem:[%s13973_s7 + $0x1b8] sm:$0xf0]  ;;  %v14078_v3 = vpack.c.bf16 %v343_v0, %v343_v0  ;;  %v12594_v10 = vld [vmem:[%s13973_s7 + $0x114] sm:$0xf] }
  0x76   : > { %v8678_v56 = vor.u32 %v12615_v51, %v8677_v50  ;;  %v8682_v57 = vor.u32 %v12611_v52, %v8679_v53  ;;  %v8645_v62 = vld [vmem:[%s13973_s7 + $0x158] sm:$0xf]  ;;  %v12603_v1 = vld [vmem:[%s13973_s7 + $0x15c] sm:$0xf]  ;;  %v8607_v11 = vld [vmem:[%s13973_s7 + $0x130] sm:$0xf0] }
  0x77   : > { %v12607_v63 = vld [vmem:[%s13973_s7 + $0x174] sm:$0xf0]  ;;  %v8647_v2 = vld [vmem:[%s13973_s7 + $0x178] sm:$0xf0]  ;;  %v341_v12 = vld [vmem:[%s13966_s26] sm:$0xff]  ;;  %v8610_v23 = vor.u32 %v12594_v10, %v8607_v11 }
  0x78   : > { %6504 = vmatpush.bf16.xpose.msra.mxu0 %v8590_v46  ;;  %6517 = vmatpush.bf16.xpose.msra.mxu1 %v8594_v47  ;;  %v8669_v46 = vld [vmem:[%s13973_s7 + $0x190] sm:$0xf]  ;;  %v344_v13 = vld [vmem:[%s13966_s26 + $0x18] sm:$0xff]  ;;  %v14089_v16 = vpack.c.bf16 %v341_v12, %v341_v12  ;;  %v12586_v28 = vld [vmem:[%s13973_s7 + $0xd4] sm:$0xf] }
  0x79   : > { %6530 = vmatpush.bf16.xpose.msra.mxu2 %v8598_v48  ;;  %v12614_v47 = vld [vmem:[%s13973_s7 + $0x1ac] sm:$0xf0]  ;;  %v12610_v48 = vld [vmem:[%s13973_s7 + $0x194] sm:$0xf]  ;;  %v8613_v14 = vld [vmem:[%s13973_s7 + $0x118] sm:$0xf]  ;;  %v14091_v17 = vpack.c.bf16 %v344_v13, %v344_v13 }
  0x7a   : > { %6543 = vmatpush.bf16.xpose.msra.mxu3 %v8602_v49  ;;  %v8671_v49 = vld [vmem:[%s13973_s7 + $0x1b0] sm:$0xf0]  ;;  %v8670_v54 = vor.u32 %v12614_v47, %v8669_v46  ;;  %v12599_v15 = vld [vmem:[%s13973_s7 + $0x134] sm:$0xf0]  ;;  %v8573_v26 = vld [vmem:[%s13973_s7 + $0xd0] sm:$0xf] }
  0x7b   : > { %v8674_v55 = vor.u32 %v12610_v48, %v8671_v49  ;;  %v8614_v24 = vor.u32 %v12599_v15, %v8613_v14  ;;  %v12590_v27 = vld [vmem:[%s13973_s7 + $0xec] sm:$0xf0]  ;;  %v8575_v29 = vld [vmem:[%s13973_s7 + $0xf0] sm:$0xf0]  ;;  %v8581_v30 = vld [vmem:[%s13973_s7 + $0xd8] sm:$0xf] }
  0x7c   : > { %v12591_v31 = vld [vmem:[%s13973_s7 + $0xf4] sm:$0xf0]  ;;  %v12587_v32 = vld [vmem:[%s13973_s7 + $0xdc] sm:$0xf]  ;;  %v8574_v34 = vor.u32 %v12590_v27, %v8573_v26  ;;  %v8578_v35 = vor.u32 %v12586_v28, %v8575_v29  ;;  %v12582_v39 = vld [vmem:[%s13973_s7 + $0xac] sm:$0xf0] }
  0x7d   : > { %v8582_v36 = vor.u32 %v12591_v31, %v8581_v30  ;;  %v12578_v40 = vld [vmem:[%s13973_s7 + $0x94] sm:$0xf]  ;;  %v8509_v50 = vld [vmem:[%s13973_s7 + $0x50] sm:$0xf]  ;;  %v8943_v11 = vld [vmem:[%s13973_s7 + $0x3e0] sm:$0xf0] }
  0x7e   : > { %v12574_v51 = vld [vmem:[%s13973_s7 + $0x6c] sm:$0xf0]  ;;  %v12570_v52 = vld [vmem:[%s13973_s7 + $0x54] sm:$0xf]  ;;  %v8949_v12 = vld [vmem:[%s13973_s7 + $0x3c8] sm:$0xf] }
  0x7f   : > { %v8511_v53 = vld [vmem:[%s13973_s7 + $0x70] sm:$0xf0]  ;;  %v12685_v13 = vld [vmem:[%s13973_s7 + $0x3e4] sm:$0xf0]  ;;  %v345_v26 = vld [vmem:[%s13966_s26 + $0x20] sm:$0xff] }
  0x80   : > { %6505 = vmatpush.bf16.xpose.msra.mxu0 %v8558_v58  ;;  %6518 = vmatpush.bf16.xpose.msra.mxu1 %v8562_v59  ;;  %v8637_v58 = vld [vmem:[%s13973_s7 + $0x150] sm:$0xf]  ;;  %v12562_v0 = vld [vmem:[%s13973_s7 + $0x14] sm:$0xf]  ;;  %v346_v28 = vld [vmem:[%s13966_s26 + $0x28] sm:$0xff]  ;;  %v14145_v30 = vpack.c.bf16 %v345_v26, %v345_v26 }
  0x81   : > { %6531 = vmatpush.bf16.xpose.msra.mxu2 %v8566_v60  ;;  %v12606_v59 = vld [vmem:[%s13973_s7 + $0x16c] sm:$0xf0]  ;;  %v12602_v60 = vld [vmem:[%s13973_s7 + $0x154] sm:$0xf]  ;;  %v348_v29 = vld [vmem:[%s13966_s26 + $0x38] sm:$0xff] }
  0x82   : > { %6544 = vmatpush.bf16.xpose.msra.mxu3 %v8570_v61  ;;  %v8639_v61 = vld [vmem:[%s13973_s7 + $0x170] sm:$0xf0]  ;;  %v8638_v4 = vor.u32 %v12606_v59, %v8637_v58  ;;  %v8510_v58 = vor.u32 %v12574_v51, %v8509_v50  ;;  %v8514_v59 = vor.u32 %v12570_v52, %v8511_v53  ;;  %v8909_v31 = vld [vmem:[%s13973_s7 + $0x380] sm:$0xf]  ;;  %v8885_v50 = vld [vmem:[%s13973_s7 + $0x348] sm:$0xf] }
  0x83   : > { %v8642_v5 = vor.u32 %v12602_v60, %v8639_v61  ;;  %v347_v27 = vld [vmem:[%s13966_s26 + $0x30] sm:$0xff]  ;;  %v12669_v51 = vld [vmem:[%s13973_s7 + $0x364] sm:$0xf0]  ;;  %v12665_v52 = vld [vmem:[%s13973_s7 + $0x34c] sm:$0xf] }
  0x84   : > { %v8887_v53 = vld [vmem:[%s13973_s7 + $0x368] sm:$0xf0]  ;;  %v8789_v26 = vld [vmem:[%s13973_s7 + $0x288] sm:$0xf] }
  0x88   : > { %6506 = vmatpush.bf16.xpose.msra.mxu0 %v8526_v6  ;;  %6519 = vmatpush.bf16.xpose.msra.mxu1 %v8530_v7  ;;  %v8646_v6 = vor.u32 %v12607_v63, %v8645_v62  ;;  %v8650_v7 = vor.u32 %v12603_v1, %v8647_v2  ;;  %v8477_v62 = vld [vmem:[%s13973_s7 + $0x10] sm:$0xf]  ;;  %v8479_v1 = vld [vmem:[%s13973_s7 + $0x30] sm:$0xf0]  ;;  %v8485_v2 = vld [vmem:[%s13973_s7 + $0x18] sm:$0xf] }
  0x89   : > { %6532 = vmatpush.bf16.xpose.msra.mxu2 %v8534_v8  ;;  %v8605_v8 = vld [vmem:[%s13973_s7 + $0x110] sm:$0xf]  ;;  %v8482_v14 = vor.u32 %v12562_v0, %v8479_v1  ;;  %v12657_v0 = vld [vmem:[%s13973_s7 + $0x30c] sm:$0xf] }
  0x8a   : > { %6545 = vmatpush.bf16.xpose.msra.mxu3 %v8538_v9  ;;  %v12598_v9 = vld [vmem:[%s13973_s7 + $0x12c] sm:$0xf0]  ;;  %v8855_v1 = vld [vmem:[%s13973_s7 + $0x328] sm:$0xf0] }
  0x8b   : > { %v8606_v22 = vor.u32 %v12598_v9, %v8605_v8  ;;  %v12566_v63 = vld [vmem:[%s13973_s7 + $0x2c] sm:$0xf0]  ;;  %v12684_v8 = vld [vmem:[%s13973_s7 + $0x3dc] sm:$0xf0]  ;;  %v12680_v9 = vld [vmem:[%s13973_s7 + $0x3c4] sm:$0xf] }
  0x8c   : > { %v8478_v10 = vor.u32 %v12566_v63, %v8477_v62  ;;  %v8853_v62 = vld [vmem:[%s13973_s7 + $0x308] sm:$0xf] }
  0x8d   : > { %v12661_v63 = vld [vmem:[%s13973_s7 + $0x324] sm:$0xf0] }
  0x90   : > { %6507 = vmatpush.bf16.xpose.msra.mxu0 %v8494_v18  ;;  %6520 = vmatpush.bf16.xpose.msra.mxu1 %v8498_v19  ;;  %v342_v18 = vld [vmem:[%s13966_s26 + $0x8] sm:$0xff]  ;;  %v12595_v19 = vld [vmem:[%s13973_s7 + $0x11c] sm:$0xf] }
  0x91   : > { %6533 = vmatpush.bf16.xpose.msra.mxu2 %v8502_v20  ;;  %v8615_v20 = vld [vmem:[%s13973_s7 + $0x138] sm:$0xf0] }
  0x92   : > { %6546 = vmatpush.bf16.xpose.msra.mxu3 %v8506_v21  ;;  %v14096_v21 = vpack.c.bf16 %v342_v18, %v342_v18  ;;  %v8618_v25 = vor.u32 %v12595_v19, %v8615_v20  ;;  %v12681_v18 = vld [vmem:[%s13973_s7 + $0x3cc] sm:$0xf] }
  0x93   : > { %v8951_v19 = vld [vmem:[%s13973_s7 + $0x3e8] sm:$0xf0] }
  0x98   : > { %6508 = vmatpush.bf16.xpose.msra.mxu0 %v8462_v33  ;;  %6521 = vmatpush.bf16.xpose.msra.mxu1 %v8466_v37  ;;  %v8583_v33 = vld [vmem:[%s13973_s7 + $0xf8] sm:$0xf0] }
  0x99   : > { %6534 = vmatpush.bf16.xpose.msra.mxu2 %v8470_v38  ;;  %v8586_v37 = vor.u32 %v12587_v32, %v8583_v33  ;;  %v8541_v38 = vld [vmem:[%s13973_s7 + $0x90] sm:$0xf]  ;;  %v12676_v32 = vld [vmem:[%s13973_s7 + $0x39c] sm:$0xf0]  ;;  %v12672_v33 = vld [vmem:[%s13973_s7 + $0x384] sm:$0xf] }
  0x9a   : > { %6547 = vmatpush.bf16.xpose.msra.mxu3 %v8474_v41  ;;  %v8543_v41 = vld [vmem:[%s13973_s7 + $0xb0] sm:$0xf0]  ;;  %v8542_v46 = vor.u32 %v12582_v39, %v8541_v38  ;;  %v14155_v38 = vpack.c.bf16 %v346_v28, %v346_v28  ;;  %v14157_v39 = vpack.c.bf16 %v348_v29, %v348_v29  ;;  %v12641_v28 = vld [vmem:[%s13973_s7 + $0x28c] sm:$0xf] }
  0x9b   : > { %v8546_v47 = vor.u32 %v12578_v40, %v8543_v41  ;;  %v12673_v40 = vld [vmem:[%s13973_s7 + $0x38c] sm:$0xf] }
  0x9c   : > { %v8919_v41 = vld [vmem:[%s13973_s7 + $0x3a8] sm:$0xf0] }
  0x9d   : > { %v8791_v29 = vld [vmem:[%s13973_s7 + $0x2a8] sm:$0xf0] }
  0x9f   : > { %6509 = vmatmul.bf16.vlgmr.msra.gmra.mxu0 %v14089_v16  ;;  %6522 = vmatmul.bf16.vlgmr.msra.gmra.mxu1 %v14096_v21 }
  0xa0   : > { %6553 = vmatpush.bf16.xpose.msrb.mxu0 %v8702_v42  ;;  %6566 = vmatpush.bf16.xpose.msrb.mxu1 %v8706_v43  ;;  %v8549_v42 = vld [vmem:[%s13973_s7 + $0x98] sm:$0xf] }
  0xa1   : > { %6579 = vmatpush.bf16.xpose.msrb.mxu2 %v8710_v44  ;;  %6548 = vmatmul.bf16.vlgmr.msra.gmra.mxu3 %v14091_v17  ;;  %v12583_v43 = vld [vmem:[%s13973_s7 + $0xb4] sm:$0xf0]  ;;  %v12579_v44 = vld [vmem:[%s13973_s7 + $0x9c] sm:$0xf] }
  0xa2   : > { %6592 = vmatpush.bf16.xpose.msrb.mxu3 %v8714_v45  ;;  %6535 = vmatmul.bf16.vlgmr.msra.gmra.mxu2 %v14078_v3  ;;  %v8551_v45 = vld [vmem:[%s13973_s7 + $0xb8] sm:$0xf0]  ;;  %v8550_v48 = vor.u32 %v12583_v43, %v8549_v42  ;;  %v8910_v42 = vor.u32 %v12676_v32, %v8909_v31 }
  0xa3   : > { %v8554_v49 = vor.u32 %v12579_v44, %v8551_v45  ;;  %v8922_v45 = vor.u32 %v12673_v40, %v8919_v41  ;;  %v12632_v40 = vld [vmem:[%s13973_s7 + $0x244] sm:$0xf] }
  0xa4   : > { %v8751_v41 = vld [vmem:[%s13973_s7 + $0x260] sm:$0xf0] }
  0xa8   : > { %6554 = vmatpush.bf16.xpose.msrb.mxu0 %v8670_v54  ;;  %6567 = vmatpush.bf16.xpose.msrb.mxu1 %v8674_v55  ;;  %v8517_v54 = vld [vmem:[%s13973_s7 + $0x58] sm:$0xf] }
  0xa9   : > { %6580 = vmatpush.bf16.xpose.msrb.mxu2 %v8678_v56  ;;  %v12575_v55 = vld [vmem:[%s13973_s7 + $0x74] sm:$0xf0]  ;;  %v12571_v56 = vld [vmem:[%s13973_s7 + $0x5c] sm:$0xf] }
  0xaa   : > { %6593 = vmatpush.bf16.xpose.msrb.mxu3 %v8682_v57  ;;  %v8519_v57 = vld [vmem:[%s13973_s7 + $0x78] sm:$0xf0]  ;;  %v8518_v60 = vor.u32 %v12575_v55, %v8517_v54 }
  0xab   : > { %v8522_v61 = vor.u32 %v12571_v56, %v8519_v57  ;;  %v8886_v56 = vor.u32 %v12669_v51, %v8885_v50  ;;  %v8890_v57 = vor.u32 %v12665_v52, %v8887_v53  ;;  %v8717_v50 = vld [vmem:[%s13973_s7 + $0x200] sm:$0xf]  ;;  %v12624_v52 = vld [vmem:[%s13973_s7 + $0x204] sm:$0xf] }
  0xac   : > { %v12628_v51 = vld [vmem:[%s13973_s7 + $0x21c] sm:$0xf0]  ;;  %v8719_v53 = vld [vmem:[%s13973_s7 + $0x220] sm:$0xf0] }
  0xb0   : > { %6555 = vmatpush.bf16.xpose.msrb.mxu0 %v8638_v4  ;;  %6568 = vmatpush.bf16.xpose.msrb.mxu1 %v8642_v5  ;;  %v12567_v4 = vld [vmem:[%s13973_s7 + $0x34] sm:$0xf0]  ;;  %v12563_v5 = vld [vmem:[%s13973_s7 + $0x1c] sm:$0xf] }
  0xb1   : > { %6581 = vmatpush.bf16.xpose.msrb.mxu2 %v8646_v6  ;;  %v8487_v6 = vld [vmem:[%s13973_s7 + $0x38] sm:$0xf0]  ;;  %v8486_v15 = vor.u32 %v12567_v4, %v8485_v2 }
  0xb2   : > { %6594 = vmatpush.bf16.xpose.msrb.mxu3 %v8650_v7  ;;  %v8941_v7 = vld [vmem:[%s13973_s7 + $0x3c0] sm:$0xf]  ;;  %v8490_v20 = vor.u32 %v12563_v5, %v8487_v6  ;;  %v8854_v5 = vor.u32 %v12661_v63, %v8853_v62  ;;  %v8858_v6 = vor.u32 %v12657_v0, %v8855_v1  ;;  %v8959_v62 = vld [vmem:[%s13973_s7 + $0x3f0] sm:$0xf0]  ;;  %v8965_v63 = vld [vmem:[%s13973_s7 + $0x3d8] sm:$0xf]  ;;  %v8722_v1 = vor.u32 %v12624_v52, %v8719_v53 }
  0xb3   : > { %v12687_v0 = vld [vmem:[%s13973_s7 + $0x3f4] sm:$0xf0] }
  0xb8   : > { %6556 = vmatpush.bf16.xpose.msrb.mxu0 %v8606_v22  ;;  %6569 = vmatpush.bf16.xpose.msrb.mxu1 %v8610_v23  ;;  %v8942_v22 = vor.u32 %v12684_v8, %v8941_v7  ;;  %v8946_v23 = vor.u32 %v12680_v9, %v8943_v11  ;;  %v8813_v7 = vld [vmem:[%s13973_s7 + $0x2c0] sm:$0xf]  ;;  %v12648_v9 = vld [vmem:[%s13973_s7 + $0x2c4] sm:$0xf]  ;;  %v8821_v11 = vld [vmem:[%s13973_s7 + $0x2c8] sm:$0xf] }
  0xb9   : > { %6582 = vmatpush.bf16.xpose.msrb.mxu2 %v8614_v24  ;;  %v8950_v24 = vor.u32 %v12685_v13, %v8949_v12  ;;  %v12652_v8 = vld [vmem:[%s13973_s7 + $0x2dc] sm:$0xf0]  ;;  %v12653_v12 = vld [vmem:[%s13973_s7 + $0x2e4] sm:$0xf0]  ;;  %v12649_v13 = vld [vmem:[%s13973_s7 + $0x2cc] sm:$0xf] }
  0xba   : > { %6595 = vmatpush.bf16.xpose.msrb.mxu3 %v8618_v25  ;;  %v8954_v25 = vor.u32 %v12681_v18, %v8951_v19  ;;  %v8822_v19 = vor.u32 %v12653_v12, %v8821_v11  ;;  %v8925_v11 = vld [vmem:[%s13973_s7 + $0x390] sm:$0xf] }
  0xbb   : > { %v12678_v12 = vld [vmem:[%s13973_s7 + $0x3ac] sm:$0xf0] }
  0xc0   : > { %6557 = vmatpush.bf16.xpose.msrb.mxu0 %v8574_v34  ;;  %6570 = vmatpush.bf16.xpose.msrb.mxu1 %v8578_v35  ;;  %v14150_v34 = vpack.c.bf16 %v347_v27, %v347_v27  ;;  %v8911_v35 = vld [vmem:[%s13973_s7 + $0x3a0] sm:$0xf0]  ;;  %v12645_v27 = vld [vmem:[%s13973_s7 + $0x2a4] sm:$0xf0] }
  0xc1   : > { %6583 = vmatpush.bf16.xpose.msrb.mxu2 %v8582_v36  ;;  %v8917_v36 = vld [vmem:[%s13973_s7 + $0x388] sm:$0xf]  ;;  %v8914_v43 = vor.u32 %v12672_v33, %v8911_v35  ;;  %v8790_v33 = vor.u32 %v12645_v27, %v8789_v26  ;;  %v8794_v35 = vor.u32 %v12641_v28, %v8791_v29  ;;  %v8893_v26 = vld [vmem:[%s13973_s7 + $0x350] sm:$0xf]  ;;  %v12666_v28 = vld [vmem:[%s13973_s7 + $0x354] sm:$0xf] }
  0xc2   : > { %6596 = vmatpush.bf16.xpose.msrb.mxu3 %v8586_v37  ;;  %v12677_v37 = vld [vmem:[%s13973_s7 + $0x3a4] sm:$0xf0]  ;;  %v12670_v27 = vld [vmem:[%s13973_s7 + $0x36c] sm:$0xf0]  ;;  %v8895_v29 = vld [vmem:[%s13973_s7 + $0x370] sm:$0xf0] }
  0xc3   : > { %v8918_v44 = vor.u32 %v12677_v37, %v8917_v36  ;;  %v8749_v36 = vld [vmem:[%s13973_s7 + $0x240] sm:$0xf] }
  0xc4   : > { %v12636_v37 = vld [vmem:[%s13973_s7 + $0x25c] sm:$0xf0] }
  0xc8   : > { %6558 = vmatpush.bf16.xpose.msrb.mxu0 %v8542_v46  ;;  %6571 = vmatpush.bf16.xpose.msrb.mxu1 %v8546_v47  ;;  %v8877_v46 = vld [vmem:[%s13973_s7 + $0x340] sm:$0xf] }
  0xc9   : > { %6584 = vmatpush.bf16.xpose.msrb.mxu2 %v8550_v48  ;;  %v12668_v47 = vld [vmem:[%s13973_s7 + $0x35c] sm:$0xf0]  ;;  %v12664_v48 = vld [vmem:[%s13973_s7 + $0x344] sm:$0xf] }
  0xca   : > { %6597 = vmatpush.bf16.xpose.msrb.mxu3 %v8554_v49  ;;  %v8879_v49 = vld [vmem:[%s13973_s7 + $0x360] sm:$0xf0]  ;;  %v8878_v54 = vor.u32 %v12668_v47, %v8877_v46  ;;  %v8750_v46 = vor.u32 %v12636_v37, %v8749_v36  ;;  %v8754_v47 = vor.u32 %v12632_v40, %v8751_v41  ;;  %v8894_v36 = vor.u32 %v12670_v27, %v8893_v26  ;;  %v12638_v26 = vld [vmem:[%s13973_s7 + $0x26c] sm:$0xf0]  ;;  %v12634_v27 = vld [vmem:[%s13973_s7 + $0x254] sm:$0xf] }
  0xcb   : > { %v8882_v55 = vor.u32 %v12664_v48, %v8879_v49  ;;  %v8898_v37 = vor.u32 %v12666_v28, %v8895_v29  ;;  %v8767_v28 = vld [vmem:[%s13973_s7 + $0x270] sm:$0xf0]  ;;  %v8773_v29 = vld [vmem:[%s13973_s7 + $0x258] sm:$0xf] }
  0xd0   : > { %6559 = vmatpush.bf16.xpose.msrb.mxu0 %v8510_v58  ;;  %6572 = vmatpush.bf16.xpose.msrb.mxu1 %v8514_v59  ;;  %v8845_v58 = vld [vmem:[%s13973_s7 + $0x300] sm:$0xf] }
  0xd1   : > { %6585 = vmatpush.bf16.xpose.msrb.mxu2 %v8518_v60  ;;  %v12660_v59 = vld [vmem:[%s13973_s7 + $0x31c] sm:$0xf0]  ;;  %v12656_v60 = vld [vmem:[%s13973_s7 + $0x304] sm:$0xf] }
  0xd2   : > { %6598 = vmatpush.bf16.xpose.msrb.mxu3 %v8522_v61  ;;  %v8847_v61 = vld [vmem:[%s13973_s7 + $0x320] sm:$0xf0]  ;;  %v8846_v2 = vor.u32 %v12660_v59, %v8845_v58  ;;  %v8957_v58 = vld [vmem:[%s13973_s7 + $0x3d0] sm:$0xf] }
  0xd3   : > { %v8850_v4 = vor.u32 %v12656_v60, %v8847_v61  ;;  %v12686_v59 = vld [vmem:[%s13973_s7 + $0x3ec] sm:$0xf0]  ;;  %v12682_v60 = vld [vmem:[%s13973_s7 + $0x3d4] sm:$0xf]  ;;  %v8718_v61 = vor.u32 %v12628_v51, %v8717_v50 }
  0xd8   : > { %6560 = vmatpush.bf16.xpose.msrb.mxu0 %v8478_v10  ;;  %6573 = vmatpush.bf16.xpose.msrb.mxu1 %v8482_v14  ;;  %v8815_v10 = vld [vmem:[%s13973_s7 + $0x2e0] sm:$0xf0]  ;;  %v8823_v14 = vld [vmem:[%s13973_s7 + $0x2e8] sm:$0xf0] }
  0xd9   : > { %6586 = vmatpush.bf16.xpose.msrb.mxu2 %v8486_v15  ;;  %v8814_v15 = vor.u32 %v12652_v8, %v8813_v7  ;;  %v8818_v18 = vor.u32 %v12648_v9, %v8815_v10  ;;  %v8958_v7 = vor.u32 %v12686_v59, %v8957_v58  ;;  %v8962_v8 = vor.u32 %v12682_v60, %v8959_v62  ;;  %v8837_v58 = vld [vmem:[%s13973_s7 + $0x2d8] sm:$0xf]  ;;  %v12651_v60 = vld [vmem:[%s13973_s7 + $0x2dc] sm:$0xf] }
  0xda   : > { %6599 = vmatpush.bf16.xpose.msrb.mxu3 %v8490_v20  ;;  %v8826_v20 = vor.u32 %v12649_v13, %v8823_v14  ;;  %v8966_v9 = vor.u32 %v12687_v0, %v8965_v63  ;;  %v12674_v13 = vld [vmem:[%s13973_s7 + $0x394] sm:$0xf]  ;;  %v12655_v59 = vld [vmem:[%s13973_s7 + $0x2f4] sm:$0xf0] }
  0xdb   : > { %v8927_v14 = vld [vmem:[%s13973_s7 + $0x3b0] sm:$0xf0]  ;;  %v8838_v0 = vor.u32 %v12655_v59, %v8837_v58  ;;  %v12745_v59 = vld [vmem:[%s13973_s7 + $0x5cc] sm:$0xf] }
  0xdf   : > { %6561 = vmatmul.bf16.vlgmr.msrb.gmra.mxu0 %v14145_v30  ;;  %6574 = vmatmul.bf16.vlgmr.msrb.gmra.mxu1 %v14155_v38 }
  0xe0   : > { %6605 = vmatpush.bf16.xpose.msra.mxu0 %v8942_v22  ;;  %6618 = vmatpush.bf16.xpose.msra.mxu1 %v8946_v23  ;;  %v8781_v22 = vld [vmem:[%s13973_s7 + $0x280] sm:$0xf] }
  0xe1   : > { %6631 = vmatpush.bf16.xpose.msra.mxu2 %v8950_v24  ;;  %6600 = vmatmul.bf16.vlgmr.msrb.gmra.mxu3 %v14157_v39  ;;  %v12644_v23 = vld [vmem:[%s13973_s7 + $0x29c] sm:$0xf0]  ;;  %v12640_v24 = vld [vmem:[%s13973_s7 + $0x284] sm:$0xf] }
  0xe2   : > { %6644 = vmatpush.bf16.xpose.msra.mxu3 %v8954_v25  ;;  %6587 = vmatmul.bf16.vlgmr.msrb.gmra.mxu2 %v14150_v34  ;;  %v8783_v25 = vld [vmem:[%s13973_s7 + $0x2a0] sm:$0xf0]  ;;  %v8782_v31 = vor.u32 %v12644_v23, %v8781_v22  ;;  %v8926_v22 = vor.u32 %v12678_v12, %v8925_v11  ;;  %v8930_v23 = vor.u32 %v12674_v13, %v8927_v14  ;;  %v12647_v11 = vld [vmem:[%s13973_s7 + $0x2b4] sm:$0xf0]  ;;  %v12643_v12 = vld [vmem:[%s13973_s7 + $0x29c] sm:$0xf] }
  0xe3   : > { %v8786_v32 = vor.u32 %v12640_v24, %v8783_v25  ;;  %v8807_v13 = vld [vmem:[%s13973_s7 + $0x2b8] sm:$0xf0] }
  0xe8   : > { %6606 = vmatpush.bf16.xpose.msra.mxu0 %v8910_v42  ;;  %6619 = vmatpush.bf16.xpose.msra.mxu1 %v8914_v43  ;;  %v8757_v42 = vld [vmem:[%s13973_s7 + $0x248] sm:$0xf] }
  0xe9   : > { %6632 = vmatpush.bf16.xpose.msra.mxu2 %v8918_v44  ;;  %v12637_v43 = vld [vmem:[%s13973_s7 + $0x264] sm:$0xf0]  ;;  %v12633_v44 = vld [vmem:[%s13973_s7 + $0x24c] sm:$0xf] }
  0xea   : > { %6645 = vmatpush.bf16.xpose.msra.mxu3 %v8922_v45  ;;  %v8759_v45 = vld [vmem:[%s13973_s7 + $0x268] sm:$0xf0]  ;;  %v8758_v48 = vor.u32 %v12637_v43, %v8757_v42  ;;  %v8861_v42 = vld [vmem:[%s13973_s7 + $0x310] sm:$0xf] }
  0xeb   : > { %v8762_v49 = vor.u32 %v12633_v44, %v8759_v45  ;;  %v12662_v43 = vld [vmem:[%s13973_s7 + $0x32c] sm:$0xf0]  ;;  %v12658_v44 = vld [vmem:[%s13973_s7 + $0x314] sm:$0xf] }
  0xec   : > { %v8863_v45 = vld [vmem:[%s13973_s7 + $0x330] sm:$0xf0]  ;;  %v8862_v50 = vor.u32 %v12662_v43, %v8861_v42  ;;  %v8733_v42 = vld [vmem:[%s13973_s7 + $0x210] sm:$0xf] }
  0xed   : > { %v8866_v51 = vor.u32 %v12658_v44, %v8863_v45  ;;  %v12630_v43 = vld [vmem:[%s13973_s7 + $0x22c] sm:$0xf0]  ;;  %v12626_v44 = vld [vmem:[%s13973_s7 + $0x214] sm:$0xf] }
  0xee   : > { %v8735_v45 = vld [vmem:[%s13973_s7 + $0x230] sm:$0xf0] }
  0xf0   : > { %6607 = vmatpush.bf16.xpose.msra.mxu0 %v8878_v54  ;;  %6620 = vmatpush.bf16.xpose.msra.mxu1 %v8882_v55  ;;  %v8725_v54 = vld [vmem:[%s13973_s7 + $0x208] sm:$0xf] }
  0xf1   : > { %6633 = vmatpush.bf16.xpose.msra.mxu2 %v8886_v56  ;;  %v12629_v55 = vld [vmem:[%s13973_s7 + $0x224] sm:$0xf0]  ;;  %v12625_v56 = vld [vmem:[%s13973_s7 + $0x20c] sm:$0xf] }
  0xf2   : > { %6646 = vmatpush.bf16.xpose.msra.mxu3 %v8890_v57  ;;  %v8727_v57 = vld [vmem:[%s13973_s7 + $0x228] sm:$0xf0] }
  0xf8   : > { %6608 = vmatpush.bf16.xpose.msra.mxu0 %v8846_v2  ;;  %6621 = vmatpush.bf16.xpose.msra.mxu1 %v8850_v4  ;;  %v8726_v2 = vor.u32 %v12629_v55, %v8725_v54  ;;  %v12683_v4 = vld [vmem:[%s13973_s7 + $0x3dc] sm:$0xf]  ;;  %v8829_v54 = vld [vmem:[%s13973_s7 + $0x2d0] sm:$0xf] }
  0xf9   : > { %6634 = vmatpush.bf16.xpose.msra.mxu2 %v8854_v5  ;;  %v8967_v5 = vld [vmem:[%s13973_s7 + $0x3f8] sm:$0xf0]  ;;  %v12654_v55 = vld [vmem:[%s13973_s7 + $0x2ec] sm:$0xf0] }
  0xfa   : > { %6647 = vmatpush.bf16.xpose.msra.mxu3 %v8858_v6  ;;  %v8730_v6 = vor.u32 %v12625_v56, %v8727_v57  ;;  %v8970_v10 = vor.u32 %v12683_v4, %v8967_v5  ;;  %v12650_v56 = vld [vmem:[%s13973_s7 + $0x2d4] sm:$0xf]  ;;  %v8830_v62 = vor.u32 %v12654_v55, %v8829_v54  ;;  %v9199_v54 = vld [vmem:[%s13973_s7 + $0x5e0] sm:$0xf0]  ;;  %v9205_v55 = vld [vmem:[%s13973_s7 + $0x5c8] sm:$0xf] }
  0xfb   : > { %v8831_v57 = vld [vmem:[%s13973_s7 + $0x2f0] sm:$0xf0] }
  0xfc   : > { %v8834_v63 = vor.u32 %v12650_v56, %v8831_v57  ;;  %v12749_v56 = vld [vmem:[%s13973_s7 + $0x5e4] sm:$0xf0]  ;;  %v8738_v57 = vor.u32 %v12626_v44, %v8735_v45  ;;  %v9103_v44 = vld [vmem:[%s13973_s7 + $0x520] sm:$0xf0] }
  0xfd   : > { %v9109_v45 = vld [vmem:[%s13973_s7 + $0x508] sm:$0xf] }
 0x100   : > { %6609 = vmatpush.bf16.xpose.msra.mxu0 %v8814_v15  ;;  %6622 = vmatpush.bf16.xpose.msra.mxu1 %v8818_v18  ;;  %v8933_v15 = vld [vmem:[%s13973_s7 + $0x398] sm:$0xf] }
 0x101   : > { %6635 = vmatpush.bf16.xpose.msra.mxu2 %v8822_v19  ;;  %v12679_v18 = vld [vmem:[%s13973_s7 + $0x3b4] sm:$0xf0]  ;;  %v12675_v19 = vld [vmem:[%s13973_s7 + $0x39c] sm:$0xf] }
 0x102   : > { %6648 = vmatpush.bf16.xpose.msra.mxu3 %v8826_v20  ;;  %v8935_v20 = vld [vmem:[%s13973_s7 + $0x3b8] sm:$0xf0]  ;;  %v8934_v24 = vor.u32 %v12679_v18, %v8933_v15 }
 0x103   : > { %v8938_v25 = vor.u32 %v12675_v19, %v8935_v20 }
 0x108   : > { %6610 = vmatpush.bf16.xpose.msra.mxu0 %v8782_v31  ;;  %6623 = vmatpush.bf16.xpose.msra.mxu1 %v8786_v32  ;;  %v8901_v31 = vld [vmem:[%s13973_s7 + $0x358] sm:$0xf] }
 0x109   : > { %6636 = vmatpush.bf16.xpose.msra.mxu2 %v8790_v33  ;;  %v12671_v32 = vld [vmem:[%s13973_s7 + $0x374] sm:$0xf0]  ;;  %v12667_v33 = vld [vmem:[%s13973_s7 + $0x35c] sm:$0xf] }
 0x10a   : > { %6649 = vmatpush.bf16.xpose.msra.mxu3 %v8794_v35  ;;  %v8903_v35 = vld [vmem:[%s13973_s7 + $0x378] sm:$0xf0]  ;;  %v8902_v40 = vor.u32 %v12671_v32, %v8901_v31  ;;  %v12639_v31 = vld [vmem:[%s13973_s7 + $0x274] sm:$0xf0] }
 0x10b   : > { %v8906_v41 = vor.u32 %v12667_v33, %v8903_v35  ;;  %v12635_v32 = vld [vmem:[%s13973_s7 + $0x25c] sm:$0xf] }
 0x10c   : > { %v8775_v33 = vld [vmem:[%s13973_s7 + $0x278] sm:$0xf0] }
 0x110   : > { %6611 = vmatpush.bf16.xpose.msra.mxu0 %v8750_v46  ;;  %6624 = vmatpush.bf16.xpose.msra.mxu1 %v8754_v47  ;;  %v8869_v46 = vld [vmem:[%s13973_s7 + $0x318] sm:$0xf] }
 0x111   : > { %6637 = vmatpush.bf16.xpose.msra.mxu2 %v8758_v48  ;;  %v12663_v47 = vld [vmem:[%s13973_s7 + $0x334] sm:$0xf0]  ;;  %v12659_v48 = vld [vmem:[%s13973_s7 + $0x31c] sm:$0xf] }
 0x112   : > { %6650 = vmatpush.bf16.xpose.msra.mxu3 %v8762_v49  ;;  %v8871_v49 = vld [vmem:[%s13973_s7 + $0x338] sm:$0xf0]  ;;  %v8870_v52 = vor.u32 %v12663_v47, %v8869_v46  ;;  %v8741_v46 = vld [vmem:[%s13973_s7 + $0x218] sm:$0xf] }
 0x113   : > { %v8874_v53 = vor.u32 %v12659_v48, %v8871_v49  ;;  %v12631_v47 = vld [vmem:[%s13973_s7 + $0x234] sm:$0xf0]  ;;  %v12627_v48 = vld [vmem:[%s13973_s7 + $0x21c] sm:$0xf] }
 0x114   : > { %v8743_v49 = vld [vmem:[%s13973_s7 + $0x238] sm:$0xf0]  ;;  %v8742_v58 = vor.u32 %v12631_v47, %v8741_v46  ;;  %v12725_v46 = vld [vmem:[%s13973_s7 + $0x524] sm:$0xf0]  ;;  %v12721_v47 = vld [vmem:[%s13973_s7 + $0x50c] sm:$0xf] }
 0x118   : > { %6612 = vmatpush.bf16.xpose.msra.mxu0 %v8718_v61  ;;  %6625 = vmatpush.bf16.xpose.msra.mxu1 %v8722_v1  ;;  %v8839_v61 = vld [vmem:[%s13973_s7 + $0x2f8] sm:$0xf0] }
 0x119   : > { %6638 = vmatpush.bf16.xpose.msra.mxu2 %v8726_v2  ;;  %v8842_v2 = vor.u32 %v12651_v60, %v8839_v61  ;;  %v9207_v60 = vld [vmem:[%s13973_s7 + $0x5e8] sm:$0xf0]  ;;  %v8746_v61 = vor.u32 %v12627_v48, %v8743_v49 }
 0x11a   : > { %6651 = vmatpush.bf16.xpose.msra.mxu3 %v8730_v6  ;;  %v8797_v6 = vld [vmem:[%s13973_s7 + $0x290] sm:$0xf]  ;;  %v9111_v48 = vld [vmem:[%s13973_s7 + $0x528] sm:$0xf0] }
 0x11c   : > { %v14257_v1 = vpop.f32.mrf.mxu0  ;;  %v14259_v4 = vpop.f32.mrf.mxu1 }
 0x11f   : > { %6613 = vmatmul.bf16.vlgmr.msra.gmra.mxu0 %v14089_v16  ;;  %6626 = vmatmul.bf16.vlgmr.msra.gmra.mxu1 %v14096_v21 }
 0x120   : > { %6657 = vmatpush.bf16.xpose.msrb.mxu0 %v8958_v7  ;;  %6670 = vmatpush.bf16.xpose.msrb.mxu1 %v8962_v8  ;;  %v12646_v7 = vld [vmem:[%s13973_s7 + $0x2ac] sm:$0xf0]  ;;  %v12642_v8 = vld [vmem:[%s13973_s7 + $0x294] sm:$0xf] }
 0x121   : > { %6683 = vmatpush.bf16.xpose.msrb.mxu2 %v8966_v9  ;;  %6652 = vmatmul.bf16.vlgmr.msra.gmra.mxu3 %v14091_v17  ;;  %v8799_v9 = vld [vmem:[%s13973_s7 + $0x2b0] sm:$0xf0]  ;;  %v8798_v14 = vor.u32 %v12646_v7, %v8797_v6  ;;  %v9165_v6 = vld [vmem:[%s13973_s7 + $0x580] sm:$0xf] }
 0x122   : > { %6696 = vmatpush.bf16.xpose.msrb.mxu3 %v8970_v10  ;;  %6639 = vmatmul.bf16.vlgmr.msra.gmra.mxu2 %v14078_v3  ;;  %v8805_v10 = vld [vmem:[%s13973_s7 + $0x298] sm:$0xf]  ;;  %v8802_v18 = vor.u32 %v12642_v8, %v8799_v9  ;;  %v12740_v7 = vld [vmem:[%s13973_s7 + $0x59c] sm:$0xf0]  ;;  %v12736_v8 = vld [vmem:[%s13973_s7 + $0x584] sm:$0xf] }
 0x123   : > { %v8806_v19 = vor.u32 %v12647_v11, %v8805_v10  ;;  %v9167_v9 = vld [vmem:[%s13973_s7 + $0x5a0] sm:$0xf0]  ;;  %v9173_v10 = vld [vmem:[%s13973_s7 + $0x588] sm:$0xf] }
 0x124   : > { %v14271_v15 = vpop.f32.mrf.mxu3  ;;  %v6512_v20 = vpop.f32.mrf.mxu0  ;;  %v12741_v11 = vld [vmem:[%s13973_s7 + $0x5a4] sm:$0xf0] }
 0x125   : > { %v14261_v5 = vpop.f32.mrf.mxu2  ;;  %v9174_v20 = vor.u32 %v12741_v11, %v9173_v10 }
 0x128   : > { %6658 = vmatpush.bf16.xpose.msrb.mxu0 %v8926_v22  ;;  %6671 = vmatpush.bf16.xpose.msrb.mxu1 %v8930_v23  ;;  %v8810_v22 = vor.u32 %v12643_v12, %v8807_v13  ;;  %v6525_v23 = vpop.f32.mrf.mxu1  ;;  %v6524_v12 = vadd.f32 %v14259_v4, %v14257_v1  ;;  %v12737_v13 = vld [vmem:[%s13973_s7 + $0x58c] sm:$0xf]  ;;  %v9133_v4 = vld [vmem:[%s13973_s7 + $0x540] sm:$0xf] }
 0x129   : > { %6684 = vmatpush.bf16.xpose.msrb.mxu2 %v8934_v24  ;;  %v12732_v23 = vld [vmem:[%s13973_s7 + $0x55c] sm:$0xf0] }
 0x12a   : > { %6697 = vmatpush.bf16.xpose.msrb.mxu3 %v8938_v25  ;;  %v8765_v25 = vld [vmem:[%s13973_s7 + $0x250] sm:$0xf]  ;;  %v6537_v1 = vadd.f32 %v14261_v5, %v6524_v12  ;;  %v9134_v5 = vor.u32 %v12732_v23, %v9133_v4  ;;  %v12709_v4 = vld [vmem:[%s13973_s7 + $0x4a4] sm:$0xf0]  ;;  %v12705_v23 = vld [vmem:[%s13973_s7 + $0x48c] sm:$0xf] }
 0x12b   : > { %v8766_v35 = vor.u32 %v12638_v26, %v8765_v25  ;;  %v9135_v25 = vld [vmem:[%s13973_s7 + $0x560] sm:$0xf0]  ;;  %v9141_v26 = vld [vmem:[%s13973_s7 + $0x548] sm:$0xf] }
 0x12d   : > { %v6538_v24 = vpop.f32.mrf.mxu2 }
 0x12e   : > { %v12728_v24 = vld [vmem:[%s13973_s7 + $0x544] sm:$0xf] }
 0x130   : > { %6659 = vmatpush.bf16.xpose.msrb.mxu0 %v8894_v36  ;;  %6672 = vmatpush.bf16.xpose.msrb.mxu1 %v8898_v37  ;;  %v6551_v36 = vpop.f32.mrf.mxu3  ;;  %v8770_v37 = vor.u32 %v12634_v27, %v8767_v28  ;;  %v12733_v27 = vld [vmem:[%s13973_s7 + $0x564] sm:$0xf0]  ;;  %v6550_v28 = vadd.f32 %v14271_v15, %v6537_v1  ;;  %v12720_v15 = vld [vmem:[%s13973_s7 + $0x504] sm:$0xf] }
 0x131   : > { %6685 = vmatpush.bf16.xpose.msrb.mxu2 %v8902_v40  ;;  %v8774_v40 = vor.u32 %v12639_v31, %v8773_v29  ;;  %v12729_v29 = vld [vmem:[%s13973_s7 + $0x54c] sm:$0xf]  ;;  %v9045_v1 = vld [vmem:[%s13973_s7 + $0x488] sm:$0xf] }
 0x132   : > { %6698 = vmatpush.bf16.xpose.msrb.mxu3 %v8906_v41  ;;  %v8778_v41 = vor.u32 %v12635_v32, %v8775_v33  ;;  %v9143_v31 = vld [vmem:[%s13973_s7 + $0x568] sm:$0xf0]  ;;  %v9138_v32 = vor.u32 %v12728_v24, %v9135_v25  ;;  %v9142_v33 = vor.u32 %v12733_v27, %v9141_v26  ;;  %v9046_v27 = vor.u32 %v12709_v4, %v9045_v1  ;;  %v9149_v1 = vld [vmem:[%s13973_s7 + $0x550] sm:$0xf] }
 0x133   : > { %v9047_v24 = vld [vmem:[%s13973_s7 + $0x4a8] sm:$0xf0]  ;;  %v12734_v4 = vld [vmem:[%s13973_s7 + $0x56c] sm:$0xf0] }
 0x138   : > { %6660 = vmatpush.bf16.xpose.msrb.mxu0 %v8862_v50  ;;  %6673 = vmatpush.bf16.xpose.msrb.mxu1 %v8866_v51  ;;  %v9197_v50 = vld [vmem:[%s13973_s7 + $0x5c0] sm:$0xf] }
 0x139   : > { %6686 = vmatpush.bf16.xpose.msrb.mxu2 %v8870_v52  ;;  %v12748_v51 = vld [vmem:[%s13973_s7 + $0x5dc] sm:$0xf0]  ;;  %v12744_v52 = vld [vmem:[%s13973_s7 + $0x5c4] sm:$0xf] }
 0x13a   : > { %6699 = vmatpush.bf16.xpose.msrb.mxu3 %v8874_v53  ;;  %v8734_v53 = vor.u32 %v12630_v43, %v8733_v42  ;;  %v12724_v42 = vld [vmem:[%s13973_s7 + $0x51c] sm:$0xf0] }
 0x140   : > { %6661 = vmatpush.bf16.xpose.msrb.mxu0 %v8830_v62  ;;  %6674 = vmatpush.bf16.xpose.msrb.mxu1 %v8834_v63  ;;  %v9198_v62 = vor.u32 %v12748_v51, %v9197_v50  ;;  %v9202_v63 = vor.u32 %v12744_v52, %v9199_v54  ;;  %v9106_v51 = vor.u32 %v12720_v15, %v9103_v44  ;;  %v12692_v44 = vld [vmem:[%s13973_s7 + $0x41c] sm:$0xf0] }
 0x141   : > { %6687 = vmatpush.bf16.xpose.msrb.mxu2 %v8838_v0  ;;  %v9206_v0 = vor.u32 %v12749_v56, %v9205_v55  ;;  %v9110_v52 = vor.u32 %v12725_v46, %v9109_v45  ;;  %v9114_v54 = vor.u32 %v12721_v47, %v9111_v48  ;;  %v12688_v45 = vld [vmem:[%s13973_s7 + $0x404] sm:$0xf]  ;;  %v8981_v47 = vld [vmem:[%s13973_s7 + $0x408] sm:$0xf] }
 0x142   : > { %6700 = vmatpush.bf16.xpose.msrb.mxu3 %v8842_v2  ;;  %v9210_v2 = vor.u32 %v12745_v59, %v9207_v60  ;;  %v9069_v60 = vld [vmem:[%s13973_s7 + $0x4c0] sm:$0xf]  ;;  %v8975_v46 = vld [vmem:[%s13973_s7 + $0x420] sm:$0xf0]  ;;  %v12693_v48 = vld [vmem:[%s13973_s7 + $0x424] sm:$0xf0] }
 0x148   : > { %6662 = vmatpush.bf16.xpose.msrb.mxu0 %v8798_v14  ;;  %6675 = vmatpush.bf16.xpose.msrb.mxu1 %v8802_v18  ;;  %v9175_v14 = vld [vmem:[%s13973_s7 + $0x5a8] sm:$0xf0]  ;;  %v9166_v18 = vor.u32 %v12740_v7, %v9165_v6  ;;  %v12717_v6 = vld [vmem:[%s13973_s7 + $0x4e4] sm:$0xf0] }
 0x149   : > { %6688 = vmatpush.bf16.xpose.msrb.mxu2 %v8806_v19  ;;  %v9170_v19 = vor.u32 %v12736_v8, %v9167_v9  ;;  %v12713_v7 = vld [vmem:[%s13973_s7 + $0x4cc] sm:$0xf] }
 0x14a   : > { %6701 = vmatpush.bf16.xpose.msrb.mxu3 %v8810_v22  ;;  %v9178_v22 = vor.u32 %v12737_v13, %v9175_v14  ;;  %v9079_v8 = vld [vmem:[%s13973_s7 + $0x4e8] sm:$0xf0] }
 0x14b   : > { %v9082_v13 = vor.u32 %v12713_v7, %v9079_v8  ;;  %v9181_v7 = vld [vmem:[%s13973_s7 + $0x590] sm:$0xf] }
 0x14c   : > { %v12742_v8 = vld [vmem:[%s13973_s7 + $0x5ac] sm:$0xf0] }
 0x150   : > { %6663 = vmatpush.bf16.xpose.msrb.mxu0 %v8766_v35  ;;  %6676 = vmatpush.bf16.xpose.msrb.mxu1 %v8770_v37  ;;  %v9146_v35 = vor.u32 %v12729_v29, %v9143_v31  ;;  %v9005_v29 = vld [vmem:[%s13973_s7 + $0x440] sm:$0xf] }
 0x151   : > { %6689 = vmatpush.bf16.xpose.msrb.mxu2 %v8774_v40  ;;  %v12700_v31 = vld [vmem:[%s13973_s7 + $0x45c] sm:$0xf0] }
 0x152   : > { %6702 = vmatpush.bf16.xpose.msrb.mxu3 %v8778_v41  ;;  %v9101_v41 = vld [vmem:[%s13973_s7 + $0x500] sm:$0xf] }
 0x153   : > { %v9102_v49 = vor.u32 %v12724_v42, %v9101_v41 }
 0x158   : > { %6664 = vmatpush.bf16.xpose.msrb.mxu0 %v8734_v53  ;;  %6677 = vmatpush.bf16.xpose.msrb.mxu1 %v8738_v57  ;;  %v325_v57 = vld [vmem:[#allocation2 + $0x30] sm:$0xff] }
 0x159   : > { %6690 = vmatpush.bf16.xpose.msrb.mxu2 %v8742_v58 }
 0x15a   : > { %6703 = vmatpush.bf16.xpose.msrb.mxu3 %v8746_v61  ;;  %v12716_v61 = vld [vmem:[%s13973_s7 + $0x4dc] sm:$0xf0] }
 0x15b   : > { %v9070_v9 = vor.u32 %v12716_v61, %v9069_v60  ;;  %v12747_v60 = vld [vmem:[%s13973_s7 + $0x5dc] sm:$0xf] }
 0x15c   : > { %v6562_v36 = vpop.f32.mrf.mxu0  ;;  %v6575_v40 = vpop.f32.mrf.mxu1  ;;  %v9223_v61 = vld [vmem:[%s13973_s7 + $0x5f8] sm:$0xf0] }
 0x15d   : > { %v6563_v37 = vadd.f32 %v6562_v36, %v6550_v28  ;;  %v9050_v28 = vor.u32 %v12705_v23, %v9047_v24  ;;  %v12697_v36 = vld [vmem:[%s13973_s7 + $0x44c] sm:$0xf]  ;;  %v12730_v23 = vld [vmem:[%s13973_s7 + $0x554] sm:$0xf] }
 0x15e   : > { %v9151_v24 = vld [vmem:[%s13973_s7 + $0x570] sm:$0xf0] }
 0x15f   : > { %6665 = vmatmul.bf16.vlgmr.msrb.gmra.mxu0 %v14145_v30  ;;  %6678 = vmatmul.bf16.vlgmr.msrb.gmra.mxu1 %v14155_v38  ;;  %v6576_v43 = vadd.f32 %v6575_v40, %v6563_v37  ;;  %v9015_v37 = vld [vmem:[%s13973_s7 + $0x468] sm:$0xf0]  ;;  %v9006_v40 = vor.u32 %v12700_v31, %v9005_v29  ;;  %v9150_v29 = vor.u32 %v12734_v4, %v9149_v1  ;;  %v12702_v1 = vld [vmem:[%s13973_s7 + $0x46c] sm:$0xf0]  ;;  %v12698_v4 = vld [vmem:[%s13973_s7 + $0x454] sm:$0xf] }
 0x160   : > { %6709 = vmatpush.bf16.xpose.msra.mxu0 %v9198_v62  ;;  %6722 = vmatpush.bf16.xpose.msra.mxu1 %v9202_v63  ;;  %v12712_v62 = vld [vmem:[%s13973_s7 + $0x4c4] sm:$0xf]  ;;  %v9018_v15 = vor.u32 %v12697_v36, %v9015_v37  ;;  %v9154_v31 = vor.u32 %v12730_v23, %v9151_v24  ;;  %v12722_v36 = vld [vmem:[%s13973_s7 + $0x514] sm:$0xf]  ;;  %v9029_v24 = vld [vmem:[%s13973_s7 + $0x458] sm:$0xf] }
 0x161   : > { %6735 = vmatpush.bf16.xpose.msra.mxu2 %v9206_v0  ;;  %6704 = vmatmul.bf16.vlgmr.msrb.gmra.mxu3 %v14157_v39  ;;  %v9071_v0 = vld [vmem:[%s13973_s7 + $0x4e0] sm:$0xf0]  ;;  %v9119_v37 = vld [vmem:[%s13973_s7 + $0x530] sm:$0xf0] }
 0x162   : > { %6748 = vmatpush.bf16.xpose.msra.mxu3 %v9210_v2  ;;  %6691 = vmatmul.bf16.vlgmr.msrb.gmra.mxu2 %v14150_v34  ;;  %v9077_v2 = vld [vmem:[%s13973_s7 + $0x4c8] sm:$0xf]  ;;  %v9074_v10 = vor.u32 %v12712_v62, %v9071_v0  ;;  %v9023_v23 = vld [vmem:[%s13973_s7 + $0x470] sm:$0xf0] }
 0x163   : > { %v9078_v11 = vor.u32 %v12717_v6, %v9077_v2  ;;  %v9226_v6 = vor.u32 %v12747_v60, %v9223_v61 }
 0x164   : > { %v6601_v55 = vpop.f32.mrf.mxu3  ;;  %v6564_v56 = vpop.f32.mrf.mxu0 }
 0x165   : > { %v6588_v50 = vpop.f32.mrf.mxu2  ;;  %v6577_v58 = vpop.f32.mrf.mxu1  ;;  %v9221_v56 = vld [vmem:[%s13973_s7 + $0x5d8] sm:$0xf] }
 0x166   : > { %v6589_v53 = vadd.f32 %v6588_v50, %v6576_v43  ;;  %v8973_v43 = vld [vmem:[%s13973_s7 + $0x400] sm:$0xf]  ;;  %v8983_v50 = vld [vmem:[%s13973_s7 + $0x428] sm:$0xf0]  ;;  %v8978_v58 = vor.u32 %v12688_v45, %v8975_v46 }
 0x168   : > { %6710 = vmatpush.bf16.xpose.msra.mxu0 %v9166_v18  ;;  %6723 = vmatpush.bf16.xpose.msra.mxu1 %v9170_v19  ;;  %v6602_v59 = vadd.f32 %v6601_v55, %v6589_v53  ;;  %v9037_v18 = vld [vmem:[%s13973_s7 + $0x480] sm:$0xf]  ;;  %v12746_v53 = vld [vmem:[%s13973_s7 + $0x5d4] sm:$0xf] }
 0x169   : > { %6736 = vmatpush.bf16.xpose.msra.mxu2 %v9174_v20  ;;  %v12708_v19 = vld [vmem:[%s13973_s7 + $0x49c] sm:$0xf0]  ;;  %v12704_v20 = vld [vmem:[%s13973_s7 + $0x484] sm:$0xf]  ;;  %v9215_v55 = vld [vmem:[%s13973_s7 + $0x5f0] sm:$0xf0] }
 0x16a   : > { %6749 = vmatpush.bf16.xpose.msra.mxu3 %v9178_v22  ;;  %v8165_v63 = vadd.f32 %v6602_v59, %v325_v57  ;;  %v9039_v22 = vld [vmem:[%s13973_s7 + $0x4a0] sm:$0xf0]  ;;  %v9038_v25 = vor.u32 %v12708_v19, %v9037_v18  ;;  %v12751_v57 = vld [vmem:[%s13973_s7 + $0x5f4] sm:$0xf0]  ;;  %v8982_v59 = vor.u32 %v12693_v48, %v8981_v47  ;;  %v9218_v0 = vor.u32 %v12746_v53, %v9215_v55  ;;  %v9085_v47 = vld [vmem:[%s13973_s7 + $0x4d0] sm:$0xf] }
 0x16b   : > { %v9042_v26 = vor.u32 %v12704_v20, %v9039_v22  ;;  %v9222_v2 = vor.u32 %v12751_v57, %v9221_v56  ;;  %v9182_v18 = vor.u32 %v12742_v8, %v9181_v7  ;;  %v12718_v48 = vld [vmem:[%s13973_s7 + $0x4ec] sm:$0xf0]  ;;  %v12715_v53 = vld [vmem:[%s13973_s7 + $0x4dc] sm:$0xf]  ;;  %v12711_v7 = vld [vmem:[%s13973_s7 + $0x4b4] sm:$0xf0] }
 0x16c   : > { %8181 = vst [vmem:[#allocation2 + $0x30] sm:$0xff] %v8165_v63  ;;  %v6603_v14 = vpop.f32.mrf.mxu3  ;;  %v9086_v55 = vor.u32 %v12718_v48, %v9085_v47  ;;  %v12707_v8 = vld [vmem:[%s13973_s7 + $0x49c] sm:$0xf]  ;;  %v9455_v47 = vld [vmem:[%s13973_s7 + $0x7e0] sm:$0xf0] }
 0x16d   : > { %v6590_v12 = vpop.f32.mrf.mxu2  ;;  %v9191_v14 = vld [vmem:[%s13973_s7 + $0x5b8] sm:$0xf0]  ;;  %v9461_v48 = vld [vmem:[%s13973_s7 + $0x7c8] sm:$0xf] }
 0x16e   : > { %v12743_v12 = vld [vmem:[%s13973_s7 + $0x5b4] sm:$0xf0] }
 0x170   : > { %6711 = vmatpush.bf16.xpose.msra.mxu0 %v9134_v5  ;;  %6724 = vmatpush.bf16.xpose.msra.mxu1 %v9138_v32  ;;  %v12696_v5 = vld [vmem:[%s13973_s7 + $0x444] sm:$0xf] }
 0x171   : > { %6737 = vmatpush.bf16.xpose.msra.mxu2 %v9142_v33  ;;  %v9007_v32 = vld [vmem:[%s13973_s7 + $0x460] sm:$0xf0]  ;;  %v9013_v33 = vld [vmem:[%s13973_s7 + $0x448] sm:$0xf] }
 0x172   : > { %6750 = vmatpush.bf16.xpose.msra.mxu3 %v9146_v35  ;;  %v12701_v35 = vld [vmem:[%s13973_s7 + $0x464] sm:$0xf0]  ;;  %v9010_v41 = vor.u32 %v12696_v5, %v9007_v32 }
 0x173   : > { %v9014_v42 = vor.u32 %v12701_v35, %v9013_v33  ;;  %v9117_v33 = vld [vmem:[%s13973_s7 + $0x510] sm:$0xf] }
 0x174   : > { %v12726_v35 = vld [vmem:[%s13973_s7 + $0x52c] sm:$0xf0] }
 0x178   : > { %6712 = vmatpush.bf16.xpose.msra.mxu0 %v9102_v49  ;;  %6725 = vmatpush.bf16.xpose.msra.mxu1 %v9106_v51  ;;  %v12689_v49 = vld [vmem:[%s13973_s7 + $0x40c] sm:$0xf]  ;;  %v9213_v51 = vld [vmem:[%s13973_s7 + $0x5d0] sm:$0xf] }
 0x179   : > { %6738 = vmatpush.bf16.xpose.msra.mxu2 %v9110_v52  ;;  %v12750_v52 = vld [vmem:[%s13973_s7 + $0x5ec] sm:$0xf0]  ;;  %v8986_v62 = vor.u32 %v12689_v49, %v8983_v50  ;;  %v12714_v49 = vld [vmem:[%s13973_s7 + $0x4d4] sm:$0xf] }
 0x17a   : > { %6751 = vmatpush.bf16.xpose.msra.mxu3 %v9114_v54  ;;  %v8974_v54 = vor.u32 %v12692_v44, %v8973_v43  ;;  %v9214_v63 = vor.u32 %v12750_v52, %v9213_v51  ;;  %v9118_v43 = vor.u32 %v12726_v35, %v9117_v33  ;;  %v9122_v44 = vor.u32 %v12722_v36, %v9119_v37  ;;  %v9087_v50 = vld [vmem:[%s13973_s7 + $0x4f0] sm:$0xf0]  ;;  %v9093_v51 = vld [vmem:[%s13973_s7 + $0x4d8] sm:$0xf]  ;;  %v8989_v33 = vld [vmem:[%s13973_s7 + $0x410] sm:$0xf] }
 0x17b   : > { %v12719_v52 = vld [vmem:[%s13973_s7 + $0x4f4] sm:$0xf0]  ;;  %v12694_v35 = vld [vmem:[%s13973_s7 + $0x42c] sm:$0xf0]  ;;  %v12690_v36 = vld [vmem:[%s13973_s7 + $0x414] sm:$0xf] }
 0x17c   : > { %v8991_v37 = vld [vmem:[%s13973_s7 + $0x430] sm:$0xf0] }
 0x180   : > { %6713 = vmatpush.bf16.xpose.msra.mxu0 %v9070_v9  ;;  %6726 = vmatpush.bf16.xpose.msra.mxu1 %v9074_v10  ;;  %v12738_v9 = vld [vmem:[%s13973_s7 + $0x594] sm:$0xf] }
 0x181   : > { %6739 = vmatpush.bf16.xpose.msra.mxu2 %v9078_v11  ;;  %v9183_v10 = vld [vmem:[%s13973_s7 + $0x5b0] sm:$0xf0]  ;;  %v9189_v11 = vld [vmem:[%s13973_s7 + $0x598] sm:$0xf] }
 0x182   : > { %6752 = vmatpush.bf16.xpose.msra.mxu3 %v9082_v13  ;;  %v12739_v13 = vld [vmem:[%s13973_s7 + $0x59c] sm:$0xf]  ;;  %v9186_v19 = vor.u32 %v12738_v9, %v9183_v10  ;;  %v9190_v20 = vor.u32 %v12743_v12, %v9189_v11 }
 0x183   : > { %v9194_v22 = vor.u32 %v12739_v13, %v9191_v14  ;;  %v9063_v9 = vld [vmem:[%s13973_s7 + $0x4b8] sm:$0xf0] }
 0x188   : > { %6714 = vmatpush.bf16.xpose.msra.mxu0 %v9038_v25  ;;  %6727 = vmatpush.bf16.xpose.msra.mxu1 %v9042_v26  ;;  %v9157_v25 = vld [vmem:[%s13973_s7 + $0x558] sm:$0xf] }
 0x189   : > { %6740 = vmatpush.bf16.xpose.msra.mxu2 %v9046_v27  ;;  %v12735_v26 = vld [vmem:[%s13973_s7 + $0x574] sm:$0xf0]  ;;  %v12731_v27 = vld [vmem:[%s13973_s7 + $0x55c] sm:$0xf] }
 0x18a   : > { %6753 = vmatpush.bf16.xpose.msra.mxu3 %v9050_v28  ;;  %v9159_v28 = vld [vmem:[%s13973_s7 + $0x578] sm:$0xf0]  ;;  %v9158_v5 = vor.u32 %v12735_v26, %v9157_v25  ;;  %v12703_v25 = vld [vmem:[%s13973_s7 + $0x474] sm:$0xf0] }
 0x18b   : > { %v9162_v32 = vor.u32 %v12731_v27, %v9159_v28  ;;  %v12699_v26 = vld [vmem:[%s13973_s7 + $0x45c] sm:$0xf] }
 0x18c   : > { %v9031_v27 = vld [vmem:[%s13973_s7 + $0x478] sm:$0xf0] }
 0x190   : > { %6715 = vmatpush.bf16.xpose.msra.mxu0 %v9006_v40  ;;  %6728 = vmatpush.bf16.xpose.msra.mxu1 %v9010_v41  ;;  %v9125_v40 = vld [vmem:[%s13973_s7 + $0x518] sm:$0xf] }
 0x191   : > { %6741 = vmatpush.bf16.xpose.msra.mxu2 %v9014_v42  ;;  %v12727_v41 = vld [vmem:[%s13973_s7 + $0x534] sm:$0xf0]  ;;  %v12723_v42 = vld [vmem:[%s13973_s7 + $0x51c] sm:$0xf] }
 0x192   : > { %6754 = vmatpush.bf16.xpose.msra.mxu3 %v9018_v15  ;;  %v9127_v15 = vld [vmem:[%s13973_s7 + $0x538] sm:$0xf0]  ;;  %v9126_v45 = vor.u32 %v12727_v41, %v9125_v40  ;;  %v8997_v40 = vld [vmem:[%s13973_s7 + $0x418] sm:$0xf] }
 0x193   : > { %v9130_v46 = vor.u32 %v12723_v42, %v9127_v15  ;;  %v12695_v41 = vld [vmem:[%s13973_s7 + $0x434] sm:$0xf0]  ;;  %v12691_v42 = vld [vmem:[%s13973_s7 + $0x41c] sm:$0xf] }
 0x194   : > { %v8999_v15 = vld [vmem:[%s13973_s7 + $0x438] sm:$0xf0] }
 0x198   : > { %6716 = vmatpush.bf16.xpose.msra.mxu0 %v8974_v54  ;;  %6729 = vmatpush.bf16.xpose.msra.mxu1 %v8978_v58  ;;  %v9095_v54 = vld [vmem:[%s13973_s7 + $0x4f8] sm:$0xf0]  ;;  %v9090_v58 = vor.u32 %v12714_v49, %v9087_v50  ;;  %v12813_v49 = vld [vmem:[%s13973_s7 + $0x7e4] sm:$0xf0]  ;;  %v8994_v50 = vor.u32 %v12690_v36, %v8991_v37  ;;  %v9359_v36 = vld [vmem:[%s13973_s7 + $0x720] sm:$0xf0] }
 0x199   : > { %6742 = vmatpush.bf16.xpose.msra.mxu2 %v8982_v59  ;;  %v9094_v59 = vor.u32 %v12719_v52, %v9093_v51  ;;  %v9098_v60 = vor.u32 %v12715_v53, %v9095_v54  ;;  %v8998_v51 = vor.u32 %v12695_v41, %v8997_v40  ;;  %v12809_v52 = vld [vmem:[%s13973_s7 + $0x7cc] sm:$0xf]  ;;  %v9002_v54 = vor.u32 %v12691_v42, %v8999_v15  ;;  %v9365_v37 = vld [vmem:[%s13973_s7 + $0x708] sm:$0xf] }
 0x19a   : > { %6755 = vmatpush.bf16.xpose.msra.mxu3 %v8986_v62  ;;  %v9053_v62 = vld [vmem:[%s13973_s7 + $0x490] sm:$0xf]  ;;  %v9463_v53 = vld [vmem:[%s13973_s7 + $0x7e8] sm:$0xf0]  ;;  %v12789_v40 = vld [vmem:[%s13973_s7 + $0x724] sm:$0xf0] }
 0x19b   : > { %v12785_v41 = vld [vmem:[%s13973_s7 + $0x70c] sm:$0xf] }
 0x19c   : > { %v14405_v56 = vpop.f32.mrf.mxu0  ;;  %v14407_v57 = vpop.f32.mrf.mxu1  ;;  %v9367_v42 = vld [vmem:[%s13973_s7 + $0x728] sm:$0xf0] }
 0x19f   : > { %6717 = vmatmul.bf16.vlgmr.msra.gmra.mxu0 %v14089_v16  ;;  %6730 = vmatmul.bf16.vlgmr.msra.gmra.mxu1 %v14096_v21 }
 0x1a0   : > { %6761 = vmatpush.bf16.xpose.msrb.mxu0 %v9214_v63  ;;  %6774 = vmatpush.bf16.xpose.msrb.mxu1 %v9218_v0  ;;  %v12710_v63 = vld [vmem:[%s13973_s7 + $0x4ac] sm:$0xf0]  ;;  %v12706_v0 = vld [vmem:[%s13973_s7 + $0x494] sm:$0xf] }
 0x1a1   : > { %6787 = vmatpush.bf16.xpose.msrb.mxu2 %v9222_v2  ;;  %6756 = vmatmul.bf16.vlgmr.msra.gmra.mxu3 %v14091_v17  ;;  %v9055_v2 = vld [vmem:[%s13973_s7 + $0x4b0] sm:$0xf0]  ;;  %v9054_v10 = vor.u32 %v12710_v63, %v9053_v62  ;;  %v9421_v62 = vld [vmem:[%s13973_s7 + $0x780] sm:$0xf] }
 0x1a2   : > { %6800 = vmatpush.bf16.xpose.msrb.mxu3 %v9226_v6  ;;  %6743 = vmatmul.bf16.vlgmr.msra.gmra.mxu2 %v14078_v3  ;;  %v9061_v6 = vld [vmem:[%s13973_s7 + $0x498] sm:$0xf]  ;;  %v9058_v13 = vor.u32 %v12706_v0, %v9055_v2  ;;  %v12804_v63 = vld [vmem:[%s13973_s7 + $0x79c] sm:$0xf0]  ;;  %v12800_v0 = vld [vmem:[%s13973_s7 + $0x784] sm:$0xf] }
 0x1a3   : > { %v9062_v14 = vor.u32 %v12711_v7, %v9061_v6  ;;  %v9423_v2 = vld [vmem:[%s13973_s7 + $0x7a0] sm:$0xf0]  ;;  %v9429_v6 = vld [vmem:[%s13973_s7 + $0x788] sm:$0xf] }
 0x1a4   : > { %v14419_v11 = vpop.f32.mrf.mxu3  ;;  %v6616_v12 = vpop.f32.mrf.mxu0  ;;  %v12805_v7 = vld [vmem:[%s13973_s7 + $0x7a4] sm:$0xf0] }
 0x1a5   : > { %v14409_v61 = vpop.f32.mrf.mxu2  ;;  %v9422_v12 = vor.u32 %v12804_v63, %v9421_v62  ;;  %v12781_v62 = vld [vmem:[%s13973_s7 + $0x6e4] sm:$0xf0]  ;;  %v12777_v63 = vld [vmem:[%s13973_s7 + $0x6cc] sm:$0xf] }
 0x1a8   : > { %6762 = vmatpush.bf16.xpose.msrb.mxu0 %v9182_v18  ;;  %6775 = vmatpush.bf16.xpose.msrb.mxu1 %v9186_v19  ;;  %v6629_v18 = vpop.f32.mrf.mxu1  ;;  %v9066_v19 = vor.u32 %v12707_v8, %v9063_v9  ;;  %v6628_v8 = vadd.f32 %v14407_v57, %v14405_v56  ;;  %v12801_v9 = vld [vmem:[%s13973_s7 + $0x78c] sm:$0xf]  ;;  %v9389_v57 = vld [vmem:[%s13973_s7 + $0x740] sm:$0xf] }
 0x1a9   : > { %6788 = vmatpush.bf16.xpose.msrb.mxu2 %v9190_v20 }
 0x1aa   : > { %6801 = vmatpush.bf16.xpose.msrb.mxu3 %v9194_v22  ;;  %v9021_v22 = vld [vmem:[%s13973_s7 + $0x450] sm:$0xf]  ;;  %v6641_v56 = vadd.f32 %v14409_v61, %v6628_v8 }
 0x1ab   : > { %v9022_v28 = vor.u32 %v12702_v1, %v9021_v22  ;;  %v9391_v22 = vld [vmem:[%s13973_s7 + $0x760] sm:$0xf0]  ;;  %v9397_v1 = vld [vmem:[%s13973_s7 + $0x748] sm:$0xf] }
 0x1ad   : > { %v6642_v20 = vpop.f32.mrf.mxu2 }
 0x1ae   : > { %v12792_v20 = vld [vmem:[%s13973_s7 + $0x744] sm:$0xf] }
 0x1b0   : > { %6763 = vmatpush.bf16.xpose.msrb.mxu0 %v9150_v29  ;;  %6776 = vmatpush.bf16.xpose.msrb.mxu1 %v9154_v31  ;;  %v6655_v29 = vpop.f32.mrf.mxu3  ;;  %v9026_v31 = vor.u32 %v12698_v4, %v9023_v23  ;;  %v12797_v4 = vld [vmem:[%s13973_s7 + $0x764] sm:$0xf0]  ;;  %v6654_v23 = vadd.f32 %v14419_v11, %v6641_v56  ;;  %v12784_v11 = vld [vmem:[%s13973_s7 + $0x704] sm:$0xf] }
 0x1b1   : > { %6789 = vmatpush.bf16.xpose.msrb.mxu2 %v9158_v5  ;;  %v9030_v5 = vor.u32 %v12703_v25, %v9029_v24  ;;  %v12793_v24 = vld [vmem:[%s13973_s7 + $0x74c] sm:$0xf]  ;;  %v9301_v56 = vld [vmem:[%s13973_s7 + $0x688] sm:$0xf] }
 0x1b2   : > { %6802 = vmatpush.bf16.xpose.msrb.mxu3 %v9162_v32  ;;  %v9034_v32 = vor.u32 %v12699_v26, %v9031_v27  ;;  %v9399_v25 = vld [vmem:[%s13973_s7 + $0x768] sm:$0xf0]  ;;  %v9394_v26 = vor.u32 %v12792_v20, %v9391_v22  ;;  %v9398_v27 = vor.u32 %v12797_v4, %v9397_v1 }
 0x1b3   : > { %v9303_v20 = vld [vmem:[%s13973_s7 + $0x6a8] sm:$0xf0] }
 0x1b8   : > { %6764 = vmatpush.bf16.xpose.msrb.mxu0 %v9118_v43  ;;  %6777 = vmatpush.bf16.xpose.msrb.mxu1 %v9122_v44  ;;  %v9453_v43 = vld [vmem:[%s13973_s7 + $0x7c0] sm:$0xf] }
 0x1b9   : > { %6790 = vmatpush.bf16.xpose.msrb.mxu2 %v9126_v45  ;;  %v12812_v44 = vld [vmem:[%s13973_s7 + $0x7dc] sm:$0xf0]  ;;  %v12808_v45 = vld [vmem:[%s13973_s7 + $0x7c4] sm:$0xf] }
 0x1ba   : > { %6803 = vmatpush.bf16.xpose.msrb.mxu3 %v9130_v46  ;;  %v8990_v46 = vor.u32 %v12694_v35, %v8989_v33  ;;  %v12788_v33 = vld [vmem:[%s13973_s7 + $0x71c] sm:$0xf0] }
 0x1c0   : > { %6765 = vmatpush.bf16.xpose.msrb.mxu0 %v9086_v55  ;;  %6778 = vmatpush.bf16.xpose.msrb.mxu1 %v9090_v58  ;;  %v9454_v55 = vor.u32 %v12812_v44, %v9453_v43  ;;  %v9458_v58 = vor.u32 %v12808_v45, %v9455_v47  ;;  %v9362_v44 = vor.u32 %v12784_v11, %v9359_v36  ;;  %v12756_v36 = vld [vmem:[%s13973_s7 + $0x61c] sm:$0xf0] }
 0x1c1   : > { %6791 = vmatpush.bf16.xpose.msrb.mxu2 %v9094_v59  ;;  %v9462_v59 = vor.u32 %v12813_v49, %v9461_v48  ;;  %v9366_v45 = vor.u32 %v12789_v40, %v9365_v37  ;;  %v9370_v47 = vor.u32 %v12785_v41, %v9367_v42  ;;  %v12752_v37 = vld [vmem:[%s13973_s7 + $0x604] sm:$0xf]  ;;  %v9237_v41 = vld [vmem:[%s13973_s7 + $0x608] sm:$0xf] }
 0x1c2   : > { %6804 = vmatpush.bf16.xpose.msrb.mxu3 %v9098_v60  ;;  %v9466_v60 = vor.u32 %v12809_v52, %v9463_v53  ;;  %v9325_v53 = vld [vmem:[%s13973_s7 + $0x6c0] sm:$0xf]  ;;  %v9231_v40 = vld [vmem:[%s13973_s7 + $0x620] sm:$0xf0]  ;;  %v12757_v42 = vld [vmem:[%s13973_s7 + $0x624] sm:$0xf0] }
 0x1c8   : > { %6766 = vmatpush.bf16.xpose.msrb.mxu0 %v9054_v10  ;;  %6779 = vmatpush.bf16.xpose.msrb.mxu1 %v9058_v13  ;;  %v9431_v10 = vld [vmem:[%s13973_s7 + $0x7a8] sm:$0xf0]  ;;  %v9426_v13 = vor.u32 %v12800_v0, %v9423_v2 }
 0x1c9   : > { %6792 = vmatpush.bf16.xpose.msrb.mxu2 %v9062_v14  ;;  %v9430_v14 = vor.u32 %v12805_v7, %v9429_v6  ;;  %v9434_v18 = vor.u32 %v12801_v9, %v9431_v10  ;;  %v9335_v0 = vld [vmem:[%s13973_s7 + $0x6e8] sm:$0xf0] }
 0x1ca   : > { %6805 = vmatpush.bf16.xpose.msrb.mxu3 %v9066_v19  ;;  %v12796_v19 = vld [vmem:[%s13973_s7 + $0x75c] sm:$0xf0]  ;;  %v9338_v9 = vor.u32 %v12777_v63, %v9335_v0  ;;  %v9437_v63 = vld [vmem:[%s13973_s7 + $0x790] sm:$0xf] }
 0x1cb   : > { %v9390_v61 = vor.u32 %v12796_v19, %v9389_v57  ;;  %v12773_v57 = vld [vmem:[%s13973_s7 + $0x6a4] sm:$0xf0]  ;;  %v12769_v19 = vld [vmem:[%s13973_s7 + $0x68c] sm:$0xf]  ;;  %v12806_v0 = vld [vmem:[%s13973_s7 + $0x7ac] sm:$0xf0] }
 0x1cc   : > { %v9302_v4 = vor.u32 %v12773_v57, %v9301_v56  ;;  %v9405_v56 = vld [vmem:[%s13973_s7 + $0x750] sm:$0xf] }
 0x1cd   : > { %v12798_v57 = vld [vmem:[%s13973_s7 + $0x76c] sm:$0xf0] }
 0x1d0   : > { %6767 = vmatpush.bf16.xpose.msrb.mxu0 %v9022_v28  ;;  %6780 = vmatpush.bf16.xpose.msrb.mxu1 %v9026_v31  ;;  %v9402_v28 = vor.u32 %v12793_v24, %v9399_v25  ;;  %v9261_v24 = vld [vmem:[%s13973_s7 + $0x640] sm:$0xf] }
 0x1d1   : > { %6793 = vmatpush.bf16.xpose.msrb.mxu2 %v9030_v5  ;;  %v12764_v25 = vld [vmem:[%s13973_s7 + $0x65c] sm:$0xf0] }
 0x1d2   : > { %6806 = vmatpush.bf16.xpose.msrb.mxu3 %v9034_v32  ;;  %v9357_v32 = vld [vmem:[%s13973_s7 + $0x700] sm:$0xf] }
 0x1d3   : > { %v9358_v15 = vor.u32 %v12788_v33, %v9357_v32 }
 0x1d8   : > { %6768 = vmatpush.bf16.xpose.msrb.mxu0 %v8990_v46  ;;  %6781 = vmatpush.bf16.xpose.msrb.mxu1 %v8994_v50  ;;  %v326_v50 = vld [vmem:[#allocation2] sm:$0xff] }
 0x1d9   : > { %6794 = vmatpush.bf16.xpose.msrb.mxu2 %v8998_v51 }
 0x1da   : > { %6807 = vmatpush.bf16.xpose.msrb.mxu3 %v9002_v54  ;;  %v12780_v54 = vld [vmem:[%s13973_s7 + $0x6dc] sm:$0xf0] }
 0x1db   : > { %v9326_v2 = vor.u32 %v12780_v54, %v9325_v53  ;;  %v12811_v53 = vld [vmem:[%s13973_s7 + $0x7dc] sm:$0xf] }
 0x1dc   : > { %v6666_v29 = vpop.f32.mrf.mxu0  ;;  %v6679_v5 = vpop.f32.mrf.mxu1  ;;  %v9479_v54 = vld [vmem:[%s13973_s7 + $0x7f8] sm:$0xf0] }
 0x1dd   : > { %v6667_v31 = vadd.f32 %v6666_v29, %v6654_v23  ;;  %v9306_v23 = vor.u32 %v12769_v19, %v9303_v20  ;;  %v12761_v29 = vld [vmem:[%s13973_s7 + $0x64c] sm:$0xf]  ;;  %v12794_v19 = vld [vmem:[%s13973_s7 + $0x754] sm:$0xf] }
 0x1de   : > { %v9407_v20 = vld [vmem:[%s13973_s7 + $0x770] sm:$0xf0] }
 0x1df   : > { %6769 = vmatmul.bf16.vlgmr.msrb.gmra.mxu0 %v14145_v30  ;;  %6782 = vmatmul.bf16.vlgmr.msrb.gmra.mxu1 %v14155_v38  ;;  %v6680_v35 = vadd.f32 %v6679_v5, %v6667_v31  ;;  %v9271_v31 = vld [vmem:[%s13973_s7 + $0x668] sm:$0xf0]  ;;  %v9262_v5 = vor.u32 %v12764_v25, %v9261_v24  ;;  %v9406_v24 = vor.u32 %v12798_v57, %v9405_v56  ;;  %v12766_v56 = vld [vmem:[%s13973_s7 + $0x66c] sm:$0xf0]  ;;  %v12762_v57 = vld [vmem:[%s13973_s7 + $0x654] sm:$0xf] }
 0x1e0   : > { %6813 = vmatpush.bf16.xpose.msra.mxu0 %v9454_v55  ;;  %6826 = vmatpush.bf16.xpose.msra.mxu1 %v9458_v58  ;;  %v12776_v55 = vld [vmem:[%s13973_s7 + $0x6c4] sm:$0xf]  ;;  %v9274_v11 = vor.u32 %v12761_v29, %v9271_v31  ;;  %v9410_v25 = vor.u32 %v12794_v19, %v9407_v20  ;;  %v12786_v29 = vld [vmem:[%s13973_s7 + $0x714] sm:$0xf]  ;;  %v9285_v20 = vld [vmem:[%s13973_s7 + $0x658] sm:$0xf] }
 0x1e1   : > { %6839 = vmatpush.bf16.xpose.msra.mxu2 %v9462_v59  ;;  %6808 = vmatmul.bf16.vlgmr.msrb.gmra.mxu3 %v14157_v39  ;;  %v9327_v59 = vld [vmem:[%s13973_s7 + $0x6e0] sm:$0xf0]  ;;  %v9375_v31 = vld [vmem:[%s13973_s7 + $0x730] sm:$0xf0] }
 0x1e2   : > { %6852 = vmatpush.bf16.xpose.msra.mxu3 %v9466_v60  ;;  %6795 = vmatmul.bf16.vlgmr.msrb.gmra.mxu2 %v14150_v34  ;;  %v9333_v60 = vld [vmem:[%s13973_s7 + $0x6c8] sm:$0xf]  ;;  %v9330_v6 = vor.u32 %v12776_v55, %v9327_v59  ;;  %v9279_v19 = vld [vmem:[%s13973_s7 + $0x670] sm:$0xf0] }
 0x1e3   : > { %v9334_v7 = vor.u32 %v12781_v62, %v9333_v60  ;;  %v9482_v62 = vor.u32 %v12811_v53, %v9479_v54 }
 0x1e4   : > { %v6705_v48 = vpop.f32.mrf.mxu3  ;;  %v6668_v49 = vpop.f32.mrf.mxu0 }
 0x1e5   : > { %v6692_v43 = vpop.f32.mrf.mxu2  ;;  %v6681_v51 = vpop.f32.mrf.mxu1  ;;  %v9477_v49 = vld [vmem:[%s13973_s7 + $0x7d8] sm:$0xf] }
 0x1e6   : > { %v6693_v46 = vadd.f32 %v6692_v43, %v6680_v35  ;;  %v9229_v35 = vld [vmem:[%s13973_s7 + $0x600] sm:$0xf]  ;;  %v9239_v43 = vld [vmem:[%s13973_s7 + $0x628] sm:$0xf0]  ;;  %v9234_v51 = vor.u32 %v12752_v37, %v9231_v40 }
 0x1e8   : > { %6814 = vmatpush.bf16.xpose.msra.mxu0 %v9422_v12  ;;  %6827 = vmatpush.bf16.xpose.msra.mxu1 %v9426_v13  ;;  %v6706_v52 = vadd.f32 %v6705_v48, %v6693_v46  ;;  %v9293_v12 = vld [vmem:[%s13973_s7 + $0x680] sm:$0xf]  ;;  %v12810_v46 = vld [vmem:[%s13973_s7 + $0x7d4] sm:$0xf] }
 0x1e9   : > { %6840 = vmatpush.bf16.xpose.msra.mxu2 %v9430_v14  ;;  %v12772_v13 = vld [vmem:[%s13973_s7 + $0x69c] sm:$0xf0]  ;;  %v12768_v14 = vld [vmem:[%s13973_s7 + $0x684] sm:$0xf]  ;;  %v9471_v48 = vld [vmem:[%s13973_s7 + $0x7f0] sm:$0xf0] }
 0x1ea   : > { %6853 = vmatpush.bf16.xpose.msra.mxu3 %v9434_v18  ;;  %v8166_v58 = vadd.f32 %v6706_v52, %v326_v50  ;;  %v9295_v18 = vld [vmem:[%s13973_s7 + $0x6a0] sm:$0xf0]  ;;  %v9294_v22 = vor.u32 %v12772_v13, %v9293_v12  ;;  %v12815_v50 = vld [vmem:[%s13973_s7 + $0x7f4] sm:$0xf0]  ;;  %v9238_v52 = vor.u32 %v12757_v42, %v9237_v41  ;;  %v9474_v59 = vor.u32 %v12810_v46, %v9471_v48  ;;  %v9341_v41 = vld [vmem:[%s13973_s7 + $0x6d0] sm:$0xf] }
 0x1eb   : > { %v9298_v1 = vor.u32 %v12768_v14, %v9295_v18  ;;  %v9478_v60 = vor.u32 %v12815_v50, %v9477_v49  ;;  %v9438_v12 = vor.u32 %v12806_v0, %v9437_v63  ;;  %v12782_v42 = vld [vmem:[%s13973_s7 + $0x6ec] sm:$0xf0]  ;;  %v12779_v46 = vld [vmem:[%s13973_s7 + $0x6dc] sm:$0xf]  ;;  %v12775_v63 = vld [vmem:[%s13973_s7 + $0x6b4] sm:$0xf0] }
 0x1ec   : > { %8182 = vst [vmem:[#allocation2] sm:$0xff] %v8166_v58  ;;  %v6707_v10 = vpop.f32.mrf.mxu3  ;;  %v9342_v48 = vor.u32 %v12782_v42, %v9341_v41  ;;  %v12771_v0 = vld [vmem:[%s13973_s7 + $0x69c] sm:$0xf]  ;;  %v9711_v41 = vld [vmem:[%s13973_s7 + $0x9e0] sm:$0xf0] }
 0x1ed   : > { %v6694_v8 = vpop.f32.mrf.mxu2  ;;  %v9447_v10 = vld [vmem:[%s13973_s7 + $0x7b8] sm:$0xf0]  ;;  %v9717_v42 = vld [vmem:[%s13973_s7 + $0x9c8] sm:$0xf] }
 0x1ee   : > { %v12807_v8 = vld [vmem:[%s13973_s7 + $0x7b4] sm:$0xf0] }
 0x1f0   : > { %6815 = vmatpush.bf16.xpose.msra.mxu0 %v9390_v61  ;;  %6828 = vmatpush.bf16.xpose.msra.mxu1 %v9394_v26  ;;  %v12760_v61 = vld [vmem:[%s13973_s7 + $0x644] sm:$0xf] }
 0x1f1   : > { %6841 = vmatpush.bf16.xpose.msra.mxu2 %v9398_v27  ;;  %v9263_v26 = vld [vmem:[%s13973_s7 + $0x660] sm:$0xf0]  ;;  %v9269_v27 = vld [vmem:[%s13973_s7 + $0x648] sm:$0xf] }
 0x1f2   : > { %6854 = vmatpush.bf16.xpose.msra.mxu3 %v9402_v28  ;;  %v12765_v28 = vld [vmem:[%s13973_s7 + $0x664] sm:$0xf0]  ;;  %v9266_v32 = vor.u32 %v12760_v61, %v9263_v26 }
 0x1f3   : > { %v9270_v33 = vor.u32 %v12765_v28, %v9269_v27  ;;  %v9373_v27 = vld [vmem:[%s13973_s7 + $0x710] sm:$0xf] }
 0x1f4   : > { %v12790_v28 = vld [vmem:[%s13973_s7 + $0x72c] sm:$0xf0] }
 0x1f8   : > { %6816 = vmatpush.bf16.xpose.msra.mxu0 %v9358_v15  ;;  %6829 = vmatpush.bf16.xpose.msra.mxu1 %v9362_v44  ;;  %v12753_v15 = vld [vmem:[%s13973_s7 + $0x60c] sm:$0xf]  ;;  %v9469_v44 = vld [vmem:[%s13973_s7 + $0x7d0] sm:$0xf] }
 0x1f9   : > { %6842 = vmatpush.bf16.xpose.msra.mxu2 %v9366_v45  ;;  %v12814_v45 = vld [vmem:[%s13973_s7 + $0x7ec] sm:$0xf0]  ;;  %v9242_v55 = vor.u32 %v12753_v15, %v9239_v43  ;;  %v12778_v15 = vld [vmem:[%s13973_s7 + $0x6d4] sm:$0xf] }
 0x1fa   : > { %6855 = vmatpush.bf16.xpose.msra.mxu3 %v9370_v47  ;;  %v9230_v47 = vor.u32 %v12756_v36, %v9229_v35  ;;  %v9470_v58 = vor.u32 %v12814_v45, %v9469_v44  ;;  %v9374_v35 = vor.u32 %v12790_v28, %v9373_v27  ;;  %v9378_v36 = vor.u32 %v12786_v29, %v9375_v31  ;;  %v9343_v43 = vld [vmem:[%s13973_s7 + $0x6f0] sm:$0xf0]  ;;  %v9349_v44 = vld [vmem:[%s13973_s7 + $0x6d8] sm:$0xf]  ;;  %v9245_v27 = vld [vmem:[%s13973_s7 + $0x610] sm:$0xf] }
 0x1fb   : > { %v12783_v45 = vld [vmem:[%s13973_s7 + $0x6f4] sm:$0xf0]  ;;  %v12758_v28 = vld [vmem:[%s13973_s7 + $0x62c] sm:$0xf0]  ;;  %v12754_v29 = vld [vmem:[%s13973_s7 + $0x614] sm:$0xf] }
 0x1fc   : > { %v9247_v31 = vld [vmem:[%s13973_s7 + $0x630] sm:$0xf0] }
 0x200   : > { %6817 = vmatpush.bf16.xpose.msra.mxu0 %v9326_v2  ;;  %6830 = vmatpush.bf16.xpose.msra.mxu1 %v9330_v6  ;;  %v12802_v2 = vld [vmem:[%s13973_s7 + $0x794] sm:$0xf] }
 0x201   : > { %6843 = vmatpush.bf16.xpose.msra.mxu2 %v9334_v7  ;;  %v9439_v6 = vld [vmem:[%s13973_s7 + $0x7b0] sm:$0xf0]  ;;  %v9445_v7 = vld [vmem:[%s13973_s7 + $0x798] sm:$0xf] }
 0x202   : > { %6856 = vmatpush.bf16.xpose.msra.mxu3 %v9338_v9  ;;  %v12803_v9 = vld [vmem:[%s13973_s7 + $0x79c] sm:$0xf]  ;;  %v9442_v13 = vor.u32 %v12802_v2, %v9439_v6  ;;  %v9446_v14 = vor.u32 %v12807_v8, %v9445_v7 }
 0x203   : > { %v9450_v18 = vor.u32 %v12803_v9, %v9447_v10  ;;  %v9319_v2 = vld [vmem:[%s13973_s7 + $0x6b8] sm:$0xf0] }
 0x208   : > { %6818 = vmatpush.bf16.xpose.msra.mxu0 %v9294_v22  ;;  %6831 = vmatpush.bf16.xpose.msra.mxu1 %v9298_v1  ;;  %v9413_v22 = vld [vmem:[%s13973_s7 + $0x758] sm:$0xf] }
 0x209   : > { %6844 = vmatpush.bf16.xpose.msra.mxu2 %v9302_v4  ;;  %v12799_v1 = vld [vmem:[%s13973_s7 + $0x774] sm:$0xf0]  ;;  %v12795_v4 = vld [vmem:[%s13973_s7 + $0x75c] sm:$0xf] }
 0x20a   : > { %6857 = vmatpush.bf16.xpose.msra.mxu3 %v9306_v23  ;;  %v9415_v23 = vld [vmem:[%s13973_s7 + $0x778] sm:$0xf0]  ;;  %v9414_v61 = vor.u32 %v12799_v1, %v9413_v22  ;;  %v12767_v22 = vld [vmem:[%s13973_s7 + $0x674] sm:$0xf0] }
 0x20b   : > { %v9418_v26 = vor.u32 %v12795_v4, %v9415_v23  ;;  %v12763_v1 = vld [vmem:[%s13973_s7 + $0x65c] sm:$0xf] }
 0x20c   : > { %v9287_v4 = vld [vmem:[%s13973_s7 + $0x678] sm:$0xf0] }
 0x210   : > { %6819 = vmatpush.bf16.xpose.msra.mxu0 %v9262_v5  ;;  %6832 = vmatpush.bf16.xpose.msra.mxu1 %v9266_v32  ;;  %v9381_v5 = vld [vmem:[%s13973_s7 + $0x718] sm:$0xf] }
 0x211   : > { %6845 = vmatpush.bf16.xpose.msra.mxu2 %v9270_v33  ;;  %v12791_v32 = vld [vmem:[%s13973_s7 + $0x734] sm:$0xf0]  ;;  %v12787_v33 = vld [vmem:[%s13973_s7 + $0x71c] sm:$0xf] }
 0x212   : > { %6858 = vmatpush.bf16.xpose.msra.mxu3 %v9274_v11  ;;  %v9383_v11 = vld [vmem:[%s13973_s7 + $0x738] sm:$0xf0]  ;;  %v9382_v37 = vor.u32 %v12791_v32, %v9381_v5  ;;  %v9253_v5 = vld [vmem:[%s13973_s7 + $0x618] sm:$0xf] }
 0x213   : > { %v9386_v40 = vor.u32 %v12787_v33, %v9383_v11  ;;  %v12759_v32 = vld [vmem:[%s13973_s7 + $0x634] sm:$0xf0]  ;;  %v12755_v33 = vld [vmem:[%s13973_s7 + $0x61c] sm:$0xf] }
 0x214   : > { %v9255_v11 = vld [vmem:[%s13973_s7 + $0x638] sm:$0xf0] }
 0x218   : > { %6820 = vmatpush.bf16.xpose.msra.mxu0 %v9230_v47  ;;  %6833 = vmatpush.bf16.xpose.msra.mxu1 %v9234_v51  ;;  %v9351_v47 = vld [vmem:[%s13973_s7 + $0x6f8] sm:$0xf0]  ;;  %v9346_v51 = vor.u32 %v12778_v15, %v9343_v43  ;;  %v12877_v15 = vld [vmem:[%s13973_s7 + $0x9e4] sm:$0xf0]  ;;  %v9250_v43 = vor.u32 %v12754_v29, %v9247_v31  ;;  %v9615_v29 = vld [vmem:[%s13973_s7 + $0x920] sm:$0xf0] }
 0x219   : > { %6846 = vmatpush.bf16.xpose.msra.mxu2 %v9238_v52  ;;  %v9350_v52 = vor.u32 %v12783_v45, %v9349_v44  ;;  %v9354_v53 = vor.u32 %v12779_v46, %v9351_v47  ;;  %v9254_v44 = vor.u32 %v12759_v32, %v9253_v5  ;;  %v12873_v45 = vld [vmem:[%s13973_s7 + $0x9cc] sm:$0xf]  ;;  %v9258_v47 = vor.u32 %v12755_v33, %v9255_v11  ;;  %v9621_v31 = vld [vmem:[%s13973_s7 + $0x908] sm:$0xf] }
 0x21a   : > { %6859 = vmatpush.bf16.xpose.msra.mxu3 %v9242_v55  ;;  %v9309_v55 = vld [vmem:[%s13973_s7 + $0x690] sm:$0xf]  ;;  %v9719_v46 = vld [vmem:[%s13973_s7 + $0x9e8] sm:$0xf0]  ;;  %v12853_v5 = vld [vmem:[%s13973_s7 + $0x924] sm:$0xf0] }
 0x21b   : > { %v12849_v32 = vld [vmem:[%s13973_s7 + $0x90c] sm:$0xf] }
 0x21c   : > { %v14553_v49 = vpop.f32.mrf.mxu0  ;;  %v14555_v50 = vpop.f32.mrf.mxu1  ;;  %v9623_v33 = vld [vmem:[%s13973_s7 + $0x928] sm:$0xf0] }
 0x21f   : > { %6821 = vmatmul.bf16.vlgmr.msra.gmra.mxu0 %v14089_v16  ;;  %6834 = vmatmul.bf16.vlgmr.msra.gmra.mxu1 %v14096_v21 }
 0x220   : > { %6865 = vmatpush.bf16.xpose.msrb.mxu0 %v9470_v58  ;;  %6878 = vmatpush.bf16.xpose.msrb.mxu1 %v9474_v59  ;;  %v12774_v58 = vld [vmem:[%s13973_s7 + $0x6ac] sm:$0xf0]  ;;  %v12770_v59 = vld [vmem:[%s13973_s7 + $0x694] sm:$0xf] }
 0x221   : > { %6891 = vmatpush.bf16.xpose.msrb.mxu2 %v9478_v60  ;;  %6860 = vmatmul.bf16.vlgmr.msra.gmra.mxu3 %v14091_v17  ;;  %v9311_v60 = vld [vmem:[%s13973_s7 + $0x6b0] sm:$0xf0]  ;;  %v9310_v6 = vor.u32 %v12774_v58, %v9309_v55  ;;  %v9677_v55 = vld [vmem:[%s13973_s7 + $0x980] sm:$0xf] }
 0x222   : > { %6904 = vmatpush.bf16.xpose.msrb.mxu3 %v9482_v62  ;;  %6847 = vmatmul.bf16.vlgmr.msra.gmra.mxu2 %v14078_v3  ;;  %v9317_v62 = vld [vmem:[%s13973_s7 + $0x698] sm:$0xf]  ;;  %v9314_v9 = vor.u32 %v12770_v59, %v9311_v60  ;;  %v12868_v58 = vld [vmem:[%s13973_s7 + $0x99c] sm:$0xf0]  ;;  %v12864_v59 = vld [vmem:[%s13973_s7 + $0x984] sm:$0xf] }
 0x223   : > { %v9318_v10 = vor.u32 %v12775_v63, %v9317_v62  ;;  %v9679_v60 = vld [vmem:[%s13973_s7 + $0x9a0] sm:$0xf0]  ;;  %v9685_v62 = vld [vmem:[%s13973_s7 + $0x988] sm:$0xf] }
 0x224   : > { %v14567_v7 = vpop.f32.mrf.mxu3  ;;  %v6720_v8 = vpop.f32.mrf.mxu0  ;;  %v12869_v63 = vld [vmem:[%s13973_s7 + $0x9a4] sm:$0xf0] }
 0x225   : > { %v14557_v54 = vpop.f32.mrf.mxu2  ;;  %v9678_v8 = vor.u32 %v12868_v58, %v9677_v55  ;;  %v12845_v55 = vld [vmem:[%s13973_s7 + $0x8e4] sm:$0xf0]  ;;  %v12841_v58 = vld [vmem:[%s13973_s7 + $0x8cc] sm:$0xf] }
 0x228   : > { %6866 = vmatpush.bf16.xpose.msrb.mxu0 %v9438_v12  ;;  %6879 = vmatpush.bf16.xpose.msrb.mxu1 %v9442_v13  ;;  %v6733_v12 = vpop.f32.mrf.mxu1  ;;  %v9322_v13 = vor.u32 %v12771_v0, %v9319_v2  ;;  %v6732_v0 = vadd.f32 %v14555_v50, %v14553_v49  ;;  %v12865_v2 = vld [vmem:[%s13973_s7 + $0x98c] sm:$0xf]  ;;  %v9645_v50 = vld [vmem:[%s13973_s7 + $0x940] sm:$0xf] }
 0x229   : > { %6892 = vmatpush.bf16.xpose.msrb.mxu2 %v9446_v14 }
 0x22a   : > { %6905 = vmatpush.bf16.xpose.msrb.mxu3 %v9450_v18  ;;  %v9277_v18 = vld [vmem:[%s13973_s7 + $0x650] sm:$0xf]  ;;  %v6745_v49 = vadd.f32 %v14557_v54, %v6732_v0 }
 0x22b   : > { %v9278_v23 = vor.u32 %v12766_v56, %v9277_v18  ;;  %v9647_v18 = vld [vmem:[%s13973_s7 + $0x960] sm:$0xf0]  ;;  %v9653_v56 = vld [vmem:[%s13973_s7 + $0x948] sm:$0xf] }
 0x22d   : > { %v6746_v14 = vpop.f32.mrf.mxu2 }
 0x22e   : > { %v12856_v14 = vld [vmem:[%s13973_s7 + $0x944] sm:$0xf] }
 0x230   : > { %6867 = vmatpush.bf16.xpose.msrb.mxu0 %v9406_v24  ;;  %6880 = vmatpush.bf16.xpose.msrb.mxu1 %v9410_v25  ;;  %v6759_v24 = vpop.f32.mrf.mxu3  ;;  %v9282_v25 = vor.u32 %v12762_v57, %v9279_v19  ;;  %v12861_v57 = vld [vmem:[%s13973_s7 + $0x964] sm:$0xf0]  ;;  %v6758_v19 = vadd.f32 %v14567_v7, %v6745_v49  ;;  %v12848_v7 = vld [vmem:[%s13973_s7 + $0x904] sm:$0xf] }
 0x231   : > { %6893 = vmatpush.bf16.xpose.msrb.mxu2 %v9414_v61  ;;  %v9286_v61 = vor.u32 %v12767_v22, %v9285_v20  ;;  %v12857_v20 = vld [vmem:[%s13973_s7 + $0x94c] sm:$0xf]  ;;  %v9557_v49 = vld [vmem:[%s13973_s7 + $0x888] sm:$0xf] }
 0x232   : > { %6906 = vmatpush.bf16.xpose.msrb.mxu3 %v9418_v26  ;;  %v9290_v26 = vor.u32 %v12763_v1, %v9287_v4  ;;  %v9655_v22 = vld [vmem:[%s13973_s7 + $0x968] sm:$0xf0]  ;;  %v9650_v1 = vor.u32 %v12856_v14, %v9647_v18  ;;  %v9654_v4 = vor.u32 %v12861_v57, %v9653_v56 }
 0x233   : > { %v9559_v14 = vld [vmem:[%s13973_s7 + $0x8a8] sm:$0xf0] }
 0x238   : > { %6868 = vmatpush.bf16.xpose.msrb.mxu0 %v9374_v35  ;;  %6881 = vmatpush.bf16.xpose.msrb.mxu1 %v9378_v36  ;;  %v9709_v35 = vld [vmem:[%s13973_s7 + $0x9c0] sm:$0xf] }
 0x239   : > { %6894 = vmatpush.bf16.xpose.msrb.mxu2 %v9382_v37  ;;  %v12876_v36 = vld [vmem:[%s13973_s7 + $0x9dc] sm:$0xf0]  ;;  %v12872_v37 = vld [vmem:[%s13973_s7 + $0x9c4] sm:$0xf] }
 0x23a   : > { %6907 = vmatpush.bf16.xpose.msrb.mxu3 %v9386_v40  ;;  %v9246_v40 = vor.u32 %v12758_v28, %v9245_v27  ;;  %v12852_v27 = vld [vmem:[%s13973_s7 + $0x91c] sm:$0xf0] }
 0x240   : > { %6869 = vmatpush.bf16.xpose.msrb.mxu0 %v9342_v48  ;;  %6882 = vmatpush.bf16.xpose.msrb.mxu1 %v9346_v51  ;;  %v9710_v48 = vor.u32 %v12876_v36, %v9709_v35  ;;  %v9714_v51 = vor.u32 %v12872_v37, %v9711_v41  ;;  %v9618_v36 = vor.u32 %v12848_v7, %v9615_v29  ;;  %v12820_v29 = vld [vmem:[%s13973_s7 + $0x81c] sm:$0xf0] }
 0x241   : > { %6895 = vmatpush.bf16.xpose.msrb.mxu2 %v9350_v52  ;;  %v9718_v52 = vor.u32 %v12877_v15, %v9717_v42  ;;  %v9622_v37 = vor.u32 %v12853_v5, %v9621_v31  ;;  %v9626_v41 = vor.u32 %v12849_v32, %v9623_v33  ;;  %v12816_v31 = vld [vmem:[%s13973_s7 + $0x804] sm:$0xf]  ;;  %v9493_v32 = vld [vmem:[%s13973_s7 + $0x808] sm:$0xf] }
 0x242   : > { %6908 = vmatpush.bf16.xpose.msrb.mxu3 %v9354_v53  ;;  %v9722_v53 = vor.u32 %v12873_v45, %v9719_v46  ;;  %v9581_v46 = vld [vmem:[%s13973_s7 + $0x8c0] sm:$0xf]  ;;  %v9487_v5 = vld [vmem:[%s13973_s7 + $0x820] sm:$0xf0]  ;;  %v12821_v33 = vld [vmem:[%s13973_s7 + $0x824] sm:$0xf0] }
 0x248   : > { %6870 = vmatpush.bf16.xpose.msrb.mxu0 %v9310_v6  ;;  %6883 = vmatpush.bf16.xpose.msrb.mxu1 %v9314_v9  ;;  %v9687_v6 = vld [vmem:[%s13973_s7 + $0x9a8] sm:$0xf0]  ;;  %v9682_v9 = vor.u32 %v12864_v59, %v9679_v60 }
 0x249   : > { %6896 = vmatpush.bf16.xpose.msrb.mxu2 %v9318_v10  ;;  %v9686_v10 = vor.u32 %v12869_v63, %v9685_v62  ;;  %v9690_v12 = vor.u32 %v12865_v2, %v9687_v6  ;;  %v9591_v59 = vld [vmem:[%s13973_s7 + $0x8e8] sm:$0xf0] }
 0x24a   : > { %6909 = vmatpush.bf16.xpose.msrb.mxu3 %v9322_v13  ;;  %v12860_v13 = vld [vmem:[%s13973_s7 + $0x95c] sm:$0xf0]  ;;  %v9594_v2 = vor.u32 %v12841_v58, %v9591_v59  ;;  %v9693_v58 = vld [vmem:[%s13973_s7 + $0x990] sm:$0xf] }
 0x24b   : > { %v9646_v54 = vor.u32 %v12860_v13, %v9645_v50  ;;  %v12837_v50 = vld [vmem:[%s13973_s7 + $0x8a4] sm:$0xf0]  ;;  %v12833_v13 = vld [vmem:[%s13973_s7 + $0x88c] sm:$0xf]  ;;  %v12870_v59 = vld [vmem:[%s13973_s7 + $0x9ac] sm:$0xf0] }
 0x24c   : > { %v9558_v57 = vor.u32 %v12837_v50, %v9557_v49  ;;  %v9661_v49 = vld [vmem:[%s13973_s7 + $0x950] sm:$0xf] }
 0x24d   : > { %v12862_v50 = vld [vmem:[%s13973_s7 + $0x96c] sm:$0xf0] }
 0x250   : > { %6871 = vmatpush.bf16.xpose.msrb.mxu0 %v9278_v23  ;;  %6884 = vmatpush.bf16.xpose.msrb.mxu1 %v9282_v25  ;;  %v9658_v23 = vor.u32 %v12857_v20, %v9655_v22  ;;  %v9517_v20 = vld [vmem:[%s13973_s7 + $0x840] sm:$0xf] }
 0x251   : > { %6897 = vmatpush.bf16.xpose.msrb.mxu2 %v9286_v61  ;;  %v12828_v22 = vld [vmem:[%s13973_s7 + $0x85c] sm:$0xf0] }
 0x252   : > { %6910 = vmatpush.bf16.xpose.msrb.mxu3 %v9290_v26  ;;  %v9613_v26 = vld [vmem:[%s13973_s7 + $0x900] sm:$0xf] }
 0x253   : > { %v9614_v11 = vor.u32 %v12852_v27, %v9613_v26 }
 0x258   : > { %6872 = vmatpush.bf16.xpose.msrb.mxu0 %v9246_v40  ;;  %6885 = vmatpush.bf16.xpose.msrb.mxu1 %v9250_v43  ;;  %v327_v43 = vld [vmem:[#allocation2 + $0x58] sm:$0xff] }
 0x259   : > { %6898 = vmatpush.bf16.xpose.msrb.mxu2 %v9254_v44 }
 0x25a   : > { %6911 = vmatpush.bf16.xpose.msrb.mxu3 %v9258_v47  ;;  %v12844_v47 = vld [vmem:[%s13973_s7 + $0x8dc] sm:$0xf0] }
 0x25b   : > { %v9582_v60 = vor.u32 %v12844_v47, %v9581_v46  ;;  %v12875_v46 = vld [vmem:[%s13973_s7 + $0x9dc] sm:$0xf] }
 0x25c   : > { %v6770_v24 = vpop.f32.mrf.mxu0  ;;  %v6783_v61 = vpop.f32.mrf.mxu1  ;;  %v9735_v47 = vld [vmem:[%s13973_s7 + $0x9f8] sm:$0xf0] }
 0x25d   : > { %v6771_v25 = vadd.f32 %v6770_v24, %v6758_v19  ;;  %v9562_v19 = vor.u32 %v12833_v13, %v9559_v14  ;;  %v12825_v24 = vld [vmem:[%s13973_s7 + $0x84c] sm:$0xf]  ;;  %v12858_v13 = vld [vmem:[%s13973_s7 + $0x954] sm:$0xf] }
 0x25e   : > { %v9663_v14 = vld [vmem:[%s13973_s7 + $0x970] sm:$0xf0] }
 0x25f   : > { %6873 = vmatmul.bf16.vlgmr.msrb.gmra.mxu0 %v14145_v30  ;;  %6886 = vmatmul.bf16.vlgmr.msrb.gmra.mxu1 %v14155_v38  ;;  %v6784_v28 = vadd.f32 %v6783_v61, %v6771_v25  ;;  %v9527_v25 = vld [vmem:[%s13973_s7 + $0x868] sm:$0xf0]  ;;  %v9518_v61 = vor.u32 %v12828_v22, %v9517_v20  ;;  %v9662_v20 = vor.u32 %v12862_v50, %v9661_v49  ;;  %v12830_v49 = vld [vmem:[%s13973_s7 + $0x86c] sm:$0xf0]  ;;  %v12826_v50 = vld [vmem:[%s13973_s7 + $0x854] sm:$0xf] }
 0x260   : > { %6917 = vmatpush.bf16.xpose.msra.mxu0 %v9710_v48  ;;  %6930 = vmatpush.bf16.xpose.msra.mxu1 %v9714_v51  ;;  %v12840_v48 = vld [vmem:[%s13973_s7 + $0x8c4] sm:$0xf]  ;;  %v9530_v7 = vor.u32 %v12825_v24, %v9527_v25  ;;  %v9666_v22 = vor.u32 %v12858_v13, %v9663_v14  ;;  %v12850_v24 = vld [vmem:[%s13973_s7 + $0x914] sm:$0xf]  ;;  %v9541_v14 = vld [vmem:[%s13973_s7 + $0x858] sm:$0xf] }
 0x261   : > { %6943 = vmatpush.bf16.xpose.msra.mxu2 %v9718_v52  ;;  %6912 = vmatmul.bf16.vlgmr.msrb.gmra.mxu3 %v14157_v39  ;;  %v9583_v52 = vld [vmem:[%s13973_s7 + $0x8e0] sm:$0xf0]  ;;  %v9631_v25 = vld [vmem:[%s13973_s7 + $0x930] sm:$0xf0] }
 0x262   : > { %6956 = vmatpush.bf16.xpose.msra.mxu3 %v9722_v53  ;;  %6899 = vmatmul.bf16.vlgmr.msrb.gmra.mxu2 %v14150_v34  ;;  %v9589_v53 = vld [vmem:[%s13973_s7 + $0x8c8] sm:$0xf]  ;;  %v9586_v62 = vor.u32 %v12840_v48, %v9583_v52  ;;  %v9535_v13 = vld [vmem:[%s13973_s7 + $0x870] sm:$0xf0] }
 0x263   : > { %v9590_v63 = vor.u32 %v12845_v55, %v9589_v53  ;;  %v9738_v55 = vor.u32 %v12875_v46, %v9735_v47 }
 0x264   : > { %v6809_v42 = vpop.f32.mrf.mxu3  ;;  %v6772_v15 = vpop.f32.mrf.mxu0 }
 0x265   : > { %v6796_v35 = vpop.f32.mrf.mxu2  ;;  %v6785_v44 = vpop.f32.mrf.mxu1  ;;  %v9733_v15 = vld [vmem:[%s13973_s7 + $0x9d8] sm:$0xf] }
 0x266   : > { %v6797_v40 = vadd.f32 %v6796_v35, %v6784_v28  ;;  %v9485_v28 = vld [vmem:[%s13973_s7 + $0x800] sm:$0xf]  ;;  %v9495_v35 = vld [vmem:[%s13973_s7 + $0x828] sm:$0xf0]  ;;  %v9490_v44 = vor.u32 %v12816_v31, %v9487_v5 }
 0x268   : > { %6918 = vmatpush.bf16.xpose.msra.mxu0 %v9678_v8  ;;  %6931 = vmatpush.bf16.xpose.msra.mxu1 %v9682_v9  ;;  %v6810_v45 = vadd.f32 %v6809_v42, %v6797_v40  ;;  %v9549_v8 = vld [vmem:[%s13973_s7 + $0x880] sm:$0xf]  ;;  %v12874_v40 = vld [vmem:[%s13973_s7 + $0x9d4] sm:$0xf] }
 0x269   : > { %6944 = vmatpush.bf16.xpose.msra.mxu2 %v9686_v10  ;;  %v12836_v9 = vld [vmem:[%s13973_s7 + $0x89c] sm:$0xf0]  ;;  %v12832_v10 = vld [vmem:[%s13973_s7 + $0x884] sm:$0xf]  ;;  %v9727_v42 = vld [vmem:[%s13973_s7 + $0x9f0] sm:$0xf0] }
 0x26a   : > { %6957 = vmatpush.bf16.xpose.msra.mxu3 %v9690_v12  ;;  %v8167_v51 = vadd.f32 %v6810_v45, %v327_v43  ;;  %v9551_v12 = vld [vmem:[%s13973_s7 + $0x8a0] sm:$0xf0]  ;;  %v9550_v18 = vor.u32 %v12836_v9, %v9549_v8  ;;  %v12879_v43 = vld [vmem:[%s13973_s7 + $0x9f4] sm:$0xf0]  ;;  %v9494_v45 = vor.u32 %v12821_v33, %v9493_v32  ;;  %v9730_v52 = vor.u32 %v12874_v40, %v9727_v42  ;;  %v9597_v32 = vld [vmem:[%s13973_s7 + $0x8d0] sm:$0xf] }
 0x26b   : > { %v9554_v56 = vor.u32 %v12832_v10, %v9551_v12  ;;  %v9734_v53 = vor.u32 %v12879_v43, %v9733_v15  ;;  %v9694_v8 = vor.u32 %v12870_v59, %v9693_v58  ;;  %v12846_v33 = vld [vmem:[%s13973_s7 + $0x8ec] sm:$0xf0]  ;;  %v12843_v40 = vld [vmem:[%s13973_s7 + $0x8dc] sm:$0xf]  ;;  %v12839_v58 = vld [vmem:[%s13973_s7 + $0x8b4] sm:$0xf0] }
 0x26c   : > { %8183 = vst [vmem:[#allocation2 + $0x58] sm:$0xff] %v8167_v51  ;;  %v6811_v6 = vpop.f32.mrf.mxu3  ;;  %v9598_v42 = vor.u32 %v12846_v33, %v9597_v32  ;;  %v12835_v59 = vld [vmem:[%s13973_s7 + $0x89c] sm:$0xf]  ;;  %v9967_v32 = vld [vmem:[%s13973_s7 + $0xbe0] sm:$0xf0] }
 0x26d   : > { %v6798_v0 = vpop.f32.mrf.mxu2  ;;  %v9703_v6 = vld [vmem:[%s13973_s7 + $0x9b8] sm:$0xf0]  ;;  %v9973_v33 = vld [vmem:[%s13973_s7 + $0xbc8] sm:$0xf] }
 0x26e   : > { %v12871_v0 = vld [vmem:[%s13973_s7 + $0x9b4] sm:$0xf0] }
 0x270   : > { %6919 = vmatpush.bf16.xpose.msra.mxu0 %v9646_v54  ;;  %6932 = vmatpush.bf16.xpose.msra.mxu1 %v9650_v1  ;;  %v12824_v54 = vld [vmem:[%s13973_s7 + $0x844] sm:$0xf] }
 0x271   : > { %6945 = vmatpush.bf16.xpose.msra.mxu2 %v9654_v4  ;;  %v9519_v1 = vld [vmem:[%s13973_s7 + $0x860] sm:$0xf0]  ;;  %v9525_v4 = vld [vmem:[%s13973_s7 + $0x848] sm:$0xf] }
 0x272   : > { %6958 = vmatpush.bf16.xpose.msra.mxu3 %v9658_v23  ;;  %v12829_v23 = vld [vmem:[%s13973_s7 + $0x864] sm:$0xf0]  ;;  %v9522_v26 = vor.u32 %v12824_v54, %v9519_v1 }
 0x273   : > { %v9526_v27 = vor.u32 %v12829_v23, %v9525_v4  ;;  %v9629_v4 = vld [vmem:[%s13973_s7 + $0x910] sm:$0xf] }
 0x274   : > { %v12854_v23 = vld [vmem:[%s13973_s7 + $0x92c] sm:$0xf0] }
 0x278   : > { %6920 = vmatpush.bf16.xpose.msra.mxu0 %v9614_v11  ;;  %6933 = vmatpush.bf16.xpose.msra.mxu1 %v9618_v36  ;;  %v12817_v11 = vld [vmem:[%s13973_s7 + $0x80c] sm:$0xf]  ;;  %v9725_v36 = vld [vmem:[%s13973_s7 + $0x9d0] sm:$0xf] }
 0x279   : > { %6946 = vmatpush.bf16.xpose.msra.mxu2 %v9622_v37  ;;  %v12878_v37 = vld [vmem:[%s13973_s7 + $0x9ec] sm:$0xf0]  ;;  %v9498_v48 = vor.u32 %v12817_v11, %v9495_v35  ;;  %v12842_v11 = vld [vmem:[%s13973_s7 + $0x8d4] sm:$0xf] }
 0x27a   : > { %6959 = vmatpush.bf16.xpose.msra.mxu3 %v9626_v41  ;;  %v9486_v41 = vor.u32 %v12820_v29, %v9485_v28  ;;  %v9726_v51 = vor.u32 %v12878_v37, %v9725_v36  ;;  %v9630_v28 = vor.u32 %v12854_v23, %v9629_v4  ;;  %v9634_v29 = vor.u32 %v12850_v24, %v9631_v25  ;;  %v9599_v35 = vld [vmem:[%s13973_s7 + $0x8f0] sm:$0xf0]  ;;  %v9605_v36 = vld [vmem:[%s13973_s7 + $0x8d8] sm:$0xf]  ;;  %v9501_v4 = vld [vmem:[%s13973_s7 + $0x810] sm:$0xf] }
 0x27b   : > { %v12847_v37 = vld [vmem:[%s13973_s7 + $0x8f4] sm:$0xf0]  ;;  %v12822_v23 = vld [vmem:[%s13973_s7 + $0x82c] sm:$0xf0]  ;;  %v12818_v24 = vld [vmem:[%s13973_s7 + $0x814] sm:$0xf] }
 0x27c   : > { %v9503_v25 = vld [vmem:[%s13973_s7 + $0x830] sm:$0xf0] }
 0x280   : > { %6921 = vmatpush.bf16.xpose.msra.mxu0 %v9582_v60  ;;  %6934 = vmatpush.bf16.xpose.msra.mxu1 %v9586_v62  ;;  %v12866_v60 = vld [vmem:[%s13973_s7 + $0x994] sm:$0xf] }
 0x281   : > { %6947 = vmatpush.bf16.xpose.msra.mxu2 %v9590_v63  ;;  %v9695_v62 = vld [vmem:[%s13973_s7 + $0x9b0] sm:$0xf0]  ;;  %v9701_v63 = vld [vmem:[%s13973_s7 + $0x998] sm:$0xf] }
 0x282   : > { %6960 = vmatpush.bf16.xpose.msra.mxu3 %v9594_v2  ;;  %v12867_v2 = vld [vmem:[%s13973_s7 + $0x99c] sm:$0xf]  ;;  %v9698_v9 = vor.u32 %v12866_v60, %v9695_v62  ;;  %v9702_v10 = vor.u32 %v12871_v0, %v9701_v63 }
 0x283   : > { %v9706_v12 = vor.u32 %v12867_v2, %v9703_v6  ;;  %v9575_v60 = vld [vmem:[%s13973_s7 + $0x8b8] sm:$0xf0] }
 0x288   : > { %6922 = vmatpush.bf16.xpose.msra.mxu0 %v9550_v18  ;;  %6935 = vmatpush.bf16.xpose.msra.mxu1 %v9554_v56  ;;  %v9669_v18 = vld [vmem:[%s13973_s7 + $0x958] sm:$0xf] }
 0x289   : > { %6948 = vmatpush.bf16.xpose.msra.mxu2 %v9558_v57  ;;  %v12863_v56 = vld [vmem:[%s13973_s7 + $0x974] sm:$0xf0]  ;;  %v12859_v57 = vld [vmem:[%s13973_s7 + $0x95c] sm:$0xf] }
 0x28a   : > { %6961 = vmatpush.bf16.xpose.msra.mxu3 %v9562_v19  ;;  %v9671_v19 = vld [vmem:[%s13973_s7 + $0x978] sm:$0xf0]  ;;  %v9670_v54 = vor.u32 %v12863_v56, %v9669_v18  ;;  %v12831_v18 = vld [vmem:[%s13973_s7 + $0x874] sm:$0xf0] }
 0x28b   : > { %v9674_v1 = vor.u32 %v12859_v57, %v9671_v19  ;;  %v12827_v56 = vld [vmem:[%s13973_s7 + $0x85c] sm:$0xf] }
 0x28c   : > { %v9543_v57 = vld [vmem:[%s13973_s7 + $0x878] sm:$0xf0] }
 0x290   : > { %6923 = vmatpush.bf16.xpose.msra.mxu0 %v9518_v61  ;;  %6936 = vmatpush.bf16.xpose.msra.mxu1 %v9522_v26  ;;  %v9637_v61 = vld [vmem:[%s13973_s7 + $0x918] sm:$0xf] }
 0x291   : > { %6949 = vmatpush.bf16.xpose.msra.mxu2 %v9526_v27  ;;  %v12855_v26 = vld [vmem:[%s13973_s7 + $0x934] sm:$0xf0]  ;;  %v12851_v27 = vld [vmem:[%s13973_s7 + $0x91c] sm:$0xf] }
 0x292   : > { %6962 = vmatpush.bf16.xpose.msra.mxu3 %v9530_v7  ;;  %v9639_v7 = vld [vmem:[%s13973_s7 + $0x938] sm:$0xf0]  ;;  %v9638_v31 = vor.u32 %v12855_v26, %v9637_v61  ;;  %v9509_v61 = vld [vmem:[%s13973_s7 + $0x818] sm:$0xf] }
 0x293   : > { %v9642_v5 = vor.u32 %v12851_v27, %v9639_v7  ;;  %v12823_v26 = vld [vmem:[%s13973_s7 + $0x834] sm:$0xf0]  ;;  %v12819_v27 = vld [vmem:[%s13973_s7 + $0x81c] sm:$0xf] }
 0x294   : > { %v9511_v7 = vld [vmem:[%s13973_s7 + $0x838] sm:$0xf0] }
 0x298   : > { %6924 = vmatpush.bf16.xpose.msra.mxu0 %v9486_v41  ;;  %6937 = vmatpush.bf16.xpose.msra.mxu1 %v9490_v44  ;;  %v9607_v41 = vld [vmem:[%s13973_s7 + $0x8f8] sm:$0xf0]  ;;  %v9602_v44 = vor.u32 %v12842_v11, %v9599_v35  ;;  %v12941_v11 = vld [vmem:[%s13973_s7 + $0xbe4] sm:$0xf0]  ;;  %v9506_v35 = vor.u32 %v12818_v24, %v9503_v25  ;;  %v9871_v24 = vld [vmem:[%s13973_s7 + $0xb20] sm:$0xf0] }
 0x299   : > { %6950 = vmatpush.bf16.xpose.msra.mxu2 %v9494_v45  ;;  %v9606_v45 = vor.u32 %v12847_v37, %v9605_v36  ;;  %v9610_v46 = vor.u32 %v12843_v40, %v9607_v41  ;;  %v9510_v36 = vor.u32 %v12823_v26, %v9509_v61  ;;  %v12937_v37 = vld [vmem:[%s13973_s7 + $0xbcc] sm:$0xf]  ;;  %v9514_v41 = vor.u32 %v12819_v27, %v9511_v7  ;;  %v9877_v25 = vld [vmem:[%s13973_s7 + $0xb08] sm:$0xf] }
 0x29a   : > { %6963 = vmatpush.bf16.xpose.msra.mxu3 %v9498_v48  ;;  %v9565_v48 = vld [vmem:[%s13973_s7 + $0x890] sm:$0xf]  ;;  %v9975_v40 = vld [vmem:[%s13973_s7 + $0xbe8] sm:$0xf0]  ;;  %v12917_v61 = vld [vmem:[%s13973_s7 + $0xb24] sm:$0xf0] }
 0x29b   : > { %v12913_v26 = vld [vmem:[%s13973_s7 + $0xb0c] sm:$0xf] }
 0x29c   : > { %v14701_v15 = vpop.f32.mrf.mxu0  ;;  %v14703_v43 = vpop.f32.mrf.mxu1  ;;  %v9879_v27 = vld [vmem:[%s13973_s7 + $0xb28] sm:$0xf0] }
 0x29f   : > { %6925 = vmatmul.bf16.vlgmr.msra.gmra.mxu0 %v14089_v16  ;;  %6938 = vmatmul.bf16.vlgmr.msra.gmra.mxu1 %v14096_v21 }
 0x2a0   : > { %6969 = vmatpush.bf16.xpose.msrb.mxu0 %v9726_v51  ;;  %6982 = vmatpush.bf16.xpose.msrb.mxu1 %v9730_v52  ;;  %v12838_v51 = vld [vmem:[%s13973_s7 + $0x8ac] sm:$0xf0]  ;;  %v12834_v52 = vld [vmem:[%s13973_s7 + $0x894] sm:$0xf] }
 0x2a1   : > { %6995 = vmatpush.bf16.xpose.msrb.mxu2 %v9734_v53  ;;  %6964 = vmatmul.bf16.vlgmr.msra.gmra.mxu3 %v14091_v17  ;;  %v9567_v53 = vld [vmem:[%s13973_s7 + $0x8b0] sm:$0xf0]  ;;  %v9566_v62 = vor.u32 %v12838_v51, %v9565_v48  ;;  %v9933_v48 = vld [vmem:[%s13973_s7 + $0xb80] sm:$0xf] }
 0x2a2   : > { %7008 = vmatpush.bf16.xpose.msrb.mxu3 %v9738_v55  ;;  %6951 = vmatmul.bf16.vlgmr.msra.gmra.mxu2 %v14078_v3  ;;  %v9573_v55 = vld [vmem:[%s13973_s7 + $0x898] sm:$0xf]  ;;  %v9570_v2 = vor.u32 %v12834_v52, %v9567_v53  ;;  %v12932_v51 = vld [vmem:[%s13973_s7 + $0xb9c] sm:$0xf0]  ;;  %v12928_v52 = vld [vmem:[%s13973_s7 + $0xb84] sm:$0xf] }
 0x2a3   : > { %v9574_v6 = vor.u32 %v12839_v58, %v9573_v55  ;;  %v9935_v53 = vld [vmem:[%s13973_s7 + $0xba0] sm:$0xf0]  ;;  %v9941_v55 = vld [vmem:[%s13973_s7 + $0xb88] sm:$0xf] }
 0x2a4   : > { %v14715_v63 = vpop.f32.mrf.mxu3  ;;  %v6824_v0 = vpop.f32.mrf.mxu0  ;;  %v12933_v58 = vld [vmem:[%s13973_s7 + $0xba4] sm:$0xf0] }
 0x2a5   : > { %v14705_v47 = vpop.f32.mrf.mxu2  ;;  %v9934_v0 = vor.u32 %v12932_v51, %v9933_v48  ;;  %v12909_v48 = vld [vmem:[%s13973_s7 + $0xae4] sm:$0xf0]  ;;  %v12905_v51 = vld [vmem:[%s13973_s7 + $0xacc] sm:$0xf] }
 0x2a8   : > { %6970 = vmatpush.bf16.xpose.msrb.mxu0 %v9694_v8  ;;  %6983 = vmatpush.bf16.xpose.msrb.mxu1 %v9698_v9  ;;  %v6837_v8 = vpop.f32.mrf.mxu1  ;;  %v9578_v9 = vor.u32 %v12835_v59, %v9575_v60  ;;  %v6836_v59 = vadd.f32 %v14703_v43, %v14701_v15  ;;  %v12929_v60 = vld [vmem:[%s13973_s7 + $0xb8c] sm:$0xf]  ;;  %v9901_v43 = vld [vmem:[%s13973_s7 + $0xb40] sm:$0xf] }
 0x2a9   : > { %6996 = vmatpush.bf16.xpose.msrb.mxu2 %v9702_v10 }
 0x2aa   : > { %7009 = vmatpush.bf16.xpose.msrb.mxu3 %v9706_v12  ;;  %v9533_v12 = vld [vmem:[%s13973_s7 + $0x850] sm:$0xf]  ;;  %v6849_v15 = vadd.f32 %v14705_v47, %v6836_v59 }
 0x2ab   : > { %v9534_v19 = vor.u32 %v12830_v49, %v9533_v12  ;;  %v9903_v12 = vld [vmem:[%s13973_s7 + $0xb60] sm:$0xf0]  ;;  %v9909_v49 = vld [vmem:[%s13973_s7 + $0xb48] sm:$0xf] }
 0x2ad   : > { %v6850_v10 = vpop.f32.mrf.mxu2 }
 0x2ae   : > { %v12920_v10 = vld [vmem:[%s13973_s7 + $0xb44] sm:$0xf] }
 0x2b0   : > { %6971 = vmatpush.bf16.xpose.msrb.mxu0 %v9662_v20  ;;  %6984 = vmatpush.bf16.xpose.msrb.mxu1 %v9666_v22  ;;  %v6863_v20 = vpop.f32.mrf.mxu3  ;;  %v9538_v22 = vor.u32 %v12826_v50, %v9535_v13  ;;  %v12925_v50 = vld [vmem:[%s13973_s7 + $0xb64] sm:$0xf0]  ;;  %v6862_v13 = vadd.f32 %v14715_v63, %v6849_v15  ;;  %v12912_v63 = vld [vmem:[%s13973_s7 + $0xb04] sm:$0xf] }
 0x2b1   : > { %6997 = vmatpush.bf16.xpose.msrb.mxu2 %v9670_v54  ;;  %v9542_v54 = vor.u32 %v12831_v18, %v9541_v14  ;;  %v12921_v14 = vld [vmem:[%s13973_s7 + $0xb4c] sm:$0xf]  ;;  %v9813_v15 = vld [vmem:[%s13973_s7 + $0xa88] sm:$0xf] }
 0x2b2   : > { %7010 = vmatpush.bf16.xpose.msrb.mxu3 %v9674_v1  ;;  %v9546_v1 = vor.u32 %v12827_v56, %v9543_v57  ;;  %v9911_v18 = vld [vmem:[%s13973_s7 + $0xb68] sm:$0xf0]  ;;  %v9906_v56 = vor.u32 %v12920_v10, %v9903_v12  ;;  %v9910_v57 = vor.u32 %v12925_v50, %v9909_v49 }
 0x2b3   : > { %v9815_v10 = vld [vmem:[%s13973_s7 + $0xaa8] sm:$0xf0] }
 0x2b8   : > { %6972 = vmatpush.bf16.xpose.msrb.mxu0 %v9630_v28  ;;  %6985 = vmatpush.bf16.xpose.msrb.mxu1 %v9634_v29  ;;  %v9965_v28 = vld [vmem:[%s13973_s7 + $0xbc0] sm:$0xf] }
 0x2b9   : > { %6998 = vmatpush.bf16.xpose.msrb.mxu2 %v9638_v31  ;;  %v12940_v29 = vld [vmem:[%s13973_s7 + $0xbdc] sm:$0xf0]  ;;  %v12936_v31 = vld [vmem:[%s13973_s7 + $0xbc4] sm:$0xf] }
 0x2ba   : > { %7011 = vmatpush.bf16.xpose.msrb.mxu3 %v9642_v5  ;;  %v9502_v5 = vor.u32 %v12822_v23, %v9501_v4  ;;  %v12916_v4 = vld [vmem:[%s13973_s7 + $0xb1c] sm:$0xf0] }
 0x2c0   : > { %6973 = vmatpush.bf16.xpose.msrb.mxu0 %v9598_v42  ;;  %6986 = vmatpush.bf16.xpose.msrb.mxu1 %v9602_v44  ;;  %v9966_v42 = vor.u32 %v12940_v29, %v9965_v28  ;;  %v9970_v44 = vor.u32 %v12936_v31, %v9967_v32  ;;  %v9874_v29 = vor.u32 %v12912_v63, %v9871_v24  ;;  %v12884_v24 = vld [vmem:[%s13973_s7 + $0xa1c] sm:$0xf0] }
 0x2c1   : > { %6999 = vmatpush.bf16.xpose.msrb.mxu2 %v9606_v45  ;;  %v9974_v45 = vor.u32 %v12941_v11, %v9973_v33  ;;  %v9878_v31 = vor.u32 %v12917_v61, %v9877_v25  ;;  %v9882_v32 = vor.u32 %v12913_v26, %v9879_v27  ;;  %v12880_v25 = vld [vmem:[%s13973_s7 + $0xa04] sm:$0xf]  ;;  %v9749_v26 = vld [vmem:[%s13973_s7 + $0xa08] sm:$0xf] }
 0x2c2   : > { %7012 = vmatpush.bf16.xpose.msrb.mxu3 %v9610_v46  ;;  %v9978_v46 = vor.u32 %v12937_v37, %v9975_v40  ;;  %v9837_v40 = vld [vmem:[%s13973_s7 + $0xac0] sm:$0xf]  ;;  %v9743_v61 = vld [vmem:[%s13973_s7 + $0xa20] sm:$0xf0]  ;;  %v12885_v27 = vld [vmem:[%s13973_s7 + $0xa24] sm:$0xf0] }
 0x2c8   : > { %6974 = vmatpush.bf16.xpose.msrb.mxu0 %v9566_v62  ;;  %6987 = vmatpush.bf16.xpose.msrb.mxu1 %v9570_v2  ;;  %v9943_v62 = vld [vmem:[%s13973_s7 + $0xba8] sm:$0xf0]  ;;  %v9938_v2 = vor.u32 %v12928_v52, %v9935_v53 }
 0x2c9   : > { %7000 = vmatpush.bf16.xpose.msrb.mxu2 %v9574_v6  ;;  %v9942_v6 = vor.u32 %v12933_v58, %v9941_v55  ;;  %v9946_v8 = vor.u32 %v12929_v60, %v9943_v62  ;;  %v9847_v52 = vld [vmem:[%s13973_s7 + $0xae8] sm:$0xf0] }
 0x2ca   : > { %7013 = vmatpush.bf16.xpose.msrb.mxu3 %v9578_v9  ;;  %v12924_v9 = vld [vmem:[%s13973_s7 + $0xb5c] sm:$0xf0]  ;;  %v9850_v60 = vor.u32 %v12905_v51, %v9847_v52  ;;  %v9949_v51 = vld [vmem:[%s13973_s7 + $0xb90] sm:$0xf] }
 0x2cb   : > { %v9902_v47 = vor.u32 %v12924_v9, %v9901_v43  ;;  %v12901_v43 = vld [vmem:[%s13973_s7 + $0xaa4] sm:$0xf0]  ;;  %v12897_v9 = vld [vmem:[%s13973_s7 + $0xa8c] sm:$0xf]  ;;  %v12934_v52 = vld [vmem:[%s13973_s7 + $0xbac] sm:$0xf0] }
 0x2cc   : > { %v9814_v50 = vor.u32 %v12901_v43, %v9813_v15  ;;  %v9917_v15 = vld [vmem:[%s13973_s7 + $0xb50] sm:$0xf] }
 0x2cd   : > { %v12926_v43 = vld [vmem:[%s13973_s7 + $0xb6c] sm:$0xf0] }
 0x2d0   : > { %6975 = vmatpush.bf16.xpose.msrb.mxu0 %v9534_v19  ;;  %6988 = vmatpush.bf16.xpose.msrb.mxu1 %v9538_v22  ;;  %v9914_v19 = vor.u32 %v12921_v14, %v9911_v18  ;;  %v9773_v14 = vld [vmem:[%s13973_s7 + $0xa40] sm:$0xf] }
 0x2d1   : > { %7001 = vmatpush.bf16.xpose.msrb.mxu2 %v9542_v54  ;;  %v12892_v18 = vld [vmem:[%s13973_s7 + $0xa5c] sm:$0xf0] }
 0x2d2   : > { %7014 = vmatpush.bf16.xpose.msrb.mxu3 %v9546_v1  ;;  %v9869_v1 = vld [vmem:[%s13973_s7 + $0xb00] sm:$0xf] }
 0x2d3   : > { %v9870_v7 = vor.u32 %v12916_v4, %v9869_v1 }
 0x2d8   : > { %6976 = vmatpush.bf16.xpose.msrb.mxu0 %v9502_v5  ;;  %6989 = vmatpush.bf16.xpose.msrb.mxu1 %v9506_v35  ;;  %v328_v35 = vld [vmem:[#allocation2 + $0x18] sm:$0xff] }
 0x2d9   : > { %7002 = vmatpush.bf16.xpose.msrb.mxu2 %v9510_v36 }
 0x2da   : > { %7015 = vmatpush.bf16.xpose.msrb.mxu3 %v9514_v41  ;;  %v12908_v41 = vld [vmem:[%s13973_s7 + $0xadc] sm:$0xf0] }
 0x2db   : > { %v9838_v53 = vor.u32 %v12908_v41, %v9837_v40  ;;  %v12939_v40 = vld [vmem:[%s13973_s7 + $0xbdc] sm:$0xf] }
 0x2dc   : > { %v6874_v20 = vpop.f32.mrf.mxu0  ;;  %v6887_v54 = vpop.f32.mrf.mxu1  ;;  %v9991_v41 = vld [vmem:[%s13973_s7 + $0xbf8] sm:$0xf0] }
 0x2dd   : > { %v6875_v22 = vadd.f32 %v6874_v20, %v6862_v13  ;;  %v9818_v13 = vor.u32 %v12897_v9, %v9815_v10  ;;  %v12889_v20 = vld [vmem:[%s13973_s7 + $0xa4c] sm:$0xf]  ;;  %v12922_v9 = vld [vmem:[%s13973_s7 + $0xb54] sm:$0xf] }
 0x2de   : > { %v9919_v10 = vld [vmem:[%s13973_s7 + $0xb70] sm:$0xf0] }
 0x2df   : > { %6977 = vmatmul.bf16.vlgmr.msrb.gmra.mxu0 %v14145_v30  ;;  %6990 = vmatmul.bf16.vlgmr.msrb.gmra.mxu1 %v14155_v38  ;;  %v6888_v23 = vadd.f32 %v6887_v54, %v6875_v22  ;;  %v9783_v22 = vld [vmem:[%s13973_s7 + $0xa68] sm:$0xf0]  ;;  %v9774_v54 = vor.u32 %v12892_v18, %v9773_v14  ;;  %v9918_v14 = vor.u32 %v12926_v43, %v9917_v15  ;;  %v12894_v15 = vld [vmem:[%s13973_s7 + $0xa6c] sm:$0xf0]  ;;  %v12890_v43 = vld [vmem:[%s13973_s7 + $0xa54] sm:$0xf] }
 0x2e0   : > { %7021 = vmatpush.bf16.xpose.msra.mxu0 %v9966_v42  ;;  %7034 = vmatpush.bf16.xpose.msra.mxu1 %v9970_v44  ;;  %v12904_v42 = vld [vmem:[%s13973_s7 + $0xac4] sm:$0xf]  ;;  %v9786_v63 = vor.u32 %v12889_v20, %v9783_v22  ;;  %v9922_v18 = vor.u32 %v12922_v9, %v9919_v10  ;;  %v12914_v20 = vld [vmem:[%s13973_s7 + $0xb14] sm:$0xf]  ;;  %v9797_v10 = vld [vmem:[%s13973_s7 + $0xa58] sm:$0xf] }
 0x2e1   : > { %7047 = vmatpush.bf16.xpose.msra.mxu2 %v9974_v45  ;;  %7016 = vmatmul.bf16.vlgmr.msrb.gmra.mxu3 %v14157_v39  ;;  %v9839_v45 = vld [vmem:[%s13973_s7 + $0xae0] sm:$0xf0]  ;;  %v9887_v22 = vld [vmem:[%s13973_s7 + $0xb30] sm:$0xf0] }
 0x2e2   : > { %7060 = vmatpush.bf16.xpose.msra.mxu3 %v9978_v46  ;;  %7003 = vmatmul.bf16.vlgmr.msrb.gmra.mxu2 %v14150_v34  ;;  %v9845_v46 = vld [vmem:[%s13973_s7 + $0xac8] sm:$0xf]  ;;  %v9842_v55 = vor.u32 %v12904_v42, %v9839_v45  ;;  %v9791_v9 = vld [vmem:[%s13973_s7 + $0xa70] sm:$0xf0] }
 0x2e3   : > { %v9846_v58 = vor.u32 %v12909_v48, %v9845_v46  ;;  %v9994_v48 = vor.u32 %v12939_v40, %v9991_v41 }
 0x2e4   : > { %v6913_v33 = vpop.f32.mrf.mxu3  ;;  %v6876_v11 = vpop.f32.mrf.mxu0 }
 0x2e5   : > { %v6900_v28 = vpop.f32.mrf.mxu2  ;;  %v6889_v36 = vpop.f32.mrf.mxu1  ;;  %v9989_v11 = vld [vmem:[%s13973_s7 + $0xbd8] sm:$0xf] }
 0x2e6   : > { %v6901_v5 = vadd.f32 %v6900_v28, %v6888_v23  ;;  %v9741_v23 = vld [vmem:[%s13973_s7 + $0xa00] sm:$0xf]  ;;  %v9751_v28 = vld [vmem:[%s13973_s7 + $0xa28] sm:$0xf0]  ;;  %v9746_v36 = vor.u32 %v12880_v25, %v9743_v61 }
 0x2e8   : > { %7022 = vmatpush.bf16.xpose.msra.mxu0 %v9934_v0  ;;  %7035 = vmatpush.bf16.xpose.msra.mxu1 %v9938_v2  ;;  %v6914_v37 = vadd.f32 %v6913_v33, %v6901_v5  ;;  %v9805_v0 = vld [vmem:[%s13973_s7 + $0xa80] sm:$0xf]  ;;  %v12938_v5 = vld [vmem:[%s13973_s7 + $0xbd4] sm:$0xf] }
 0x2e9   : > { %7048 = vmatpush.bf16.xpose.msra.mxu2 %v9942_v6  ;;  %v12900_v2 = vld [vmem:[%s13973_s7 + $0xa9c] sm:$0xf0]  ;;  %v12896_v6 = vld [vmem:[%s13973_s7 + $0xa84] sm:$0xf]  ;;  %v9983_v33 = vld [vmem:[%s13973_s7 + $0xbf0] sm:$0xf0] }
 0x2ea   : > { %7061 = vmatpush.bf16.xpose.msra.mxu3 %v9946_v8  ;;  %v8168_v44 = vadd.f32 %v6914_v37, %v328_v35  ;;  %v9807_v8 = vld [vmem:[%s13973_s7 + $0xaa0] sm:$0xf0]  ;;  %v9806_v12 = vor.u32 %v12900_v2, %v9805_v0  ;;  %v12943_v35 = vld [vmem:[%s13973_s7 + $0xbf4] sm:$0xf0]  ;;  %v9750_v37 = vor.u32 %v12885_v27, %v9749_v26  ;;  %v9986_v45 = vor.u32 %v12938_v5, %v9983_v33  ;;  %v9853_v26 = vld [vmem:[%s13973_s7 + $0xad0] sm:$0xf] }
 0x2eb   : > { %v9810_v49 = vor.u32 %v12896_v6, %v9807_v8  ;;  %v9990_v46 = vor.u32 %v12943_v35, %v9989_v11  ;;  %v9950_v0 = vor.u32 %v12934_v52, %v9949_v51  ;;  %v12910_v27 = vld [vmem:[%s13973_s7 + $0xaec] sm:$0xf0]  ;;  %v12907_v5 = vld [vmem:[%s13973_s7 + $0xadc] sm:$0xf]  ;;  %v12903_v51 = vld [vmem:[%s13973_s7 + $0xab4] sm:$0xf0] }
 0x2ec   : > { %8184 = vst [vmem:[#allocation2 + $0x18] sm:$0xff] %v8168_v44  ;;  %v6915_v62 = vpop.f32.mrf.mxu3  ;;  %v9854_v33 = vor.u32 %v12910_v27, %v9853_v26  ;;  %v12899_v52 = vld [vmem:[%s13973_s7 + $0xa9c] sm:$0xf]  ;;  %v10223_v26 = vld [vmem:[%s13973_s7 + $0xde0] sm:$0xf0] }
 0x2ed   : > { %v6902_v59 = vpop.f32.mrf.mxu2  ;;  %v9959_v62 = vld [vmem:[%s13973_s7 + $0xbb8] sm:$0xf0]  ;;  %v10229_v27 = vld [vmem:[%s13973_s7 + $0xdc8] sm:$0xf] }
 0x2ee   : > { %v12935_v59 = vld [vmem:[%s13973_s7 + $0xbb4] sm:$0xf0] }
 0x2f0   : > { %7023 = vmatpush.bf16.xpose.msra.mxu0 %v9902_v47  ;;  %7036 = vmatpush.bf16.xpose.msra.mxu1 %v9906_v56  ;;  %v12888_v47 = vld [vmem:[%s13973_s7 + $0xa44] sm:$0xf] }
 0x2f1   : > { %7049 = vmatpush.bf16.xpose.msra.mxu2 %v9910_v57  ;;  %v9775_v56 = vld [vmem:[%s13973_s7 + $0xa60] sm:$0xf0]  ;;  %v9781_v57 = vld [vmem:[%s13973_s7 + $0xa48] sm:$0xf] }
 0x2f2   : > { %7062 = vmatpush.bf16.xpose.msra.mxu3 %v9914_v19  ;;  %v12893_v19 = vld [vmem:[%s13973_s7 + $0xa64] sm:$0xf0]  ;;  %v9778_v1 = vor.u32 %v12888_v47, %v9775_v56 }
 0x2f3   : > { %v9782_v4 = vor.u32 %v12893_v19, %v9781_v57  ;;  %v9885_v57 = vld [vmem:[%s13973_s7 + $0xb10] sm:$0xf] }
 0x2f4   : > { %v12918_v19 = vld [vmem:[%s13973_s7 + $0xb2c] sm:$0xf0] }
 0x2f8   : > { %7024 = vmatpush.bf16.xpose.msra.mxu0 %v9870_v7  ;;  %7037 = vmatpush.bf16.xpose.msra.mxu1 %v9874_v29  ;;  %v12881_v7 = vld [vmem:[%s13973_s7 + $0xa0c] sm:$0xf]  ;;  %v9981_v29 = vld [vmem:[%s13973_s7 + $0xbd0] sm:$0xf] }
 0x2f9   : > { %7050 = vmatpush.bf16.xpose.msra.mxu2 %v9878_v31  ;;  %v12942_v31 = vld [vmem:[%s13973_s7 + $0xbec] sm:$0xf0]  ;;  %v9754_v42 = vor.u32 %v12881_v7, %v9751_v28  ;;  %v12906_v7 = vld [vmem:[%s13973_s7 + $0xad4] sm:$0xf] }
 0x2fa   : > { %7063 = vmatpush.bf16.xpose.msra.mxu3 %v9882_v32  ;;  %v9742_v32 = vor.u32 %v12884_v24, %v9741_v23  ;;  %v9982_v44 = vor.u32 %v12942_v31, %v9981_v29  ;;  %v9886_v23 = vor.u32 %v12918_v19, %v9885_v57  ;;  %v9890_v24 = vor.u32 %v12914_v20, %v9887_v22  ;;  %v9855_v28 = vld [vmem:[%s13973_s7 + $0xaf0] sm:$0xf0]  ;;  %v9861_v29 = vld [vmem:[%s13973_s7 + $0xad8] sm:$0xf]  ;;  %v9757_v57 = vld [vmem:[%s13973_s7 + $0xa10] sm:$0xf] }
 0x2fb   : > { %v12911_v31 = vld [vmem:[%s13973_s7 + $0xaf4] sm:$0xf0]  ;;  %v12886_v19 = vld [vmem:[%s13973_s7 + $0xa2c] sm:$0xf0]  ;;  %v12882_v20 = vld [vmem:[%s13973_s7 + $0xa14] sm:$0xf] }
 0x2fc   : > { %v9759_v22 = vld [vmem:[%s13973_s7 + $0xa30] sm:$0xf0] }
 0x300   : > { %7025 = vmatpush.bf16.xpose.msra.mxu0 %v9838_v53  ;;  %7038 = vmatpush.bf16.xpose.msra.mxu1 %v9842_v55  ;;  %v12930_v53 = vld [vmem:[%s13973_s7 + $0xb94] sm:$0xf] }
 0x301   : > { %7051 = vmatpush.bf16.xpose.msra.mxu2 %v9846_v58  ;;  %v9951_v55 = vld [vmem:[%s13973_s7 + $0xbb0] sm:$0xf0]  ;;  %v9957_v58 = vld [vmem:[%s13973_s7 + $0xb98] sm:$0xf] }
 0x302   : > { %7064 = vmatpush.bf16.xpose.msra.mxu3 %v9850_v60  ;;  %v12931_v60 = vld [vmem:[%s13973_s7 + $0xb9c] sm:$0xf]  ;;  %v9954_v2 = vor.u32 %v12930_v53, %v9951_v55  ;;  %v9958_v6 = vor.u32 %v12935_v59, %v9957_v58 }
 0x303   : > { %v9962_v8 = vor.u32 %v12931_v60, %v9959_v62  ;;  %v9831_v53 = vld [vmem:[%s13973_s7 + $0xab8] sm:$0xf0] }
 0x308   : > { %7026 = vmatpush.bf16.xpose.msra.mxu0 %v9806_v12  ;;  %7039 = vmatpush.bf16.xpose.msra.mxu1 %v9810_v49  ;;  %v9925_v12 = vld [vmem:[%s13973_s7 + $0xb58] sm:$0xf] }
 0x309   : > { %7052 = vmatpush.bf16.xpose.msra.mxu2 %v9814_v50  ;;  %v12927_v49 = vld [vmem:[%s13973_s7 + $0xb74] sm:$0xf0]  ;;  %v12923_v50 = vld [vmem:[%s13973_s7 + $0xb5c] sm:$0xf] }
 0x30a   : > { %7065 = vmatpush.bf16.xpose.msra.mxu3 %v9818_v13  ;;  %v9927_v13 = vld [vmem:[%s13973_s7 + $0xb78] sm:$0xf0]  ;;  %v9926_v47 = vor.u32 %v12927_v49, %v9925_v12  ;;  %v12895_v12 = vld [vmem:[%s13973_s7 + $0xa74] sm:$0xf0] }
 0x30b   : > { %v9930_v56 = vor.u32 %v12923_v50, %v9927_v13  ;;  %v12891_v49 = vld [vmem:[%s13973_s7 + $0xa5c] sm:$0xf] }
 0x30c   : > { %v9799_v50 = vld [vmem:[%s13973_s7 + $0xa78] sm:$0xf0] }
 0x310   : > { %7027 = vmatpush.bf16.xpose.msra.mxu0 %v9774_v54  ;;  %7040 = vmatpush.bf16.xpose.msra.mxu1 %v9778_v1  ;;  %v9893_v54 = vld [vmem:[%s13973_s7 + $0xb18] sm:$0xf] }
 0x311   : > { %7053 = vmatpush.bf16.xpose.msra.mxu2 %v9782_v4  ;;  %v12919_v1 = vld [vmem:[%s13973_s7 + $0xb34] sm:$0xf0]  ;;  %v12915_v4 = vld [vmem:[%s13973_s7 + $0xb1c] sm:$0xf] }
 0x312   : > { %7066 = vmatpush.bf16.xpose.msra.mxu3 %v9786_v63  ;;  %v9895_v63 = vld [vmem:[%s13973_s7 + $0xb38] sm:$0xf0]  ;;  %v9894_v25 = vor.u32 %v12919_v1, %v9893_v54  ;;  %v9765_v54 = vld [vmem:[%s13973_s7 + $0xa18] sm:$0xf] }
 0x313   : > { %v9898_v61 = vor.u32 %v12915_v4, %v9895_v63  ;;  %v12887_v1 = vld [vmem:[%s13973_s7 + $0xa34] sm:$0xf0]  ;;  %v12883_v4 = vld [vmem:[%s13973_s7 + $0xa1c] sm:$0xf] }
 0x314   : > { %v9767_v63 = vld [vmem:[%s13973_s7 + $0xa38] sm:$0xf0] }
 0x318   : > { %7028 = vmatpush.bf16.xpose.msra.mxu0 %v9742_v32  ;;  %7041 = vmatpush.bf16.xpose.msra.mxu1 %v9746_v36  ;;  %v9863_v32 = vld [vmem:[%s13973_s7 + $0xaf8] sm:$0xf0]  ;;  %v9858_v36 = vor.u32 %v12906_v7, %v9855_v28  ;;  %v13005_v7 = vld [vmem:[%s13973_s7 + $0xde4] sm:$0xf0]  ;;  %v9762_v28 = vor.u32 %v12882_v20, %v9759_v22  ;;  %v10127_v20 = vld [vmem:[%s13973_s7 + $0xd20] sm:$0xf0] }
 0x319   : > { %7054 = vmatpush.bf16.xpose.msra.mxu2 %v9750_v37  ;;  %v9862_v37 = vor.u32 %v12911_v31, %v9861_v29  ;;  %v9866_v40 = vor.u32 %v12907_v5, %v9863_v32  ;;  %v9766_v29 = vor.u32 %v12887_v1, %v9765_v54  ;;  %v13001_v31 = vld [vmem:[%s13973_s7 + $0xdcc] sm:$0xf]  ;;  %v9770_v32 = vor.u32 %v12883_v4, %v9767_v63  ;;  %v10133_v22 = vld [vmem:[%s13973_s7 + $0xd08] sm:$0xf] }
 0x31a   : > { %7067 = vmatpush.bf16.xpose.msra.mxu3 %v9754_v42  ;;  %v9821_v42 = vld [vmem:[%s13973_s7 + $0xa90] sm:$0xf]  ;;  %v10231_v5 = vld [vmem:[%s13973_s7 + $0xde8] sm:$0xf0]  ;;  %v12981_v54 = vld [vmem:[%s13973_s7 + $0xd24] sm:$0xf0] }
 0x31b   : > { %v12977_v1 = vld [vmem:[%s13973_s7 + $0xd0c] sm:$0xf] }
 0x31c   : > { %v14849_v11 = vpop.f32.mrf.mxu0  ;;  %v14851_v35 = vpop.f32.mrf.mxu1  ;;  %v10135_v4 = vld [vmem:[%s13973_s7 + $0xd28] sm:$0xf0] }
 0x31f   : > { %7029 = vmatmul.bf16.vlgmr.msra.gmra.mxu0 %v14089_v16  ;;  %7042 = vmatmul.bf16.vlgmr.msra.gmra.mxu1 %v14096_v21 }
 0x320   : > { %7073 = vmatpush.bf16.xpose.msrb.mxu0 %v9982_v44  ;;  %7086 = vmatpush.bf16.xpose.msrb.mxu1 %v9986_v45  ;;  %v12902_v44 = vld [vmem:[%s13973_s7 + $0xaac] sm:$0xf0]  ;;  %v12898_v45 = vld [vmem:[%s13973_s7 + $0xa94] sm:$0xf] }
 0x321   : > { %7099 = vmatpush.bf16.xpose.msrb.mxu2 %v9990_v46  ;;  %7068 = vmatmul.bf16.vlgmr.msra.gmra.mxu3 %v14091_v17  ;;  %v9823_v46 = vld [vmem:[%s13973_s7 + $0xab0] sm:$0xf0]  ;;  %v9822_v55 = vor.u32 %v12902_v44, %v9821_v42  ;;  %v10189_v42 = vld [vmem:[%s13973_s7 + $0xd80] sm:$0xf] }
 0x322   : > { %7112 = vmatpush.bf16.xpose.msrb.mxu3 %v9994_v48  ;;  %7055 = vmatmul.bf16.vlgmr.msra.gmra.mxu2 %v14078_v3  ;;  %v9829_v48 = vld [vmem:[%s13973_s7 + $0xa98] sm:$0xf]  ;;  %v9826_v60 = vor.u32 %v12898_v45, %v9823_v46  ;;  %v12996_v44 = vld [vmem:[%s13973_s7 + $0xd9c] sm:$0xf0]  ;;  %v12992_v45 = vld [vmem:[%s13973_s7 + $0xd84] sm:$0xf] }
 0x323   : > { %v9830_v62 = vor.u32 %v12903_v51, %v9829_v48  ;;  %v10191_v46 = vld [vmem:[%s13973_s7 + $0xda0] sm:$0xf0]  ;;  %v10197_v48 = vld [vmem:[%s13973_s7 + $0xd88] sm:$0xf] }
 0x324   : > { %v14863_v58 = vpop.f32.mrf.mxu3  ;;  %v6928_v59 = vpop.f32.mrf.mxu0  ;;  %v12997_v51 = vld [vmem:[%s13973_s7 + $0xda4] sm:$0xf0] }
 0x325   : > { %v14853_v41 = vpop.f32.mrf.mxu2  ;;  %v10190_v59 = vor.u32 %v12996_v44, %v10189_v42  ;;  %v12973_v42 = vld [vmem:[%s13973_s7 + $0xce4] sm:$0xf0]  ;;  %v12969_v44 = vld [vmem:[%s13973_s7 + $0xccc] sm:$0xf] }
 0x328   : > { %7074 = vmatpush.bf16.xpose.msrb.mxu0 %v9950_v0  ;;  %7087 = vmatpush.bf16.xpose.msrb.mxu1 %v9954_v2  ;;  %v6941_v0 = vpop.f32.mrf.mxu1  ;;  %v9834_v2 = vor.u32 %v12899_v52, %v9831_v53  ;;  %v6940_v52 = vadd.f32 %v14851_v35, %v14849_v11  ;;  %v12993_v53 = vld [vmem:[%s13973_s7 + $0xd8c] sm:$0xf]  ;;  %v10157_v35 = vld [vmem:[%s13973_s7 + $0xd40] sm:$0xf] }
 0x329   : > { %7100 = vmatpush.bf16.xpose.msrb.mxu2 %v9958_v6 }
 0x32a   : > { %7113 = vmatpush.bf16.xpose.msrb.mxu3 %v9962_v8  ;;  %v9789_v8 = vld [vmem:[%s13973_s7 + $0xa50] sm:$0xf]  ;;  %v6953_v11 = vadd.f32 %v14853_v41, %v6940_v52 }
 0x32b   : > { %v9790_v13 = vor.u32 %v12894_v15, %v9789_v8  ;;  %v10159_v8 = vld [vmem:[%s13973_s7 + $0xd60] sm:$0xf0]  ;;  %v10165_v15 = vld [vmem:[%s13973_s7 + $0xd48] sm:$0xf] }
 0x32d   : > { %v6954_v6 = vpop.f32.mrf.mxu2 }
 0x32e   : > { %v12984_v6 = vld [vmem:[%s13973_s7 + $0xd44] sm:$0xf] }
 0x330   : > { %7075 = vmatpush.bf16.xpose.msrb.mxu0 %v9918_v14  ;;  %7088 = vmatpush.bf16.xpose.msrb.mxu1 %v9922_v18  ;;  %v6967_v14 = vpop.f32.mrf.mxu3  ;;  %v9794_v18 = vor.u32 %v12890_v43, %v9791_v9  ;;  %v12989_v43 = vld [vmem:[%s13973_s7 + $0xd64] sm:$0xf0]  ;;  %v6966_v9 = vadd.f32 %v14863_v58, %v6953_v11  ;;  %v12976_v58 = vld [vmem:[%s13973_s7 + $0xd04] sm:$0xf] }
 0x331   : > { %7101 = vmatpush.bf16.xpose.msrb.mxu2 %v9926_v47  ;;  %v9798_v47 = vor.u32 %v12895_v12, %v9797_v10  ;;  %v12985_v10 = vld [vmem:[%s13973_s7 + $0xd4c] sm:$0xf]  ;;  %v10069_v11 = vld [vmem:[%s13973_s7 + $0xc88] sm:$0xf] }
 0x332   : > { %7114 = vmatpush.bf16.xpose.msrb.mxu3 %v9930_v56  ;;  %v9802_v56 = vor.u32 %v12891_v49, %v9799_v50  ;;  %v10167_v12 = vld [vmem:[%s13973_s7 + $0xd68] sm:$0xf0]  ;;  %v10162_v49 = vor.u32 %v12984_v6, %v10159_v8  ;;  %v10166_v50 = vor.u32 %v12989_v43, %v10165_v15 }
 0x333   : > { %v10071_v6 = vld [vmem:[%s13973_s7 + $0xca8] sm:$0xf0] }
 0x338   : > { %7076 = vmatpush.bf16.xpose.msrb.mxu0 %v9886_v23  ;;  %7089 = vmatpush.bf16.xpose.msrb.mxu1 %v9890_v24  ;;  %v10221_v23 = vld [vmem:[%s13973_s7 + $0xdc0] sm:$0xf] }
 0x339   : > { %7102 = vmatpush.bf16.xpose.msrb.mxu2 %v9894_v25  ;;  %v13004_v24 = vld [vmem:[%s13973_s7 + $0xddc] sm:$0xf0]  ;;  %v13000_v25 = vld [vmem:[%s13973_s7 + $0xdc4] sm:$0xf] }
 0x33a   : > { %7115 = vmatpush.bf16.xpose.msrb.mxu3 %v9898_v61  ;;  %v9758_v61 = vor.u32 %v12886_v19, %v9757_v57  ;;  %v12980_v57 = vld [vmem:[%s13973_s7 + $0xd1c] sm:$0xf0] }
 0x340   : > { %7077 = vmatpush.bf16.xpose.msrb.mxu0 %v9854_v33  ;;  %7090 = vmatpush.bf16.xpose.msrb.mxu1 %v9858_v36  ;;  %v10222_v33 = vor.u32 %v13004_v24, %v10221_v23  ;;  %v10226_v36 = vor.u32 %v13000_v25, %v10223_v26  ;;  %v10130_v24 = vor.u32 %v12976_v58, %v10127_v20  ;;  %v12948_v20 = vld [vmem:[%s13973_s7 + $0xc1c] sm:$0xf0] }
 0x341   : > { %7103 = vmatpush.bf16.xpose.msrb.mxu2 %v9862_v37  ;;  %v10230_v37 = vor.u32 %v13005_v7, %v10229_v27  ;;  %v10134_v25 = vor.u32 %v12981_v54, %v10133_v22  ;;  %v10138_v26 = vor.u32 %v12977_v1, %v10135_v4  ;;  %v12944_v22 = vld [vmem:[%s13973_s7 + $0xc04] sm:$0xf]  ;;  %v10005_v1 = vld [vmem:[%s13973_s7 + $0xc08] sm:$0xf] }
 0x342   : > { %7116 = vmatpush.bf16.xpose.msrb.mxu3 %v9866_v40  ;;  %v10234_v40 = vor.u32 %v13001_v31, %v10231_v5  ;;  %v10093_v5 = vld [vmem:[%s13973_s7 + $0xcc0] sm:$0xf]  ;;  %v9999_v54 = vld [vmem:[%s13973_s7 + $0xc20] sm:$0xf0]  ;;  %v12949_v4 = vld [vmem:[%s13973_s7 + $0xc24] sm:$0xf0] }
 0x348   : > { %7078 = vmatpush.bf16.xpose.msrb.mxu0 %v9822_v55  ;;  %7091 = vmatpush.bf16.xpose.msrb.mxu1 %v9826_v60  ;;  %v10199_v55 = vld [vmem:[%s13973_s7 + $0xda8] sm:$0xf0]  ;;  %v10194_v60 = vor.u32 %v12992_v45, %v10191_v46 }
 0x349   : > { %7104 = vmatpush.bf16.xpose.msrb.mxu2 %v9830_v62  ;;  %v10198_v62 = vor.u32 %v12997_v51, %v10197_v48  ;;  %v10202_v0 = vor.u32 %v12993_v53, %v10199_v55  ;;  %v10103_v45 = vld [vmem:[%s13973_s7 + $0xce8] sm:$0xf0] }
 0x34a   : > { %7117 = vmatpush.bf16.xpose.msrb.mxu3 %v9834_v2  ;;  %v12988_v2 = vld [vmem:[%s13973_s7 + $0xd5c] sm:$0xf0]  ;;  %v10106_v53 = vor.u32 %v12969_v44, %v10103_v45  ;;  %v10205_v44 = vld [vmem:[%s13973_s7 + $0xd90] sm:$0xf] }
 0x34b   : > { %v10158_v41 = vor.u32 %v12988_v2, %v10157_v35  ;;  %v12965_v35 = vld [vmem:[%s13973_s7 + $0xca4] sm:$0xf0]  ;;  %v12961_v2 = vld [vmem:[%s13973_s7 + $0xc8c] sm:$0xf]  ;;  %v12998_v45 = vld [vmem:[%s13973_s7 + $0xdac] sm:$0xf0] }
 0x34c   : > { %v10070_v43 = vor.u32 %v12965_v35, %v10069_v11  ;;  %v10173_v11 = vld [vmem:[%s13973_s7 + $0xd50] sm:$0xf] }
 0x34d   : > { %v12990_v35 = vld [vmem:[%s13973_s7 + $0xd6c] sm:$0xf0] }
 0x350   : > { %7079 = vmatpush.bf16.xpose.msrb.mxu0 %v9790_v13  ;;  %7092 = vmatpush.bf16.xpose.msrb.mxu1 %v9794_v18  ;;  %v10170_v13 = vor.u32 %v12985_v10, %v10167_v12  ;;  %v10029_v10 = vld [vmem:[%s13973_s7 + $0xc40] sm:$0xf] }
 0x351   : > { %7105 = vmatpush.bf16.xpose.msrb.mxu2 %v9798_v47  ;;  %v12956_v12 = vld [vmem:[%s13973_s7 + $0xc5c] sm:$0xf0] }
 0x352   : > { %7118 = vmatpush.bf16.xpose.msrb.mxu3 %v9802_v56  ;;  %v10125_v56 = vld [vmem:[%s13973_s7 + $0xd00] sm:$0xf] }
 0x353   : > { %v10126_v63 = vor.u32 %v12980_v57, %v10125_v56 }
 0x358   : > { %7080 = vmatpush.bf16.xpose.msrb.mxu0 %v9758_v61  ;;  %7093 = vmatpush.bf16.xpose.msrb.mxu1 %v9762_v28  ;;  %v329_v28 = vld [vmem:[#allocation2 + $0x50] sm:$0xff] }
 0x359   : > { %7106 = vmatpush.bf16.xpose.msrb.mxu2 %v9766_v29 }
 0x35a   : > { %7119 = vmatpush.bf16.xpose.msrb.mxu3 %v9770_v32  ;;  %v12972_v32 = vld [vmem:[%s13973_s7 + $0xcdc] sm:$0xf0] }
 0x35b   : > { %v10094_v46 = vor.u32 %v12972_v32, %v10093_v5  ;;  %v13003_v5 = vld [vmem:[%s13973_s7 + $0xddc] sm:$0xf] }
 0x35c   : > { %v6978_v14 = vpop.f32.mrf.mxu0  ;;  %v6991_v47 = vpop.f32.mrf.mxu1  ;;  %v10247_v32 = vld [vmem:[%s13973_s7 + $0xdf8] sm:$0xf0] }
 0x35d   : > { %v6979_v18 = vadd.f32 %v6978_v14, %v6966_v9  ;;  %v10074_v9 = vor.u32 %v12961_v2, %v10071_v6  ;;  %v12953_v14 = vld [vmem:[%s13973_s7 + $0xc4c] sm:$0xf]  ;;  %v12986_v2 = vld [vmem:[%s13973_s7 + $0xd54] sm:$0xf] }
 0x35e   : > { %v10175_v6 = vld [vmem:[%s13973_s7 + $0xd70] sm:$0xf0] }
 0x35f   : > { %7081 = vmatmul.bf16.vlgmr.msrb.gmra.mxu0 %v14145_v30  ;;  %7094 = vmatmul.bf16.vlgmr.msrb.gmra.mxu1 %v14155_v38  ;;  %v6992_v19 = vadd.f32 %v6991_v47, %v6979_v18  ;;  %v10039_v18 = vld [vmem:[%s13973_s7 + $0xc68] sm:$0xf0]  ;;  %v10030_v47 = vor.u32 %v12956_v12, %v10029_v10  ;;  %v10174_v10 = vor.u32 %v12990_v35, %v10173_v11  ;;  %v12958_v11 = vld [vmem:[%s13973_s7 + $0xc6c] sm:$0xf0]  ;;  %v12954_v35 = vld [vmem:[%s13973_s7 + $0xc54] sm:$0xf] }
 0x360   : > { %7125 = vmatpush.bf16.xpose.msra.mxu0 %v10222_v33  ;;  %7138 = vmatpush.bf16.xpose.msra.mxu1 %v10226_v36  ;;  %v12968_v33 = vld [vmem:[%s13973_s7 + $0xcc4] sm:$0xf]  ;;  %v10042_v58 = vor.u32 %v12953_v14, %v10039_v18  ;;  %v10178_v12 = vor.u32 %v12986_v2, %v10175_v6  ;;  %v12978_v14 = vld [vmem:[%s13973_s7 + $0xd14] sm:$0xf]  ;;  %v10053_v6 = vld [vmem:[%s13973_s7 + $0xc58] sm:$0xf] }
 0x361   : > { %7151 = vmatpush.bf16.xpose.msra.mxu2 %v10230_v37  ;;  %7120 = vmatmul.bf16.vlgmr.msrb.gmra.mxu3 %v14157_v39  ;;  %v10095_v37 = vld [vmem:[%s13973_s7 + $0xce0] sm:$0xf0]  ;;  %v10143_v18 = vld [vmem:[%s13973_s7 + $0xd30] sm:$0xf0] }
 0x362   : > { %7164 = vmatpush.bf16.xpose.msra.mxu3 %v10234_v40  ;;  %7107 = vmatmul.bf16.vlgmr.msrb.gmra.mxu2 %v14150_v34  ;;  %v10101_v40 = vld [vmem:[%s13973_s7 + $0xcc8] sm:$0xf]  ;;  %v10098_v48 = vor.u32 %v12968_v33, %v10095_v37  ;;  %v10047_v2 = vld [vmem:[%s13973_s7 + $0xc70] sm:$0xf0] }
 0x363   : > { %v10102_v51 = vor.u32 %v12973_v42, %v10101_v40  ;;  %v10250_v42 = vor.u32 %v13003_v5, %v10247_v32 }
 0x364   : > { %v7017_v27 = vpop.f32.mrf.mxu3  ;;  %v6980_v7 = vpop.f32.mrf.mxu0 }
 0x365   : > { %v7004_v23 = vpop.f32.mrf.mxu2  ;;  %v6993_v29 = vpop.f32.mrf.mxu1  ;;  %v10245_v7 = vld [vmem:[%s13973_s7 + $0xdd8] sm:$0xf] }
 0x366   : > { %v7005_v61 = vadd.f32 %v7004_v23, %v6992_v19  ;;  %v9997_v19 = vld [vmem:[%s13973_s7 + $0xc00] sm:$0xf]  ;;  %v10007_v23 = vld [vmem:[%s13973_s7 + $0xc28] sm:$0xf0]  ;;  %v10002_v29 = vor.u32 %v12944_v22, %v9999_v54 }
 0x368   : > { %7126 = vmatpush.bf16.xpose.msra.mxu0 %v10190_v59  ;;  %7139 = vmatpush.bf16.xpose.msra.mxu1 %v10194_v60  ;;  %v7018_v31 = vadd.f32 %v7017_v27, %v7005_v61  ;;  %v10061_v59 = vld [vmem:[%s13973_s7 + $0xc80] sm:$0xf]  ;;  %v13002_v61 = vld [vmem:[%s13973_s7 + $0xdd4] sm:$0xf] }
 0x369   : > { %7152 = vmatpush.bf16.xpose.msra.mxu2 %v10198_v62  ;;  %v12964_v60 = vld [vmem:[%s13973_s7 + $0xc9c] sm:$0xf0]  ;;  %v12960_v62 = vld [vmem:[%s13973_s7 + $0xc84] sm:$0xf]  ;;  %v10239_v27 = vld [vmem:[%s13973_s7 + $0xdf0] sm:$0xf0] }
 0x36a   : > { %7165 = vmatpush.bf16.xpose.msra.mxu3 %v10202_v0  ;;  %v8169_v36 = vadd.f32 %v7018_v31, %v329_v28  ;;  %v10063_v0 = vld [vmem:[%s13973_s7 + $0xca0] sm:$0xf0]  ;;  %v10062_v8 = vor.u32 %v12964_v60, %v10061_v59  ;;  %v13007_v28 = vld [vmem:[%s13973_s7 + $0xdf4] sm:$0xf0]  ;;  %v10006_v31 = vor.u32 %v12949_v4, %v10005_v1  ;;  %v10242_v37 = vor.u32 %v13002_v61, %v10239_v27  ;;  %v10109_v1 = vld [vmem:[%s13973_s7 + $0xcd0] sm:$0xf] }
 0x36b   : > { %v10066_v15 = vor.u32 %v12960_v62, %v10063_v0  ;;  %v10246_v40 = vor.u32 %v13007_v28, %v10245_v7  ;;  %v10206_v59 = vor.u32 %v12998_v45, %v10205_v44  ;;  %v12974_v4 = vld [vmem:[%s13973_s7 + $0xcec] sm:$0xf0]  ;;  %v12971_v61 = vld [vmem:[%s13973_s7 + $0xcdc] sm:$0xf]  ;;  %v12967_v44 = vld [vmem:[%s13973_s7 + $0xcb4] sm:$0xf0] }
 0x36c   : > { %8185 = vst [vmem:[#allocation2 + $0x50] sm:$0xff] %v8169_v36  ;;  %v7019_v55 = vpop.f32.mrf.mxu3  ;;  %v10110_v27 = vor.u32 %v12974_v4, %v10109_v1  ;;  %v12963_v45 = vld [vmem:[%s13973_s7 + $0xc9c] sm:$0xf]  ;;  %v10479_v1 = vld [vmem:[%s13973_s7 + $0xfe0] sm:$0xf0] }
 0x36d   : > { %v7006_v52 = vpop.f32.mrf.mxu2  ;;  %v10215_v55 = vld [vmem:[%s13973_s7 + $0xdb8] sm:$0xf0]  ;;  %v10485_v4 = vld [vmem:[%s13973_s7 + $0xfc8] sm:$0xf] }
 0x36e   : > { %v12999_v52 = vld [vmem:[%s13973_s7 + $0xdb4] sm:$0xf0] }
 0x370   : > { %7127 = vmatpush.bf16.xpose.msra.mxu0 %v10158_v41  ;;  %7140 = vmatpush.bf16.xpose.msra.mxu1 %v10162_v49  ;;  %v12952_v41 = vld [vmem:[%s13973_s7 + $0xc44] sm:$0xf] }
 0x371   : > { %7153 = vmatpush.bf16.xpose.msra.mxu2 %v10166_v50  ;;  %v10031_v49 = vld [vmem:[%s13973_s7 + $0xc60] sm:$0xf0]  ;;  %v10037_v50 = vld [vmem:[%s13973_s7 + $0xc48] sm:$0xf] }
 0x372   : > { %7166 = vmatpush.bf16.xpose.msra.mxu3 %v10170_v13  ;;  %v12957_v13 = vld [vmem:[%s13973_s7 + $0xc64] sm:$0xf0]  ;;  %v10034_v56 = vor.u32 %v12952_v41, %v10031_v49 }
 0x373   : > { %v10038_v57 = vor.u32 %v12957_v13, %v10037_v50  ;;  %v10141_v50 = vld [vmem:[%s13973_s7 + $0xd10] sm:$0xf] }
 0x374   : > { %v12982_v13 = vld [vmem:[%s13973_s7 + $0xd2c] sm:$0xf0] }
 0x378   : > { %7128 = vmatpush.bf16.xpose.msra.mxu0 %v10126_v63  ;;  %7141 = vmatpush.bf16.xpose.msra.mxu1 %v10130_v24  ;;  %v12945_v63 = vld [vmem:[%s13973_s7 + $0xc0c] sm:$0xf]  ;;  %v10237_v24 = vld [vmem:[%s13973_s7 + $0xdd0] sm:$0xf] }
 0x379   : > { %7154 = vmatpush.bf16.xpose.msra.mxu2 %v10134_v25  ;;  %v13006_v25 = vld [vmem:[%s13973_s7 + $0xdec] sm:$0xf0]  ;;  %v10010_v33 = vor.u32 %v12945_v63, %v10007_v23  ;;  %v12970_v63 = vld [vmem:[%s13973_s7 + $0xcd4] sm:$0xf] }
 0x37a   : > { %7167 = vmatpush.bf16.xpose.msra.mxu3 %v10138_v26  ;;  %v9998_v26 = vor.u32 %v12948_v20, %v9997_v19  ;;  %v10238_v36 = vor.u32 %v13006_v25, %v10237_v24  ;;  %v10142_v19 = vor.u32 %v12982_v13, %v10141_v50  ;;  %v10146_v20 = vor.u32 %v12978_v14, %v10143_v18  ;;  %v10111_v23 = vld [vmem:[%s13973_s7 + $0xcf0] sm:$0xf0]  ;;  %v10117_v24 = vld [vmem:[%s13973_s7 + $0xcd8] sm:$0xf]  ;;  %v10013_v50 = vld [vmem:[%s13973_s7 + $0xc10] sm:$0xf] }
 0x37b   : > { %v12975_v25 = vld [vmem:[%s13973_s7 + $0xcf4] sm:$0xf0]  ;;  %v12950_v13 = vld [vmem:[%s13973_s7 + $0xc2c] sm:$0xf0]  ;;  %v12946_v14 = vld [vmem:[%s13973_s7 + $0xc14] sm:$0xf] }
 0x37c   : > { %v10015_v18 = vld [vmem:[%s13973_s7 + $0xc30] sm:$0xf0] }
 0x380   : > { %7129 = vmatpush.bf16.xpose.msra.mxu0 %v10094_v46  ;;  %7142 = vmatpush.bf16.xpose.msra.mxu1 %v10098_v48  ;;  %v12994_v46 = vld [vmem:[%s13973_s7 + $0xd94] sm:$0xf] }
 0x381   : > { %7155 = vmatpush.bf16.xpose.msra.mxu2 %v10102_v51  ;;  %v10207_v48 = vld [vmem:[%s13973_s7 + $0xdb0] sm:$0xf0]  ;;  %v10213_v51 = vld [vmem:[%s13973_s7 + $0xd98] sm:$0xf] }
 0x382   : > { %7168 = vmatpush.bf16.xpose.msra.mxu3 %v10106_v53  ;;  %v12995_v53 = vld [vmem:[%s13973_s7 + $0xd9c] sm:$0xf]  ;;  %v10210_v60 = vor.u32 %v12994_v46, %v10207_v48  ;;  %v10214_v62 = vor.u32 %v12999_v52, %v10213_v51 }
 0x383   : > { %v10218_v0 = vor.u32 %v12995_v53, %v10215_v55  ;;  %v10087_v46 = vld [vmem:[%s13973_s7 + $0xcb8] sm:$0xf0] }
 0x388   : > { %7130 = vmatpush.bf16.xpose.msra.mxu0 %v10062_v8  ;;  %7143 = vmatpush.bf16.xpose.msra.mxu1 %v10066_v15  ;;  %v10181_v8 = vld [vmem:[%s13973_s7 + $0xd58] sm:$0xf] }
 0x389   : > { %7156 = vmatpush.bf16.xpose.msra.mxu2 %v10070_v43  ;;  %v12991_v15 = vld [vmem:[%s13973_s7 + $0xd74] sm:$0xf0]  ;;  %v12987_v43 = vld [vmem:[%s13973_s7 + $0xd5c] sm:$0xf] }
 0x38a   : > { %7169 = vmatpush.bf16.xpose.msra.mxu3 %v10074_v9  ;;  %v10183_v9 = vld [vmem:[%s13973_s7 + $0xd78] sm:$0xf0]  ;;  %v10182_v41 = vor.u32 %v12991_v15, %v10181_v8  ;;  %v12959_v8 = vld [vmem:[%s13973_s7 + $0xc74] sm:$0xf0] }
 0x38b   : > { %v10186_v49 = vor.u32 %v12987_v43, %v10183_v9  ;;  %v12955_v15 = vld [vmem:[%s13973_s7 + $0xc5c] sm:$0xf] }
 0x38c   : > { %v10055_v43 = vld [vmem:[%s13973_s7 + $0xc78] sm:$0xf0] }
 0x390   : > { %7131 = vmatpush.bf16.xpose.msra.mxu0 %v10030_v47  ;;  %7144 = vmatpush.bf16.xpose.msra.mxu1 %v10034_v56  ;;  %v10149_v47 = vld [vmem:[%s13973_s7 + $0xd18] sm:$0xf] }
 0x391   : > { %7157 = vmatpush.bf16.xpose.msra.mxu2 %v10038_v57  ;;  %v12983_v56 = vld [vmem:[%s13973_s7 + $0xd34] sm:$0xf0]  ;;  %v12979_v57 = vld [vmem:[%s13973_s7 + $0xd1c] sm:$0xf] }
 0x392   : > { %7170 = vmatpush.bf16.xpose.msra.mxu3 %v10042_v58  ;;  %v10151_v58 = vld [vmem:[%s13973_s7 + $0xd38] sm:$0xf0]  ;;  %v10150_v22 = vor.u32 %v12983_v56, %v10149_v47  ;;  %v10021_v47 = vld [vmem:[%s13973_s7 + $0xc18] sm:$0xf] }
 0x393   : > { %v10154_v54 = vor.u32 %v12979_v57, %v10151_v58  ;;  %v12951_v56 = vld [vmem:[%s13973_s7 + $0xc34] sm:$0xf0]  ;;  %v12947_v57 = vld [vmem:[%s13973_s7 + $0xc1c] sm:$0xf] }
 0x394   : > { %v10023_v58 = vld [vmem:[%s13973_s7 + $0xc38] sm:$0xf0] }
 0x398   : > { %7132 = vmatpush.bf16.xpose.msra.mxu0 %v9998_v26  ;;  %7145 = vmatpush.bf16.xpose.msra.mxu1 %v10002_v29  ;;  %v10119_v26 = vld [vmem:[%s13973_s7 + $0xcf8] sm:$0xf0]  ;;  %v10114_v29 = vor.u32 %v12970_v63, %v10111_v23  ;;  %v13069_v63 = vld [vmem:[%s13973_s7 + $0xfe4] sm:$0xf0]  ;;  %v10018_v23 = vor.u32 %v12946_v14, %v10015_v18  ;;  %v10383_v14 = vld [vmem:[%s13973_s7 + $0xf20] sm:$0xf0] }
 0x399   : > { %7158 = vmatpush.bf16.xpose.msra.mxu2 %v10006_v31  ;;  %v10118_v31 = vor.u32 %v12975_v25, %v10117_v24  ;;  %v10122_v5 = vor.u32 %v12971_v61, %v10119_v26  ;;  %v10022_v24 = vor.u32 %v12951_v56, %v10021_v47  ;;  %v13065_v25 = vld [vmem:[%s13973_s7 + $0xfcc] sm:$0xf]  ;;  %v10026_v26 = vor.u32 %v12947_v57, %v10023_v58  ;;  %v10389_v18 = vld [vmem:[%s13973_s7 + $0xf08] sm:$0xf] }
 0x39a   : > { %7171 = vmatpush.bf16.xpose.msra.mxu3 %v10010_v33  ;;  %v10077_v33 = vld [vmem:[%s13973_s7 + $0xc90] sm:$0xf]  ;;  %v10487_v61 = vld [vmem:[%s13973_s7 + $0xfe8] sm:$0xf0]  ;;  %v13045_v47 = vld [vmem:[%s13973_s7 + $0xf24] sm:$0xf0] }
 0x39b   : > { %v13041_v56 = vld [vmem:[%s13973_s7 + $0xf0c] sm:$0xf] }
 0x39c   : > { %v14997_v7 = vpop.f32.mrf.mxu0  ;;  %v14999_v28 = vpop.f32.mrf.mxu1  ;;  %v10391_v57 = vld [vmem:[%s13973_s7 + $0xf28] sm:$0xf0] }
 0x39f   : > { %7133 = vmatmul.bf16.vlgmr.msra.gmra.mxu0 %v14089_v16  ;;  %7146 = vmatmul.bf16.vlgmr.msra.gmra.mxu1 %v14096_v21 }
 0x3a0   : > { %7177 = vmatpush.bf16.xpose.msrb.mxu0 %v10238_v36  ;;  %7190 = vmatpush.bf16.xpose.msrb.mxu1 %v10242_v37  ;;  %v12966_v36 = vld [vmem:[%s13973_s7 + $0xcac] sm:$0xf0]  ;;  %v12962_v37 = vld [vmem:[%s13973_s7 + $0xc94] sm:$0xf] }
 0x3a1   : > { %7203 = vmatpush.bf16.xpose.msrb.mxu2 %v10246_v40  ;;  %7172 = vmatmul.bf16.vlgmr.msra.gmra.mxu3 %v14091_v17  ;;  %v10079_v40 = vld [vmem:[%s13973_s7 + $0xcb0] sm:$0xf0]  ;;  %v10078_v48 = vor.u32 %v12966_v36, %v10077_v33  ;;  %v10445_v33 = vld [vmem:[%s13973_s7 + $0xf80] sm:$0xf] }
 0x3a2   : > { %7216 = vmatpush.bf16.xpose.msrb.mxu3 %v10250_v42  ;;  %7159 = vmatmul.bf16.vlgmr.msra.gmra.mxu2 %v14078_v3  ;;  %v10085_v42 = vld [vmem:[%s13973_s7 + $0xc98] sm:$0xf]  ;;  %v10082_v53 = vor.u32 %v12962_v37, %v10079_v40  ;;  %v13060_v36 = vld [vmem:[%s13973_s7 + $0xf9c] sm:$0xf0]  ;;  %v13056_v37 = vld [vmem:[%s13973_s7 + $0xf84] sm:$0xf] }
 0x3a3   : > { %v10086_v55 = vor.u32 %v12967_v44, %v10085_v42  ;;  %v10447_v40 = vld [vmem:[%s13973_s7 + $0xfa0] sm:$0xf0]  ;;  %v10453_v42 = vld [vmem:[%s13973_s7 + $0xf88] sm:$0xf] }
 0x3a4   : > { %v15011_v51 = vpop.f32.mrf.mxu3  ;;  %v7032_v52 = vpop.f32.mrf.mxu0  ;;  %v13061_v44 = vld [vmem:[%s13973_s7 + $0xfa4] sm:$0xf0] }
 0x3a5   : > { %v15001_v32 = vpop.f32.mrf.mxu2  ;;  %v10446_v52 = vor.u32 %v13060_v36, %v10445_v33  ;;  %v13037_v33 = vld [vmem:[%s13973_s7 + $0xee4] sm:$0xf0]  ;;  %v13033_v36 = vld [vmem:[%s13973_s7 + $0xecc] sm:$0xf] }
 0x3a8   : > { %7178 = vmatpush.bf16.xpose.msrb.mxu0 %v10206_v59  ;;  %7191 = vmatpush.bf16.xpose.msrb.mxu1 %v10210_v60  ;;  %v7045_v59 = vpop.f32.mrf.mxu1  ;;  %v10090_v60 = vor.u32 %v12963_v45, %v10087_v46  ;;  %v7044_v45 = vadd.f32 %v14999_v28, %v14997_v7  ;;  %v13057_v46 = vld [vmem:[%s13973_s7 + $0xf8c] sm:$0xf]  ;;  %v10413_v28 = vld [vmem:[%s13973_s7 + $0xf40] sm:$0xf] }
 0x3a9   : > { %7204 = vmatpush.bf16.xpose.msrb.mxu2 %v10214_v62 }
 0x3aa   : > { %7217 = vmatpush.bf16.xpose.msrb.mxu3 %v10218_v0  ;;  %v10045_v0 = vld [vmem:[%s13973_s7 + $0xc50] sm:$0xf]  ;;  %v7057_v7 = vadd.f32 %v15001_v32, %v7044_v45 }
 0x3ab   : > { %v10046_v9 = vor.u32 %v12958_v11, %v10045_v0  ;;  %v10415_v0 = vld [vmem:[%s13973_s7 + $0xf60] sm:$0xf0]  ;;  %v10421_v11 = vld [vmem:[%s13973_s7 + $0xf48] sm:$0xf] }
 0x3ad   : > { %v7058_v62 = vpop.f32.mrf.mxu2 }
 0x3ae   : > { %v13048_v62 = vld [vmem:[%s13973_s7 + $0xf44] sm:$0xf] }
 0x3b0   : > { %7179 = vmatpush.bf16.xpose.msrb.mxu0 %v10174_v10  ;;  %7192 = vmatpush.bf16.xpose.msrb.mxu1 %v10178_v12  ;;  %v7071_v10 = vpop.f32.mrf.mxu3  ;;  %v10050_v12 = vor.u32 %v12954_v35, %v10047_v2  ;;  %v13053_v35 = vld [vmem:[%s13973_s7 + $0xf64] sm:$0xf0]  ;;  %v7070_v2 = vadd.f32 %v15011_v51, %v7057_v7  ;;  %v13040_v51 = vld [vmem:[%s13973_s7 + $0xf04] sm:$0xf] }
 0x3b1   : > { %7205 = vmatpush.bf16.xpose.msrb.mxu2 %v10182_v41  ;;  %v10054_v41 = vor.u32 %v12959_v8, %v10053_v6  ;;  %v13049_v6 = vld [vmem:[%s13973_s7 + $0xf4c] sm:$0xf]  ;;  %v10325_v7 = vld [vmem:[%s13973_s7 + $0xe88] sm:$0xf] }
 0x3b2   : > { %7218 = vmatpush.bf16.xpose.msrb.mxu3 %v10186_v49  ;;  %v10058_v49 = vor.u32 %v12955_v15, %v10055_v43  ;;  %v10423_v8 = vld [vmem:[%s13973_s7 + $0xf68] sm:$0xf0]  ;;  %v10418_v15 = vor.u32 %v13048_v62, %v10415_v0  ;;  %v10422_v43 = vor.u32 %v13053_v35, %v10421_v11 }
 0x3b3   : > { %v10327_v62 = vld [vmem:[%s13973_s7 + $0xea8] sm:$0xf0] }
 0x3b8   : > { %7180 = vmatpush.bf16.xpose.msrb.mxu0 %v10142_v19  ;;  %7193 = vmatpush.bf16.xpose.msrb.mxu1 %v10146_v20  ;;  %v10477_v19 = vld [vmem:[%s13973_s7 + $0xfc0] sm:$0xf] }
 0x3b9   : > { %7206 = vmatpush.bf16.xpose.msrb.mxu2 %v10150_v22  ;;  %v13068_v20 = vld [vmem:[%s13973_s7 + $0xfdc] sm:$0xf0]  ;;  %v13064_v22 = vld [vmem:[%s13973_s7 + $0xfc4] sm:$0xf] }
 0x3ba   : > { %7219 = vmatpush.bf16.xpose.msrb.mxu3 %v10154_v54  ;;  %v10014_v54 = vor.u32 %v12950_v13, %v10013_v50  ;;  %v13044_v50 = vld [vmem:[%s13973_s7 + $0xf1c] sm:$0xf0] }
 0x3c0   : > { %7181 = vmatpush.bf16.xpose.msrb.mxu0 %v10110_v27  ;;  %7194 = vmatpush.bf16.xpose.msrb.mxu1 %v10114_v29  ;;  %v10478_v27 = vor.u32 %v13068_v20, %v10477_v19  ;;  %v10482_v29 = vor.u32 %v13064_v22, %v10479_v1  ;;  %v10386_v20 = vor.u32 %v13040_v51, %v10383_v14  ;;  %v13012_v14 = vld [vmem:[%s13973_s7 + $0xe1c] sm:$0xf0] }
 0x3c1   : > { %7207 = vmatpush.bf16.xpose.msrb.mxu2 %v10118_v31  ;;  %v10486_v31 = vor.u32 %v13069_v63, %v10485_v4  ;;  %v10390_v22 = vor.u32 %v13045_v47, %v10389_v18  ;;  %v10394_v1 = vor.u32 %v13041_v56, %v10391_v57  ;;  %v13008_v18 = vld [vmem:[%s13973_s7 + $0xe04] sm:$0xf]  ;;  %v10261_v56 = vld [vmem:[%s13973_s7 + $0xe08] sm:$0xf] }
 0x3c2   : > { %7220 = vmatpush.bf16.xpose.msrb.mxu3 %v10122_v5  ;;  %v10490_v5 = vor.u32 %v13065_v25, %v10487_v61  ;;  %v10349_v61 = vld [vmem:[%s13973_s7 + $0xec0] sm:$0xf]  ;;  %v10255_v47 = vld [vmem:[%s13973_s7 + $0xe20] sm:$0xf0]  ;;  %v13013_v57 = vld [vmem:[%s13973_s7 + $0xe24] sm:$0xf0] }
 0x3c8   : > { %7182 = vmatpush.bf16.xpose.msrb.mxu0 %v10078_v48  ;;  %7195 = vmatpush.bf16.xpose.msrb.mxu1 %v10082_v53  ;;  %v10455_v48 = vld [vmem:[%s13973_s7 + $0xfa8] sm:$0xf0]  ;;  %v10450_v53 = vor.u32 %v13056_v37, %v10447_v40 }
 0x3c9   : > { %7208 = vmatpush.bf16.xpose.msrb.mxu2 %v10086_v55  ;;  %v10454_v55 = vor.u32 %v13061_v44, %v10453_v42  ;;  %v10458_v59 = vor.u32 %v13057_v46, %v10455_v48  ;;  %v10359_v37 = vld [vmem:[%s13973_s7 + $0xee8] sm:$0xf0] }
 0x3ca   : > { %7221 = vmatpush.bf16.xpose.msrb.mxu3 %v10090_v60  ;;  %v13052_v60 = vld [vmem:[%s13973_s7 + $0xf5c] sm:$0xf0]  ;;  %v10362_v46 = vor.u32 %v13033_v36, %v10359_v37  ;;  %v10461_v36 = vld [vmem:[%s13973_s7 + $0xf90] sm:$0xf] }
 0x3cb   : > { %v10414_v32 = vor.u32 %v13052_v60, %v10413_v28  ;;  %v13029_v28 = vld [vmem:[%s13973_s7 + $0xea4] sm:$0xf0]  ;;  %v13025_v60 = vld [vmem:[%s13973_s7 + $0xe8c] sm:$0xf]  ;;  %v13062_v37 = vld [vmem:[%s13973_s7 + $0xfac] sm:$0xf0] }
 0x3cc   : > { %v10326_v35 = vor.u32 %v13029_v28, %v10325_v7  ;;  %v10429_v7 = vld [vmem:[%s13973_s7 + $0xf50] sm:$0xf] }
 0x3cd   : > { %v13054_v28 = vld [vmem:[%s13973_s7 + $0xf6c] sm:$0xf0] }
 0x3d0   : > { %7183 = vmatpush.bf16.xpose.msrb.mxu0 %v10046_v9  ;;  %7196 = vmatpush.bf16.xpose.msrb.mxu1 %v10050_v12  ;;  %v10426_v9 = vor.u32 %v13049_v6, %v10423_v8  ;;  %v10285_v6 = vld [vmem:[%s13973_s7 + $0xe40] sm:$0xf] }
 0x3d1   : > { %7209 = vmatpush.bf16.xpose.msrb.mxu2 %v10054_v41  ;;  %v13020_v8 = vld [vmem:[%s13973_s7 + $0xe5c] sm:$0xf0] }
 0x3d2   : > { %7222 = vmatpush.bf16.xpose.msrb.mxu3 %v10058_v49  ;;  %v10381_v49 = vld [vmem:[%s13973_s7 + $0xf00] sm:$0xf] }
 0x3d3   : > { %v10382_v58 = vor.u32 %v13044_v50, %v10381_v49 }
 0x3d8   : > { %7184 = vmatpush.bf16.xpose.msrb.mxu0 %v10014_v54  ;;  %7197 = vmatpush.bf16.xpose.msrb.mxu1 %v10018_v23  ;;  %v330_v23 = vld [vmem:[#allocation2 + $0x68] sm:$0xff] }
 0x3d9   : > { %7210 = vmatpush.bf16.xpose.msrb.mxu2 %v10022_v24 }
 0x3da   : > { %7223 = vmatpush.bf16.xpose.msrb.mxu3 %v10026_v26  ;;  %v13036_v26 = vld [vmem:[%s13973_s7 + $0xedc] sm:$0xf0] }
 0x3db   : > { %v10350_v40 = vor.u32 %v13036_v26, %v10349_v61  ;;  %v13067_v61 = vld [vmem:[%s13973_s7 + $0xfdc] sm:$0xf] }
 0x3dc   : > { %v7082_v10 = vpop.f32.mrf.mxu0  ;;  %v7095_v41 = vpop.f32.mrf.mxu1  ;;  %v10503_v26 = vld [vmem:[%s13973_s7 + $0xff8] sm:$0xf0] }
 0x3dd   : > { %v7083_v12 = vadd.f32 %v7082_v10, %v7070_v2  ;;  %v10330_v2 = vor.u32 %v13025_v60, %v10327_v62  ;;  %v13017_v10 = vld [vmem:[%s13973_s7 + $0xe4c] sm:$0xf]  ;;  %v13050_v60 = vld [vmem:[%s13973_s7 + $0xf54] sm:$0xf] }
 0x3de   : > { %v10431_v62 = vld [vmem:[%s13973_s7 + $0xf70] sm:$0xf0] }
 0x3df   : > { %7185 = vmatmul.bf16.vlgmr.msrb.gmra.mxu0 %v14145_v30  ;;  %7198 = vmatmul.bf16.vlgmr.msrb.gmra.mxu1 %v14155_v38  ;;  %v7096_v13 = vadd.f32 %v7095_v41, %v7083_v12  ;;  %v10295_v12 = vld [vmem:[%s13973_s7 + $0xe68] sm:$0xf0]  ;;  %v10286_v41 = vor.u32 %v13020_v8, %v10285_v6  ;;  %v10430_v6 = vor.u32 %v13054_v28, %v10429_v7  ;;  %v13022_v7 = vld [vmem:[%s13973_s7 + $0xe6c] sm:$0xf0]  ;;  %v13018_v28 = vld [vmem:[%s13973_s7 + $0xe54] sm:$0xf] }
 0x3e0   : > { %7229 = vmatpush.bf16.xpose.msra.mxu0 %v10478_v27  ;;  %7242 = vmatpush.bf16.xpose.msra.mxu1 %v10482_v29  ;;  %v13032_v27 = vld [vmem:[%s13973_s7 + $0xec4] sm:$0xf]  ;;  %v10298_v51 = vor.u32 %v13017_v10, %v10295_v12  ;;  %v10434_v8 = vor.u32 %v13050_v60, %v10431_v62  ;;  %v13042_v10 = vld [vmem:[%s13973_s7 + $0xf14] sm:$0xf]  ;;  %v10309_v62 = vld [vmem:[%s13973_s7 + $0xe58] sm:$0xf] }
 0x3e1   : > { %7255 = vmatpush.bf16.xpose.msra.mxu2 %v10486_v31  ;;  %7224 = vmatmul.bf16.vlgmr.msrb.gmra.mxu3 %v14157_v39  ;;  %v10351_v31 = vld [vmem:[%s13973_s7 + $0xee0] sm:$0xf0]  ;;  %v10399_v12 = vld [vmem:[%s13973_s7 + $0xf30] sm:$0xf0] }
 0x3e2   : > { %7268 = vmatpush.bf16.xpose.msra.mxu3 %v10490_v5  ;;  %7211 = vmatmul.bf16.vlgmr.msrb.gmra.mxu2 %v14150_v34  ;;  %v10357_v5 = vld [vmem:[%s13973_s7 + $0xec8] sm:$0xf]  ;;  %v10354_v42 = vor.u32 %v13032_v27, %v10351_v31  ;;  %v10303_v60 = vld [vmem:[%s13973_s7 + $0xe70] sm:$0xf0] }
 0x3e3   : > { %v10358_v44 = vor.u32 %v13037_v33, %v10357_v5  ;;  %v10506_v33 = vor.u32 %v13067_v61, %v10503_v26 }
 0x3e4   : > { %v7121_v4 = vpop.f32.mrf.mxu3  ;;  %v7084_v63 = vpop.f32.mrf.mxu0 }
 0x3e5   : > { %v7108_v19 = vpop.f32.mrf.mxu2  ;;  %v7097_v24 = vpop.f32.mrf.mxu1  ;;  %v10501_v63 = vld [vmem:[%s13973_s7 + $0xfd8] sm:$0xf] }
 0x3e6   : > { %v7109_v54 = vadd.f32 %v7108_v19, %v7096_v13  ;;  %v10253_v13 = vld [vmem:[%s13973_s7 + $0xe00] sm:$0xf]  ;;  %v10263_v19 = vld [vmem:[%s13973_s7 + $0xe28] sm:$0xf0]  ;;  %v10258_v24 = vor.u32 %v13008_v18, %v10255_v47 }
 0x3e8   : > { %7230 = vmatpush.bf16.xpose.msra.mxu0 %v10446_v52  ;;  %7243 = vmatpush.bf16.xpose.msra.mxu1 %v10450_v53  ;;  %v7122_v25 = vadd.f32 %v7121_v4, %v7109_v54  ;;  %v10317_v52 = vld [vmem:[%s13973_s7 + $0xe80] sm:$0xf]  ;;  %v13066_v54 = vld [vmem:[%s13973_s7 + $0xfd4] sm:$0xf] }
 0x3e9   : > { %7256 = vmatpush.bf16.xpose.msra.mxu2 %v10454_v55  ;;  %v13028_v53 = vld [vmem:[%s13973_s7 + $0xe9c] sm:$0xf0]  ;;  %v13024_v55 = vld [vmem:[%s13973_s7 + $0xe84] sm:$0xf]  ;;  %v10495_v4 = vld [vmem:[%s13973_s7 + $0xff0] sm:$0xf0] }
 0x3ea   : > { %7269 = vmatpush.bf16.xpose.msra.mxu3 %v10458_v59  ;;  %v8170_v29 = vadd.f32 %v7122_v25, %v330_v23  ;;  %v10319_v59 = vld [vmem:[%s13973_s7 + $0xea0] sm:$0xf0]  ;;  %v10318_v0 = vor.u32 %v13028_v53, %v10317_v52  ;;  %v13071_v23 = vld [vmem:[%s13973_s7 + $0xff4] sm:$0xf0]  ;;  %v10262_v25 = vor.u32 %v13013_v57, %v10261_v56  ;;  %v10498_v31 = vor.u32 %v13066_v54, %v10495_v4  ;;  %v10365_v56 = vld [vmem:[%s13973_s7 + $0xed0] sm:$0xf] }
 0x3eb   : > { %v10322_v11 = vor.u32 %v13024_v55, %v10319_v59  ;;  %v10502_v5 = vor.u32 %v13071_v23, %v10501_v63  ;;  %v10462_v52 = vor.u32 %v13062_v37, %v10461_v36  ;;  %v13038_v57 = vld [vmem:[%s13973_s7 + $0xeec] sm:$0xf0]  ;;  %v13035_v54 = vld [vmem:[%s13973_s7 + $0xedc] sm:$0xf]  ;;  %v13031_v36 = vld [vmem:[%s13973_s7 + $0xeb4] sm:$0xf0] }
 0x3ec   : > { %8186 = vst [vmem:[#allocation2 + $0x68] sm:$0xff] %v8170_v29  ;;  %v7123_v48 = vpop.f32.mrf.mxu3  ;;  %v10366_v4 = vor.u32 %v13038_v57, %v10365_v56  ;;  %v13027_v37 = vld [vmem:[%s13973_s7 + $0xe9c] sm:$0xf]  ;;  %v10735_v56 = vld [vmem:[%s13973_s7 + $0x11e0] sm:$0xf0] }
 0x3ed   : > { %v7110_v45 = vpop.f32.mrf.mxu2  ;;  %v10471_v48 = vld [vmem:[%s13973_s7 + $0xfb8] sm:$0xf0]  ;;  %v10741_v57 = vld [vmem:[%s13973_s7 + $0x11c8] sm:$0xf] }
 0x3ee   : > { %v13063_v45 = vld [vmem:[%s13973_s7 + $0xfb4] sm:$0xf0] }
 0x3f0   : > { %7231 = vmatpush.bf16.xpose.msra.mxu0 %v10414_v32  ;;  %7244 = vmatpush.bf16.xpose.msra.mxu1 %v10418_v15  ;;  %v13016_v32 = vld [vmem:[%s13973_s7 + $0xe44] sm:$0xf] }
 0x3f1   : > { %7257 = vmatpush.bf16.xpose.msra.mxu2 %v10422_v43  ;;  %v10287_v15 = vld [vmem:[%s13973_s7 + $0xe60] sm:$0xf0]  ;;  %v10293_v43 = vld [vmem:[%s13973_s7 + $0xe48] sm:$0xf] }
 0x3f2   : > { %7270 = vmatpush.bf16.xpose.msra.mxu3 %v10426_v9  ;;  %v13021_v9 = vld [vmem:[%s13973_s7 + $0xe64] sm:$0xf0]  ;;  %v10290_v49 = vor.u32 %v13016_v32, %v10287_v15 }
 0x3f3   : > { %v10294_v50 = vor.u32 %v13021_v9, %v10293_v43  ;;  %v10397_v43 = vld [vmem:[%s13973_s7 + $0xf10] sm:$0xf] }
 0x3f4   : > { %v13046_v9 = vld [vmem:[%s13973_s7 + $0xf2c] sm:$0xf0] }
 0x3f8   : > { %7232 = vmatpush.bf16.xpose.msra.mxu0 %v10382_v58  ;;  %7245 = vmatpush.bf16.xpose.msra.mxu1 %v10386_v20  ;;  %v13009_v58 = vld [vmem:[%s13973_s7 + $0xe0c] sm:$0xf]  ;;  %v10493_v20 = vld [vmem:[%s13973_s7 + $0xfd0] sm:$0xf] }
 0x3f9   : > { %7258 = vmatpush.bf16.xpose.msra.mxu2 %v10390_v22  ;;  %v13070_v22 = vld [vmem:[%s13973_s7 + $0xfec] sm:$0xf0]  ;;  %v10266_v27 = vor.u32 %v13009_v58, %v10263_v19  ;;  %v13034_v58 = vld [vmem:[%s13973_s7 + $0xed4] sm:$0xf] }
 0x3fa   : > { %7271 = vmatpush.bf16.xpose.msra.mxu3 %v10394_v1  ;;  %v10254_v1 = vor.u32 %v13012_v14, %v10253_v13  ;;  %v10494_v29 = vor.u32 %v13070_v22, %v10493_v20  ;;  %v10398_v13 = vor.u32 %v13046_v9, %v10397_v43  ;;  %v10402_v14 = vor.u32 %v13042_v10, %v10399_v12  ;;  %v10367_v19 = vld [vmem:[%s13973_s7 + $0xef0] sm:$0xf0]  ;;  %v10373_v20 = vld [vmem:[%s13973_s7 + $0xed8] sm:$0xf]  ;;  %v10269_v43 = vld [vmem:[%s13973_s7 + $0xe10] sm:$0xf] }
 0x3fb   : > { %v13039_v22 = vld [vmem:[%s13973_s7 + $0xef4] sm:$0xf0]  ;;  %v13014_v9 = vld [vmem:[%s13973_s7 + $0xe2c] sm:$0xf0]  ;;  %v13010_v10 = vld [vmem:[%s13973_s7 + $0xe14] sm:$0xf] }
 0x3fc   : > { %v10271_v12 = vld [vmem:[%s13973_s7 + $0xe30] sm:$0xf0] }
 0x400   : > { %7233 = vmatpush.bf16.xpose.msra.mxu0 %v10350_v40  ;;  %7246 = vmatpush.bf16.xpose.msra.mxu1 %v10354_v42  ;;  %v13058_v40 = vld [vmem:[%s13973_s7 + $0xf94] sm:$0xf] }
 0x401   : > { %7259 = vmatpush.bf16.xpose.msra.mxu2 %v10358_v44  ;;  %v10463_v42 = vld [vmem:[%s13973_s7 + $0xfb0] sm:$0xf0]  ;;  %v10469_v44 = vld [vmem:[%s13973_s7 + $0xf98] sm:$0xf] }
 0x402   : > { %7272 = vmatpush.bf16.xpose.msra.mxu3 %v10362_v46  ;;  %v13059_v46 = vld [vmem:[%s13973_s7 + $0xf9c] sm:$0xf]  ;;  %v10466_v53 = vor.u32 %v13058_v40, %v10463_v42  ;;  %v10470_v55 = vor.u32 %v13063_v45, %v10469_v44 }
 0x403   : > { %v10474_v59 = vor.u32 %v13059_v46, %v10471_v48  ;;  %v10343_v40 = vld [vmem:[%s13973_s7 + $0xeb8] sm:$0xf0] }
 0x408   : > { %7234 = vmatpush.bf16.xpose.msra.mxu0 %v10318_v0  ;;  %7247 = vmatpush.bf16.xpose.msra.mxu1 %v10322_v11  ;;  %v10437_v0 = vld [vmem:[%s13973_s7 + $0xf58] sm:$0xf] }
 0x409   : > { %7260 = vmatpush.bf16.xpose.msra.mxu2 %v10326_v35  ;;  %v13055_v11 = vld [vmem:[%s13973_s7 + $0xf74] sm:$0xf0]  ;;  %v13051_v35 = vld [vmem:[%s13973_s7 + $0xf5c] sm:$0xf] }
 0x40a   : > { %7273 = vmatpush.bf16.xpose.msra.mxu3 %v10330_v2  ;;  %v10439_v2 = vld [vmem:[%s13973_s7 + $0xf78] sm:$0xf0]  ;;  %v10438_v32 = vor.u32 %v13055_v11, %v10437_v0  ;;  %v13023_v0 = vld [vmem:[%s13973_s7 + $0xe74] sm:$0xf0] }
 0x40b   : > { %v10442_v15 = vor.u32 %v13051_v35, %v10439_v2  ;;  %v13019_v11 = vld [vmem:[%s13973_s7 + $0xe5c] sm:$0xf] }
 0x40c   : > { %v10311_v35 = vld [vmem:[%s13973_s7 + $0xe78] sm:$0xf0] }
 0x410   : > { %7235 = vmatpush.bf16.xpose.msra.mxu0 %v10286_v41  ;;  %7248 = vmatpush.bf16.xpose.msra.mxu1 %v10290_v49  ;;  %v10405_v41 = vld [vmem:[%s13973_s7 + $0xf18] sm:$0xf] }
 0x411   : > { %7261 = vmatpush.bf16.xpose.msra.mxu2 %v10294_v50  ;;  %v13047_v49 = vld [vmem:[%s13973_s7 + $0xf34] sm:$0xf0]  ;;  %v13043_v50 = vld [vmem:[%s13973_s7 + $0xf1c] sm:$0xf] }
 0x412   : > { %7274 = vmatpush.bf16.xpose.msra.mxu3 %v10298_v51  ;;  %v10407_v51 = vld [vmem:[%s13973_s7 + $0xf38] sm:$0xf0]  ;;  %v10406_v18 = vor.u32 %v13047_v49, %v10405_v41  ;;  %v10277_v41 = vld [vmem:[%s13973_s7 + $0xe18] sm:$0xf] }
 0x413   : > { %v10410_v47 = vor.u32 %v13043_v50, %v10407_v51  ;;  %v13015_v49 = vld [vmem:[%s13973_s7 + $0xe34] sm:$0xf0]  ;;  %v13011_v50 = vld [vmem:[%s13973_s7 + $0xe1c] sm:$0xf] }
 0x414   : > { %v10279_v51 = vld [vmem:[%s13973_s7 + $0xe38] sm:$0xf0] }
 0x418   : > { %7236 = vmatpush.bf16.xpose.msra.mxu0 %v10254_v1  ;;  %7249 = vmatpush.bf16.xpose.msra.mxu1 %v10258_v24  ;;  %v10375_v1 = vld [vmem:[%s13973_s7 + $0xef8] sm:$0xf0]  ;;  %v10370_v24 = vor.u32 %v13034_v58, %v10367_v19  ;;  %v13133_v58 = vld [vmem:[%s13973_s7 + $0x11e4] sm:$0xf0]  ;;  %v10274_v19 = vor.u32 %v13010_v10, %v10271_v12  ;;  %v10639_v10 = vld [vmem:[%s13973_s7 + $0x1120] sm:$0xf0] }
 0x419   : > { %7262 = vmatpush.bf16.xpose.msra.mxu2 %v10262_v25  ;;  %v10374_v25 = vor.u32 %v13039_v22, %v10373_v20  ;;  %v10378_v61 = vor.u32 %v13035_v54, %v10375_v1  ;;  %v10278_v20 = vor.u32 %v13015_v49, %v10277_v41  ;;  %v13129_v22 = vld [vmem:[%s13973_s7 + $0x11cc] sm:$0xf]  ;;  %v10282_v1 = vor.u32 %v13011_v50, %v10279_v51  ;;  %v10645_v12 = vld [vmem:[%s13973_s7 + $0x1108] sm:$0xf] }
 0x41a   : > { %7275 = vmatpush.bf16.xpose.msra.mxu3 %v10266_v27  ;;  %v10333_v27 = vld [vmem:[%s13973_s7 + $0xe90] sm:$0xf]  ;;  %v10743_v54 = vld [vmem:[%s13973_s7 + $0x11e8] sm:$0xf0]  ;;  %v13109_v41 = vld [vmem:[%s13973_s7 + $0x1124] sm:$0xf0] }
 0x41b   : > { %v13105_v49 = vld [vmem:[%s13973_s7 + $0x110c] sm:$0xf] }
 0x41c   : > { %v15145_v63 = vpop.f32.mrf.mxu0  ;;  %v15147_v23 = vpop.f32.mrf.mxu1  ;;  %v10647_v50 = vld [vmem:[%s13973_s7 + $0x1128] sm:$0xf0] }
 0x41f   : > { %7237 = vmatmul.bf16.vlgmr.msra.gmra.mxu0 %v14089_v16  ;;  %7250 = vmatmul.bf16.vlgmr.msra.gmra.mxu1 %v14096_v21 }
 0x420   : > { %7281 = vmatpush.bf16.xpose.msrb.mxu0 %v10494_v29  ;;  %7294 = vmatpush.bf16.xpose.msrb.mxu1 %v10498_v31  ;;  %v13030_v29 = vld [vmem:[%s13973_s7 + $0xeac] sm:$0xf0]  ;;  %v13026_v31 = vld [vmem:[%s13973_s7 + $0xe94] sm:$0xf] }
 0x421   : > { %7307 = vmatpush.bf16.xpose.msrb.mxu2 %v10502_v5  ;;  %7276 = vmatmul.bf16.vlgmr.msra.gmra.mxu3 %v14091_v17  ;;  %v10335_v5 = vld [vmem:[%s13973_s7 + $0xeb0] sm:$0xf0]  ;;  %v10334_v42 = vor.u32 %v13030_v29, %v10333_v27  ;;  %v10701_v27 = vld [vmem:[%s13973_s7 + $0x1180] sm:$0xf] }
 0x422   : > { %7320 = vmatpush.bf16.xpose.msrb.mxu3 %v10506_v33  ;;  %7263 = vmatmul.bf16.vlgmr.msra.gmra.mxu2 %v14078_v3  ;;  %v10341_v33 = vld [vmem:[%s13973_s7 + $0xe98] sm:$0xf]  ;;  %v10338_v46 = vor.u32 %v13026_v31, %v10335_v5  ;;  %v13124_v29 = vld [vmem:[%s13973_s7 + $0x119c] sm:$0xf0]  ;;  %v13120_v31 = vld [vmem:[%s13973_s7 + $0x1184] sm:$0xf] }
 0x423   : > { %v10342_v48 = vor.u32 %v13031_v36, %v10341_v33  ;;  %v10703_v5 = vld [vmem:[%s13973_s7 + $0x11a0] sm:$0xf0]  ;;  %v10709_v33 = vld [vmem:[%s13973_s7 + $0x1188] sm:$0xf] }
 0x424   : > { %v15159_v44 = vpop.f32.mrf.mxu3  ;;  %v7136_v45 = vpop.f32.mrf.mxu0  ;;  %v13125_v36 = vld [vmem:[%s13973_s7 + $0x11a4] sm:$0xf0] }
 0x425   : > { %v15149_v26 = vpop.f32.mrf.mxu2  ;;  %v10702_v45 = vor.u32 %v13124_v29, %v10701_v27  ;;  %v13101_v27 = vld [vmem:[%s13973_s7 + $0x10e4] sm:$0xf0]  ;;  %v13097_v29 = vld [vmem:[%s13973_s7 + $0x10cc] sm:$0xf] }
 0x428   : > { %7282 = vmatpush.bf16.xpose.msrb.mxu0 %v10462_v52  ;;  %7295 = vmatpush.bf16.xpose.msrb.mxu1 %v10466_v53  ;;  %v7149_v52 = vpop.f32.mrf.mxu1  ;;  %v10346_v53 = vor.u32 %v13027_v37, %v10343_v40  ;;  %v7148_v37 = vadd.f32 %v15147_v23, %v15145_v63  ;;  %v13121_v40 = vld [vmem:[%s13973_s7 + $0x118c] sm:$0xf]  ;;  %v10669_v23 = vld [vmem:[%s13973_s7 + $0x1140] sm:$0xf] }
 0x429   : > { %7308 = vmatpush.bf16.xpose.msrb.mxu2 %v10470_v55 }
 0x42a   : > { %7321 = vmatpush.bf16.xpose.msrb.mxu3 %v10474_v59  ;;  %v10301_v59 = vld [vmem:[%s13973_s7 + $0xe50] sm:$0xf]  ;;  %v7161_v63 = vadd.f32 %v15149_v26, %v7148_v37 }
 0x42b   : > { %v10302_v2 = vor.u32 %v13022_v7, %v10301_v59  ;;  %v10671_v59 = vld [vmem:[%s13973_s7 + $0x1160] sm:$0xf0]  ;;  %v10677_v7 = vld [vmem:[%s13973_s7 + $0x1148] sm:$0xf] }
 0x42d   : > { %v7162_v55 = vpop.f32.mrf.mxu2 }
 0x42e   : > { %v13112_v55 = vld [vmem:[%s13973_s7 + $0x1144] sm:$0xf] }
 0x430   : > { %7283 = vmatpush.bf16.xpose.msrb.mxu0 %v10430_v6  ;;  %7296 = vmatpush.bf16.xpose.msrb.mxu1 %v10434_v8  ;;  %v7175_v6 = vpop.f32.mrf.mxu3  ;;  %v10306_v8 = vor.u32 %v13018_v28, %v10303_v60  ;;  %v13117_v28 = vld [vmem:[%s13973_s7 + $0x1164] sm:$0xf0]  ;;  %v7174_v60 = vadd.f32 %v15159_v44, %v7161_v63  ;;  %v13104_v44 = vld [vmem:[%s13973_s7 + $0x1104] sm:$0xf] }
 0x431   : > { %7309 = vmatpush.bf16.xpose.msrb.mxu2 %v10438_v32  ;;  %v10310_v32 = vor.u32 %v13023_v0, %v10309_v62  ;;  %v13113_v62 = vld [vmem:[%s13973_s7 + $0x114c] sm:$0xf]  ;;  %v10581_v63 = vld [vmem:[%s13973_s7 + $0x1088] sm:$0xf] }
 0x432   : > { %7322 = vmatpush.bf16.xpose.msrb.mxu3 %v10442_v15  ;;  %v10314_v15 = vor.u32 %v13019_v11, %v10311_v35  ;;  %v10679_v0 = vld [vmem:[%s13973_s7 + $0x1168] sm:$0xf0]  ;;  %v10674_v11 = vor.u32 %v13112_v55, %v10671_v59  ;;  %v10678_v35 = vor.u32 %v13117_v28, %v10677_v7 }
 0x433   : > { %v10583_v55 = vld [vmem:[%s13973_s7 + $0x10a8] sm:$0xf0] }
 0x438   : > { %7284 = vmatpush.bf16.xpose.msrb.mxu0 %v10398_v13  ;;  %7297 = vmatpush.bf16.xpose.msrb.mxu1 %v10402_v14  ;;  %v10733_v13 = vld [vmem:[%s13973_s7 + $0x11c0] sm:$0xf] }
 0x439   : > { %7310 = vmatpush.bf16.xpose.msrb.mxu2 %v10406_v18  ;;  %v13132_v14 = vld [vmem:[%s13973_s7 + $0x11dc] sm:$0xf0]  ;;  %v13128_v18 = vld [vmem:[%s13973_s7 + $0x11c4] sm:$0xf] }
 0x43a   : > { %7323 = vmatpush.bf16.xpose.msrb.mxu3 %v10410_v47  ;;  %v10270_v47 = vor.u32 %v13014_v9, %v10269_v43  ;;  %v13108_v43 = vld [vmem:[%s13973_s7 + $0x111c] sm:$0xf0] }
 0x440   : > { %7285 = vmatpush.bf16.xpose.msrb.mxu0 %v10366_v4  ;;  %7298 = vmatpush.bf16.xpose.msrb.mxu1 %v10370_v24  ;;  %v10734_v4 = vor.u32 %v13132_v14, %v10733_v13  ;;  %v10738_v24 = vor.u32 %v13128_v18, %v10735_v56  ;;  %v10642_v14 = vor.u32 %v13104_v44, %v10639_v10  ;;  %v13076_v10 = vld [vmem:[%s13973_s7 + $0x101c] sm:$0xf0] }
 0x441   : > { %7311 = vmatpush.bf16.xpose.msrb.mxu2 %v10374_v25  ;;  %v10742_v25 = vor.u32 %v13133_v58, %v10741_v57  ;;  %v10646_v18 = vor.u32 %v13109_v41, %v10645_v12  ;;  %v10650_v56 = vor.u32 %v13105_v49, %v10647_v50  ;;  %v13072_v12 = vld [vmem:[%s13973_s7 + $0x1004] sm:$0xf]  ;;  %v10517_v49 = vld [vmem:[%s13973_s7 + $0x1008] sm:$0xf] }
 0x442   : > { %7324 = vmatpush.bf16.xpose.msrb.mxu3 %v10378_v61  ;;  %v10746_v61 = vor.u32 %v13129_v22, %v10743_v54  ;;  %v10605_v54 = vld [vmem:[%s13973_s7 + $0x10c0] sm:$0xf]  ;;  %v10511_v41 = vld [vmem:[%s13973_s7 + $0x1020] sm:$0xf0]  ;;  %v13077_v50 = vld [vmem:[%s13973_s7 + $0x1024] sm:$0xf0] }
 0x448   : > { %7286 = vmatpush.bf16.xpose.msrb.mxu0 %v10334_v42  ;;  %7299 = vmatpush.bf16.xpose.msrb.mxu1 %v10338_v46  ;;  %v10711_v42 = vld [vmem:[%s13973_s7 + $0x11a8] sm:$0xf0]  ;;  %v10706_v46 = vor.u32 %v13120_v31, %v10703_v5 }
 0x449   : > { %7312 = vmatpush.bf16.xpose.msrb.mxu2 %v10342_v48  ;;  %v10710_v48 = vor.u32 %v13125_v36, %v10709_v33  ;;  %v10714_v52 = vor.u32 %v13121_v40, %v10711_v42  ;;  %v10615_v31 = vld [vmem:[%s13973_s7 + $0x10e8] sm:$0xf0] }
 0x44a   : > { %7325 = vmatpush.bf16.xpose.msrb.mxu3 %v10346_v53  ;;  %v13116_v53 = vld [vmem:[%s13973_s7 + $0x115c] sm:$0xf0]  ;;  %v10618_v40 = vor.u32 %v13097_v29, %v10615_v31  ;;  %v10717_v29 = vld [vmem:[%s13973_s7 + $0x1190] sm:$0xf] }
 0x44b   : > { %v10670_v26 = vor.u32 %v13116_v53, %v10669_v23  ;;  %v13093_v23 = vld [vmem:[%s13973_s7 + $0x10a4] sm:$0xf0]  ;;  %v13089_v53 = vld [vmem:[%s13973_s7 + $0x108c] sm:$0xf]  ;;  %v13126_v31 = vld [vmem:[%s13973_s7 + $0x11ac] sm:$0xf0] }
 0x44c   : > { %v10582_v28 = vor.u32 %v13093_v23, %v10581_v63  ;;  %v10685_v63 = vld [vmem:[%s13973_s7 + $0x1150] sm:$0xf] }
 0x44d   : > { %v13118_v23 = vld [vmem:[%s13973_s7 + $0x116c] sm:$0xf0] }
 0x450   : > { %7287 = vmatpush.bf16.xpose.msrb.mxu0 %v10302_v2  ;;  %7300 = vmatpush.bf16.xpose.msrb.mxu1 %v10306_v8  ;;  %v10682_v2 = vor.u32 %v13113_v62, %v10679_v0  ;;  %v10541_v62 = vld [vmem:[%s13973_s7 + $0x1040] sm:$0xf] }
 0x451   : > { %7313 = vmatpush.bf16.xpose.msrb.mxu2 %v10310_v32  ;;  %v13084_v0 = vld [vmem:[%s13973_s7 + $0x105c] sm:$0xf0] }
 0x452   : > { %7326 = vmatpush.bf16.xpose.msrb.mxu3 %v10314_v15  ;;  %v10637_v15 = vld [vmem:[%s13973_s7 + $0x1100] sm:$0xf] }
 0x453   : > { %v10638_v51 = vor.u32 %v13108_v43, %v10637_v15 }
 0x458   : > { %7288 = vmatpush.bf16.xpose.msrb.mxu0 %v10270_v47  ;;  %7301 = vmatpush.bf16.xpose.msrb.mxu1 %v10274_v19  ;;  %v331_v19 = vld [vmem:[#allocation2 + $0x8] sm:$0xff] }
 0x459   : > { %7314 = vmatpush.bf16.xpose.msrb.mxu2 %v10278_v20 }
 0x45a   : > { %7327 = vmatpush.bf16.xpose.msrb.mxu3 %v10282_v1  ;;  %v13100_v1 = vld [vmem:[%s13973_s7 + $0x10dc] sm:$0xf0] }
 0x45b   : > { %v10606_v5 = vor.u32 %v13100_v1, %v10605_v54  ;;  %v13131_v54 = vld [vmem:[%s13973_s7 + $0x11dc] sm:$0xf] }
 0x45c   : > { %v7186_v6 = vpop.f32.mrf.mxu0  ;;  %v7199_v32 = vpop.f32.mrf.mxu1  ;;  %v10759_v1 = vld [vmem:[%s13973_s7 + $0x11f8] sm:$0xf0] }
 0x45d   : > { %v7187_v8 = vadd.f32 %v7186_v6, %v7174_v60  ;;  %v10586_v60 = vor.u32 %v13089_v53, %v10583_v55  ;;  %v13081_v6 = vld [vmem:[%s13973_s7 + $0x104c] sm:$0xf]  ;;  %v13114_v53 = vld [vmem:[%s13973_s7 + $0x1154] sm:$0xf] }
 0x45e   : > { %v10687_v55 = vld [vmem:[%s13973_s7 + $0x1170] sm:$0xf0] }
 0x45f   : > { %7289 = vmatmul.bf16.vlgmr.msrb.gmra.mxu0 %v14145_v30  ;;  %7302 = vmatmul.bf16.vlgmr.msrb.gmra.mxu1 %v14155_v38  ;;  %v7200_v9 = vadd.f32 %v7199_v32, %v7187_v8  ;;  %v10551_v8 = vld [vmem:[%s13973_s7 + $0x1068] sm:$0xf0]  ;;  %v10542_v32 = vor.u32 %v13084_v0, %v10541_v62  ;;  %v10686_v62 = vor.u32 %v13118_v23, %v10685_v63  ;;  %v13086_v63 = vld [vmem:[%s13973_s7 + $0x106c] sm:$0xf0]  ;;  %v13082_v23 = vld [vmem:[%s13973_s7 + $0x1054] sm:$0xf] }
 0x460   : > { %7333 = vmatpush.bf16.xpose.msra.mxu0 %v10734_v4  ;;  %7346 = vmatpush.bf16.xpose.msra.mxu1 %v10738_v24  ;;  %v13096_v4 = vld [vmem:[%s13973_s7 + $0x10c4] sm:$0xf]  ;;  %v10554_v44 = vor.u32 %v13081_v6, %v10551_v8  ;;  %v10690_v0 = vor.u32 %v13114_v53, %v10687_v55  ;;  %v13106_v6 = vld [vmem:[%s13973_s7 + $0x1114] sm:$0xf]  ;;  %v10565_v55 = vld [vmem:[%s13973_s7 + $0x1058] sm:$0xf] }
 0x461   : > { %7359 = vmatpush.bf16.xpose.msra.mxu2 %v10742_v25  ;;  %7328 = vmatmul.bf16.vlgmr.msrb.gmra.mxu3 %v14157_v39  ;;  %v10607_v25 = vld [vmem:[%s13973_s7 + $0x10e0] sm:$0xf0]  ;;  %v10655_v8 = vld [vmem:[%s13973_s7 + $0x1130] sm:$0xf0] }
 0x462   : > { %7372 = vmatpush.bf16.xpose.msra.mxu3 %v10746_v61  ;;  %7315 = vmatmul.bf16.vlgmr.msrb.gmra.mxu2 %v14150_v34  ;;  %v10613_v61 = vld [vmem:[%s13973_s7 + $0x10c8] sm:$0xf]  ;;  %v10610_v33 = vor.u32 %v13096_v4, %v10607_v25  ;;  %v10559_v53 = vld [vmem:[%s13973_s7 + $0x1070] sm:$0xf0] }
 0x463   : > { %v10614_v36 = vor.u32 %v13101_v27, %v10613_v61  ;;  %v10762_v27 = vor.u32 %v13131_v54, %v10759_v1 }
 0x464   : > { %v7225_v57 = vpop.f32.mrf.mxu3  ;;  %v7188_v58 = vpop.f32.mrf.mxu0 }
 0x465   : > { %v7212_v13 = vpop.f32.mrf.mxu2  ;;  %v7201_v20 = vpop.f32.mrf.mxu1  ;;  %v10757_v58 = vld [vmem:[%s13973_s7 + $0x11d8] sm:$0xf] }
 0x466   : > { %v7213_v47 = vadd.f32 %v7212_v13, %v7200_v9  ;;  %v10509_v9 = vld [vmem:[%s13973_s7 + $0x1000] sm:$0xf]  ;;  %v10519_v13 = vld [vmem:[%s13973_s7 + $0x1028] sm:$0xf0]  ;;  %v10514_v20 = vor.u32 %v13072_v12, %v10511_v41 }
 0x468   : > { %7334 = vmatpush.bf16.xpose.msra.mxu0 %v10702_v45  ;;  %7347 = vmatpush.bf16.xpose.msra.mxu1 %v10706_v46  ;;  %v7226_v22 = vadd.f32 %v7225_v57, %v7213_v47  ;;  %v10573_v45 = vld [vmem:[%s13973_s7 + $0x1080] sm:$0xf]  ;;  %v13130_v47 = vld [vmem:[%s13973_s7 + $0x11d4] sm:$0xf] }
 0x469   : > { %7360 = vmatpush.bf16.xpose.msra.mxu2 %v10710_v48  ;;  %v13092_v46 = vld [vmem:[%s13973_s7 + $0x109c] sm:$0xf0]  ;;  %v13088_v48 = vld [vmem:[%s13973_s7 + $0x1084] sm:$0xf]  ;;  %v10751_v57 = vld [vmem:[%s13973_s7 + $0x11f0] sm:$0xf0] }
 0x46a   : > { %7373 = vmatpush.bf16.xpose.msra.mxu3 %v10714_v52  ;;  %v8171_v24 = vadd.f32 %v7226_v22, %v331_v19  ;;  %v10575_v52 = vld [vmem:[%s13973_s7 + $0x10a0] sm:$0xf0]  ;;  %v10574_v59 = vor.u32 %v13092_v46, %v10573_v45  ;;  %v13135_v19 = vld [vmem:[%s13973_s7 + $0x11f4] sm:$0xf0]  ;;  %v10518_v22 = vor.u32 %v13077_v50, %v10517_v49  ;;  %v10754_v25 = vor.u32 %v13130_v47, %v10751_v57  ;;  %v10621_v49 = vld [vmem:[%s13973_s7 + $0x10d0] sm:$0xf] }
 0x46b   : > { %v10578_v7 = vor.u32 %v13088_v48, %v10575_v52  ;;  %v10758_v61 = vor.u32 %v13135_v19, %v10757_v58  ;;  %v10718_v45 = vor.u32 %v13126_v31, %v10717_v29  ;;  %v13102_v50 = vld [vmem:[%s13973_s7 + $0x10ec] sm:$0xf0]  ;;  %v13099_v47 = vld [vmem:[%s13973_s7 + $0x10dc] sm:$0xf]  ;;  %v13095_v29 = vld [vmem:[%s13973_s7 + $0x10b4] sm:$0xf0] }
 0x46c   : > { %8187 = vst [vmem:[#allocation2 + $0x8] sm:$0xff] %v8171_v24  ;;  %v7227_v42 = vpop.f32.mrf.mxu3  ;;  %v10622_v57 = vor.u32 %v13102_v50, %v10621_v49  ;;  %v13091_v31 = vld [vmem:[%s13973_s7 + $0x109c] sm:$0xf]  ;;  %v10991_v49 = vld [vmem:[%s13973_s7 + $0x13e0] sm:$0xf0] }
 0x46d   : > { %v7214_v37 = vpop.f32.mrf.mxu2  ;;  %v10727_v42 = vld [vmem:[%s13973_s7 + $0x11b8] sm:$0xf0]  ;;  %v10997_v50 = vld [vmem:[%s13973_s7 + $0x13c8] sm:$0xf] }
 0x46e   : > { %v13127_v37 = vld [vmem:[%s13973_s7 + $0x11b4] sm:$0xf0] }
 0x470   : > { %7335 = vmatpush.bf16.xpose.msra.mxu0 %v10670_v26  ;;  %7348 = vmatpush.bf16.xpose.msra.mxu1 %v10674_v11  ;;  %v13080_v26 = vld [vmem:[%s13973_s7 + $0x1044] sm:$0xf] }
 0x471   : > { %7361 = vmatpush.bf16.xpose.msra.mxu2 %v10678_v35  ;;  %v10543_v11 = vld [vmem:[%s13973_s7 + $0x1060] sm:$0xf0]  ;;  %v10549_v35 = vld [vmem:[%s13973_s7 + $0x1048] sm:$0xf] }
 0x472   : > { %7374 = vmatpush.bf16.xpose.msra.mxu3 %v10682_v2  ;;  %v13085_v2 = vld [vmem:[%s13973_s7 + $0x1064] sm:$0xf0]  ;;  %v10546_v15 = vor.u32 %v13080_v26, %v10543_v11 }
 0x473   : > { %v10550_v43 = vor.u32 %v13085_v2, %v10549_v35  ;;  %v10653_v35 = vld [vmem:[%s13973_s7 + $0x1110] sm:$0xf] }
 0x474   : > { %v13110_v2 = vld [vmem:[%s13973_s7 + $0x112c] sm:$0xf0] }
 0x478   : > { %7336 = vmatpush.bf16.xpose.msra.mxu0 %v10638_v51  ;;  %7349 = vmatpush.bf16.xpose.msra.mxu1 %v10642_v14  ;;  %v13073_v51 = vld [vmem:[%s13973_s7 + $0x100c] sm:$0xf]  ;;  %v10749_v14 = vld [vmem:[%s13973_s7 + $0x11d0] sm:$0xf] }
 0x479   : > { %7362 = vmatpush.bf16.xpose.msra.mxu2 %v10646_v18  ;;  %v13134_v18 = vld [vmem:[%s13973_s7 + $0x11ec] sm:$0xf0]  ;;  %v10522_v4 = vor.u32 %v13073_v51, %v10519_v13  ;;  %v13098_v51 = vld [vmem:[%s13973_s7 + $0x10d4] sm:$0xf] }
 0x47a   : > { %7375 = vmatpush.bf16.xpose.msra.mxu3 %v10650_v56  ;;  %v10510_v56 = vor.u32 %v13076_v10, %v10509_v9  ;;  %v10750_v24 = vor.u32 %v13134_v18, %v10749_v14  ;;  %v10654_v9 = vor.u32 %v13110_v2, %v10653_v35  ;;  %v10658_v10 = vor.u32 %v13106_v6, %v10655_v8  ;;  %v10623_v13 = vld [vmem:[%s13973_s7 + $0x10f0] sm:$0xf0]  ;;  %v10629_v14 = vld [vmem:[%s13973_s7 + $0x10d8] sm:$0xf]  ;;  %v10525_v35 = vld [vmem:[%s13973_s7 + $0x1010] sm:$0xf] }
 0x47b   : > { %v13103_v18 = vld [vmem:[%s13973_s7 + $0x10f4] sm:$0xf0]  ;;  %v13078_v2 = vld [vmem:[%s13973_s7 + $0x102c] sm:$0xf0]  ;;  %v13074_v6 = vld [vmem:[%s13973_s7 + $0x1014] sm:$0xf] }
 0x47c   : > { %v10527_v8 = vld [vmem:[%s13973_s7 + $0x1030] sm:$0xf0] }
 0x480   : > { %7337 = vmatpush.bf16.xpose.msra.mxu0 %v10606_v5  ;;  %7350 = vmatpush.bf16.xpose.msra.mxu1 %v10610_v33  ;;  %v13122_v5 = vld [vmem:[%s13973_s7 + $0x1194] sm:$0xf] }
 0x481   : > { %7363 = vmatpush.bf16.xpose.msra.mxu2 %v10614_v36  ;;  %v10719_v33 = vld [vmem:[%s13973_s7 + $0x11b0] sm:$0xf0]  ;;  %v10725_v36 = vld [vmem:[%s13973_s7 + $0x1198] sm:$0xf] }
 0x482   : > { %7376 = vmatpush.bf16.xpose.msra.mxu3 %v10618_v40  ;;  %v13123_v40 = vld [vmem:[%s13973_s7 + $0x119c] sm:$0xf]  ;;  %v10722_v46 = vor.u32 %v13122_v5, %v10719_v33  ;;  %v10726_v48 = vor.u32 %v13127_v37, %v10725_v36 }
 0x483   : > { %v10730_v52 = vor.u32 %v13123_v40, %v10727_v42  ;;  %v10599_v5 = vld [vmem:[%s13973_s7 + $0x10b8] sm:$0xf0] }
 0x488   : > { %7338 = vmatpush.bf16.xpose.msra.mxu0 %v10574_v59  ;;  %7351 = vmatpush.bf16.xpose.msra.mxu1 %v10578_v7  ;;  %v10693_v59 = vld [vmem:[%s13973_s7 + $0x1158] sm:$0xf] }
 0x489   : > { %7364 = vmatpush.bf16.xpose.msra.mxu2 %v10582_v28  ;;  %v13119_v7 = vld [vmem:[%s13973_s7 + $0x1174] sm:$0xf0]  ;;  %v13115_v28 = vld [vmem:[%s13973_s7 + $0x115c] sm:$0xf] }
 0x48a   : > { %7377 = vmatpush.bf16.xpose.msra.mxu3 %v10586_v60  ;;  %v10695_v60 = vld [vmem:[%s13973_s7 + $0x1178] sm:$0xf0]  ;;  %v10694_v26 = vor.u32 %v13119_v7, %v10693_v59  ;;  %v13087_v59 = vld [vmem:[%s13973_s7 + $0x1074] sm:$0xf0] }
 0x48b   : > { %v10698_v11 = vor.u32 %v13115_v28, %v10695_v60  ;;  %v13083_v7 = vld [vmem:[%s13973_s7 + $0x105c] sm:$0xf] }
 0x48c   : > { %v10567_v28 = vld [vmem:[%s13973_s7 + $0x1078] sm:$0xf0] }
 0x490   : > { %7339 = vmatpush.bf16.xpose.msra.mxu0 %v10542_v32  ;;  %7352 = vmatpush.bf16.xpose.msra.mxu1 %v10546_v15  ;;  %v10661_v32 = vld [vmem:[%s13973_s7 + $0x1118] sm:$0xf] }
 0x491   : > { %7365 = vmatpush.bf16.xpose.msra.mxu2 %v10550_v43  ;;  %v13111_v15 = vld [vmem:[%s13973_s7 + $0x1134] sm:$0xf0]  ;;  %v13107_v43 = vld [vmem:[%s13973_s7 + $0x111c] sm:$0xf] }
 0x492   : > { %7378 = vmatpush.bf16.xpose.msra.mxu3 %v10554_v44  ;;  %v10663_v44 = vld [vmem:[%s13973_s7 + $0x1138] sm:$0xf0]  ;;  %v10662_v12 = vor.u32 %v13111_v15, %v10661_v32  ;;  %v10533_v32 = vld [vmem:[%s13973_s7 + $0x1018] sm:$0xf] }
 0x493   : > { %v10666_v41 = vor.u32 %v13107_v43, %v10663_v44  ;;  %v13079_v15 = vld [vmem:[%s13973_s7 + $0x1034] sm:$0xf0]  ;;  %v13075_v43 = vld [vmem:[%s13973_s7 + $0x101c] sm:$0xf] }
 0x494   : > { %v10535_v44 = vld [vmem:[%s13973_s7 + $0x1038] sm:$0xf0] }
 0x498   : > { %7340 = vmatpush.bf16.xpose.msra.mxu0 %v10510_v56  ;;  %7353 = vmatpush.bf16.xpose.msra.mxu1 %v10514_v20  ;;  %v10631_v56 = vld [vmem:[%s13973_s7 + $0x10f8] sm:$0xf0]  ;;  %v10626_v20 = vor.u32 %v13098_v51, %v10623_v13  ;;  %v13197_v51 = vld [vmem:[%s13973_s7 + $0x13e4] sm:$0xf0]  ;;  %v10530_v13 = vor.u32 %v13074_v6, %v10527_v8  ;;  %v10895_v6 = vld [vmem:[%s13973_s7 + $0x1320] sm:$0xf0] }
 0x499   : > { %7366 = vmatpush.bf16.xpose.msra.mxu2 %v10518_v22  ;;  %v10630_v22 = vor.u32 %v13103_v18, %v10629_v14  ;;  %v10634_v54 = vor.u32 %v13099_v47, %v10631_v56  ;;  %v10534_v14 = vor.u32 %v13079_v15, %v10533_v32  ;;  %v13193_v18 = vld [vmem:[%s13973_s7 + $0x13cc] sm:$0xf]  ;;  %v10538_v56 = vor.u32 %v13075_v43, %v10535_v44  ;;  %v10901_v8 = vld [vmem:[%s13973_s7 + $0x1308] sm:$0xf] }
 0x49a   : > { %7379 = vmatpush.bf16.xpose.msra.mxu3 %v10522_v4  ;;  %v10589_v4 = vld [vmem:[%s13973_s7 + $0x1090] sm:$0xf]  ;;  %v10999_v47 = vld [vmem:[%s13973_s7 + $0x13e8] sm:$0xf0]  ;;  %v13173_v32 = vld [vmem:[%s13973_s7 + $0x1324] sm:$0xf0] }
 0x49b   : > { %v13169_v15 = vld [vmem:[%s13973_s7 + $0x130c] sm:$0xf] }
 0x49c   : > { %v15293_v58 = vpop.f32.mrf.mxu0  ;;  %v15295_v19 = vpop.f32.mrf.mxu1  ;;  %v10903_v43 = vld [vmem:[%s13973_s7 + $0x1328] sm:$0xf0] }
 0x49f   : > { %7341 = vmatmul.bf16.vlgmr.msra.gmra.mxu0 %v14089_v16  ;;  %7354 = vmatmul.bf16.vlgmr.msra.gmra.mxu1 %v14096_v21 }
 0x4a0   : > { %7385 = vmatpush.bf16.xpose.msrb.mxu0 %v10750_v24  ;;  %7398 = vmatpush.bf16.xpose.msrb.mxu1 %v10754_v25  ;;  %v13094_v24 = vld [vmem:[%s13973_s7 + $0x10ac] sm:$0xf0]  ;;  %v13090_v25 = vld [vmem:[%s13973_s7 + $0x1094] sm:$0xf] }
 0x4a1   : > { %7411 = vmatpush.bf16.xpose.msrb.mxu2 %v10758_v61  ;;  %7380 = vmatmul.bf16.vlgmr.msra.gmra.mxu3 %v14091_v17  ;;  %v10591_v61 = vld [vmem:[%s13973_s7 + $0x10b0] sm:$0xf0]  ;;  %v10590_v33 = vor.u32 %v13094_v24, %v10589_v4  ;;  %v10957_v4 = vld [vmem:[%s13973_s7 + $0x1380] sm:$0xf] }
 0x4a2   : > { %7424 = vmatpush.bf16.xpose.msrb.mxu3 %v10762_v27  ;;  %7367 = vmatmul.bf16.vlgmr.msra.gmra.mxu2 %v14078_v3  ;;  %v10597_v27 = vld [vmem:[%s13973_s7 + $0x1098] sm:$0xf]  ;;  %v10594_v40 = vor.u32 %v13090_v25, %v10591_v61  ;;  %v13188_v24 = vld [vmem:[%s13973_s7 + $0x139c] sm:$0xf0]  ;;  %v13184_v25 = vld [vmem:[%s13973_s7 + $0x1384] sm:$0xf] }
 0x4a3   : > { %v10598_v42 = vor.u32 %v13095_v29, %v10597_v27  ;;  %v10959_v61 = vld [vmem:[%s13973_s7 + $0x13a0] sm:$0xf0]  ;;  %v10965_v27 = vld [vmem:[%s13973_s7 + $0x1388] sm:$0xf] }
 0x4a4   : > { %v15307_v36 = vpop.f32.mrf.mxu3  ;;  %v7240_v37 = vpop.f32.mrf.mxu0  ;;  %v13189_v29 = vld [vmem:[%s13973_s7 + $0x13a4] sm:$0xf0] }
 0x4a5   : > { %v15297_v1 = vpop.f32.mrf.mxu2  ;;  %v10958_v37 = vor.u32 %v13188_v24, %v10957_v4  ;;  %v13165_v4 = vld [vmem:[%s13973_s7 + $0x12e4] sm:$0xf0]  ;;  %v13161_v24 = vld [vmem:[%s13973_s7 + $0x12cc] sm:$0xf] }
 0x4a8   : > { %7386 = vmatpush.bf16.xpose.msrb.mxu0 %v10718_v45  ;;  %7399 = vmatpush.bf16.xpose.msrb.mxu1 %v10722_v46  ;;  %v7253_v45 = vpop.f32.mrf.mxu1  ;;  %v10602_v46 = vor.u32 %v13091_v31, %v10599_v5  ;;  %v7252_v31 = vadd.f32 %v15295_v19, %v15293_v58  ;;  %v13185_v5 = vld [vmem:[%s13973_s7 + $0x138c] sm:$0xf]  ;;  %v10925_v19 = vld [vmem:[%s13973_s7 + $0x1340] sm:$0xf] }
 0x4a9   : > { %7412 = vmatpush.bf16.xpose.msrb.mxu2 %v10726_v48 }
 0x4aa   : > { %7425 = vmatpush.bf16.xpose.msrb.mxu3 %v10730_v52  ;;  %v10557_v52 = vld [vmem:[%s13973_s7 + $0x1050] sm:$0xf]  ;;  %v7265_v58 = vadd.f32 %v15297_v1, %v7252_v31 }
 0x4ab   : > { %v10558_v60 = vor.u32 %v13086_v63, %v10557_v52  ;;  %v10927_v52 = vld [vmem:[%s13973_s7 + $0x1360] sm:$0xf0]  ;;  %v10933_v63 = vld [vmem:[%s13973_s7 + $0x1348] sm:$0xf] }
 0x4ad   : > { %v7266_v48 = vpop.f32.mrf.mxu2 }
 0x4ae   : > { %v13176_v48 = vld [vmem:[%s13973_s7 + $0x1344] sm:$0xf] }
 0x4b0   : > { %7387 = vmatpush.bf16.xpose.msrb.mxu0 %v10686_v62  ;;  %7400 = vmatpush.bf16.xpose.msrb.mxu1 %v10690_v0  ;;  %v7279_v62 = vpop.f32.mrf.mxu3  ;;  %v10562_v0 = vor.u32 %v13082_v23, %v10559_v53  ;;  %v13181_v23 = vld [vmem:[%s13973_s7 + $0x1364] sm:$0xf0]  ;;  %v7278_v53 = vadd.f32 %v15307_v36, %v7265_v58  ;;  %v13168_v36 = vld [vmem:[%s13973_s7 + $0x1304] sm:$0xf] }
 0x4b1   : > { %7413 = vmatpush.bf16.xpose.msrb.mxu2 %v10694_v26  ;;  %v10566_v26 = vor.u32 %v13087_v59, %v10565_v55  ;;  %v13177_v55 = vld [vmem:[%s13973_s7 + $0x134c] sm:$0xf]  ;;  %v10837_v58 = vld [vmem:[%s13973_s7 + $0x1288] sm:$0xf] }
 0x4b2   : > { %7426 = vmatpush.bf16.xpose.msrb.mxu3 %v10698_v11  ;;  %v10570_v11 = vor.u32 %v13083_v7, %v10567_v28  ;;  %v10935_v59 = vld [vmem:[%s13973_s7 + $0x1368] sm:$0xf0]  ;;  %v10930_v7 = vor.u32 %v13176_v48, %v10927_v52  ;;  %v10934_v28 = vor.u32 %v13181_v23, %v10933_v63 }
 0x4b3   : > { %v10839_v48 = vld [vmem:[%s13973_s7 + $0x12a8] sm:$0xf0] }
 0x4b8   : > { %7388 = vmatpush.bf16.xpose.msrb.mxu0 %v10654_v9  ;;  %7401 = vmatpush.bf16.xpose.msrb.mxu1 %v10658_v10  ;;  %v10989_v9 = vld [vmem:[%s13973_s7 + $0x13c0] sm:$0xf] }
 0x4b9   : > { %7414 = vmatpush.bf16.xpose.msrb.mxu2 %v10662_v12  ;;  %v13196_v10 = vld [vmem:[%s13973_s7 + $0x13dc] sm:$0xf0]  ;;  %v13192_v12 = vld [vmem:[%s13973_s7 + $0x13c4] sm:$0xf] }
 0x4ba   : > { %7427 = vmatpush.bf16.xpose.msrb.mxu3 %v10666_v41  ;;  %v10526_v41 = vor.u32 %v13078_v2, %v10525_v35  ;;  %v13172_v35 = vld [vmem:[%s13973_s7 + $0x131c] sm:$0xf0] }
 0x4c0   : > { %7389 = vmatpush.bf16.xpose.msrb.mxu0 %v10622_v57  ;;  %7402 = vmatpush.bf16.xpose.msrb.mxu1 %v10626_v20  ;;  %v10990_v57 = vor.u32 %v13196_v10, %v10989_v9  ;;  %v10994_v20 = vor.u32 %v13192_v12, %v10991_v49  ;;  %v10898_v10 = vor.u32 %v13168_v36, %v10895_v6  ;;  %v13140_v6 = vld [vmem:[%s13973_s7 + $0x121c] sm:$0xf0] }
 0x4c1   : > { %7415 = vmatpush.bf16.xpose.msrb.mxu2 %v10630_v22  ;;  %v10998_v22 = vor.u32 %v13197_v51, %v10997_v50  ;;  %v10902_v12 = vor.u32 %v13173_v32, %v10901_v8  ;;  %v10906_v49 = vor.u32 %v13169_v15, %v10903_v43  ;;  %v13136_v8 = vld [vmem:[%s13973_s7 + $0x1204] sm:$0xf]  ;;  %v10773_v15 = vld [vmem:[%s13973_s7 + $0x1208] sm:$0xf] }
 0x4c2   : > { %7428 = vmatpush.bf16.xpose.msrb.mxu3 %v10634_v54  ;;  %v11002_v54 = vor.u32 %v13193_v18, %v10999_v47  ;;  %v10861_v47 = vld [vmem:[%s13973_s7 + $0x12c0] sm:$0xf]  ;;  %v10767_v32 = vld [vmem:[%s13973_s7 + $0x1220] sm:$0xf0]  ;;  %v13141_v43 = vld [vmem:[%s13973_s7 + $0x1224] sm:$0xf0] }
 0x4c8   : > { %7390 = vmatpush.bf16.xpose.msrb.mxu0 %v10590_v33  ;;  %7403 = vmatpush.bf16.xpose.msrb.mxu1 %v10594_v40  ;;  %v10967_v33 = vld [vmem:[%s13973_s7 + $0x13a8] sm:$0xf0]  ;;  %v10962_v40 = vor.u32 %v13184_v25, %v10959_v61 }
 0x4c9   : > { %7416 = vmatpush.bf16.xpose.msrb.mxu2 %v10598_v42  ;;  %v10966_v42 = vor.u32 %v13189_v29, %v10965_v27  ;;  %v10970_v45 = vor.u32 %v13185_v5, %v10967_v33  ;;  %v10871_v25 = vld [vmem:[%s13973_s7 + $0x12e8] sm:$0xf0] }
 0x4ca   : > { %7429 = vmatpush.bf16.xpose.msrb.mxu3 %v10602_v46  ;;  %v13180_v46 = vld [vmem:[%s13973_s7 + $0x135c] sm:$0xf0]  ;;  %v10874_v5 = vor.u32 %v13161_v24, %v10871_v25  ;;  %v10973_v24 = vld [vmem:[%s13973_s7 + $0x1390] sm:$0xf] }
 0x4cb   : > { %v10926_v1 = vor.u32 %v13180_v46, %v10925_v19  ;;  %v13157_v19 = vld [vmem:[%s13973_s7 + $0x12a4] sm:$0xf0]  ;;  %v13153_v46 = vld [vmem:[%s13973_s7 + $0x128c] sm:$0xf]  ;;  %v13190_v25 = vld [vmem:[%s13973_s7 + $0x13ac] sm:$0xf0] }
 0x4cc   : > { %v10838_v23 = vor.u32 %v13157_v19, %v10837_v58  ;;  %v10941_v58 = vld [vmem:[%s13973_s7 + $0x1350] sm:$0xf] }
 0x4cd   : > { %v13182_v19 = vld [vmem:[%s13973_s7 + $0x136c] sm:$0xf0] }
 0x4d0   : > { %7391 = vmatpush.bf16.xpose.msrb.mxu0 %v10558_v60  ;;  %7404 = vmatpush.bf16.xpose.msrb.mxu1 %v10562_v0  ;;  %v10938_v60 = vor.u32 %v13177_v55, %v10935_v59  ;;  %v10797_v55 = vld [vmem:[%s13973_s7 + $0x1240] sm:$0xf] }
 0x4d1   : > { %7417 = vmatpush.bf16.xpose.msrb.mxu2 %v10566_v26  ;;  %v13148_v59 = vld [vmem:[%s13973_s7 + $0x125c] sm:$0xf0] }
 0x4d2   : > { %7430 = vmatpush.bf16.xpose.msrb.mxu3 %v10570_v11  ;;  %v10893_v11 = vld [vmem:[%s13973_s7 + $0x1300] sm:$0xf] }
 0x4d3   : > { %v10894_v44 = vor.u32 %v13172_v35, %v10893_v11 }
 0x4d8   : > { %7392 = vmatpush.bf16.xpose.msrb.mxu0 %v10526_v41  ;;  %7405 = vmatpush.bf16.xpose.msrb.mxu1 %v10530_v13  ;;  %v332_v13 = vld [vmem:[#allocation2 + $0x48] sm:$0xff] }
 0x4d9   : > { %7418 = vmatpush.bf16.xpose.msrb.mxu2 %v10534_v14 }
 0x4da   : > { %7431 = vmatpush.bf16.xpose.msrb.mxu3 %v10538_v56  ;;  %v13164_v56 = vld [vmem:[%s13973_s7 + $0x12dc] sm:$0xf0] }
 0x4db   : > { %v10862_v61 = vor.u32 %v13164_v56, %v10861_v47  ;;  %v13195_v47 = vld [vmem:[%s13973_s7 + $0x13dc] sm:$0xf] }
 0x4dc   : > { %v7290_v62 = vpop.f32.mrf.mxu0  ;;  %v7303_v26 = vpop.f32.mrf.mxu1  ;;  %v11015_v56 = vld [vmem:[%s13973_s7 + $0x13f8] sm:$0xf0] }
 0x4dd   : > { %v7291_v0 = vadd.f32 %v7290_v62, %v7278_v53  ;;  %v10842_v53 = vor.u32 %v13153_v46, %v10839_v48  ;;  %v13145_v62 = vld [vmem:[%s13973_s7 + $0x124c] sm:$0xf]  ;;  %v13178_v46 = vld [vmem:[%s13973_s7 + $0x1354] sm:$0xf] }
 0x4de   : > { %v10943_v48 = vld [vmem:[%s13973_s7 + $0x1370] sm:$0xf0] }
 0x4df   : > { %7393 = vmatmul.bf16.vlgmr.msrb.gmra.mxu0 %v14145_v30  ;;  %7406 = vmatmul.bf16.vlgmr.msrb.gmra.mxu1 %v14155_v38  ;;  %v7304_v2 = vadd.f32 %v7303_v26, %v7291_v0  ;;  %v10807_v0 = vld [vmem:[%s13973_s7 + $0x1268] sm:$0xf0]  ;;  %v10798_v26 = vor.u32 %v13148_v59, %v10797_v55  ;;  %v10942_v55 = vor.u32 %v13182_v19, %v10941_v58  ;;  %v13150_v58 = vld [vmem:[%s13973_s7 + $0x126c] sm:$0xf0]  ;;  %v13146_v19 = vld [vmem:[%s13973_s7 + $0x1254] sm:$0xf] }
 0x4e0   : > { %7437 = vmatpush.bf16.xpose.msra.mxu0 %v10990_v57  ;;  %7450 = vmatpush.bf16.xpose.msra.mxu1 %v10994_v20  ;;  %v13160_v57 = vld [vmem:[%s13973_s7 + $0x12c4] sm:$0xf]  ;;  %v10810_v36 = vor.u32 %v13145_v62, %v10807_v0  ;;  %v10946_v59 = vor.u32 %v13178_v46, %v10943_v48  ;;  %v13170_v62 = vld [vmem:[%s13973_s7 + $0x1314] sm:$0xf]  ;;  %v10821_v48 = vld [vmem:[%s13973_s7 + $0x1258] sm:$0xf] }
 0x4e1   : > { %7463 = vmatpush.bf16.xpose.msra.mxu2 %v10998_v22  ;;  %7432 = vmatmul.bf16.vlgmr.msrb.gmra.mxu3 %v14157_v39  ;;  %v10863_v22 = vld [vmem:[%s13973_s7 + $0x12e0] sm:$0xf0]  ;;  %v10911_v0 = vld [vmem:[%s13973_s7 + $0x1330] sm:$0xf0] }
 0x4e2   : > { %7476 = vmatpush.bf16.xpose.msra.mxu3 %v11002_v54  ;;  %7419 = vmatmul.bf16.vlgmr.msrb.gmra.mxu2 %v14150_v34  ;;  %v10869_v54 = vld [vmem:[%s13973_s7 + $0x12c8] sm:$0xf]  ;;  %v10866_v27 = vor.u32 %v13160_v57, %v10863_v22  ;;  %v10815_v46 = vld [vmem:[%s13973_s7 + $0x1270] sm:$0xf0] }
 0x4e3   : > { %v10870_v29 = vor.u32 %v13165_v4, %v10869_v54  ;;  %v11018_v4 = vor.u32 %v13195_v47, %v11015_v56 }
 0x4e4   : > { %v7329_v50 = vpop.f32.mrf.mxu3  ;;  %v7292_v51 = vpop.f32.mrf.mxu0 }
 0x4e5   : > { %v7316_v9 = vpop.f32.mrf.mxu2  ;;  %v7305_v14 = vpop.f32.mrf.mxu1  ;;  %v11013_v51 = vld [vmem:[%s13973_s7 + $0x13d8] sm:$0xf] }
 0x4e6   : > { %v7317_v41 = vadd.f32 %v7316_v9, %v7304_v2  ;;  %v10765_v2 = vld [vmem:[%s13973_s7 + $0x1200] sm:$0xf]  ;;  %v10775_v9 = vld [vmem:[%s13973_s7 + $0x1228] sm:$0xf0]  ;;  %v10770_v14 = vor.u32 %v13136_v8, %v10767_v32 }
 0x4e8   : > { %7438 = vmatpush.bf16.xpose.msra.mxu0 %v10958_v37  ;;  %7451 = vmatpush.bf16.xpose.msra.mxu1 %v10962_v40  ;;  %v7330_v18 = vadd.f32 %v7329_v50, %v7317_v41  ;;  %v10829_v37 = vld [vmem:[%s13973_s7 + $0x1280] sm:$0xf]  ;;  %v13194_v41 = vld [vmem:[%s13973_s7 + $0x13d4] sm:$0xf] }
 0x4e9   : > { %7464 = vmatpush.bf16.xpose.msra.mxu2 %v10966_v42  ;;  %v13156_v40 = vld [vmem:[%s13973_s7 + $0x129c] sm:$0xf0]  ;;  %v13152_v42 = vld [vmem:[%s13973_s7 + $0x1284] sm:$0xf]  ;;  %v11007_v50 = vld [vmem:[%s13973_s7 + $0x13f0] sm:$0xf0] }
 0x4ea   : > { %7477 = vmatpush.bf16.xpose.msra.mxu3 %v10970_v45  ;;  %v8172_v20 = vadd.f32 %v7330_v18, %v332_v13  ;;  %v10831_v45 = vld [vmem:[%s13973_s7 + $0x12a0] sm:$0xf0]  ;;  %v10830_v52 = vor.u32 %v13156_v40, %v10829_v37  ;;  %v13199_v13 = vld [vmem:[%s13973_s7 + $0x13f4] sm:$0xf0]  ;;  %v10774_v18 = vor.u32 %v13141_v43, %v10773_v15  ;;  %v11010_v22 = vor.u32 %v13194_v41, %v11007_v50  ;;  %v10877_v15 = vld [vmem:[%s13973_s7 + $0x12d0] sm:$0xf] }
 0x4eb   : > { %v10834_v63 = vor.u32 %v13152_v42, %v10831_v45  ;;  %v11014_v54 = vor.u32 %v13199_v13, %v11013_v51  ;;  %v10974_v37 = vor.u32 %v13190_v25, %v10973_v24  ;;  %v13166_v43 = vld [vmem:[%s13973_s7 + $0x12ec] sm:$0xf0]  ;;  %v13163_v41 = vld [vmem:[%s13973_s7 + $0x12dc] sm:$0xf]  ;;  %v13159_v24 = vld [vmem:[%s13973_s7 + $0x12b4] sm:$0xf0] }
 0x4ec   : > { %8188 = vst [vmem:[#allocation2 + $0x48] sm:$0xff] %v8172_v20  ;;  %v7331_v33 = vpop.f32.mrf.mxu3  ;;  %v10878_v50 = vor.u32 %v13166_v43, %v10877_v15  ;;  %v13155_v25 = vld [vmem:[%s13973_s7 + $0x129c] sm:$0xf]  ;;  %v11247_v15 = vld [vmem:[%s13973_s7 + $0x15e0] sm:$0xf0] }
 0x4ed   : > { %v7318_v31 = vpop.f32.mrf.mxu2  ;;  %v10983_v33 = vld [vmem:[%s13973_s7 + $0x13b8] sm:$0xf0]  ;;  %v11253_v43 = vld [vmem:[%s13973_s7 + $0x15c8] sm:$0xf] }
 0x4ee   : > { %v13191_v31 = vld [vmem:[%s13973_s7 + $0x13b4] sm:$0xf0] }
 0x4f0   : > { %7439 = vmatpush.bf16.xpose.msra.mxu0 %v10926_v1  ;;  %7452 = vmatpush.bf16.xpose.msra.mxu1 %v10930_v7  ;;  %v13144_v1 = vld [vmem:[%s13973_s7 + $0x1244] sm:$0xf] }
 0x4f1   : > { %7465 = vmatpush.bf16.xpose.msra.mxu2 %v10934_v28  ;;  %v10799_v7 = vld [vmem:[%s13973_s7 + $0x1260] sm:$0xf0]  ;;  %v10805_v28 = vld [vmem:[%s13973_s7 + $0x1248] sm:$0xf] }
 0x4f2   : > { %7478 = vmatpush.bf16.xpose.msra.mxu3 %v10938_v60  ;;  %v13149_v60 = vld [vmem:[%s13973_s7 + $0x1264] sm:$0xf0]  ;;  %v10802_v11 = vor.u32 %v13144_v1, %v10799_v7 }
 0x4f3   : > { %v10806_v35 = vor.u32 %v13149_v60, %v10805_v28  ;;  %v10909_v28 = vld [vmem:[%s13973_s7 + $0x1310] sm:$0xf] }
 0x4f4   : > { %v13174_v60 = vld [vmem:[%s13973_s7 + $0x132c] sm:$0xf0] }
 0x4f8   : > { %7440 = vmatpush.bf16.xpose.msra.mxu0 %v10894_v44  ;;  %7453 = vmatpush.bf16.xpose.msra.mxu1 %v10898_v10  ;;  %v13137_v44 = vld [vmem:[%s13973_s7 + $0x120c] sm:$0xf]  ;;  %v11005_v10 = vld [vmem:[%s13973_s7 + $0x13d0] sm:$0xf] }
 0x4f9   : > { %7466 = vmatpush.bf16.xpose.msra.mxu2 %v10902_v12  ;;  %v13198_v12 = vld [vmem:[%s13973_s7 + $0x13ec] sm:$0xf0]  ;;  %v10778_v57 = vor.u32 %v13137_v44, %v10775_v9  ;;  %v13162_v44 = vld [vmem:[%s13973_s7 + $0x12d4] sm:$0xf] }
 0x4fa   : > { %7479 = vmatpush.bf16.xpose.msra.mxu3 %v10906_v49  ;;  %v10766_v49 = vor.u32 %v13140_v6, %v10765_v2  ;;  %v11006_v20 = vor.u32 %v13198_v12, %v11005_v10  ;;  %v10910_v2 = vor.u32 %v13174_v60, %v10909_v28  ;;  %v10914_v6 = vor.u32 %v13170_v62, %v10911_v0  ;;  %v10879_v9 = vld [vmem:[%s13973_s7 + $0x12f0] sm:$0xf0]  ;;  %v10885_v10 = vld [vmem:[%s13973_s7 + $0x12d8] sm:$0xf]  ;;  %v10781_v28 = vld [vmem:[%s13973_s7 + $0x1210] sm:$0xf] }
 0x4fb   : > { %v13167_v12 = vld [vmem:[%s13973_s7 + $0x12f4] sm:$0xf0]  ;;  %v13142_v60 = vld [vmem:[%s13973_s7 + $0x122c] sm:$0xf0]  ;;  %v13138_v62 = vld [vmem:[%s13973_s7 + $0x1214] sm:$0xf] }
 0x4fc   : > { %v10783_v0 = vld [vmem:[%s13973_s7 + $0x1230] sm:$0xf0] }
 0x500   : > { %7441 = vmatpush.bf16.xpose.msra.mxu0 %v10862_v61  ;;  %7454 = vmatpush.bf16.xpose.msra.mxu1 %v10866_v27  ;;  %v13186_v61 = vld [vmem:[%s13973_s7 + $0x1394] sm:$0xf] }
 0x501   : > { %7467 = vmatpush.bf16.xpose.msra.mxu2 %v10870_v29  ;;  %v10975_v27 = vld [vmem:[%s13973_s7 + $0x13b0] sm:$0xf0]  ;;  %v10981_v29 = vld [vmem:[%s13973_s7 + $0x1398] sm:$0xf] }
 0x502   : > { %7480 = vmatpush.bf16.xpose.msra.mxu3 %v10874_v5  ;;  %v13187_v5 = vld [vmem:[%s13973_s7 + $0x139c] sm:$0xf]  ;;  %v10978_v40 = vor.u32 %v13186_v61, %v10975_v27  ;;  %v10982_v42 = vor.u32 %v13191_v31, %v10981_v29 }
 0x503   : > { %v10986_v45 = vor.u32 %v13187_v5, %v10983_v33  ;;  %v10855_v61 = vld [vmem:[%s13973_s7 + $0x12b8] sm:$0xf0] }
 0x508   : > { %7442 = vmatpush.bf16.xpose.msra.mxu0 %v10830_v52  ;;  %7455 = vmatpush.bf16.xpose.msra.mxu1 %v10834_v63  ;;  %v10949_v52 = vld [vmem:[%s13973_s7 + $0x1358] sm:$0xf] }
 0x509   : > { %7468 = vmatpush.bf16.xpose.msra.mxu2 %v10838_v23  ;;  %v13183_v63 = vld [vmem:[%s13973_s7 + $0x1374] sm:$0xf0]  ;;  %v13179_v23 = vld [vmem:[%s13973_s7 + $0x135c] sm:$0xf] }
 0x50a   : > { %7481 = vmatpush.bf16.xpose.msra.mxu3 %v10842_v53  ;;  %v10951_v53 = vld [vmem:[%s13973_s7 + $0x1378] sm:$0xf0]  ;;  %v10950_v1 = vor.u32 %v13183_v63, %v10949_v52  ;;  %v13151_v52 = vld [vmem:[%s13973_s7 + $0x1274] sm:$0xf0] }
 0x50b   : > { %v10954_v7 = vor.u32 %v13179_v23, %v10951_v53  ;;  %v13147_v63 = vld [vmem:[%s13973_s7 + $0x125c] sm:$0xf] }
 0x50c   : > { %v10823_v23 = vld [vmem:[%s13973_s7 + $0x1278] sm:$0xf0] }
 0x510   : > { %7443 = vmatpush.bf16.xpose.msra.mxu0 %v10798_v26  ;;  %7456 = vmatpush.bf16.xpose.msra.mxu1 %v10802_v11  ;;  %v10917_v26 = vld [vmem:[%s13973_s7 + $0x1318] sm:$0xf] }
 0x511   : > { %7469 = vmatpush.bf16.xpose.msra.mxu2 %v10806_v35  ;;  %v13175_v11 = vld [vmem:[%s13973_s7 + $0x1334] sm:$0xf0]  ;;  %v13171_v35 = vld [vmem:[%s13973_s7 + $0x131c] sm:$0xf] }
 0x512   : > { %7482 = vmatpush.bf16.xpose.msra.mxu3 %v10810_v36  ;;  %v10919_v36 = vld [vmem:[%s13973_s7 + $0x1338] sm:$0xf0]  ;;  %v10918_v8 = vor.u32 %v13175_v11, %v10917_v26  ;;  %v10789_v26 = vld [vmem:[%s13973_s7 + $0x1218] sm:$0xf] }
 0x513   : > { %v10922_v32 = vor.u32 %v13171_v35, %v10919_v36  ;;  %v13143_v11 = vld [vmem:[%s13973_s7 + $0x1234] sm:$0xf0]  ;;  %v13139_v35 = vld [vmem:[%s13973_s7 + $0x121c] sm:$0xf] }
 0x514   : > { %v10791_v36 = vld [vmem:[%s13973_s7 + $0x1238] sm:$0xf0] }
 0x518   : > { %7444 = vmatpush.bf16.xpose.msra.mxu0 %v10766_v49  ;;  %7457 = vmatpush.bf16.xpose.msra.mxu1 %v10770_v14  ;;  %v10887_v49 = vld [vmem:[%s13973_s7 + $0x12f8] sm:$0xf0]  ;;  %v10882_v14 = vor.u32 %v13162_v44, %v10879_v9  ;;  %v13261_v44 = vld [vmem:[%s13973_s7 + $0x15e4] sm:$0xf0]  ;;  %v10786_v9 = vor.u32 %v13138_v62, %v10783_v0  ;;  %v11151_v62 = vld [vmem:[%s13973_s7 + $0x1520] sm:$0xf0] }
 0x519   : > { %7470 = vmatpush.bf16.xpose.msra.mxu2 %v10774_v18  ;;  %v10886_v18 = vor.u32 %v13167_v12, %v10885_v10  ;;  %v10890_v47 = vor.u32 %v13163_v41, %v10887_v49  ;;  %v10790_v10 = vor.u32 %v13143_v11, %v10789_v26  ;;  %v13257_v12 = vld [vmem:[%s13973_s7 + $0x15cc] sm:$0xf]  ;;  %v10794_v49 = vor.u32 %v13139_v35, %v10791_v36  ;;  %v11157_v0 = vld [vmem:[%s13973_s7 + $0x1508] sm:$0xf] }
 0x51a   : > { %7483 = vmatpush.bf16.xpose.msra.mxu3 %v10778_v57  ;;  %v10845_v57 = vld [vmem:[%s13973_s7 + $0x1290] sm:$0xf]  ;;  %v11255_v41 = vld [vmem:[%s13973_s7 + $0x15e8] sm:$0xf0]  ;;  %v13237_v26 = vld [vmem:[%s13973_s7 + $0x1524] sm:$0xf0] }
 0x51b   : > { %v13233_v11 = vld [vmem:[%s13973_s7 + $0x150c] sm:$0xf] }
 0x51c   : > { %v15441_v51 = vpop.f32.mrf.mxu0  ;;  %v15443_v13 = vpop.f32.mrf.mxu1  ;;  %v11159_v35 = vld [vmem:[%s13973_s7 + $0x1528] sm:$0xf0] }
 0x51f   : > { %7445 = vmatmul.bf16.vlgmr.msra.gmra.mxu0 %v14089_v16  ;;  %7458 = vmatmul.bf16.vlgmr.msra.gmra.mxu1 %v14096_v21 }
 0x520   : > { %7489 = vmatpush.bf16.xpose.msrb.mxu0 %v11006_v20  ;;  %7502 = vmatpush.bf16.xpose.msrb.mxu1 %v11010_v22  ;;  %v13158_v20 = vld [vmem:[%s13973_s7 + $0x12ac] sm:$0xf0]  ;;  %v13154_v22 = vld [vmem:[%s13973_s7 + $0x1294] sm:$0xf] }
 0x521   : > { %7515 = vmatpush.bf16.xpose.msrb.mxu2 %v11014_v54  ;;  %7484 = vmatmul.bf16.vlgmr.msra.gmra.mxu3 %v14091_v17  ;;  %v10847_v54 = vld [vmem:[%s13973_s7 + $0x12b0] sm:$0xf0]  ;;  %v10846_v27 = vor.u32 %v13158_v20, %v10845_v57  ;;  %v11213_v57 = vld [vmem:[%s13973_s7 + $0x1580] sm:$0xf] }
 0x522   : > { %7528 = vmatpush.bf16.xpose.msrb.mxu3 %v11018_v4  ;;  %7471 = vmatmul.bf16.vlgmr.msra.gmra.mxu2 %v14078_v3  ;;  %v10853_v4 = vld [vmem:[%s13973_s7 + $0x1298] sm:$0xf]  ;;  %v10850_v5 = vor.u32 %v13154_v22, %v10847_v54  ;;  %v13252_v20 = vld [vmem:[%s13973_s7 + $0x159c] sm:$0xf0]  ;;  %v13248_v22 = vld [vmem:[%s13973_s7 + $0x1584] sm:$0xf] }
 0x523   : > { %v10854_v33 = vor.u32 %v13159_v24, %v10853_v4  ;;  %v11215_v54 = vld [vmem:[%s13973_s7 + $0x15a0] sm:$0xf0]  ;;  %v11221_v4 = vld [vmem:[%s13973_s7 + $0x1588] sm:$0xf] }
 0x524   : > { %v15455_v29 = vpop.f32.mrf.mxu3  ;;  %v7344_v31 = vpop.f32.mrf.mxu0  ;;  %v13253_v24 = vld [vmem:[%s13973_s7 + $0x15a4] sm:$0xf0] }
 0x525   : > { %v15445_v56 = vpop.f32.mrf.mxu2  ;;  %v11214_v31 = vor.u32 %v13252_v20, %v11213_v57  ;;  %v13229_v57 = vld [vmem:[%s13973_s7 + $0x14e4] sm:$0xf0]  ;;  %v13225_v20 = vld [vmem:[%s13973_s7 + $0x14cc] sm:$0xf] }
 0x528   : > { %7490 = vmatpush.bf16.xpose.msrb.mxu0 %v10974_v37  ;;  %7503 = vmatpush.bf16.xpose.msrb.mxu1 %v10978_v40  ;;  %v7357_v37 = vpop.f32.mrf.mxu1  ;;  %v10858_v40 = vor.u32 %v13155_v25, %v10855_v61  ;;  %v7356_v25 = vadd.f32 %v15443_v13, %v15441_v51  ;;  %v13249_v61 = vld [vmem:[%s13973_s7 + $0x158c] sm:$0xf]  ;;  %v11181_v13 = vld [vmem:[%s13973_s7 + $0x1540] sm:$0xf] }
 0x529   : > { %7516 = vmatpush.bf16.xpose.msrb.mxu2 %v10982_v42 }
 0x52a   : > { %7529 = vmatpush.bf16.xpose.msrb.mxu3 %v10986_v45  ;;  %v10813_v45 = vld [vmem:[%s13973_s7 + $0x1250] sm:$0xf]  ;;  %v7369_v51 = vadd.f32 %v15445_v56, %v7356_v25 }
 0x52b   : > { %v10814_v53 = vor.u32 %v13150_v58, %v10813_v45  ;;  %v11183_v45 = vld [vmem:[%s13973_s7 + $0x1560] sm:$0xf0]  ;;  %v11189_v58 = vld [vmem:[%s13973_s7 + $0x1548] sm:$0xf] }
 0x52d   : > { %v7370_v42 = vpop.f32.mrf.mxu2 }
 0x52e   : > { %v13240_v42 = vld [vmem:[%s13973_s7 + $0x1544] sm:$0xf] }
 0x530   : > { %7491 = vmatpush.bf16.xpose.msrb.mxu0 %v10942_v55  ;;  %7504 = vmatpush.bf16.xpose.msrb.mxu1 %v10946_v59  ;;  %v7383_v55 = vpop.f32.mrf.mxu3  ;;  %v10818_v59 = vor.u32 %v13146_v19, %v10815_v46  ;;  %v13245_v19 = vld [vmem:[%s13973_s7 + $0x1564] sm:$0xf0]  ;;  %v7382_v46 = vadd.f32 %v15455_v29, %v7369_v51  ;;  %v13232_v29 = vld [vmem:[%s13973_s7 + $0x1504] sm:$0xf] }
 0x531   : > { %7517 = vmatpush.bf16.xpose.msrb.mxu2 %v10950_v1  ;;  %v10822_v1 = vor.u32 %v13151_v52, %v10821_v48  ;;  %v13241_v48 = vld [vmem:[%s13973_s7 + $0x154c] sm:$0xf]  ;;  %v11093_v51 = vld [vmem:[%s13973_s7 + $0x1488] sm:$0xf] }
 0x532   : > { %7530 = vmatpush.bf16.xpose.msrb.mxu3 %v10954_v7  ;;  %v10826_v7 = vor.u32 %v13147_v63, %v10823_v23  ;;  %v11191_v52 = vld [vmem:[%s13973_s7 + $0x1568] sm:$0xf0]  ;;  %v11186_v63 = vor.u32 %v13240_v42, %v11183_v45  ;;  %v11190_v23 = vor.u32 %v13245_v19, %v11189_v58 }
 0x533   : > { %v11095_v42 = vld [vmem:[%s13973_s7 + $0x14a8] sm:$0xf0] }
 0x538   : > { %7492 = vmatpush.bf16.xpose.msrb.mxu0 %v10910_v2  ;;  %7505 = vmatpush.bf16.xpose.msrb.mxu1 %v10914_v6  ;;  %v11245_v2 = vld [vmem:[%s13973_s7 + $0x15c0] sm:$0xf] }
 0x539   : > { %7518 = vmatpush.bf16.xpose.msrb.mxu2 %v10918_v8  ;;  %v13260_v6 = vld [vmem:[%s13973_s7 + $0x15dc] sm:$0xf0]  ;;  %v13256_v8 = vld [vmem:[%s13973_s7 + $0x15c4] sm:$0xf] }
 0x53a   : > { %7531 = vmatpush.bf16.xpose.msrb.mxu3 %v10922_v32  ;;  %v10782_v32 = vor.u32 %v13142_v60, %v10781_v28  ;;  %v13236_v28 = vld [vmem:[%s13973_s7 + $0x151c] sm:$0xf0] }
 0x540   : > { %7493 = vmatpush.bf16.xpose.msrb.mxu0 %v10878_v50  ;;  %7506 = vmatpush.bf16.xpose.msrb.mxu1 %v10882_v14  ;;  %v11246_v50 = vor.u32 %v13260_v6, %v11245_v2  ;;  %v11250_v14 = vor.u32 %v13256_v8, %v11247_v15  ;;  %v11154_v6 = vor.u32 %v13232_v29, %v11151_v62  ;;  %v13204_v62 = vld [vmem:[%s13973_s7 + $0x141c] sm:$0xf0] }
 0x541   : > { %7519 = vmatpush.bf16.xpose.msrb.mxu2 %v10886_v18  ;;  %v11254_v18 = vor.u32 %v13261_v44, %v11253_v43  ;;  %v11158_v8 = vor.u32 %v13237_v26, %v11157_v0  ;;  %v11162_v15 = vor.u32 %v13233_v11, %v11159_v35  ;;  %v13200_v0 = vld [vmem:[%s13973_s7 + $0x1404] sm:$0xf]  ;;  %v11029_v11 = vld [vmem:[%s13973_s7 + $0x1408] sm:$0xf] }
 0x542   : > { %7532 = vmatpush.bf16.xpose.msrb.mxu3 %v10890_v47  ;;  %v11258_v47 = vor.u32 %v13257_v12, %v11255_v41  ;;  %v11117_v41 = vld [vmem:[%s13973_s7 + $0x14c0] sm:$0xf]  ;;  %v11023_v26 = vld [vmem:[%s13973_s7 + $0x1420] sm:$0xf0]  ;;  %v13205_v35 = vld [vmem:[%s13973_s7 + $0x1424] sm:$0xf0] }
 0x548   : > { %7494 = vmatpush.bf16.xpose.msrb.mxu0 %v10846_v27  ;;  %7507 = vmatpush.bf16.xpose.msrb.mxu1 %v10850_v5  ;;  %v11223_v27 = vld [vmem:[%s13973_s7 + $0x15a8] sm:$0xf0]  ;;  %v11218_v5 = vor.u32 %v13248_v22, %v11215_v54 }
 0x549   : > { %7520 = vmatpush.bf16.xpose.msrb.mxu2 %v10854_v33  ;;  %v11222_v33 = vor.u32 %v13253_v24, %v11221_v4  ;;  %v11226_v37 = vor.u32 %v13249_v61, %v11223_v27  ;;  %v11127_v22 = vld [vmem:[%s13973_s7 + $0x14e8] sm:$0xf0] }
 0x54a   : > { %7533 = vmatpush.bf16.xpose.msrb.mxu3 %v10858_v40  ;;  %v13244_v40 = vld [vmem:[%s13973_s7 + $0x155c] sm:$0xf0]  ;;  %v11130_v61 = vor.u32 %v13225_v20, %v11127_v22  ;;  %v11229_v20 = vld [vmem:[%s13973_s7 + $0x1590] sm:$0xf] }
 0x54b   : > { %v11182_v56 = vor.u32 %v13244_v40, %v11181_v13  ;;  %v13221_v13 = vld [vmem:[%s13973_s7 + $0x14a4] sm:$0xf0]  ;;  %v13217_v40 = vld [vmem:[%s13973_s7 + $0x148c] sm:$0xf]  ;;  %v13254_v22 = vld [vmem:[%s13973_s7 + $0x15ac] sm:$0xf0] }
 0x54c   : > { %v11094_v19 = vor.u32 %v13221_v13, %v11093_v51  ;;  %v11197_v51 = vld [vmem:[%s13973_s7 + $0x1550] sm:$0xf] }
 0x54d   : > { %v13246_v13 = vld [vmem:[%s13973_s7 + $0x156c] sm:$0xf0] }
 0x550   : > { %7495 = vmatpush.bf16.xpose.msrb.mxu0 %v10814_v53  ;;  %7508 = vmatpush.bf16.xpose.msrb.mxu1 %v10818_v59  ;;  %v11194_v53 = vor.u32 %v13241_v48, %v11191_v52  ;;  %v11053_v48 = vld [vmem:[%s13973_s7 + $0x1440] sm:$0xf] }
 0x551   : > { %7521 = vmatpush.bf16.xpose.msrb.mxu2 %v10822_v1  ;;  %v13212_v52 = vld [vmem:[%s13973_s7 + $0x145c] sm:$0xf0] }
 0x552   : > { %7534 = vmatpush.bf16.xpose.msrb.mxu3 %v10826_v7  ;;  %v11149_v7 = vld [vmem:[%s13973_s7 + $0x1500] sm:$0xf] }
 0x553   : > { %v11150_v36 = vor.u32 %v13236_v28, %v11149_v7 }
 0x558   : > { %7496 = vmatpush.bf16.xpose.msrb.mxu0 %v10782_v32  ;;  %7509 = vmatpush.bf16.xpose.msrb.mxu1 %v10786_v9  ;;  %v333_v9 = vld [vmem:[#allocation2 + $0x40] sm:$0xff] }
 0x559   : > { %7522 = vmatpush.bf16.xpose.msrb.mxu2 %v10790_v10 }
 0x55a   : > { %7535 = vmatpush.bf16.xpose.msrb.mxu3 %v10794_v49  ;;  %v13228_v49 = vld [vmem:[%s13973_s7 + $0x14dc] sm:$0xf0] }
 0x55b   : > { %v11118_v54 = vor.u32 %v13228_v49, %v11117_v41  ;;  %v13259_v41 = vld [vmem:[%s13973_s7 + $0x15dc] sm:$0xf] }
 0x55c   : > { %v7394_v55 = vpop.f32.mrf.mxu0  ;;  %v7407_v1 = vpop.f32.mrf.mxu1  ;;  %v11271_v49 = vld [vmem:[%s13973_s7 + $0x15f8] sm:$0xf0] }
 0x55d   : > { %v7395_v59 = vadd.f32 %v7394_v55, %v7382_v46  ;;  %v11098_v46 = vor.u32 %v13217_v40, %v11095_v42  ;;  %v13209_v55 = vld [vmem:[%s13973_s7 + $0x144c] sm:$0xf]  ;;  %v13242_v40 = vld [vmem:[%s13973_s7 + $0x1554] sm:$0xf] }
 0x55e   : > { %v11199_v42 = vld [vmem:[%s13973_s7 + $0x1570] sm:$0xf0] }
 0x55f   : > { %7497 = vmatmul.bf16.vlgmr.msrb.gmra.mxu0 %v14145_v30  ;;  %7510 = vmatmul.bf16.vlgmr.msrb.gmra.mxu1 %v14155_v38  ;;  %v7408_v60 = vadd.f32 %v7407_v1, %v7395_v59  ;;  %v11063_v59 = vld [vmem:[%s13973_s7 + $0x1468] sm:$0xf0]  ;;  %v11054_v1 = vor.u32 %v13212_v52, %v11053_v48  ;;  %v11198_v48 = vor.u32 %v13246_v13, %v11197_v51  ;;  %v13214_v51 = vld [vmem:[%s13973_s7 + $0x146c] sm:$0xf0]  ;;  %v13210_v13 = vld [vmem:[%s13973_s7 + $0x1454] sm:$0xf] }
 0x560   : > { %7541 = vmatpush.bf16.xpose.msra.mxu0 %v11246_v50  ;;  %7554 = vmatpush.bf16.xpose.msra.mxu1 %v11250_v14  ;;  %v13224_v50 = vld [vmem:[%s13973_s7 + $0x14c4] sm:$0xf]  ;;  %v11066_v29 = vor.u32 %v13209_v55, %v11063_v59  ;;  %v11202_v52 = vor.u32 %v13242_v40, %v11199_v42  ;;  %v13234_v55 = vld [vmem:[%s13973_s7 + $0x1514] sm:$0xf]  ;;  %v11077_v42 = vld [vmem:[%s13973_s7 + $0x1458] sm:$0xf] }
 0x561   : > { %7567 = vmatpush.bf16.xpose.msra.mxu2 %v11254_v18  ;;  %7536 = vmatmul.bf16.vlgmr.msrb.gmra.mxu3 %v14157_v39  ;;  %v11119_v18 = vld [vmem:[%s13973_s7 + $0x14e0] sm:$0xf0]  ;;  %v11167_v59 = vld [vmem:[%s13973_s7 + $0x1530] sm:$0xf0] }
 0x562   : > { %7580 = vmatpush.bf16.xpose.msra.mxu3 %v11258_v47  ;;  %7523 = vmatmul.bf16.vlgmr.msrb.gmra.mxu2 %v14150_v34  ;;  %v11125_v47 = vld [vmem:[%s13973_s7 + $0x14c8] sm:$0xf]  ;;  %v11122_v4 = vor.u32 %v13224_v50, %v11119_v18  ;;  %v11071_v40 = vld [vmem:[%s13973_s7 + $0x1470] sm:$0xf0] }
 0x563   : > { %v11126_v24 = vor.u32 %v13229_v57, %v11125_v47  ;;  %v11274_v57 = vor.u32 %v13259_v41, %v11271_v49 }
 0x564   : > { %v7433_v43 = vpop.f32.mrf.mxu3  ;;  %v7396_v44 = vpop.f32.mrf.mxu0 }
 0x565   : > { %v7420_v2 = vpop.f32.mrf.mxu2  ;;  %v7409_v10 = vpop.f32.mrf.mxu1  ;;  %v11269_v44 = vld [vmem:[%s13973_s7 + $0x15d8] sm:$0xf] }
 0x566   : > { %v7421_v32 = vadd.f32 %v7420_v2, %v7408_v60  ;;  %v11021_v60 = vld [vmem:[%s13973_s7 + $0x1400] sm:$0xf]  ;;  %v11031_v2 = vld [vmem:[%s13973_s7 + $0x1428] sm:$0xf0]  ;;  %v11026_v10 = vor.u32 %v13200_v0, %v11023_v26 }
 0x568   : > { %7542 = vmatpush.bf16.xpose.msra.mxu0 %v11214_v31  ;;  %7555 = vmatpush.bf16.xpose.msra.mxu1 %v11218_v5  ;;  %v7434_v12 = vadd.f32 %v7433_v43, %v7421_v32  ;;  %v11085_v31 = vld [vmem:[%s13973_s7 + $0x1480] sm:$0xf]  ;;  %v13258_v32 = vld [vmem:[%s13973_s7 + $0x15d4] sm:$0xf] }
 0x569   : > { %7568 = vmatpush.bf16.xpose.msra.mxu2 %v11222_v33  ;;  %v13220_v5 = vld [vmem:[%s13973_s7 + $0x149c] sm:$0xf0]  ;;  %v13216_v33 = vld [vmem:[%s13973_s7 + $0x1484] sm:$0xf]  ;;  %v11263_v43 = vld [vmem:[%s13973_s7 + $0x15f0] sm:$0xf0] }
 0x56a   : > { %7581 = vmatpush.bf16.xpose.msra.mxu3 %v11226_v37  ;;  %v8173_v14 = vadd.f32 %v7434_v12, %v333_v9  ;;  %v11087_v37 = vld [vmem:[%s13973_s7 + $0x14a0] sm:$0xf0]  ;;  %v11086_v45 = vor.u32 %v13220_v5, %v11085_v31  ;;  %v13263_v9 = vld [vmem:[%s13973_s7 + $0x15f4] sm:$0xf0]  ;;  %v11030_v12 = vor.u32 %v13205_v35, %v11029_v11  ;;  %v11266_v18 = vor.u32 %v13258_v32, %v11263_v43  ;;  %v11133_v11 = vld [vmem:[%s13973_s7 + $0x14d0] sm:$0xf] }
 0x56b   : > { %v11090_v58 = vor.u32 %v13216_v33, %v11087_v37  ;;  %v11270_v47 = vor.u32 %v13263_v9, %v11269_v44  ;;  %v11230_v31 = vor.u32 %v13254_v22, %v11229_v20  ;;  %v13230_v35 = vld [vmem:[%s13973_s7 + $0x14ec] sm:$0xf0]  ;;  %v13227_v32 = vld [vmem:[%s13973_s7 + $0x14dc] sm:$0xf]  ;;  %v13223_v20 = vld [vmem:[%s13973_s7 + $0x14b4] sm:$0xf0] }
 0x56c   : > { %8189 = vst [vmem:[#allocation2 + $0x40] sm:$0xff] %v8173_v14  ;;  %v7435_v27 = vpop.f32.mrf.mxu3  ;;  %v11134_v43 = vor.u32 %v13230_v35, %v11133_v11  ;;  %v13219_v22 = vld [vmem:[%s13973_s7 + $0x149c] sm:$0xf]  ;;  %v11503_v11 = vld [vmem:[%s13973_s7 + $0x17e0] sm:$0xf0] }
 0x56d   : > { %v7422_v25 = vpop.f32.mrf.mxu2  ;;  %v11239_v27 = vld [vmem:[%s13973_s7 + $0x15b8] sm:$0xf0]  ;;  %v11509_v35 = vld [vmem:[%s13973_s7 + $0x17c8] sm:$0xf] }
 0x56e   : > { %v13255_v25 = vld [vmem:[%s13973_s7 + $0x15b4] sm:$0xf0] }
 0x570   : > { %7543 = vmatpush.bf16.xpose.msra.mxu0 %v11182_v56  ;;  %7556 = vmatpush.bf16.xpose.msra.mxu1 %v11186_v63  ;;  %v13208_v56 = vld [vmem:[%s13973_s7 + $0x1444] sm:$0xf] }
 0x571   : > { %7569 = vmatpush.bf16.xpose.msra.mxu2 %v11190_v23  ;;  %v11055_v63 = vld [vmem:[%s13973_s7 + $0x1460] sm:$0xf0]  ;;  %v11061_v23 = vld [vmem:[%s13973_s7 + $0x1448] sm:$0xf] }
 0x572   : > { %7582 = vmatpush.bf16.xpose.msra.mxu3 %v11194_v53  ;;  %v13213_v53 = vld [vmem:[%s13973_s7 + $0x1464] sm:$0xf0]  ;;  %v11058_v7 = vor.u32 %v13208_v56, %v11055_v63 }
 0x573   : > { %v11062_v28 = vor.u32 %v13213_v53, %v11061_v23  ;;  %v11165_v23 = vld [vmem:[%s13973_s7 + $0x1510] sm:$0xf] }
 0x574   : > { %v13238_v53 = vld [vmem:[%s13973_s7 + $0x152c] sm:$0xf0] }
 0x578   : > { %7544 = vmatpush.bf16.xpose.msra.mxu0 %v11150_v36  ;;  %7557 = vmatpush.bf16.xpose.msra.mxu1 %v11154_v6  ;;  %v13201_v36 = vld [vmem:[%s13973_s7 + $0x140c] sm:$0xf]  ;;  %v11261_v6 = vld [vmem:[%s13973_s7 + $0x15d0] sm:$0xf] }
 0x579   : > { %7570 = vmatpush.bf16.xpose.msra.mxu2 %v11158_v8  ;;  %v13262_v8 = vld [vmem:[%s13973_s7 + $0x15ec] sm:$0xf0]  ;;  %v11034_v50 = vor.u32 %v13201_v36, %v11031_v2  ;;  %v13226_v36 = vld [vmem:[%s13973_s7 + $0x14d4] sm:$0xf] }
 0x57a   : > { %7583 = vmatpush.bf16.xpose.msra.mxu3 %v11162_v15  ;;  %v11022_v15 = vor.u32 %v13204_v62, %v11021_v60  ;;  %v11262_v14 = vor.u32 %v13262_v8, %v11261_v6  ;;  %v11166_v60 = vor.u32 %v13238_v53, %v11165_v23  ;;  %v11170_v62 = vor.u32 %v13234_v55, %v11167_v59  ;;  %v11135_v2 = vld [vmem:[%s13973_s7 + $0x14f0] sm:$0xf0]  ;;  %v11141_v6 = vld [vmem:[%s13973_s7 + $0x14d8] sm:$0xf]  ;;  %v11037_v23 = vld [vmem:[%s13973_s7 + $0x1410] sm:$0xf] }
 0x57b   : > { %v13231_v8 = vld [vmem:[%s13973_s7 + $0x14f4] sm:$0xf0]  ;;  %v13206_v53 = vld [vmem:[%s13973_s7 + $0x142c] sm:$0xf0]  ;;  %v13202_v55 = vld [vmem:[%s13973_s7 + $0x1414] sm:$0xf] }
 0x57c   : > { %v11039_v59 = vld [vmem:[%s13973_s7 + $0x1430] sm:$0xf0] }
 0x580   : > { %7545 = vmatpush.bf16.xpose.msra.mxu0 %v11118_v54  ;;  %7558 = vmatpush.bf16.xpose.msra.mxu1 %v11122_v4  ;;  %v13250_v54 = vld [vmem:[%s13973_s7 + $0x1594] sm:$0xf] }
 0x581   : > { %7571 = vmatpush.bf16.xpose.msra.mxu2 %v11126_v24  ;;  %v11231_v4 = vld [vmem:[%s13973_s7 + $0x15b0] sm:$0xf0]  ;;  %v11237_v24 = vld [vmem:[%s13973_s7 + $0x1598] sm:$0xf] }
 0x582   : > { %7584 = vmatpush.bf16.xpose.msra.mxu3 %v11130_v61  ;;  %v13251_v61 = vld [vmem:[%s13973_s7 + $0x159c] sm:$0xf]  ;;  %v11234_v5 = vor.u32 %v13250_v54, %v11231_v4  ;;  %v11238_v33 = vor.u32 %v13255_v25, %v11237_v24 }
 0x583   : > { %v11242_v37 = vor.u32 %v13251_v61, %v11239_v27  ;;  %v11111_v54 = vld [vmem:[%s13973_s7 + $0x14b8] sm:$0xf0] }
 0x588   : > { %7546 = vmatpush.bf16.xpose.msra.mxu0 %v11086_v45  ;;  %7559 = vmatpush.bf16.xpose.msra.mxu1 %v11090_v58  ;;  %v11205_v45 = vld [vmem:[%s13973_s7 + $0x1558] sm:$0xf] }
 0x589   : > { %7572 = vmatpush.bf16.xpose.msra.mxu2 %v11094_v19  ;;  %v13247_v58 = vld [vmem:[%s13973_s7 + $0x1574] sm:$0xf0]  ;;  %v13243_v19 = vld [vmem:[%s13973_s7 + $0x155c] sm:$0xf] }
 0x58a   : > { %7585 = vmatpush.bf16.xpose.msra.mxu3 %v11098_v46  ;;  %v11207_v46 = vld [vmem:[%s13973_s7 + $0x1578] sm:$0xf0]  ;;  %v11206_v56 = vor.u32 %v13247_v58, %v11205_v45  ;;  %v13215_v45 = vld [vmem:[%s13973_s7 + $0x1474] sm:$0xf0] }
 0x58b   : > { %v11210_v63 = vor.u32 %v13243_v19, %v11207_v46  ;;  %v13211_v58 = vld [vmem:[%s13973_s7 + $0x145c] sm:$0xf] }
 0x58c   : > { %v11079_v19 = vld [vmem:[%s13973_s7 + $0x1478] sm:$0xf0] }
 0x590   : > { %7547 = vmatpush.bf16.xpose.msra.mxu0 %v11054_v1  ;;  %7560 = vmatpush.bf16.xpose.msra.mxu1 %v11058_v7  ;;  %v11173_v1 = vld [vmem:[%s13973_s7 + $0x1518] sm:$0xf] }
 0x591   : > { %7573 = vmatpush.bf16.xpose.msra.mxu2 %v11062_v28  ;;  %v13239_v7 = vld [vmem:[%s13973_s7 + $0x1534] sm:$0xf0]  ;;  %v13235_v28 = vld [vmem:[%s13973_s7 + $0x151c] sm:$0xf] }
 0x592   : > { %7586 = vmatpush.bf16.xpose.msra.mxu3 %v11066_v29  ;;  %v11175_v29 = vld [vmem:[%s13973_s7 + $0x1538] sm:$0xf0]  ;;  %v11174_v0 = vor.u32 %v13239_v7, %v11173_v1  ;;  %v11045_v1 = vld [vmem:[%s13973_s7 + $0x1418] sm:$0xf] }
 0x593   : > { %v11178_v26 = vor.u32 %v13235_v28, %v11175_v29  ;;  %v13207_v7 = vld [vmem:[%s13973_s7 + $0x1434] sm:$0xf0]  ;;  %v13203_v28 = vld [vmem:[%s13973_s7 + $0x141c] sm:$0xf] }
 0x594   : > { %v11047_v29 = vld [vmem:[%s13973_s7 + $0x1438] sm:$0xf0] }
 0x598   : > { %7548 = vmatpush.bf16.xpose.msra.mxu0 %v11022_v15  ;;  %7561 = vmatpush.bf16.xpose.msra.mxu1 %v11026_v10  ;;  %v11143_v15 = vld [vmem:[%s13973_s7 + $0x14f8] sm:$0xf0]  ;;  %v11138_v10 = vor.u32 %v13226_v36, %v11135_v2  ;;  %v13325_v36 = vld [vmem:[%s13973_s7 + $0x17e4] sm:$0xf0]  ;;  %v11042_v2 = vor.u32 %v13202_v55, %v11039_v59  ;;  %v11407_v55 = vld [vmem:[%s13973_s7 + $0x1720] sm:$0xf0] }
 0x599   : > { %7574 = vmatpush.bf16.xpose.msra.mxu2 %v11030_v12  ;;  %v11142_v12 = vor.u32 %v13231_v8, %v11141_v6  ;;  %v11146_v41 = vor.u32 %v13227_v32, %v11143_v15  ;;  %v11046_v6 = vor.u32 %v13207_v7, %v11045_v1  ;;  %v13321_v8 = vld [vmem:[%s13973_s7 + $0x17cc] sm:$0xf]  ;;  %v11050_v15 = vor.u32 %v13203_v28, %v11047_v29  ;;  %v11413_v59 = vld [vmem:[%s13973_s7 + $0x1708] sm:$0xf] }
 0x59a   : > { %7587 = vmatpush.bf16.xpose.msra.mxu3 %v11034_v50  ;;  %v11101_v50 = vld [vmem:[%s13973_s7 + $0x1490] sm:$0xf]  ;;  %v11511_v32 = vld [vmem:[%s13973_s7 + $0x17e8] sm:$0xf0]  ;;  %v13301_v1 = vld [vmem:[%s13973_s7 + $0x1724] sm:$0xf0] }
 0x59b   : > { %v13297_v7 = vld [vmem:[%s13973_s7 + $0x170c] sm:$0xf] }
 0x59c   : > { %v15589_v44 = vpop.f32.mrf.mxu0  ;;  %v15591_v9 = vpop.f32.mrf.mxu1  ;;  %v11415_v28 = vld [vmem:[%s13973_s7 + $0x1728] sm:$0xf0] }
 0x59f   : > { %7549 = vmatmul.bf16.vlgmr.msra.gmra.mxu0 %v14089_v16  ;;  %7562 = vmatmul.bf16.vlgmr.msra.gmra.mxu1 %v14096_v21 }
 0x5a0   : > { %7593 = vmatpush.bf16.xpose.msrb.mxu0 %v11262_v14  ;;  %7606 = vmatpush.bf16.xpose.msrb.mxu1 %v11266_v18  ;;  %v13222_v14 = vld [vmem:[%s13973_s7 + $0x14ac] sm:$0xf0]  ;;  %v13218_v18 = vld [vmem:[%s13973_s7 + $0x1494] sm:$0xf] }
 0x5a1   : > { %7619 = vmatpush.bf16.xpose.msrb.mxu2 %v11270_v47  ;;  %7588 = vmatmul.bf16.vlgmr.msra.gmra.mxu3 %v14091_v17  ;;  %v11103_v47 = vld [vmem:[%s13973_s7 + $0x14b0] sm:$0xf0]  ;;  %v11102_v4 = vor.u32 %v13222_v14, %v11101_v50  ;;  %v11469_v50 = vld [vmem:[%s13973_s7 + $0x1780] sm:$0xf] }
 0x5a2   : > { %7632 = vmatpush.bf16.xpose.msrb.mxu3 %v11274_v57  ;;  %7575 = vmatmul.bf16.vlgmr.msra.gmra.mxu2 %v14078_v3  ;;  %v11109_v57 = vld [vmem:[%s13973_s7 + $0x1498] sm:$0xf]  ;;  %v11106_v61 = vor.u32 %v13218_v18, %v11103_v47  ;;  %v13316_v14 = vld [vmem:[%s13973_s7 + $0x179c] sm:$0xf0]  ;;  %v13312_v18 = vld [vmem:[%s13973_s7 + $0x1784] sm:$0xf] }
 0x5a3   : > { %v11110_v27 = vor.u32 %v13223_v20, %v11109_v57  ;;  %v11471_v47 = vld [vmem:[%s13973_s7 + $0x17a0] sm:$0xf0]  ;;  %v11477_v57 = vld [vmem:[%s13973_s7 + $0x1788] sm:$0xf] }
 0x5a4   : > { %v15603_v24 = vpop.f32.mrf.mxu3  ;;  %v7448_v25 = vpop.f32.mrf.mxu0  ;;  %v13317_v20 = vld [vmem:[%s13973_s7 + $0x17a4] sm:$0xf0] }
 0x5a5   : > { %v15593_v49 = vpop.f32.mrf.mxu2  ;;  %v11470_v25 = vor.u32 %v13316_v14, %v11469_v50  ;;  %v13293_v50 = vld [vmem:[%s13973_s7 + $0x16e4] sm:$0xf0]  ;;  %v13289_v14 = vld [vmem:[%s13973_s7 + $0x16cc] sm:$0xf] }
 0x5a8   : > { %7594 = vmatpush.bf16.xpose.msrb.mxu0 %v11230_v31  ;;  %7607 = vmatpush.bf16.xpose.msrb.mxu1 %v11234_v5  ;;  %v7461_v31 = vpop.f32.mrf.mxu1  ;;  %v11114_v5 = vor.u32 %v13219_v22, %v11111_v54  ;;  %v7460_v22 = vadd.f32 %v15591_v9, %v15589_v44  ;;  %v13313_v54 = vld [vmem:[%s13973_s7 + $0x178c] sm:$0xf]  ;;  %v11437_v9 = vld [vmem:[%s13973_s7 + $0x1740] sm:$0xf] }
 0x5a9   : > { %7620 = vmatpush.bf16.xpose.msrb.mxu2 %v11238_v33 }
 0x5aa   : > { %7633 = vmatpush.bf16.xpose.msrb.mxu3 %v11242_v37  ;;  %v11069_v37 = vld [vmem:[%s13973_s7 + $0x1450] sm:$0xf]  ;;  %v7473_v44 = vadd.f32 %v15593_v49, %v7460_v22 }
 0x5ab   : > { %v11070_v46 = vor.u32 %v13214_v51, %v11069_v37  ;;  %v11439_v37 = vld [vmem:[%s13973_s7 + $0x1760] sm:$0xf0]  ;;  %v11445_v51 = vld [vmem:[%s13973_s7 + $0x1748] sm:$0xf] }
 0x5ad   : > { %v7474_v33 = vpop.f32.mrf.mxu2 }
 0x5ae   : > { %v13304_v33 = vld [vmem:[%s13973_s7 + $0x1744] sm:$0xf] }
 0x5b0   : > { %7595 = vmatpush.bf16.xpose.msrb.mxu0 %v11198_v48  ;;  %7608 = vmatpush.bf16.xpose.msrb.mxu1 %v11202_v52  ;;  %v7487_v48 = vpop.f32.mrf.mxu3  ;;  %v11074_v52 = vor.u32 %v13210_v13, %v11071_v40  ;;  %v13309_v13 = vld [vmem:[%s13973_s7 + $0x1764] sm:$0xf0]  ;;  %v7486_v40 = vadd.f32 %v15603_v24, %v7473_v44  ;;  %v13296_v24 = vld [vmem:[%s13973_s7 + $0x1704] sm:$0xf] }
 0x5b1   : > { %7621 = vmatpush.bf16.xpose.msrb.mxu2 %v11206_v56  ;;  %v11078_v56 = vor.u32 %v13215_v45, %v11077_v42  ;;  %v13305_v42 = vld [vmem:[%s13973_s7 + $0x174c] sm:$0xf]  ;;  %v11349_v44 = vld [vmem:[%s13973_s7 + $0x1688] sm:$0xf] }
 0x5b2   : > { %7634 = vmatpush.bf16.xpose.msrb.mxu3 %v11210_v63  ;;  %v11082_v63 = vor.u32 %v13211_v58, %v11079_v19  ;;  %v11447_v45 = vld [vmem:[%s13973_s7 + $0x1768] sm:$0xf0]  ;;  %v11442_v58 = vor.u32 %v13304_v33, %v11439_v37  ;;  %v11446_v19 = vor.u32 %v13309_v13, %v11445_v51 }
 0x5b3   : > { %v11351_v33 = vld [vmem:[%s13973_s7 + $0x16a8] sm:$0xf0] }
 0x5b8   : > { %7596 = vmatpush.bf16.xpose.msrb.mxu0 %v11166_v60  ;;  %7609 = vmatpush.bf16.xpose.msrb.mxu1 %v11170_v62  ;;  %v11501_v60 = vld [vmem:[%s13973_s7 + $0x17c0] sm:$0xf] }
 0x5b9   : > { %7622 = vmatpush.bf16.xpose.msrb.mxu2 %v11174_v0  ;;  %v13324_v62 = vld [vmem:[%s13973_s7 + $0x17dc] sm:$0xf0]  ;;  %v13320_v0 = vld [vmem:[%s13973_s7 + $0x17c4] sm:$0xf] }
 0x5ba   : > { %7635 = vmatpush.bf16.xpose.msrb.mxu3 %v11178_v26  ;;  %v11038_v26 = vor.u32 %v13206_v53, %v11037_v23  ;;  %v13300_v23 = vld [vmem:[%s13973_s7 + $0x171c] sm:$0xf0] }
 0x5c0   : > { %7597 = vmatpush.bf16.xpose.msrb.mxu0 %v11134_v43  ;;  %7610 = vmatpush.bf16.xpose.msrb.mxu1 %v11138_v10  ;;  %v11502_v43 = vor.u32 %v13324_v62, %v11501_v60  ;;  %v11506_v10 = vor.u32 %v13320_v0, %v11503_v11  ;;  %v11410_v62 = vor.u32 %v13296_v24, %v11407_v55  ;;  %v13268_v55 = vld [vmem:[%s13973_s7 + $0x161c] sm:$0xf0] }
 0x5c1   : > { %7623 = vmatpush.bf16.xpose.msrb.mxu2 %v11142_v12  ;;  %v11510_v12 = vor.u32 %v13325_v36, %v11509_v35  ;;  %v11414_v0 = vor.u32 %v13301_v1, %v11413_v59  ;;  %v11418_v11 = vor.u32 %v13297_v7, %v11415_v28  ;;  %v13264_v59 = vld [vmem:[%s13973_s7 + $0x1604] sm:$0xf]  ;;  %v11285_v7 = vld [vmem:[%s13973_s7 + $0x1608] sm:$0xf] }
 0x5c2   : > { %7636 = vmatpush.bf16.xpose.msrb.mxu3 %v11146_v41  ;;  %v11514_v41 = vor.u32 %v13321_v8, %v11511_v32  ;;  %v11373_v32 = vld [vmem:[%s13973_s7 + $0x16c0] sm:$0xf]  ;;  %v11279_v1 = vld [vmem:[%s13973_s7 + $0x1620] sm:$0xf0]  ;;  %v13269_v28 = vld [vmem:[%s13973_s7 + $0x1624] sm:$0xf0] }
 0x5c8   : > { %7598 = vmatpush.bf16.xpose.msrb.mxu0 %v11102_v4  ;;  %7611 = vmatpush.bf16.xpose.msrb.mxu1 %v11106_v61  ;;  %v11479_v4 = vld [vmem:[%s13973_s7 + $0x17a8] sm:$0xf0]  ;;  %v11474_v61 = vor.u32 %v13312_v18, %v11471_v47 }
 0x5c9   : > { %7624 = vmatpush.bf16.xpose.msrb.mxu2 %v11110_v27  ;;  %v11478_v27 = vor.u32 %v13317_v20, %v11477_v57  ;;  %v11482_v31 = vor.u32 %v13313_v54, %v11479_v4  ;;  %v11383_v18 = vld [vmem:[%s13973_s7 + $0x16e8] sm:$0xf0] }
 0x5ca   : > { %7637 = vmatpush.bf16.xpose.msrb.mxu3 %v11114_v5  ;;  %v13308_v5 = vld [vmem:[%s13973_s7 + $0x175c] sm:$0xf0]  ;;  %v11386_v54 = vor.u32 %v13289_v14, %v11383_v18  ;;  %v11485_v14 = vld [vmem:[%s13973_s7 + $0x1790] sm:$0xf] }
 0x5cb   : > { %v11438_v49 = vor.u32 %v13308_v5, %v11437_v9  ;;  %v13285_v9 = vld [vmem:[%s13973_s7 + $0x16a4] sm:$0xf0]  ;;  %v13281_v5 = vld [vmem:[%s13973_s7 + $0x168c] sm:$0xf]  ;;  %v13318_v18 = vld [vmem:[%s13973_s7 + $0x17ac] sm:$0xf0] }
 0x5cc   : > { %v11350_v13 = vor.u32 %v13285_v9, %v11349_v44  ;;  %v11453_v44 = vld [vmem:[%s13973_s7 + $0x1750] sm:$0xf] }
 0x5cd   : > { %v13310_v9 = vld [vmem:[%s13973_s7 + $0x176c] sm:$0xf0] }
 0x5d0   : > { %7599 = vmatpush.bf16.xpose.msrb.mxu0 %v11070_v46  ;;  %7612 = vmatpush.bf16.xpose.msrb.mxu1 %v11074_v52  ;;  %v11450_v46 = vor.u32 %v13305_v42, %v11447_v45  ;;  %v11309_v42 = vld [vmem:[%s13973_s7 + $0x1640] sm:$0xf] }
 0x5d1   : > { %7625 = vmatpush.bf16.xpose.msrb.mxu2 %v11078_v56  ;;  %v13276_v45 = vld [vmem:[%s13973_s7 + $0x165c] sm:$0xf0] }
 0x5d2   : > { %7638 = vmatpush.bf16.xpose.msrb.mxu3 %v11082_v63  ;;  %v11405_v63 = vld [vmem:[%s13973_s7 + $0x1700] sm:$0xf] }
 0x5d3   : > { %v11406_v29 = vor.u32 %v13300_v23, %v11405_v63 }
 0x5d8   : > { %7600 = vmatpush.bf16.xpose.msrb.mxu0 %v11038_v26  ;;  %7613 = vmatpush.bf16.xpose.msrb.mxu1 %v11042_v2  ;;  %v334_v2 = vld [vmem:[#allocation2 + $0x20] sm:$0xff] }
 0x5d9   : > { %7626 = vmatpush.bf16.xpose.msrb.mxu2 %v11046_v6 }
 0x5da   : > { %7639 = vmatpush.bf16.xpose.msrb.mxu3 %v11050_v15  ;;  %v13292_v15 = vld [vmem:[%s13973_s7 + $0x16dc] sm:$0xf0] }
 0x5db   : > { %v11374_v47 = vor.u32 %v13292_v15, %v11373_v32  ;;  %v13323_v32 = vld [vmem:[%s13973_s7 + $0x17dc] sm:$0xf] }
 0x5dc   : > { %v7498_v48 = vpop.f32.mrf.mxu0  ;;  %v7511_v56 = vpop.f32.mrf.mxu1  ;;  %v11527_v15 = vld [vmem:[%s13973_s7 + $0x17f8] sm:$0xf0] }
 0x5dd   : > { %v7499_v52 = vadd.f32 %v7498_v48, %v7486_v40  ;;  %v11354_v40 = vor.u32 %v13281_v5, %v11351_v33  ;;  %v13273_v48 = vld [vmem:[%s13973_s7 + $0x164c] sm:$0xf]  ;;  %v13306_v5 = vld [vmem:[%s13973_s7 + $0x1754] sm:$0xf] }
 0x5de   : > { %v11455_v33 = vld [vmem:[%s13973_s7 + $0x1770] sm:$0xf0] }
 0x5df   : > { %7601 = vmatmul.bf16.vlgmr.msrb.gmra.mxu0 %v14145_v30  ;;  %7614 = vmatmul.bf16.vlgmr.msrb.gmra.mxu1 %v14155_v38  ;;  %v7512_v53 = vadd.f32 %v7511_v56, %v7499_v52  ;;  %v11319_v52 = vld [vmem:[%s13973_s7 + $0x1668] sm:$0xf0]  ;;  %v11310_v56 = vor.u32 %v13276_v45, %v11309_v42  ;;  %v11454_v42 = vor.u32 %v13310_v9, %v11453_v44  ;;  %v13278_v44 = vld [vmem:[%s13973_s7 + $0x166c] sm:$0xf0]  ;;  %v13274_v9 = vld [vmem:[%s13973_s7 + $0x1654] sm:$0xf] }
 0x5e0   : > { %7645 = vmatpush.bf16.xpose.msra.mxu0 %v11502_v43  ;;  %7658 = vmatpush.bf16.xpose.msra.mxu1 %v11506_v10  ;;  %v13288_v43 = vld [vmem:[%s13973_s7 + $0x16c4] sm:$0xf]  ;;  %v11322_v24 = vor.u32 %v13273_v48, %v11319_v52  ;;  %v11458_v45 = vor.u32 %v13306_v5, %v11455_v33  ;;  %v13298_v48 = vld [vmem:[%s13973_s7 + $0x1714] sm:$0xf]  ;;  %v11333_v33 = vld [vmem:[%s13973_s7 + $0x1658] sm:$0xf] }
 0x5e1   : > { %7671 = vmatpush.bf16.xpose.msra.mxu2 %v11510_v12  ;;  %7640 = vmatmul.bf16.vlgmr.msrb.gmra.mxu3 %v14157_v39  ;;  %v11375_v12 = vld [vmem:[%s13973_s7 + $0x16e0] sm:$0xf0]  ;;  %v11423_v52 = vld [vmem:[%s13973_s7 + $0x1730] sm:$0xf0] }
 0x5e2   : > { %7684 = vmatpush.bf16.xpose.msra.mxu3 %v11514_v41  ;;  %7627 = vmatmul.bf16.vlgmr.msrb.gmra.mxu2 %v14150_v34  ;;  %v11381_v41 = vld [vmem:[%s13973_s7 + $0x16c8] sm:$0xf]  ;;  %v11378_v57 = vor.u32 %v13288_v43, %v11375_v12  ;;  %v11327_v5 = vld [vmem:[%s13973_s7 + $0x1670] sm:$0xf0] }
 0x5e3   : > { %v11382_v20 = vor.u32 %v13293_v50, %v11381_v41  ;;  %v11530_v50 = vor.u32 %v13323_v32, %v11527_v15 }
 0x5e4   : > { %v7537_v35 = vpop.f32.mrf.mxu3  ;;  %v7500_v36 = vpop.f32.mrf.mxu0 }
 0x5e5   : > { %v7524_v60 = vpop.f32.mrf.mxu2  ;;  %v7513_v6 = vpop.f32.mrf.mxu1  ;;  %v11525_v36 = vld [vmem:[%s13973_s7 + $0x17d8] sm:$0xf] }
 0x5e6   : > { %v7525_v26 = vadd.f32 %v7524_v60, %v7512_v53  ;;  %v11277_v53 = vld [vmem:[%s13973_s7 + $0x1600] sm:$0xf]  ;;  %v11287_v60 = vld [vmem:[%s13973_s7 + $0x1628] sm:$0xf0]  ;;  %v11282_v6 = vor.u32 %v13264_v59, %v11279_v1 }
 0x5e8   : > { %7646 = vmatpush.bf16.xpose.msra.mxu0 %v11470_v25  ;;  %7659 = vmatpush.bf16.xpose.msra.mxu1 %v11474_v61  ;;  %v7538_v8 = vadd.f32 %v7537_v35, %v7525_v26  ;;  %v11341_v25 = vld [vmem:[%s13973_s7 + $0x1680] sm:$0xf]  ;;  %v13322_v26 = vld [vmem:[%s13973_s7 + $0x17d4] sm:$0xf] }
 0x5e9   : > { %7672 = vmatpush.bf16.xpose.msra.mxu2 %v11478_v27  ;;  %v13284_v61 = vld [vmem:[%s13973_s7 + $0x169c] sm:$0xf0]  ;;  %v13280_v27 = vld [vmem:[%s13973_s7 + $0x1684] sm:$0xf]  ;;  %v11519_v35 = vld [vmem:[%s13973_s7 + $0x17f0] sm:$0xf0] }
 0x5ea   : > { %7685 = vmatpush.bf16.xpose.msra.mxu3 %v11482_v31  ;;  %v8174_v10 = vadd.f32 %v7538_v8, %v334_v2  ;;  %v11343_v31 = vld [vmem:[%s13973_s7 + $0x16a0] sm:$0xf0]  ;;  %v11342_v37 = vor.u32 %v13284_v61, %v11341_v25  ;;  %v13327_v2 = vld [vmem:[%s13973_s7 + $0x17f4] sm:$0xf0]  ;;  %v11286_v8 = vor.u32 %v13269_v28, %v11285_v7  ;;  %v11522_v12 = vor.u32 %v13322_v26, %v11519_v35  ;;  %v11389_v7 = vld [vmem:[%s13973_s7 + $0x16d0] sm:$0xf] }
 0x5eb   : > { %v11346_v51 = vor.u32 %v13280_v27, %v11343_v31  ;;  %v11526_v41 = vor.u32 %v13327_v2, %v11525_v36  ;;  %v11486_v25 = vor.u32 %v13318_v18, %v11485_v14  ;;  %v13294_v28 = vld [vmem:[%s13973_s7 + $0x16ec] sm:$0xf0]  ;;  %v13291_v26 = vld [vmem:[%s13973_s7 + $0x16dc] sm:$0xf]  ;;  %v13287_v14 = vld [vmem:[%s13973_s7 + $0x16b4] sm:$0xf0] }
 0x5ec   : > { %8190 = vst [vmem:[#allocation2 + $0x20] sm:$0xff] %v8174_v10  ;;  %v7539_v4 = vpop.f32.mrf.mxu3  ;;  %v11390_v35 = vor.u32 %v13294_v28, %v11389_v7  ;;  %v13283_v18 = vld [vmem:[%s13973_s7 + $0x169c] sm:$0xf]  ;;  %v11759_v7 = vld [vmem:[%s13973_s7 + $0x19e0] sm:$0xf0] }
 0x5ed   : > { %v7526_v22 = vpop.f32.mrf.mxu2  ;;  %v11495_v4 = vld [vmem:[%s13973_s7 + $0x17b8] sm:$0xf0]  ;;  %v11765_v28 = vld [vmem:[%s13973_s7 + $0x19c8] sm:$0xf] }
 0x5ee   : > { %v13319_v22 = vld [vmem:[%s13973_s7 + $0x17b4] sm:$0xf0] }
 0x5f0   : > { %7647 = vmatpush.bf16.xpose.msra.mxu0 %v11438_v49  ;;  %7660 = vmatpush.bf16.xpose.msra.mxu1 %v11442_v58  ;;  %v13272_v49 = vld [vmem:[%s13973_s7 + $0x1644] sm:$0xf] }
 0x5f1   : > { %7673 = vmatpush.bf16.xpose.msra.mxu2 %v11446_v19  ;;  %v11311_v58 = vld [vmem:[%s13973_s7 + $0x1660] sm:$0xf0]  ;;  %v11317_v19 = vld [vmem:[%s13973_s7 + $0x1648] sm:$0xf] }
 0x5f2   : > { %7686 = vmatpush.bf16.xpose.msra.mxu3 %v11450_v46  ;;  %v13277_v46 = vld [vmem:[%s13973_s7 + $0x1664] sm:$0xf0]  ;;  %v11314_v63 = vor.u32 %v13272_v49, %v11311_v58 }
 0x5f3   : > { %v11318_v23 = vor.u32 %v13277_v46, %v11317_v19  ;;  %v11421_v19 = vld [vmem:[%s13973_s7 + $0x1710] sm:$0xf] }
 0x5f4   : > { %v13302_v46 = vld [vmem:[%s13973_s7 + $0x172c] sm:$0xf0] }
 0x5f8   : > { %7648 = vmatpush.bf16.xpose.msra.mxu0 %v11406_v29  ;;  %7661 = vmatpush.bf16.xpose.msra.mxu1 %v11410_v62  ;;  %v13265_v29 = vld [vmem:[%s13973_s7 + $0x160c] sm:$0xf]  ;;  %v11517_v62 = vld [vmem:[%s13973_s7 + $0x17d0] sm:$0xf] }
 0x5f9   : > { %7674 = vmatpush.bf16.xpose.msra.mxu2 %v11414_v0  ;;  %v13326_v0 = vld [vmem:[%s13973_s7 + $0x17ec] sm:$0xf0]  ;;  %v11290_v43 = vor.u32 %v13265_v29, %v11287_v60  ;;  %v13290_v29 = vld [vmem:[%s13973_s7 + $0x16d4] sm:$0xf] }
 0x5fa   : > { %7687 = vmatpush.bf16.xpose.msra.mxu3 %v11418_v11  ;;  %v11278_v11 = vor.u32 %v13268_v55, %v11277_v53  ;;  %v11518_v10 = vor.u32 %v13326_v0, %v11517_v62  ;;  %v11422_v53 = vor.u32 %v13302_v46, %v11421_v19  ;;  %v11426_v55 = vor.u32 %v13298_v48, %v11423_v52  ;;  %v11391_v60 = vld [vmem:[%s13973_s7 + $0x16f0] sm:$0xf0]  ;;  %v11397_v62 = vld [vmem:[%s13973_s7 + $0x16d8] sm:$0xf]  ;;  %v11293_v19 = vld [vmem:[%s13973_s7 + $0x1610] sm:$0xf] }
 0x5fb   : > { %v13295_v0 = vld [vmem:[%s13973_s7 + $0x16f4] sm:$0xf0]  ;;  %v13270_v46 = vld [vmem:[%s13973_s7 + $0x162c] sm:$0xf0]  ;;  %v13266_v48 = vld [vmem:[%s13973_s7 + $0x1614] sm:$0xf] }
 0x5fc   : > { %v11295_v52 = vld [vmem:[%s13973_s7 + $0x1630] sm:$0xf0] }
 0x600   : > { %7649 = vmatpush.bf16.xpose.msra.mxu0 %v11374_v47  ;;  %7662 = vmatpush.bf16.xpose.msra.mxu1 %v11378_v57  ;;  %v13314_v47 = vld [vmem:[%s13973_s7 + $0x1794] sm:$0xf] }
 0x601   : > { %7675 = vmatpush.bf16.xpose.msra.mxu2 %v11382_v20  ;;  %v11487_v57 = vld [vmem:[%s13973_s7 + $0x17b0] sm:$0xf0]  ;;  %v11493_v20 = vld [vmem:[%s13973_s7 + $0x1798] sm:$0xf] }
 0x602   : > { %7688 = vmatpush.bf16.xpose.msra.mxu3 %v11386_v54  ;;  %v13315_v54 = vld [vmem:[%s13973_s7 + $0x179c] sm:$0xf]  ;;  %v11490_v61 = vor.u32 %v13314_v47, %v11487_v57  ;;  %v11494_v27 = vor.u32 %v13319_v22, %v11493_v20 }
 0x603   : > { %v11498_v31 = vor.u32 %v13315_v54, %v11495_v4  ;;  %v11367_v47 = vld [vmem:[%s13973_s7 + $0x16b8] sm:$0xf0] }
 0x608   : > { %7650 = vmatpush.bf16.xpose.msra.mxu0 %v11342_v37  ;;  %7663 = vmatpush.bf16.xpose.msra.mxu1 %v11346_v51  ;;  %v11461_v37 = vld [vmem:[%s13973_s7 + $0x1758] sm:$0xf] }
 0x609   : > { %7676 = vmatpush.bf16.xpose.msra.mxu2 %v11350_v13  ;;  %v13311_v51 = vld [vmem:[%s13973_s7 + $0x1774] sm:$0xf0]  ;;  %v13307_v13 = vld [vmem:[%s13973_s7 + $0x175c] sm:$0xf] }
 0x60a   : > { %7689 = vmatpush.bf16.xpose.msra.mxu3 %v11354_v40  ;;  %v11463_v40 = vld [vmem:[%s13973_s7 + $0x1778] sm:$0xf0]  ;;  %v11462_v49 = vor.u32 %v13311_v51, %v11461_v37  ;;  %v13279_v37 = vld [vmem:[%s13973_s7 + $0x1674] sm:$0xf0] }
 0x60b   : > { %v11466_v58 = vor.u32 %v13307_v13, %v11463_v40  ;;  %v13275_v51 = vld [vmem:[%s13973_s7 + $0x165c] sm:$0xf] }
 0x60c   : > { %v11335_v13 = vld [vmem:[%s13973_s7 + $0x1678] sm:$0xf0] }
 0x610   : > { %7651 = vmatpush.bf16.xpose.msra.mxu0 %v11310_v56  ;;  %7664 = vmatpush.bf16.xpose.msra.mxu1 %v11314_v63  ;;  %v11429_v56 = vld [vmem:[%s13973_s7 + $0x1718] sm:$0xf] }
 0x611   : > { %7677 = vmatpush.bf16.xpose.msra.mxu2 %v11318_v23  ;;  %v13303_v63 = vld [vmem:[%s13973_s7 + $0x1734] sm:$0xf0]  ;;  %v13299_v23 = vld [vmem:[%s13973_s7 + $0x171c] sm:$0xf] }
 0x612   : > { %7690 = vmatpush.bf16.xpose.msra.mxu3 %v11322_v24  ;;  %v11431_v24 = vld [vmem:[%s13973_s7 + $0x1738] sm:$0xf0]  ;;  %v11430_v59 = vor.u32 %v13303_v63, %v11429_v56  ;;  %v11301_v56 = vld [vmem:[%s13973_s7 + $0x1618] sm:$0xf] }
 0x613   : > { %v11434_v1 = vor.u32 %v13299_v23, %v11431_v24  ;;  %v13271_v63 = vld [vmem:[%s13973_s7 + $0x1634] sm:$0xf0]  ;;  %v13267_v23 = vld [vmem:[%s13973_s7 + $0x161c] sm:$0xf] }
 0x614   : > { %v11303_v24 = vld [vmem:[%s13973_s7 + $0x1638] sm:$0xf0] }
 0x618   : > { %7652 = vmatpush.bf16.xpose.msra.mxu0 %v11278_v11  ;;  %7665 = vmatpush.bf16.xpose.msra.mxu1 %v11282_v6  ;;  %v11399_v11 = vld [vmem:[%s13973_s7 + $0x16f8] sm:$0xf0]  ;;  %v11394_v6 = vor.u32 %v13290_v29, %v11391_v60  ;;  %v13389_v29 = vld [vmem:[%s13973_s7 + $0x19e4] sm:$0xf0]  ;;  %v11298_v60 = vor.u32 %v13266_v48, %v11295_v52  ;;  %v11663_v48 = vld [vmem:[%s13973_s7 + $0x1920] sm:$0xf0] }
 0x619   : > { %7678 = vmatpush.bf16.xpose.msra.mxu2 %v11286_v8  ;;  %v11398_v8 = vor.u32 %v13295_v0, %v11397_v62  ;;  %v11402_v32 = vor.u32 %v13291_v26, %v11399_v11  ;;  %v11302_v62 = vor.u32 %v13271_v63, %v11301_v56  ;;  %v13385_v0 = vld [vmem:[%s13973_s7 + $0x19cc] sm:$0xf]  ;;  %v11306_v11 = vor.u32 %v13267_v23, %v11303_v24  ;;  %v11669_v52 = vld [vmem:[%s13973_s7 + $0x1908] sm:$0xf] }
 0x61a   : > { %7691 = vmatpush.bf16.xpose.msra.mxu3 %v11290_v43  ;;  %v11357_v43 = vld [vmem:[%s13973_s7 + $0x1690] sm:$0xf]  ;;  %v11767_v26 = vld [vmem:[%s13973_s7 + $0x19e8] sm:$0xf0]  ;;  %v13365_v56 = vld [vmem:[%s13973_s7 + $0x1924] sm:$0xf0] }
 0x61b   : > { %v13361_v63 = vld [vmem:[%s13973_s7 + $0x190c] sm:$0xf] }
 0x61c   : > { %v15737_v36 = vpop.f32.mrf.mxu0  ;;  %v15739_v2 = vpop.f32.mrf.mxu1  ;;  %v11671_v23 = vld [vmem:[%s13973_s7 + $0x1928] sm:$0xf0] }
 0x61f   : > { %7653 = vmatmul.bf16.vlgmr.msra.gmra.mxu0 %v14089_v16  ;;  %7666 = vmatmul.bf16.vlgmr.msra.gmra.mxu1 %v14096_v21 }
 0x620   : > { %7697 = vmatpush.bf16.xpose.msrb.mxu0 %v11518_v10  ;;  %7710 = vmatpush.bf16.xpose.msrb.mxu1 %v11522_v12  ;;  %v13286_v10 = vld [vmem:[%s13973_s7 + $0x16ac] sm:$0xf0]  ;;  %v13282_v12 = vld [vmem:[%s13973_s7 + $0x1694] sm:$0xf] }
 0x621   : > { %7723 = vmatpush.bf16.xpose.msrb.mxu2 %v11526_v41  ;;  %7692 = vmatmul.bf16.vlgmr.msra.gmra.mxu3 %v14091_v17  ;;  %v11359_v41 = vld [vmem:[%s13973_s7 + $0x16b0] sm:$0xf0]  ;;  %v11358_v57 = vor.u32 %v13286_v10, %v11357_v43  ;;  %v11725_v43 = vld [vmem:[%s13973_s7 + $0x1980] sm:$0xf] }
 0x622   : > { %7736 = vmatpush.bf16.xpose.msrb.mxu3 %v11530_v50  ;;  %7679 = vmatmul.bf16.vlgmr.msra.gmra.mxu2 %v14078_v3  ;;  %v11365_v50 = vld [vmem:[%s13973_s7 + $0x1698] sm:$0xf]  ;;  %v11362_v54 = vor.u32 %v13282_v12, %v11359_v41  ;;  %v13380_v10 = vld [vmem:[%s13973_s7 + $0x199c] sm:$0xf0]  ;;  %v13376_v12 = vld [vmem:[%s13973_s7 + $0x1984] sm:$0xf] }
 0x623   : > { %v11366_v4 = vor.u32 %v13287_v14, %v11365_v50  ;;  %v11727_v41 = vld [vmem:[%s13973_s7 + $0x19a0] sm:$0xf0]  ;;  %v11733_v50 = vld [vmem:[%s13973_s7 + $0x1988] sm:$0xf] }
 0x624   : > { %v15751_v20 = vpop.f32.mrf.mxu3  ;;  %v7552_v22 = vpop.f32.mrf.mxu0  ;;  %v13381_v14 = vld [vmem:[%s13973_s7 + $0x19a4] sm:$0xf0] }
 0x625   : > { %v15741_v15 = vpop.f32.mrf.mxu2  ;;  %v11726_v22 = vor.u32 %v13380_v10, %v11725_v43  ;;  %v13357_v43 = vld [vmem:[%s13973_s7 + $0x18e4] sm:$0xf0]  ;;  %v13353_v10 = vld [vmem:[%s13973_s7 + $0x18cc] sm:$0xf] }
 0x628   : > { %7698 = vmatpush.bf16.xpose.msrb.mxu0 %v11486_v25  ;;  %7711 = vmatpush.bf16.xpose.msrb.mxu1 %v11490_v61  ;;  %v7565_v25 = vpop.f32.mrf.mxu1  ;;  %v11370_v61 = vor.u32 %v13283_v18, %v11367_v47  ;;  %v7564_v18 = vadd.f32 %v15739_v2, %v15737_v36  ;;  %v13377_v47 = vld [vmem:[%s13973_s7 + $0x198c] sm:$0xf]  ;;  %v11693_v2 = vld [vmem:[%s13973_s7 + $0x1940] sm:$0xf] }
 0x629   : > { %7724 = vmatpush.bf16.xpose.msrb.mxu2 %v11494_v27 }
 0x62a   : > { %7737 = vmatpush.bf16.xpose.msrb.mxu3 %v11498_v31  ;;  %v11325_v31 = vld [vmem:[%s13973_s7 + $0x1650] sm:$0xf]  ;;  %v7577_v36 = vadd.f32 %v15741_v15, %v7564_v18 }
 0x62b   : > { %v11326_v40 = vor.u32 %v13278_v44, %v11325_v31  ;;  %v11695_v31 = vld [vmem:[%s13973_s7 + $0x1960] sm:$0xf0]  ;;  %v11701_v44 = vld [vmem:[%s13973_s7 + $0x1948] sm:$0xf] }
 0x62d   : > { %v7578_v27 = vpop.f32.mrf.mxu2 }
 0x62e   : > { %v13368_v27 = vld [vmem:[%s13973_s7 + $0x1944] sm:$0xf] }
 0x630   : > { %7699 = vmatpush.bf16.xpose.msrb.mxu0 %v11454_v42  ;;  %7712 = vmatpush.bf16.xpose.msrb.mxu1 %v11458_v45  ;;  %v7591_v42 = vpop.f32.mrf.mxu3  ;;  %v11330_v45 = vor.u32 %v13274_v9, %v11327_v5  ;;  %v13373_v9 = vld [vmem:[%s13973_s7 + $0x1964] sm:$0xf0]  ;;  %v7590_v5 = vadd.f32 %v15751_v20, %v7577_v36  ;;  %v13360_v20 = vld [vmem:[%s13973_s7 + $0x1904] sm:$0xf] }
 0x631   : > { %7725 = vmatpush.bf16.xpose.msrb.mxu2 %v11462_v49  ;;  %v11334_v49 = vor.u32 %v13279_v37, %v11333_v33  ;;  %v13369_v33 = vld [vmem:[%s13973_s7 + $0x194c] sm:$0xf]  ;;  %v11605_v36 = vld [vmem:[%s13973_s7 + $0x1888] sm:$0xf] }
 0x632   : > { %7738 = vmatpush.bf16.xpose.msrb.mxu3 %v11466_v58  ;;  %v11338_v58 = vor.u32 %v13275_v51, %v11335_v13  ;;  %v11703_v37 = vld [vmem:[%s13973_s7 + $0x1968] sm:$0xf0]  ;;  %v11698_v51 = vor.u32 %v13368_v27, %v11695_v31  ;;  %v11702_v13 = vor.u32 %v13373_v9, %v11701_v44 }
 0x633   : > { %v11607_v27 = vld [vmem:[%s13973_s7 + $0x18a8] sm:$0xf0] }
 0x638   : > { %7700 = vmatpush.bf16.xpose.msrb.mxu0 %v11422_v53  ;;  %7713 = vmatpush.bf16.xpose.msrb.mxu1 %v11426_v55  ;;  %v11757_v53 = vld [vmem:[%s13973_s7 + $0x19c0] sm:$0xf] }
 0x639   : > { %7726 = vmatpush.bf16.xpose.msrb.mxu2 %v11430_v59  ;;  %v13388_v55 = vld [vmem:[%s13973_s7 + $0x19dc] sm:$0xf0]  ;;  %v13384_v59 = vld [vmem:[%s13973_s7 + $0x19c4] sm:$0xf] }
 0x63a   : > { %7739 = vmatpush.bf16.xpose.msrb.mxu3 %v11434_v1  ;;  %v11294_v1 = vor.u32 %v13270_v46, %v11293_v19  ;;  %v13364_v19 = vld [vmem:[%s13973_s7 + $0x191c] sm:$0xf0] }
 0x640   : > { %7701 = vmatpush.bf16.xpose.msrb.mxu0 %v11390_v35  ;;  %7714 = vmatpush.bf16.xpose.msrb.mxu1 %v11394_v6  ;;  %v11758_v35 = vor.u32 %v13388_v55, %v11757_v53  ;;  %v11762_v6 = vor.u32 %v13384_v59, %v11759_v7  ;;  %v11666_v55 = vor.u32 %v13360_v20, %v11663_v48  ;;  %v13332_v48 = vld [vmem:[%s13973_s7 + $0x181c] sm:$0xf0] }
 0x641   : > { %7727 = vmatpush.bf16.xpose.msrb.mxu2 %v11398_v8  ;;  %v11766_v8 = vor.u32 %v13389_v29, %v11765_v28  ;;  %v11670_v59 = vor.u32 %v13365_v56, %v11669_v52  ;;  %v11674_v7 = vor.u32 %v13361_v63, %v11671_v23  ;;  %v13328_v52 = vld [vmem:[%s13973_s7 + $0x1804] sm:$0xf]  ;;  %v11541_v63 = vld [vmem:[%s13973_s7 + $0x1808] sm:$0xf] }
 0x642   : > { %7740 = vmatpush.bf16.xpose.msrb.mxu3 %v11402_v32  ;;  %v11770_v32 = vor.u32 %v13385_v0, %v11767_v26  ;;  %v11629_v26 = vld [vmem:[%s13973_s7 + $0x18c0] sm:$0xf]  ;;  %v11535_v56 = vld [vmem:[%s13973_s7 + $0x1820] sm:$0xf0]  ;;  %v13333_v23 = vld [vmem:[%s13973_s7 + $0x1824] sm:$0xf0] }
 0x648   : > { %7702 = vmatpush.bf16.xpose.msrb.mxu0 %v11358_v57  ;;  %7715 = vmatpush.bf16.xpose.msrb.mxu1 %v11362_v54  ;;  %v11735_v57 = vld [vmem:[%s13973_s7 + $0x19a8] sm:$0xf0]  ;;  %v11730_v54 = vor.u32 %v13376_v12, %v11727_v41 }
 0x649   : > { %7728 = vmatpush.bf16.xpose.msrb.mxu2 %v11366_v4  ;;  %v11734_v4 = vor.u32 %v13381_v14, %v11733_v50  ;;  %v11738_v25 = vor.u32 %v13377_v47, %v11735_v57  ;;  %v11639_v12 = vld [vmem:[%s13973_s7 + $0x18e8] sm:$0xf0] }
 0x64a   : > { %7741 = vmatpush.bf16.xpose.msrb.mxu3 %v11370_v61  ;;  %v13372_v61 = vld [vmem:[%s13973_s7 + $0x195c] sm:$0xf0]  ;;  %v11642_v47 = vor.u32 %v13353_v10, %v11639_v12  ;;  %v11741_v10 = vld [vmem:[%s13973_s7 + $0x1990] sm:$0xf] }
 0x64b   : > { %v11694_v15 = vor.u32 %v13372_v61, %v11693_v2  ;;  %v13349_v2 = vld [vmem:[%s13973_s7 + $0x18a4] sm:$0xf0]  ;;  %v13345_v61 = vld [vmem:[%s13973_s7 + $0x188c] sm:$0xf]  ;;  %v13382_v12 = vld [vmem:[%s13973_s7 + $0x19ac] sm:$0xf0] }
 0x64c   : > { %v11606_v9 = vor.u32 %v13349_v2, %v11605_v36  ;;  %v11709_v36 = vld [vmem:[%s13973_s7 + $0x1950] sm:$0xf] }
 0x64d   : > { %v13374_v2 = vld [vmem:[%s13973_s7 + $0x196c] sm:$0xf0] }
 0x650   : > { %7703 = vmatpush.bf16.xpose.msrb.mxu0 %v11326_v40  ;;  %7716 = vmatpush.bf16.xpose.msrb.mxu1 %v11330_v45  ;;  %v11706_v40 = vor.u32 %v13369_v33, %v11703_v37  ;;  %v11565_v33 = vld [vmem:[%s13973_s7 + $0x1840] sm:$0xf] }
 0x651   : > { %7729 = vmatpush.bf16.xpose.msrb.mxu2 %v11334_v49  ;;  %v13340_v37 = vld [vmem:[%s13973_s7 + $0x185c] sm:$0xf0] }
 0x652   : > { %7742 = vmatpush.bf16.xpose.msrb.mxu3 %v11338_v58  ;;  %v11661_v58 = vld [vmem:[%s13973_s7 + $0x1900] sm:$0xf] }
 0x653   : > { %v11662_v24 = vor.u32 %v13364_v19, %v11661_v58 }
 0x658   : > { %7704 = vmatpush.bf16.xpose.msrb.mxu0 %v11294_v1  ;;  %7717 = vmatpush.bf16.xpose.msrb.mxu1 %v11298_v60  ;;  %v335_v60 = vld [vmem:[#allocation2 + $0x10] sm:$0xff] }
 0x659   : > { %7730 = vmatpush.bf16.xpose.msrb.mxu2 %v11302_v62 }
 0x65a   : > { %7743 = vmatpush.bf16.xpose.msrb.mxu3 %v11306_v11  ;;  %v13356_v11 = vld [vmem:[%s13973_s7 + $0x18dc] sm:$0xf0] }
 0x65b   : > { %v11630_v41 = vor.u32 %v13356_v11, %v11629_v26  ;;  %v13387_v26 = vld [vmem:[%s13973_s7 + $0x19dc] sm:$0xf] }
 0x65c   : > { %v7602_v42 = vpop.f32.mrf.mxu0  ;;  %v7615_v49 = vpop.f32.mrf.mxu1  ;;  %v11783_v11 = vld [vmem:[%s13973_s7 + $0x19f8] sm:$0xf0] }
 0x65d   : > { %v7603_v45 = vadd.f32 %v7602_v42, %v7590_v5  ;;  %v11610_v5 = vor.u32 %v13345_v61, %v11607_v27  ;;  %v13337_v42 = vld [vmem:[%s13973_s7 + $0x184c] sm:$0xf]  ;;  %v13370_v61 = vld [vmem:[%s13973_s7 + $0x1954] sm:$0xf] }
 0x65e   : > { %v11711_v27 = vld [vmem:[%s13973_s7 + $0x1970] sm:$0xf0] }
 0x65f   : > { %7705 = vmatmul.bf16.vlgmr.msrb.gmra.mxu0 %v14145_v30  ;;  %7718 = vmatmul.bf16.vlgmr.msrb.gmra.mxu1 %v14155_v38  ;;  %v7616_v46 = vadd.f32 %v7615_v49, %v7603_v45  ;;  %v11575_v45 = vld [vmem:[%s13973_s7 + $0x1868] sm:$0xf0]  ;;  %v11566_v49 = vor.u32 %v13340_v37, %v11565_v33  ;;  %v11710_v33 = vor.u32 %v13374_v2, %v11709_v36  ;;  %v13342_v36 = vld [vmem:[%s13973_s7 + $0x186c] sm:$0xf0]  ;;  %v13338_v2 = vld [vmem:[%s13973_s7 + $0x1854] sm:$0xf] }
 0x660   : > { %7749 = vmatpush.bf16.xpose.msra.mxu0 %v11758_v35  ;;  %7762 = vmatpush.bf16.xpose.msra.mxu1 %v11762_v6  ;;  %v13352_v35 = vld [vmem:[%s13973_s7 + $0x18c4] sm:$0xf]  ;;  %v11578_v20 = vor.u32 %v13337_v42, %v11575_v45  ;;  %v11714_v37 = vor.u32 %v13370_v61, %v11711_v27  ;;  %v13362_v42 = vld [vmem:[%s13973_s7 + $0x1914] sm:$0xf]  ;;  %v11589_v27 = vld [vmem:[%s13973_s7 + $0x1858] sm:$0xf] }
 0x661   : > { %7775 = vmatpush.bf16.xpose.msra.mxu2 %v11766_v8  ;;  %7744 = vmatmul.bf16.vlgmr.msrb.gmra.mxu3 %v14157_v39  ;;  %v11631_v8 = vld [vmem:[%s13973_s7 + $0x18e0] sm:$0xf0]  ;;  %v11679_v45 = vld [vmem:[%s13973_s7 + $0x1930] sm:$0xf0] }
 0x662   : > { %7788 = vmatpush.bf16.xpose.msra.mxu3 %v11770_v32  ;;  %7731 = vmatmul.bf16.vlgmr.msrb.gmra.mxu2 %v14150_v34  ;;  %v11637_v32 = vld [vmem:[%s13973_s7 + $0x18c8] sm:$0xf]  ;;  %v11634_v50 = vor.u32 %v13352_v35, %v11631_v8  ;;  %v11583_v61 = vld [vmem:[%s13973_s7 + $0x1870] sm:$0xf0] }
 0x663   : > { %v11638_v14 = vor.u32 %v13357_v43, %v11637_v32  ;;  %v11786_v43 = vor.u32 %v13387_v26, %v11783_v11 }
 0x664   : > { %v7641_v28 = vpop.f32.mrf.mxu3  ;;  %v7604_v29 = vpop.f32.mrf.mxu0 }
 0x665   : > { %v7628_v53 = vpop.f32.mrf.mxu2  ;;  %v7617_v62 = vpop.f32.mrf.mxu1  ;;  %v11781_v29 = vld [vmem:[%s13973_s7 + $0x19d8] sm:$0xf] }
 0x666   : > { %v7629_v1 = vadd.f32 %v7628_v53, %v7616_v46  ;;  %v11533_v46 = vld [vmem:[%s13973_s7 + $0x1800] sm:$0xf]  ;;  %v11543_v53 = vld [vmem:[%s13973_s7 + $0x1828] sm:$0xf0]  ;;  %v11538_v62 = vor.u32 %v13328_v52, %v11535_v56 }
 0x668   : > { %7750 = vmatpush.bf16.xpose.msra.mxu0 %v11726_v22  ;;  %7763 = vmatpush.bf16.xpose.msra.mxu1 %v11730_v54  ;;  %v7642_v0 = vadd.f32 %v7641_v28, %v7629_v1  ;;  %v11597_v22 = vld [vmem:[%s13973_s7 + $0x1880] sm:$0xf]  ;;  %v13386_v1 = vld [vmem:[%s13973_s7 + $0x19d4] sm:$0xf] }
 0x669   : > { %7776 = vmatpush.bf16.xpose.msra.mxu2 %v11734_v4  ;;  %v13348_v54 = vld [vmem:[%s13973_s7 + $0x189c] sm:$0xf0]  ;;  %v13344_v4 = vld [vmem:[%s13973_s7 + $0x1884] sm:$0xf]  ;;  %v11775_v28 = vld [vmem:[%s13973_s7 + $0x19f0] sm:$0xf0] }
 0x66a   : > { %7789 = vmatpush.bf16.xpose.msra.mxu3 %v11738_v25  ;;  %v8175_v6 = vadd.f32 %v7642_v0, %v335_v60  ;;  %v11599_v25 = vld [vmem:[%s13973_s7 + $0x18a0] sm:$0xf0]  ;;  %v11598_v31 = vor.u32 %v13348_v54, %v11597_v22  ;;  %v13391_v60 = vld [vmem:[%s13973_s7 + $0x19f4] sm:$0xf0]  ;;  %v11542_v0 = vor.u32 %v13333_v23, %v11541_v63  ;;  %v11778_v8 = vor.u32 %v13386_v1, %v11775_v28  ;;  %v11645_v63 = vld [vmem:[%s13973_s7 + $0x18d0] sm:$0xf] }
 0x66b   : > { %v11602_v44 = vor.u32 %v13344_v4, %v11599_v25  ;;  %v11782_v32 = vor.u32 %v13391_v60, %v11781_v29  ;;  %v11742_v22 = vor.u32 %v13382_v12, %v11741_v10  ;;  %v13358_v23 = vld [vmem:[%s13973_s7 + $0x18ec] sm:$0xf0]  ;;  %v13355_v1 = vld [vmem:[%s13973_s7 + $0x18dc] sm:$0xf]  ;;  %v13351_v10 = vld [vmem:[%s13973_s7 + $0x18b4] sm:$0xf0] }
 0x66c   : > { %8191 = vst [vmem:[#allocation2 + $0x10] sm:$0xff] %v8175_v6  ;;  %v7643_v57 = vpop.f32.mrf.mxu3  ;;  %v11646_v28 = vor.u32 %v13358_v23, %v11645_v63  ;;  %v13347_v12 = vld [vmem:[%s13973_s7 + $0x189c] sm:$0xf]  ;;  %v12015_v63 = vld [vmem:[%s13973_s7 + $0x1be0] sm:$0xf0] }
 0x66d   : > { %v7630_v18 = vpop.f32.mrf.mxu2  ;;  %v11751_v57 = vld [vmem:[%s13973_s7 + $0x19b8] sm:$0xf0]  ;;  %v12021_v23 = vld [vmem:[%s13973_s7 + $0x1bc8] sm:$0xf] }
 0x66e   : > { %v13383_v18 = vld [vmem:[%s13973_s7 + $0x19b4] sm:$0xf0] }
 0x670   : > { %7751 = vmatpush.bf16.xpose.msra.mxu0 %v11694_v15  ;;  %7764 = vmatpush.bf16.xpose.msra.mxu1 %v11698_v51  ;;  %v13336_v15 = vld [vmem:[%s13973_s7 + $0x1844] sm:$0xf] }
 0x671   : > { %7777 = vmatpush.bf16.xpose.msra.mxu2 %v11702_v13  ;;  %v11567_v51 = vld [vmem:[%s13973_s7 + $0x1860] sm:$0xf0]  ;;  %v11573_v13 = vld [vmem:[%s13973_s7 + $0x1848] sm:$0xf] }
 0x672   : > { %7790 = vmatpush.bf16.xpose.msra.mxu3 %v11706_v40  ;;  %v13341_v40 = vld [vmem:[%s13973_s7 + $0x1864] sm:$0xf0]  ;;  %v11570_v58 = vor.u32 %v13336_v15, %v11567_v51 }
 0x673   : > { %v11574_v19 = vor.u32 %v13341_v40, %v11573_v13  ;;  %v11677_v13 = vld [vmem:[%s13973_s7 + $0x1910] sm:$0xf] }
 0x674   : > { %v13366_v40 = vld [vmem:[%s13973_s7 + $0x192c] sm:$0xf0] }
 0x678   : > { %7752 = vmatpush.bf16.xpose.msra.mxu0 %v11662_v24  ;;  %7765 = vmatpush.bf16.xpose.msra.mxu1 %v11666_v55  ;;  %v13329_v24 = vld [vmem:[%s13973_s7 + $0x180c] sm:$0xf]  ;;  %v11773_v55 = vld [vmem:[%s13973_s7 + $0x19d0] sm:$0xf] }
 0x679   : > { %7778 = vmatpush.bf16.xpose.msra.mxu2 %v11670_v59  ;;  %v13390_v59 = vld [vmem:[%s13973_s7 + $0x19ec] sm:$0xf0]  ;;  %v11546_v35 = vor.u32 %v13329_v24, %v11543_v53  ;;  %v13354_v24 = vld [vmem:[%s13973_s7 + $0x18d4] sm:$0xf] }
 0x67a   : > { %7791 = vmatpush.bf16.xpose.msra.mxu3 %v11674_v7  ;;  %v11534_v7 = vor.u32 %v13332_v48, %v11533_v46  ;;  %v11774_v6 = vor.u32 %v13390_v59, %v11773_v55  ;;  %v11678_v46 = vor.u32 %v13366_v40, %v11677_v13  ;;  %v11682_v48 = vor.u32 %v13362_v42, %v11679_v45  ;;  %v11647_v53 = vld [vmem:[%s13973_s7 + $0x18f0] sm:$0xf0]  ;;  %v11653_v55 = vld [vmem:[%s13973_s7 + $0x18d8] sm:$0xf]  ;;  %v11549_v13 = vld [vmem:[%s13973_s7 + $0x1810] sm:$0xf] }
 0x67b   : > { %v13359_v59 = vld [vmem:[%s13973_s7 + $0x18f4] sm:$0xf0]  ;;  %v13334_v40 = vld [vmem:[%s13973_s7 + $0x182c] sm:$0xf0]  ;;  %v13330_v42 = vld [vmem:[%s13973_s7 + $0x1814] sm:$0xf] }
 0x67c   : > { %v11551_v45 = vld [vmem:[%s13973_s7 + $0x1830] sm:$0xf0] }
 0x680   : > { %7753 = vmatpush.bf16.xpose.msra.mxu0 %v11630_v41  ;;  %7766 = vmatpush.bf16.xpose.msra.mxu1 %v11634_v50  ;;  %v13378_v41 = vld [vmem:[%s13973_s7 + $0x1994] sm:$0xf] }
 0x681   : > { %7779 = vmatpush.bf16.xpose.msra.mxu2 %v11638_v14  ;;  %v11743_v50 = vld [vmem:[%s13973_s7 + $0x19b0] sm:$0xf0]  ;;  %v11749_v14 = vld [vmem:[%s13973_s7 + $0x1998] sm:$0xf] }
 0x682   : > { %7792 = vmatpush.bf16.xpose.msra.mxu3 %v11642_v47  ;;  %v13379_v47 = vld [vmem:[%s13973_s7 + $0x199c] sm:$0xf]  ;;  %v11746_v54 = vor.u32 %v13378_v41, %v11743_v50  ;;  %v11750_v4 = vor.u32 %v13383_v18, %v11749_v14 }
 0x683   : > { %v11754_v25 = vor.u32 %v13379_v47, %v11751_v57  ;;  %v11623_v41 = vld [vmem:[%s13973_s7 + $0x18b8] sm:$0xf0] }
 0x688   : > { %7754 = vmatpush.bf16.xpose.msra.mxu0 %v11598_v31  ;;  %7767 = vmatpush.bf16.xpose.msra.mxu1 %v11602_v44  ;;  %v11717_v31 = vld [vmem:[%s13973_s7 + $0x1958] sm:$0xf] }
 0x689   : > { %7780 = vmatpush.bf16.xpose.msra.mxu2 %v11606_v9  ;;  %v13375_v44 = vld [vmem:[%s13973_s7 + $0x1974] sm:$0xf0]  ;;  %v13371_v9 = vld [vmem:[%s13973_s7 + $0x195c] sm:$0xf] }
 0x68a   : > { %7793 = vmatpush.bf16.xpose.msra.mxu3 %v11610_v5  ;;  %v11719_v5 = vld [vmem:[%s13973_s7 + $0x1978] sm:$0xf0]  ;;  %v11718_v15 = vor.u32 %v13375_v44, %v11717_v31  ;;  %v13343_v31 = vld [vmem:[%s13973_s7 + $0x1874] sm:$0xf0] }
 0x68b   : > { %v11722_v51 = vor.u32 %v13371_v9, %v11719_v5  ;;  %v13339_v44 = vld [vmem:[%s13973_s7 + $0x185c] sm:$0xf] }
 0x68c   : > { %v11591_v9 = vld [vmem:[%s13973_s7 + $0x1878] sm:$0xf0] }
 0x690   : > { %7755 = vmatpush.bf16.xpose.msra.mxu0 %v11566_v49  ;;  %7768 = vmatpush.bf16.xpose.msra.mxu1 %v11570_v58  ;;  %v11685_v49 = vld [vmem:[%s13973_s7 + $0x1918] sm:$0xf] }
 0x691   : > { %7781 = vmatpush.bf16.xpose.msra.mxu2 %v11574_v19  ;;  %v13367_v58 = vld [vmem:[%s13973_s7 + $0x1934] sm:$0xf0]  ;;  %v13363_v19 = vld [vmem:[%s13973_s7 + $0x191c] sm:$0xf] }
 0x692   : > { %7794 = vmatpush.bf16.xpose.msra.mxu3 %v11578_v20  ;;  %v11687_v20 = vld [vmem:[%s13973_s7 + $0x1938] sm:$0xf0]  ;;  %v11686_v52 = vor.u32 %v13367_v58, %v11685_v49  ;;  %v11557_v49 = vld [vmem:[%s13973_s7 + $0x1818] sm:$0xf] }
 0x693   : > { %v11690_v56 = vor.u32 %v13363_v19, %v11687_v20  ;;  %v13335_v58 = vld [vmem:[%s13973_s7 + $0x1834] sm:$0xf0]  ;;  %v13331_v19 = vld [vmem:[%s13973_s7 + $0x181c] sm:$0xf] }
 0x694   : > { %v11559_v20 = vld [vmem:[%s13973_s7 + $0x1838] sm:$0xf0] }
 0x698   : > { %7756 = vmatpush.bf16.xpose.msra.mxu0 %v11534_v7  ;;  %7769 = vmatpush.bf16.xpose.msra.mxu1 %v11538_v62  ;;  %v11655_v7 = vld [vmem:[%s13973_s7 + $0x18f8] sm:$0xf0]  ;;  %v11650_v62 = vor.u32 %v13354_v24, %v11647_v53  ;;  %v13453_v24 = vld [vmem:[%s13973_s7 + $0x1be4] sm:$0xf0]  ;;  %v11554_v53 = vor.u32 %v13330_v42, %v11551_v45  ;;  %v11919_v42 = vld [vmem:[%s13973_s7 + $0x1b20] sm:$0xf0] }
 0x699   : > { %7782 = vmatpush.bf16.xpose.msra.mxu2 %v11542_v0  ;;  %v11654_v0 = vor.u32 %v13359_v59, %v11653_v55  ;;  %v11658_v26 = vor.u32 %v13355_v1, %v11655_v7  ;;  %v11558_v55 = vor.u32 %v13335_v58, %v11557_v49  ;;  %v13449_v59 = vld [vmem:[%s13973_s7 + $0x1bcc] sm:$0xf]  ;;  %v11562_v7 = vor.u32 %v13331_v19, %v11559_v20  ;;  %v11925_v45 = vld [vmem:[%s13973_s7 + $0x1b08] sm:$0xf] }
 0x69a   : > { %7795 = vmatpush.bf16.xpose.msra.mxu3 %v11546_v35  ;;  %v11613_v35 = vld [vmem:[%s13973_s7 + $0x1890] sm:$0xf]  ;;  %v12023_v1 = vld [vmem:[%s13973_s7 + $0x1be8] sm:$0xf0]  ;;  %v13429_v49 = vld [vmem:[%s13973_s7 + $0x1b24] sm:$0xf0] }
 0x69b   : > { %v13425_v58 = vld [vmem:[%s13973_s7 + $0x1b0c] sm:$0xf] }
 0x69c   : > { %v15885_v29 = vpop.f32.mrf.mxu0  ;;  %v15887_v60 = vpop.f32.mrf.mxu1  ;;  %v11927_v19 = vld [vmem:[%s13973_s7 + $0x1b28] sm:$0xf0] }
 0x69f   : > { %7757 = vmatmul.bf16.vlgmr.msra.gmra.mxu0 %v14089_v16  ;;  %7770 = vmatmul.bf16.vlgmr.msra.gmra.mxu1 %v14096_v21 }
 0x6a0   : > { %7801 = vmatpush.bf16.xpose.msrb.mxu0 %v11774_v6  ;;  %7814 = vmatpush.bf16.xpose.msrb.mxu1 %v11778_v8  ;;  %v13350_v6 = vld [vmem:[%s13973_s7 + $0x18ac] sm:$0xf0]  ;;  %v13346_v8 = vld [vmem:[%s13973_s7 + $0x1894] sm:$0xf] }
 0x6a1   : > { %7827 = vmatpush.bf16.xpose.msrb.mxu2 %v11782_v32  ;;  %7796 = vmatmul.bf16.vlgmr.msra.gmra.mxu3 %v14091_v17  ;;  %v11615_v32 = vld [vmem:[%s13973_s7 + $0x18b0] sm:$0xf0]  ;;  %v11614_v50 = vor.u32 %v13350_v6, %v11613_v35  ;;  %v11981_v35 = vld [vmem:[%s13973_s7 + $0x1b80] sm:$0xf] }
 0x6a2   : > { %7840 = vmatpush.bf16.xpose.msrb.mxu3 %v11786_v43  ;;  %7783 = vmatmul.bf16.vlgmr.msra.gmra.mxu2 %v14078_v3  ;;  %v11621_v43 = vld [vmem:[%s13973_s7 + $0x1898] sm:$0xf]  ;;  %v11618_v47 = vor.u32 %v13346_v8, %v11615_v32  ;;  %v13444_v6 = vld [vmem:[%s13973_s7 + $0x1b9c] sm:$0xf0]  ;;  %v13440_v8 = vld [vmem:[%s13973_s7 + $0x1b84] sm:$0xf] }
 0x6a3   : > { %v11622_v57 = vor.u32 %v13351_v10, %v11621_v43  ;;  %v11983_v32 = vld [vmem:[%s13973_s7 + $0x1ba0] sm:$0xf0]  ;;  %v11989_v43 = vld [vmem:[%s13973_s7 + $0x1b88] sm:$0xf] }
 0x6a4   : > { %v15899_v14 = vpop.f32.mrf.mxu3  ;;  %v7656_v18 = vpop.f32.mrf.mxu0  ;;  %v13445_v10 = vld [vmem:[%s13973_s7 + $0x1ba4] sm:$0xf0] }
 0x6a5   : > { %v15889_v11 = vpop.f32.mrf.mxu2  ;;  %v11982_v18 = vor.u32 %v13444_v6, %v11981_v35  ;;  %v13421_v35 = vld [vmem:[%s13973_s7 + $0x1ae4] sm:$0xf0]  ;;  %v13417_v6 = vld [vmem:[%s13973_s7 + $0x1acc] sm:$0xf] }
 0x6a8   : > { %7802 = vmatpush.bf16.xpose.msrb.mxu0 %v11742_v22  ;;  %7815 = vmatpush.bf16.xpose.msrb.mxu1 %v11746_v54  ;;  %v7669_v22 = vpop.f32.mrf.mxu1  ;;  %v11626_v54 = vor.u32 %v13347_v12, %v11623_v41  ;;  %v7668_v12 = vadd.f32 %v15887_v60, %v15885_v29  ;;  %v13441_v41 = vld [vmem:[%s13973_s7 + $0x1b8c] sm:$0xf]  ;;  %v11949_v60 = vld [vmem:[%s13973_s7 + $0x1b40] sm:$0xf] }
 0x6a9   : > { %7828 = vmatpush.bf16.xpose.msrb.mxu2 %v11750_v4 }
 0x6aa   : > { %7841 = vmatpush.bf16.xpose.msrb.mxu3 %v11754_v25  ;;  %v11581_v25 = vld [vmem:[%s13973_s7 + $0x1850] sm:$0xf]  ;;  %v7681_v29 = vadd.f32 %v15889_v11, %v7668_v12 }
 0x6ab   : > { %v11582_v5 = vor.u32 %v13342_v36, %v11581_v25  ;;  %v11951_v25 = vld [vmem:[%s13973_s7 + $0x1b60] sm:$0xf0]  ;;  %v11957_v36 = vld [vmem:[%s13973_s7 + $0x1b48] sm:$0xf] }
 0x6ad   : > { %v7682_v4 = vpop.f32.mrf.mxu2 }
 0x6ae   : > { %v13432_v4 = vld [vmem:[%s13973_s7 + $0x1b44] sm:$0xf] }
 0x6b0   : > { %7803 = vmatpush.bf16.xpose.msrb.mxu0 %v11710_v33  ;;  %7816 = vmatpush.bf16.xpose.msrb.mxu1 %v11714_v37  ;;  %v7695_v33 = vpop.f32.mrf.mxu3  ;;  %v11586_v37 = vor.u32 %v13338_v2, %v11583_v61  ;;  %v13437_v2 = vld [vmem:[%s13973_s7 + $0x1b64] sm:$0xf0]  ;;  %v7694_v61 = vadd.f32 %v15899_v14, %v7681_v29  ;;  %v13424_v14 = vld [vmem:[%s13973_s7 + $0x1b04] sm:$0xf] }
 0x6b1   : > { %7829 = vmatpush.bf16.xpose.msrb.mxu2 %v11718_v15  ;;  %v11590_v15 = vor.u32 %v13343_v31, %v11589_v27  ;;  %v13433_v27 = vld [vmem:[%s13973_s7 + $0x1b4c] sm:$0xf]  ;;  %v11861_v29 = vld [vmem:[%s13973_s7 + $0x1a88] sm:$0xf] }
 0x6b2   : > { %7842 = vmatpush.bf16.xpose.msrb.mxu3 %v11722_v51  ;;  %v11594_v51 = vor.u32 %v13339_v44, %v11591_v9  ;;  %v11959_v31 = vld [vmem:[%s13973_s7 + $0x1b68] sm:$0xf0]  ;;  %v11954_v44 = vor.u32 %v13432_v4, %v11951_v25  ;;  %v11958_v9 = vor.u32 %v13437_v2, %v11957_v36 }
 0x6b3   : > { %v11863_v4 = vld [vmem:[%s13973_s7 + $0x1aa8] sm:$0xf0] }
 0x6b8   : > { %7804 = vmatpush.bf16.xpose.msrb.mxu0 %v11678_v46  ;;  %7817 = vmatpush.bf16.xpose.msrb.mxu1 %v11682_v48  ;;  %v12013_v46 = vld [vmem:[%s13973_s7 + $0x1bc0] sm:$0xf] }
 0x6b9   : > { %7830 = vmatpush.bf16.xpose.msrb.mxu2 %v11686_v52  ;;  %v13452_v48 = vld [vmem:[%s13973_s7 + $0x1bdc] sm:$0xf0]  ;;  %v13448_v52 = vld [vmem:[%s13973_s7 + $0x1bc4] sm:$0xf] }
 0x6ba   : > { %7843 = vmatpush.bf16.xpose.msrb.mxu3 %v11690_v56  ;;  %v11550_v56 = vor.u32 %v13334_v40, %v11549_v13  ;;  %v13428_v13 = vld [vmem:[%s13973_s7 + $0x1b1c] sm:$0xf0] }
 0x6c0   : > { %7805 = vmatpush.bf16.xpose.msrb.mxu0 %v11646_v28  ;;  %7818 = vmatpush.bf16.xpose.msrb.mxu1 %v11650_v62  ;;  %v12014_v28 = vor.u32 %v13452_v48, %v12013_v46  ;;  %v12018_v62 = vor.u32 %v13448_v52, %v12015_v63  ;;  %v11922_v48 = vor.u32 %v13424_v14, %v11919_v42  ;;  %v13396_v42 = vld [vmem:[%s13973_s7 + $0x1a1c] sm:$0xf0] }
 0x6c1   : > { %7831 = vmatpush.bf16.xpose.msrb.mxu2 %v11654_v0  ;;  %v12022_v0 = vor.u32 %v13453_v24, %v12021_v23  ;;  %v11926_v52 = vor.u32 %v13429_v49, %v11925_v45  ;;  %v11930_v63 = vor.u32 %v13425_v58, %v11927_v19  ;;  %v13392_v45 = vld [vmem:[%s13973_s7 + $0x1a04] sm:$0xf]  ;;  %v11797_v58 = vld [vmem:[%s13973_s7 + $0x1a08] sm:$0xf] }
 0x6c2   : > { %7844 = vmatpush.bf16.xpose.msrb.mxu3 %v11658_v26  ;;  %v12026_v26 = vor.u32 %v13449_v59, %v12023_v1  ;;  %v11885_v1 = vld [vmem:[%s13973_s7 + $0x1ac0] sm:$0xf]  ;;  %v11791_v49 = vld [vmem:[%s13973_s7 + $0x1a20] sm:$0xf0]  ;;  %v13397_v19 = vld [vmem:[%s13973_s7 + $0x1a24] sm:$0xf0] }
 0x6c8   : > { %7806 = vmatpush.bf16.xpose.msrb.mxu0 %v11614_v50  ;;  %7819 = vmatpush.bf16.xpose.msrb.mxu1 %v11618_v47  ;;  %v11991_v50 = vld [vmem:[%s13973_s7 + $0x1ba8] sm:$0xf0]  ;;  %v11986_v47 = vor.u32 %v13440_v8, %v11983_v32 }
 0x6c9   : > { %7832 = vmatpush.bf16.xpose.msrb.mxu2 %v11622_v57  ;;  %v11990_v57 = vor.u32 %v13445_v10, %v11989_v43  ;;  %v11994_v22 = vor.u32 %v13441_v41, %v11991_v50  ;;  %v11895_v8 = vld [vmem:[%s13973_s7 + $0x1ae8] sm:$0xf0] }
 0x6ca   : > { %7845 = vmatpush.bf16.xpose.msrb.mxu3 %v11626_v54  ;;  %v13436_v54 = vld [vmem:[%s13973_s7 + $0x1b5c] sm:$0xf0]  ;;  %v11898_v41 = vor.u32 %v13417_v6, %v11895_v8  ;;  %v11997_v6 = vld [vmem:[%s13973_s7 + $0x1b90] sm:$0xf] }
 0x6cb   : > { %v11950_v11 = vor.u32 %v13436_v54, %v11949_v60  ;;  %v13413_v60 = vld [vmem:[%s13973_s7 + $0x1aa4] sm:$0xf0]  ;;  %v13409_v54 = vld [vmem:[%s13973_s7 + $0x1a8c] sm:$0xf]  ;;  %v13446_v8 = vld [vmem:[%s13973_s7 + $0x1bac] sm:$0xf0] }
 0x6cc   : > { %v11862_v2 = vor.u32 %v13413_v60, %v11861_v29  ;;  %v11965_v29 = vld [vmem:[%s13973_s7 + $0x1b50] sm:$0xf] }
 0x6cd   : > { %v13438_v60 = vld [vmem:[%s13973_s7 + $0x1b6c] sm:$0xf0] }
 0x6d0   : > { %7807 = vmatpush.bf16.xpose.msrb.mxu0 %v11582_v5  ;;  %7820 = vmatpush.bf16.xpose.msrb.mxu1 %v11586_v37  ;;  %v11962_v5 = vor.u32 %v13433_v27, %v11959_v31  ;;  %v11821_v27 = vld [vmem:[%s13973_s7 + $0x1a40] sm:$0xf] }
 0x6d1   : > { %7833 = vmatpush.bf16.xpose.msrb.mxu2 %v11590_v15  ;;  %v13404_v31 = vld [vmem:[%s13973_s7 + $0x1a5c] sm:$0xf0] }
 0x6d2   : > { %7846 = vmatpush.bf16.xpose.msrb.mxu3 %v11594_v51  ;;  %v11917_v51 = vld [vmem:[%s13973_s7 + $0x1b00] sm:$0xf] }
 0x6d3   : > { %v11918_v20 = vor.u32 %v13428_v13, %v11917_v51 }
 0x6d8   : > { %7808 = vmatpush.bf16.xpose.msrb.mxu0 %v11550_v56  ;;  %7821 = vmatpush.bf16.xpose.msrb.mxu1 %v11554_v53  ;;  %v336_v53 = vld [vmem:[#allocation2 + $0x38] sm:$0xff] }
 0x6d9   : > { %7834 = vmatpush.bf16.xpose.msrb.mxu2 %v11558_v55 }
 0x6da   : > { %7847 = vmatpush.bf16.xpose.msrb.mxu3 %v11562_v7  ;;  %v13420_v7 = vld [vmem:[%s13973_s7 + $0x1adc] sm:$0xf0] }
 0x6db   : > { %v11886_v32 = vor.u32 %v13420_v7, %v11885_v1  ;;  %v13451_v1 = vld [vmem:[%s13973_s7 + $0x1bdc] sm:$0xf] }
 0x6dc   : > { %v7706_v33 = vpop.f32.mrf.mxu0  ;;  %v7719_v15 = vpop.f32.mrf.mxu1  ;;  %v12039_v7 = vld [vmem:[%s13973_s7 + $0x1bf8] sm:$0xf0] }
 0x6dd   : > { %v7707_v37 = vadd.f32 %v7706_v33, %v7694_v61  ;;  %v11866_v61 = vor.u32 %v13409_v54, %v11863_v4  ;;  %v13401_v33 = vld [vmem:[%s13973_s7 + $0x1a4c] sm:$0xf]  ;;  %v13434_v54 = vld [vmem:[%s13973_s7 + $0x1b54] sm:$0xf] }
 0x6de   : > { %v11967_v4 = vld [vmem:[%s13973_s7 + $0x1b70] sm:$0xf0] }
 0x6df   : > { %7809 = vmatmul.bf16.vlgmr.msrb.gmra.mxu0 %v14145_v30  ;;  %7822 = vmatmul.bf16.vlgmr.msrb.gmra.mxu1 %v14155_v38  ;;  %v7720_v40 = vadd.f32 %v7719_v15, %v7707_v37  ;;  %v11831_v37 = vld [vmem:[%s13973_s7 + $0x1a68] sm:$0xf0]  ;;  %v11822_v15 = vor.u32 %v13404_v31, %v11821_v27  ;;  %v11966_v27 = vor.u32 %v13438_v60, %v11965_v29  ;;  %v13406_v29 = vld [vmem:[%s13973_s7 + $0x1a6c] sm:$0xf0]  ;;  %v13402_v60 = vld [vmem:[%s13973_s7 + $0x1a54] sm:$0xf] }
 0x6e0   : > { %7853 = vmatpush.bf16.xpose.msra.mxu0 %v12014_v28  ;;  %7866 = vmatpush.bf16.xpose.msra.mxu1 %v12018_v62  ;;  %v13416_v28 = vld [vmem:[%s13973_s7 + $0x1ac4] sm:$0xf]  ;;  %v11834_v14 = vor.u32 %v13401_v33, %v11831_v37  ;;  %v11970_v31 = vor.u32 %v13434_v54, %v11967_v4  ;;  %v13426_v33 = vld [vmem:[%s13973_s7 + $0x1b14] sm:$0xf]  ;;  %v11845_v4 = vld [vmem:[%s13973_s7 + $0x1a58] sm:$0xf] }
 0x6e1   : > { %7879 = vmatpush.bf16.xpose.msra.mxu2 %v12022_v0  ;;  %7848 = vmatmul.bf16.vlgmr.msrb.gmra.mxu3 %v14157_v39  ;;  %v11887_v0 = vld [vmem:[%s13973_s7 + $0x1ae0] sm:$0xf0]  ;;  %v11935_v37 = vld [vmem:[%s13973_s7 + $0x1b30] sm:$0xf0] }
 0x6e2   : > { %7892 = vmatpush.bf16.xpose.msra.mxu3 %v12026_v26  ;;  %7835 = vmatmul.bf16.vlgmr.msrb.gmra.mxu2 %v14150_v34  ;;  %v11893_v26 = vld [vmem:[%s13973_s7 + $0x1ac8] sm:$0xf]  ;;  %v11890_v43 = vor.u32 %v13416_v28, %v11887_v0  ;;  %v11839_v54 = vld [vmem:[%s13973_s7 + $0x1a70] sm:$0xf0] }
 0x6e3   : > { %v11894_v10 = vor.u32 %v13421_v35, %v11893_v26  ;;  %v12042_v35 = vor.u32 %v13451_v1, %v12039_v7 }
 0x6e4   : > { %v7745_v23 = vpop.f32.mrf.mxu3  ;;  %v7708_v24 = vpop.f32.mrf.mxu0 }
 0x6e5   : > { %v7732_v46 = vpop.f32.mrf.mxu2  ;;  %v7721_v55 = vpop.f32.mrf.mxu1  ;;  %v12037_v24 = vld [vmem:[%s13973_s7 + $0x1bd8] sm:$0xf] }
 0x6e6   : > { %v7733_v56 = vadd.f32 %v7732_v46, %v7720_v40  ;;  %v11789_v40 = vld [vmem:[%s13973_s7 + $0x1a00] sm:$0xf]  ;;  %v11799_v46 = vld [vmem:[%s13973_s7 + $0x1a28] sm:$0xf0]  ;;  %v11794_v55 = vor.u32 %v13392_v45, %v11791_v49 }
 0x6e8   : > { %7854 = vmatpush.bf16.xpose.msra.mxu0 %v11982_v18  ;;  %7867 = vmatpush.bf16.xpose.msra.mxu1 %v11986_v47  ;;  %v7746_v59 = vadd.f32 %v7745_v23, %v7733_v56  ;;  %v11853_v18 = vld [vmem:[%s13973_s7 + $0x1a80] sm:$0xf]  ;;  %v13450_v56 = vld [vmem:[%s13973_s7 + $0x1bd4] sm:$0xf] }
 0x6e9   : > { %7880 = vmatpush.bf16.xpose.msra.mxu2 %v11990_v57  ;;  %v13412_v47 = vld [vmem:[%s13973_s7 + $0x1a9c] sm:$0xf0]  ;;  %v13408_v57 = vld [vmem:[%s13973_s7 + $0x1a84] sm:$0xf]  ;;  %v12031_v23 = vld [vmem:[%s13973_s7 + $0x1bf0] sm:$0xf0] }
 0x6ea   : > { %7893 = vmatpush.bf16.xpose.msra.mxu3 %v11994_v22  ;;  %v8176_v62 = vadd.f32 %v7746_v59, %v336_v53  ;;  %v11855_v22 = vld [vmem:[%s13973_s7 + $0x1aa0] sm:$0xf0]  ;;  %v11854_v25 = vor.u32 %v13412_v47, %v11853_v18  ;;  %v13455_v53 = vld [vmem:[%s13973_s7 + $0x1bf4] sm:$0xf0]  ;;  %v11798_v59 = vor.u32 %v13397_v19, %v11797_v58  ;;  %v12034_v0 = vor.u32 %v13450_v56, %v12031_v23  ;;  %v11901_v58 = vld [vmem:[%s13973_s7 + $0x1ad0] sm:$0xf] }
 0x6eb   : > { %v11858_v36 = vor.u32 %v13408_v57, %v11855_v22  ;;  %v12038_v26 = vor.u32 %v13455_v53, %v12037_v24  ;;  %v11998_v18 = vor.u32 %v13446_v8, %v11997_v6  ;;  %v13422_v19 = vld [vmem:[%s13973_s7 + $0x1aec] sm:$0xf0]  ;;  %v13419_v56 = vld [vmem:[%s13973_s7 + $0x1adc] sm:$0xf]  ;;  %v13415_v6 = vld [vmem:[%s13973_s7 + $0x1ab4] sm:$0xf0] }
 0x6ec   : > { %8192 = vst [vmem:[#allocation2 + $0x38] sm:$0xff] %v8176_v62  ;;  %v7747_v50 = vpop.f32.mrf.mxu3  ;;  %v11902_v23 = vor.u32 %v13422_v19, %v11901_v58  ;;  %v13411_v8 = vld [vmem:[%s13973_s7 + $0x1a9c] sm:$0xf]  ;;  %v12271_v58 = vld [vmem:[%s13973_s7 + $0x1de0] sm:$0xf0] }
 0x6ed   : > { %v7734_v12 = vpop.f32.mrf.mxu2  ;;  %v12007_v50 = vld [vmem:[%s13973_s7 + $0x1bb8] sm:$0xf0]  ;;  %v12277_v19 = vld [vmem:[%s13973_s7 + $0x1dc8] sm:$0xf] }
 0x6ee   : > { %v13447_v12 = vld [vmem:[%s13973_s7 + $0x1bb4] sm:$0xf0] }
 0x6f0   : > { %7855 = vmatpush.bf16.xpose.msra.mxu0 %v11950_v11  ;;  %7868 = vmatpush.bf16.xpose.msra.mxu1 %v11954_v44  ;;  %v13400_v11 = vld [vmem:[%s13973_s7 + $0x1a44] sm:$0xf] }
 0x6f1   : > { %7881 = vmatpush.bf16.xpose.msra.mxu2 %v11958_v9  ;;  %v11823_v44 = vld [vmem:[%s13973_s7 + $0x1a60] sm:$0xf0]  ;;  %v11829_v9 = vld [vmem:[%s13973_s7 + $0x1a48] sm:$0xf] }
 0x6f2   : > { %7894 = vmatpush.bf16.xpose.msra.mxu3 %v11962_v5  ;;  %v13405_v5 = vld [vmem:[%s13973_s7 + $0x1a64] sm:$0xf0]  ;;  %v11826_v51 = vor.u32 %v13400_v11, %v11823_v44 }
 0x6f3   : > { %v11830_v13 = vor.u32 %v13405_v5, %v11829_v9  ;;  %v11933_v9 = vld [vmem:[%s13973_s7 + $0x1b10] sm:$0xf] }
 0x6f4   : > { %v13430_v5 = vld [vmem:[%s13973_s7 + $0x1b2c] sm:$0xf0] }
 0x6f8   : > { %7856 = vmatpush.bf16.xpose.msra.mxu0 %v11918_v20  ;;  %7869 = vmatpush.bf16.xpose.msra.mxu1 %v11922_v48  ;;  %v13393_v20 = vld [vmem:[%s13973_s7 + $0x1a0c] sm:$0xf]  ;;  %v12029_v48 = vld [vmem:[%s13973_s7 + $0x1bd0] sm:$0xf] }
 0x6f9   : > { %7882 = vmatpush.bf16.xpose.msra.mxu2 %v11926_v52  ;;  %v13454_v52 = vld [vmem:[%s13973_s7 + $0x1bec] sm:$0xf0]  ;;  %v11802_v28 = vor.u32 %v13393_v20, %v11799_v46  ;;  %v13418_v20 = vld [vmem:[%s13973_s7 + $0x1ad4] sm:$0xf] }
 0x6fa   : > { %7895 = vmatpush.bf16.xpose.msra.mxu3 %v11930_v63  ;;  %v11790_v63 = vor.u32 %v13396_v42, %v11789_v40  ;;  %v12030_v62 = vor.u32 %v13454_v52, %v12029_v48  ;;  %v11934_v40 = vor.u32 %v13430_v5, %v11933_v9  ;;  %v11938_v42 = vor.u32 %v13426_v33, %v11935_v37  ;;  %v11903_v46 = vld [vmem:[%s13973_s7 + $0x1af0] sm:$0xf0]  ;;  %v11909_v48 = vld [vmem:[%s13973_s7 + $0x1ad8] sm:$0xf]  ;;  %v11805_v9 = vld [vmem:[%s13973_s7 + $0x1a10] sm:$0xf] }
 0x6fb   : > { %v13423_v52 = vld [vmem:[%s13973_s7 + $0x1af4] sm:$0xf0]  ;;  %v13398_v5 = vld [vmem:[%s13973_s7 + $0x1a2c] sm:$0xf0]  ;;  %v13394_v33 = vld [vmem:[%s13973_s7 + $0x1a14] sm:$0xf] }
 0x6fc   : > { %v11807_v37 = vld [vmem:[%s13973_s7 + $0x1a30] sm:$0xf0] }
 0x700   : > { %7857 = vmatpush.bf16.xpose.msra.mxu0 %v11886_v32  ;;  %7870 = vmatpush.bf16.xpose.msra.mxu1 %v11890_v43  ;;  %v13442_v32 = vld [vmem:[%s13973_s7 + $0x1b94] sm:$0xf] }
 0x701   : > { %7883 = vmatpush.bf16.xpose.msra.mxu2 %v11894_v10  ;;  %v11999_v43 = vld [vmem:[%s13973_s7 + $0x1bb0] sm:$0xf0]  ;;  %v12005_v10 = vld [vmem:[%s13973_s7 + $0x1b98] sm:$0xf] }
 0x702   : > { %7896 = vmatpush.bf16.xpose.msra.mxu3 %v11898_v41  ;;  %v13443_v41 = vld [vmem:[%s13973_s7 + $0x1b9c] sm:$0xf]  ;;  %v12002_v47 = vor.u32 %v13442_v32, %v11999_v43  ;;  %v12006_v57 = vor.u32 %v13447_v12, %v12005_v10 }
 0x703   : > { %v12010_v22 = vor.u32 %v13443_v41, %v12007_v50  ;;  %v11879_v32 = vld [vmem:[%s13973_s7 + $0x1ab8] sm:$0xf0] }
 0x708   : > { %7858 = vmatpush.bf16.xpose.msra.mxu0 %v11854_v25  ;;  %7871 = vmatpush.bf16.xpose.msra.mxu1 %v11858_v36  ;;  %v11973_v25 = vld [vmem:[%s13973_s7 + $0x1b58] sm:$0xf] }
 0x709   : > { %7884 = vmatpush.bf16.xpose.msra.mxu2 %v11862_v2  ;;  %v13439_v36 = vld [vmem:[%s13973_s7 + $0x1b74] sm:$0xf0]  ;;  %v13435_v2 = vld [vmem:[%s13973_s7 + $0x1b5c] sm:$0xf] }
 0x70a   : > { %7897 = vmatpush.bf16.xpose.msra.mxu3 %v11866_v61  ;;  %v11975_v61 = vld [vmem:[%s13973_s7 + $0x1b78] sm:$0xf0]  ;;  %v11974_v11 = vor.u32 %v13439_v36, %v11973_v25  ;;  %v13407_v25 = vld [vmem:[%s13973_s7 + $0x1a74] sm:$0xf0] }
 0x70b   : > { %v11978_v44 = vor.u32 %v13435_v2, %v11975_v61  ;;  %v13403_v36 = vld [vmem:[%s13973_s7 + $0x1a5c] sm:$0xf] }
 0x70c   : > { %v11847_v2 = vld [vmem:[%s13973_s7 + $0x1a78] sm:$0xf0] }
 0x710   : > { %7859 = vmatpush.bf16.xpose.msra.mxu0 %v11822_v15  ;;  %7872 = vmatpush.bf16.xpose.msra.mxu1 %v11826_v51  ;;  %v11941_v15 = vld [vmem:[%s13973_s7 + $0x1b18] sm:$0xf] }
 0x711   : > { %7885 = vmatpush.bf16.xpose.msra.mxu2 %v11830_v13  ;;  %v13431_v51 = vld [vmem:[%s13973_s7 + $0x1b34] sm:$0xf0]  ;;  %v13427_v13 = vld [vmem:[%s13973_s7 + $0x1b1c] sm:$0xf] }
 0x712   : > { %7898 = vmatpush.bf16.xpose.msra.mxu3 %v11834_v14  ;;  %v11943_v14 = vld [vmem:[%s13973_s7 + $0x1b38] sm:$0xf0]  ;;  %v11942_v45 = vor.u32 %v13431_v51, %v11941_v15  ;;  %v11813_v15 = vld [vmem:[%s13973_s7 + $0x1a18] sm:$0xf] }
 0x713   : > { %v11946_v49 = vor.u32 %v13427_v13, %v11943_v14  ;;  %v13399_v51 = vld [vmem:[%s13973_s7 + $0x1a34] sm:$0xf0]  ;;  %v13395_v13 = vld [vmem:[%s13973_s7 + $0x1a1c] sm:$0xf] }
 0x714   : > { %v11815_v14 = vld [vmem:[%s13973_s7 + $0x1a38] sm:$0xf0] }
 0x718   : > { %7860 = vmatpush.bf16.xpose.msra.mxu0 %v11790_v63  ;;  %7873 = vmatpush.bf16.xpose.msra.mxu1 %v11794_v55  ;;  %v11911_v63 = vld [vmem:[%s13973_s7 + $0x1af8] sm:$0xf0]  ;;  %v11906_v55 = vor.u32 %v13418_v20, %v11903_v46  ;;  %v13517_v20 = vld [vmem:[%s13973_s7 + $0x1de4] sm:$0xf0]  ;;  %v11810_v46 = vor.u32 %v13394_v33, %v11807_v37  ;;  %v12175_v33 = vld [vmem:[%s13973_s7 + $0x1d20] sm:$0xf0] }
 0x719   : > { %7886 = vmatpush.bf16.xpose.msra.mxu2 %v11798_v59  ;;  %v11910_v59 = vor.u32 %v13423_v52, %v11909_v48  ;;  %v11914_v1 = vor.u32 %v13419_v56, %v11911_v63  ;;  %v11814_v48 = vor.u32 %v13399_v51, %v11813_v15  ;;  %v13513_v52 = vld [vmem:[%s13973_s7 + $0x1dcc] sm:$0xf]  ;;  %v11818_v63 = vor.u32 %v13395_v13, %v11815_v14  ;;  %v12181_v37 = vld [vmem:[%s13973_s7 + $0x1d08] sm:$0xf] }
 0x71a   : > { %7899 = vmatpush.bf16.xpose.msra.mxu3 %v11802_v28  ;;  %v11869_v28 = vld [vmem:[%s13973_s7 + $0x1a90] sm:$0xf]  ;;  %v12279_v56 = vld [vmem:[%s13973_s7 + $0x1de8] sm:$0xf0]  ;;  %v13493_v15 = vld [vmem:[%s13973_s7 + $0x1d24] sm:$0xf0] }
 0x71b   : > { %v13489_v51 = vld [vmem:[%s13973_s7 + $0x1d0c] sm:$0xf] }
 0x71c   : > { %v16033_v24 = vpop.f32.mrf.mxu0  ;;  %v16035_v53 = vpop.f32.mrf.mxu1  ;;  %v12183_v13 = vld [vmem:[%s13973_s7 + $0x1d28] sm:$0xf0] }
 0x71f   : > { %7861 = vmatmul.bf16.vlgmr.msra.gmra.mxu0 %v14089_v16  ;;  %7874 = vmatmul.bf16.vlgmr.msra.gmra.mxu1 %v14096_v21 }
 0x720   : > { %7905 = vmatpush.bf16.xpose.msrb.mxu0 %v12030_v62  ;;  %7918 = vmatpush.bf16.xpose.msrb.mxu1 %v12034_v0  ;;  %v13414_v62 = vld [vmem:[%s13973_s7 + $0x1aac] sm:$0xf0]  ;;  %v13410_v0 = vld [vmem:[%s13973_s7 + $0x1a94] sm:$0xf] }
 0x721   : > { %7931 = vmatpush.bf16.xpose.msrb.mxu2 %v12038_v26  ;;  %7900 = vmatmul.bf16.vlgmr.msra.gmra.mxu3 %v14091_v17  ;;  %v11871_v26 = vld [vmem:[%s13973_s7 + $0x1ab0] sm:$0xf0]  ;;  %v11870_v43 = vor.u32 %v13414_v62, %v11869_v28  ;;  %v12237_v28 = vld [vmem:[%s13973_s7 + $0x1d80] sm:$0xf] }
 0x722   : > { %7944 = vmatpush.bf16.xpose.msrb.mxu3 %v12042_v35  ;;  %7887 = vmatmul.bf16.vlgmr.msra.gmra.mxu2 %v14078_v3  ;;  %v11877_v35 = vld [vmem:[%s13973_s7 + $0x1a98] sm:$0xf]  ;;  %v11874_v41 = vor.u32 %v13410_v0, %v11871_v26  ;;  %v13508_v62 = vld [vmem:[%s13973_s7 + $0x1d9c] sm:$0xf0]  ;;  %v13504_v0 = vld [vmem:[%s13973_s7 + $0x1d84] sm:$0xf] }
 0x723   : > { %v11878_v50 = vor.u32 %v13415_v6, %v11877_v35  ;;  %v12239_v26 = vld [vmem:[%s13973_s7 + $0x1da0] sm:$0xf0]  ;;  %v12245_v35 = vld [vmem:[%s13973_s7 + $0x1d88] sm:$0xf] }
 0x724   : > { %v16047_v10 = vpop.f32.mrf.mxu3  ;;  %v7760_v12 = vpop.f32.mrf.mxu0  ;;  %v13509_v6 = vld [vmem:[%s13973_s7 + $0x1da4] sm:$0xf0] }
 0x725   : > { %v16037_v7 = vpop.f32.mrf.mxu2  ;;  %v12238_v12 = vor.u32 %v13508_v62, %v12237_v28  ;;  %v13485_v28 = vld [vmem:[%s13973_s7 + $0x1ce4] sm:$0xf0]  ;;  %v13481_v62 = vld [vmem:[%s13973_s7 + $0x1ccc] sm:$0xf] }
 0x728   : > { %7906 = vmatpush.bf16.xpose.msrb.mxu0 %v11998_v18  ;;  %7919 = vmatpush.bf16.xpose.msrb.mxu1 %v12002_v47  ;;  %v7773_v18 = vpop.f32.mrf.mxu1  ;;  %v11882_v47 = vor.u32 %v13411_v8, %v11879_v32  ;;  %v7772_v8 = vadd.f32 %v16035_v53, %v16033_v24  ;;  %v13505_v32 = vld [vmem:[%s13973_s7 + $0x1d8c] sm:$0xf]  ;;  %v12205_v53 = vld [vmem:[%s13973_s7 + $0x1d40] sm:$0xf] }
 0x729   : > { %7932 = vmatpush.bf16.xpose.msrb.mxu2 %v12006_v57 }
 0x72a   : > { %7945 = vmatpush.bf16.xpose.msrb.mxu3 %v12010_v22  ;;  %v11837_v22 = vld [vmem:[%s13973_s7 + $0x1a50] sm:$0xf]  ;;  %v7785_v24 = vadd.f32 %v16037_v7, %v7772_v8 }
 0x72b   : > { %v11838_v61 = vor.u32 %v13406_v29, %v11837_v22  ;;  %v12207_v22 = vld [vmem:[%s13973_s7 + $0x1d60] sm:$0xf0]  ;;  %v12213_v29 = vld [vmem:[%s13973_s7 + $0x1d48] sm:$0xf] }
 0x72d   : > { %v7786_v57 = vpop.f32.mrf.mxu2 }
 0x72e   : > { %v13496_v57 = vld [vmem:[%s13973_s7 + $0x1d44] sm:$0xf] }
 0x730   : > { %7907 = vmatpush.bf16.xpose.msrb.mxu0 %v11966_v27  ;;  %7920 = vmatpush.bf16.xpose.msrb.mxu1 %v11970_v31  ;;  %v7799_v27 = vpop.f32.mrf.mxu3  ;;  %v11842_v31 = vor.u32 %v13402_v60, %v11839_v54  ;;  %v13501_v60 = vld [vmem:[%s13973_s7 + $0x1d64] sm:$0xf0]  ;;  %v7798_v54 = vadd.f32 %v16047_v10, %v7785_v24  ;;  %v13488_v10 = vld [vmem:[%s13973_s7 + $0x1d04] sm:$0xf] }
 0x731   : > { %7933 = vmatpush.bf16.xpose.msrb.mxu2 %v11974_v11  ;;  %v11846_v11 = vor.u32 %v13407_v25, %v11845_v4  ;;  %v13497_v4 = vld [vmem:[%s13973_s7 + $0x1d4c] sm:$0xf]  ;;  %v12117_v24 = vld [vmem:[%s13973_s7 + $0x1c88] sm:$0xf] }
 0x732   : > { %7946 = vmatpush.bf16.xpose.msrb.mxu3 %v11978_v44  ;;  %v11850_v44 = vor.u32 %v13403_v36, %v11847_v2  ;;  %v12215_v25 = vld [vmem:[%s13973_s7 + $0x1d68] sm:$0xf0]  ;;  %v12210_v36 = vor.u32 %v13496_v57, %v12207_v22  ;;  %v12214_v2 = vor.u32 %v13501_v60, %v12213_v29 }
 0x733   : > { %v12119_v57 = vld [vmem:[%s13973_s7 + $0x1ca8] sm:$0xf0] }
 0x738   : > { %7908 = vmatpush.bf16.xpose.msrb.mxu0 %v11934_v40  ;;  %7921 = vmatpush.bf16.xpose.msrb.mxu1 %v11938_v42  ;;  %v12269_v40 = vld [vmem:[%s13973_s7 + $0x1dc0] sm:$0xf] }
 0x739   : > { %7934 = vmatpush.bf16.xpose.msrb.mxu2 %v11942_v45  ;;  %v13516_v42 = vld [vmem:[%s13973_s7 + $0x1ddc] sm:$0xf0]  ;;  %v13512_v45 = vld [vmem:[%s13973_s7 + $0x1dc4] sm:$0xf] }
 0x73a   : > { %7947 = vmatpush.bf16.xpose.msrb.mxu3 %v11946_v49  ;;  %v11806_v49 = vor.u32 %v13398_v5, %v11805_v9  ;;  %v13492_v9 = vld [vmem:[%s13973_s7 + $0x1d1c] sm:$0xf0] }
 0x740   : > { %7909 = vmatpush.bf16.xpose.msrb.mxu0 %v11902_v23  ;;  %7922 = vmatpush.bf16.xpose.msrb.mxu1 %v11906_v55  ;;  %v12270_v23 = vor.u32 %v13516_v42, %v12269_v40  ;;  %v12274_v55 = vor.u32 %v13512_v45, %v12271_v58  ;;  %v12178_v42 = vor.u32 %v13488_v10, %v12175_v33  ;;  %v13460_v33 = vld [vmem:[%s13973_s7 + $0x1c1c] sm:$0xf0] }
 0x741   : > { %7935 = vmatpush.bf16.xpose.msrb.mxu2 %v11910_v59  ;;  %v12278_v59 = vor.u32 %v13517_v20, %v12277_v19  ;;  %v12182_v45 = vor.u32 %v13493_v15, %v12181_v37  ;;  %v12186_v58 = vor.u32 %v13489_v51, %v12183_v13  ;;  %v13456_v37 = vld [vmem:[%s13973_s7 + $0x1c04] sm:$0xf]  ;;  %v12053_v51 = vld [vmem:[%s13973_s7 + $0x1c08] sm:$0xf] }
 0x742   : > { %7948 = vmatpush.bf16.xpose.msrb.mxu3 %v11914_v1  ;;  %v12282_v1 = vor.u32 %v13513_v52, %v12279_v56  ;;  %v12141_v56 = vld [vmem:[%s13973_s7 + $0x1cc0] sm:$0xf]  ;;  %v12047_v15 = vld [vmem:[%s13973_s7 + $0x1c20] sm:$0xf0]  ;;  %v13461_v13 = vld [vmem:[%s13973_s7 + $0x1c24] sm:$0xf0] }
 0x748   : > { %7910 = vmatpush.bf16.xpose.msrb.mxu0 %v11870_v43  ;;  %7923 = vmatpush.bf16.xpose.msrb.mxu1 %v11874_v41  ;;  %v12247_v43 = vld [vmem:[%s13973_s7 + $0x1da8] sm:$0xf0]  ;;  %v12242_v41 = vor.u32 %v13504_v0, %v12239_v26 }
 0x749   : > { %7936 = vmatpush.bf16.xpose.msrb.mxu2 %v11878_v50  ;;  %v12246_v50 = vor.u32 %v13509_v6, %v12245_v35  ;;  %v12250_v18 = vor.u32 %v13505_v32, %v12247_v43  ;;  %v12151_v0 = vld [vmem:[%s13973_s7 + $0x1ce8] sm:$0xf0] }
 0x74a   : > { %7949 = vmatpush.bf16.xpose.msrb.mxu3 %v11882_v47  ;;  %v13500_v47 = vld [vmem:[%s13973_s7 + $0x1d5c] sm:$0xf0]  ;;  %v12154_v32 = vor.u32 %v13481_v62, %v12151_v0  ;;  %v12253_v62 = vld [vmem:[%s13973_s7 + $0x1d90] sm:$0xf] }
 0x74b   : > { %v12206_v7 = vor.u32 %v13500_v47, %v12205_v53  ;;  %v13477_v53 = vld [vmem:[%s13973_s7 + $0x1ca4] sm:$0xf0]  ;;  %v13473_v47 = vld [vmem:[%s13973_s7 + $0x1c8c] sm:$0xf]  ;;  %v13510_v0 = vld [vmem:[%s13973_s7 + $0x1dac] sm:$0xf0] }
 0x74c   : > { %v12118_v60 = vor.u32 %v13477_v53, %v12117_v24  ;;  %v12221_v24 = vld [vmem:[%s13973_s7 + $0x1d50] sm:$0xf] }
 0x74d   : > { %v13502_v53 = vld [vmem:[%s13973_s7 + $0x1d6c] sm:$0xf0] }
 0x750   : > { %7911 = vmatpush.bf16.xpose.msrb.mxu0 %v11838_v61  ;;  %7924 = vmatpush.bf16.xpose.msrb.mxu1 %v11842_v31  ;;  %v12218_v61 = vor.u32 %v13497_v4, %v12215_v25  ;;  %v12077_v4 = vld [vmem:[%s13973_s7 + $0x1c40] sm:$0xf] }
 0x751   : > { %7937 = vmatpush.bf16.xpose.msrb.mxu2 %v11846_v11  ;;  %v13468_v25 = vld [vmem:[%s13973_s7 + $0x1c5c] sm:$0xf0] }
 0x752   : > { %7950 = vmatpush.bf16.xpose.msrb.mxu3 %v11850_v44  ;;  %v12173_v44 = vld [vmem:[%s13973_s7 + $0x1d00] sm:$0xf] }
 0x753   : > { %v12174_v14 = vor.u32 %v13492_v9, %v12173_v44 }
 0x758   : > { %7912 = vmatpush.bf16.xpose.msrb.mxu0 %v11806_v49  ;;  %7925 = vmatpush.bf16.xpose.msrb.mxu1 %v11810_v46  ;;  %v337_v46 = vld [vmem:[#allocation2 + $0x60] sm:$0xff] }
 0x759   : > { %7938 = vmatpush.bf16.xpose.msrb.mxu2 %v11814_v48 }
 0x75a   : > { %7951 = vmatpush.bf16.xpose.msrb.mxu3 %v11818_v63  ;;  %v13484_v63 = vld [vmem:[%s13973_s7 + $0x1cdc] sm:$0xf0] }
 0x75b   : > { %v12142_v26 = vor.u32 %v13484_v63, %v12141_v56  ;;  %v13515_v56 = vld [vmem:[%s13973_s7 + $0x1ddc] sm:$0xf] }
 0x75c   : > { %v7810_v27 = vpop.f32.mrf.mxu0  ;;  %v7823_v11 = vpop.f32.mrf.mxu1  ;;  %v12295_v63 = vld [vmem:[%s13973_s7 + $0x1df8] sm:$0xf0] }
 0x75d   : > { %v7811_v31 = vadd.f32 %v7810_v27, %v7798_v54  ;;  %v12122_v54 = vor.u32 %v13473_v47, %v12119_v57  ;;  %v13465_v27 = vld [vmem:[%s13973_s7 + $0x1c4c] sm:$0xf]  ;;  %v13498_v47 = vld [vmem:[%s13973_s7 + $0x1d54] sm:$0xf] }
 0x75e   : > { %v12223_v57 = vld [vmem:[%s13973_s7 + $0x1d70] sm:$0xf0] }
 0x75f   : > { %7913 = vmatmul.bf16.vlgmr.msrb.gmra.mxu0 %v14145_v30  ;;  %7926 = vmatmul.bf16.vlgmr.msrb.gmra.mxu1 %v14155_v38  ;;  %v7824_v5 = vadd.f32 %v7823_v11, %v7811_v31  ;;  %v12087_v31 = vld [vmem:[%s13973_s7 + $0x1c68] sm:$0xf0]  ;;  %v12078_v11 = vor.u32 %v13468_v25, %v12077_v4  ;;  %v12222_v4 = vor.u32 %v13502_v53, %v12221_v24  ;;  %v13470_v24 = vld [vmem:[%s13973_s7 + $0x1c6c] sm:$0xf0]  ;;  %v13466_v53 = vld [vmem:[%s13973_s7 + $0x1c54] sm:$0xf] }
 0x760   : > { %7957 = vmatpush.bf16.xpose.msra.mxu0 %v12270_v23  ;;  %7970 = vmatpush.bf16.xpose.msra.mxu1 %v12274_v55  ;;  %v13480_v23 = vld [vmem:[%s13973_s7 + $0x1cc4] sm:$0xf]  ;;  %v12090_v10 = vor.u32 %v13465_v27, %v12087_v31  ;;  %v12226_v25 = vor.u32 %v13498_v47, %v12223_v57  ;;  %v13490_v27 = vld [vmem:[%s13973_s7 + $0x1d14] sm:$0xf]  ;;  %v12101_v57 = vld [vmem:[%s13973_s7 + $0x1c58] sm:$0xf] }
 0x761   : > { %7983 = vmatpush.bf16.xpose.msra.mxu2 %v12278_v59  ;;  %7952 = vmatmul.bf16.vlgmr.msrb.gmra.mxu3 %v14157_v39  ;;  %v12143_v59 = vld [vmem:[%s13973_s7 + $0x1ce0] sm:$0xf0]  ;;  %v12191_v31 = vld [vmem:[%s13973_s7 + $0x1d30] sm:$0xf0] }
 0x762   : > { %7996 = vmatpush.bf16.xpose.msra.mxu3 %v12282_v1  ;;  %7939 = vmatmul.bf16.vlgmr.msrb.gmra.mxu2 %v14150_v34  ;;  %v12149_v1 = vld [vmem:[%s13973_s7 + $0x1cc8] sm:$0xf]  ;;  %v12146_v35 = vor.u32 %v13480_v23, %v12143_v59  ;;  %v12095_v47 = vld [vmem:[%s13973_s7 + $0x1c70] sm:$0xf0] }
 0x763   : > { %v12150_v6 = vor.u32 %v13485_v28, %v12149_v1  ;;  %v12298_v28 = vor.u32 %v13515_v56, %v12295_v63 }
 0x764   : > { %v7849_v19 = vpop.f32.mrf.mxu3  ;;  %v7812_v20 = vpop.f32.mrf.mxu0 }
 0x765   : > { %v7836_v40 = vpop.f32.mrf.mxu2  ;;  %v7825_v48 = vpop.f32.mrf.mxu1  ;;  %v12293_v20 = vld [vmem:[%s13973_s7 + $0x1dd8] sm:$0xf] }
 0x766   : > { %v7837_v49 = vadd.f32 %v7836_v40, %v7824_v5  ;;  %v12045_v5 = vld [vmem:[%s13973_s7 + $0x1c00] sm:$0xf]  ;;  %v12055_v40 = vld [vmem:[%s13973_s7 + $0x1c28] sm:$0xf0]  ;;  %v12050_v48 = vor.u32 %v13456_v37, %v12047_v15 }
 0x768   : > { %7958 = vmatpush.bf16.xpose.msra.mxu0 %v12238_v12  ;;  %7971 = vmatpush.bf16.xpose.msra.mxu1 %v12242_v41  ;;  %v7850_v52 = vadd.f32 %v7849_v19, %v7837_v49  ;;  %v12109_v12 = vld [vmem:[%s13973_s7 + $0x1c80] sm:$0xf]  ;;  %v13514_v49 = vld [vmem:[%s13973_s7 + $0x1dd4] sm:$0xf] }
 0x769   : > { %7984 = vmatpush.bf16.xpose.msra.mxu2 %v12246_v50  ;;  %v13476_v41 = vld [vmem:[%s13973_s7 + $0x1c9c] sm:$0xf0]  ;;  %v13472_v50 = vld [vmem:[%s13973_s7 + $0x1c84] sm:$0xf]  ;;  %v12287_v19 = vld [vmem:[%s13973_s7 + $0x1df0] sm:$0xf0] }
 0x76a   : > { %7997 = vmatpush.bf16.xpose.msra.mxu3 %v12250_v18  ;;  %v8177_v55 = vadd.f32 %v7850_v52, %v337_v46  ;;  %v12111_v18 = vld [vmem:[%s13973_s7 + $0x1ca0] sm:$0xf0]  ;;  %v12110_v22 = vor.u32 %v13476_v41, %v12109_v12  ;;  %v13519_v46 = vld [vmem:[%s13973_s7 + $0x1df4] sm:$0xf0]  ;;  %v12054_v52 = vor.u32 %v13461_v13, %v12053_v51  ;;  %v12290_v59 = vor.u32 %v13514_v49, %v12287_v19  ;;  %v12157_v51 = vld [vmem:[%s13973_s7 + $0x1cd0] sm:$0xf] }
 0x76b   : > { %v12114_v29 = vor.u32 %v13472_v50, %v12111_v18  ;;  %v12294_v1 = vor.u32 %v13519_v46, %v12293_v20  ;;  %v12254_v12 = vor.u32 %v13510_v0, %v12253_v62  ;;  %v13486_v13 = vld [vmem:[%s13973_s7 + $0x1cec] sm:$0xf0]  ;;  %v13483_v49 = vld [vmem:[%s13973_s7 + $0x1cdc] sm:$0xf]  ;;  %v13479_v62 = vld [vmem:[%s13973_s7 + $0x1cb4] sm:$0xf0] }
 0x76c   : > { %8193 = vst [vmem:[#allocation2 + $0x60] sm:$0xff] %v8177_v55  ;;  %v7851_v43 = vpop.f32.mrf.mxu3  ;;  %v12158_v19 = vor.u32 %v13486_v13, %v12157_v51  ;;  %v13475_v0 = vld [vmem:[%s13973_s7 + $0x1c9c] sm:$0xf]  ;;  %v12527_v51 = vld [vmem:[%s13973_s7 + $0x1fe0] sm:$0xf0] }
 0x76d   : > { %v7838_v8 = vpop.f32.mrf.mxu2  ;;  %v12263_v43 = vld [vmem:[%s13973_s7 + $0x1db8] sm:$0xf0]  ;;  %v12533_v13 = vld [vmem:[%s13973_s7 + $0x1fc8] sm:$0xf] }
 0x76e   : > { %v13511_v8 = vld [vmem:[%s13973_s7 + $0x1db4] sm:$0xf0] }
 0x770   : > { %7959 = vmatpush.bf16.xpose.msra.mxu0 %v12206_v7  ;;  %7972 = vmatpush.bf16.xpose.msra.mxu1 %v12210_v36  ;;  %v13464_v7 = vld [vmem:[%s13973_s7 + $0x1c44] sm:$0xf] }
 0x771   : > { %7985 = vmatpush.bf16.xpose.msra.mxu2 %v12214_v2  ;;  %v12079_v36 = vld [vmem:[%s13973_s7 + $0x1c60] sm:$0xf0]  ;;  %v12085_v2 = vld [vmem:[%s13973_s7 + $0x1c48] sm:$0xf] }
 0x772   : > { %7998 = vmatpush.bf16.xpose.msra.mxu3 %v12218_v61  ;;  %v13469_v61 = vld [vmem:[%s13973_s7 + $0x1c64] sm:$0xf0]  ;;  %v12082_v44 = vor.u32 %v13464_v7, %v12079_v36 }
 0x773   : > { %v12086_v9 = vor.u32 %v13469_v61, %v12085_v2  ;;  %v12189_v2 = vld [vmem:[%s13973_s7 + $0x1d10] sm:$0xf] }
 0x774   : > { %v13494_v61 = vld [vmem:[%s13973_s7 + $0x1d2c] sm:$0xf0] }
 0x778   : > { %7960 = vmatpush.bf16.xpose.msra.mxu0 %v12174_v14  ;;  %7973 = vmatpush.bf16.xpose.msra.mxu1 %v12178_v42  ;;  %v13457_v14 = vld [vmem:[%s13973_s7 + $0x1c0c] sm:$0xf]  ;;  %v12285_v42 = vld [vmem:[%s13973_s7 + $0x1dd0] sm:$0xf] }
 0x779   : > { %7986 = vmatpush.bf16.xpose.msra.mxu2 %v12182_v45  ;;  %v13518_v45 = vld [vmem:[%s13973_s7 + $0x1dec] sm:$0xf0]  ;;  %v12058_v23 = vor.u32 %v13457_v14, %v12055_v40  ;;  %v13482_v14 = vld [vmem:[%s13973_s7 + $0x1cd4] sm:$0xf] }
 0x77a   : > { %7999 = vmatpush.bf16.xpose.msra.mxu3 %v12186_v58  ;;  %v12046_v58 = vor.u32 %v13460_v33, %v12045_v5  ;;  %v12286_v55 = vor.u32 %v13518_v45, %v12285_v42  ;;  %v12190_v5 = vor.u32 %v13494_v61, %v12189_v2  ;;  %v12194_v33 = vor.u32 %v13490_v27, %v12191_v31  ;;  %v12159_v40 = vld [vmem:[%s13973_s7 + $0x1cf0] sm:$0xf0]  ;;  %v12165_v42 = vld [vmem:[%s13973_s7 + $0x1cd8] sm:$0xf]  ;;  %v12061_v2 = vld [vmem:[%s13973_s7 + $0x1c10] sm:$0xf] }
 0x77b   : > { %v13487_v45 = vld [vmem:[%s13973_s7 + $0x1cf4] sm:$0xf0]  ;;  %v13462_v61 = vld [vmem:[%s13973_s7 + $0x1c2c] sm:$0xf0]  ;;  %v13458_v27 = vld [vmem:[%s13973_s7 + $0x1c14] sm:$0xf] }
 0x77c   : > { %v12063_v31 = vld [vmem:[%s13973_s7 + $0x1c30] sm:$0xf0] }
 0x780   : > { %7961 = vmatpush.bf16.xpose.msra.mxu0 %v12142_v26  ;;  %7974 = vmatpush.bf16.xpose.msra.mxu1 %v12146_v35  ;;  %v13506_v26 = vld [vmem:[%s13973_s7 + $0x1d94] sm:$0xf] }
 0x781   : > { %7987 = vmatpush.bf16.xpose.msra.mxu2 %v12150_v6  ;;  %v12255_v35 = vld [vmem:[%s13973_s7 + $0x1db0] sm:$0xf0]  ;;  %v12261_v6 = vld [vmem:[%s13973_s7 + $0x1d98] sm:$0xf] }
 0x782   : > { %8000 = vmatpush.bf16.xpose.msra.mxu3 %v12154_v32  ;;  %v13507_v32 = vld [vmem:[%s13973_s7 + $0x1d9c] sm:$0xf]  ;;  %v12258_v41 = vor.u32 %v13506_v26, %v12255_v35  ;;  %v12262_v50 = vor.u32 %v13511_v8, %v12261_v6 }
 0x783   : > { %v12266_v18 = vor.u32 %v13507_v32, %v12263_v43  ;;  %v12135_v26 = vld [vmem:[%s13973_s7 + $0x1cb8] sm:$0xf0] }
 0x788   : > { %7962 = vmatpush.bf16.xpose.msra.mxu0 %v12110_v22  ;;  %7975 = vmatpush.bf16.xpose.msra.mxu1 %v12114_v29  ;;  %v12229_v22 = vld [vmem:[%s13973_s7 + $0x1d58] sm:$0xf] }
 0x789   : > { %7988 = vmatpush.bf16.xpose.msra.mxu2 %v12118_v60  ;;  %v13503_v29 = vld [vmem:[%s13973_s7 + $0x1d74] sm:$0xf0]  ;;  %v13499_v60 = vld [vmem:[%s13973_s7 + $0x1d5c] sm:$0xf] }
 0x78a   : > { %8001 = vmatpush.bf16.xpose.msra.mxu3 %v12122_v54  ;;  %v12231_v54 = vld [vmem:[%s13973_s7 + $0x1d78] sm:$0xf0]  ;;  %v12230_v7 = vor.u32 %v13503_v29, %v12229_v22  ;;  %v13471_v22 = vld [vmem:[%s13973_s7 + $0x1c74] sm:$0xf0] }
 0x78b   : > { %v12234_v36 = vor.u32 %v13499_v60, %v12231_v54  ;;  %v13467_v29 = vld [vmem:[%s13973_s7 + $0x1c5c] sm:$0xf] }
 0x78c   : > { %v12103_v60 = vld [vmem:[%s13973_s7 + $0x1c78] sm:$0xf0] }
 0x790   : > { %7963 = vmatpush.bf16.xpose.msra.mxu0 %v12078_v11  ;;  %7976 = vmatpush.bf16.xpose.msra.mxu1 %v12082_v44  ;;  %v12197_v11 = vld [vmem:[%s13973_s7 + $0x1d18] sm:$0xf] }
 0x791   : > { %7989 = vmatpush.bf16.xpose.msra.mxu2 %v12086_v9  ;;  %v13495_v44 = vld [vmem:[%s13973_s7 + $0x1d34] sm:$0xf0]  ;;  %v13491_v9 = vld [vmem:[%s13973_s7 + $0x1d1c] sm:$0xf] }
 0x792   : > { %8002 = vmatpush.bf16.xpose.msra.mxu3 %v12090_v10  ;;  %v12199_v10 = vld [vmem:[%s13973_s7 + $0x1d38] sm:$0xf0]  ;;  %v12198_v37 = vor.u32 %v13495_v44, %v12197_v11  ;;  %v12069_v11 = vld [vmem:[%s13973_s7 + $0x1c18] sm:$0xf] }
 0x793   : > { %v12202_v15 = vor.u32 %v13491_v9, %v12199_v10  ;;  %v13463_v44 = vld [vmem:[%s13973_s7 + $0x1c34] sm:$0xf0]  ;;  %v13459_v9 = vld [vmem:[%s13973_s7 + $0x1c1c] sm:$0xf] }
 0x794   : > { %v12071_v10 = vld [vmem:[%s13973_s7 + $0x1c38] sm:$0xf0] }
 0x798   : > { %7964 = vmatpush.bf16.xpose.msra.mxu0 %v12046_v58  ;;  %7977 = vmatpush.bf16.xpose.msra.mxu1 %v12050_v48  ;;  %v12167_v58 = vld [vmem:[%s13973_s7 + $0x1cf8] sm:$0xf0]  ;;  %v12162_v48 = vor.u32 %v13482_v14, %v12159_v40  ;;  %v13581_v14 = vld [vmem:[%s13973_s7 + $0x1fe4] sm:$0xf0]  ;;  %v12066_v40 = vor.u32 %v13458_v27, %v12063_v31  ;;  %v12431_v27 = vld [vmem:[%s13973_s7 + $0x1f20] sm:$0xf0] }
 0x799   : > { %7990 = vmatpush.bf16.xpose.msra.mxu2 %v12054_v52  ;;  %v12166_v52 = vor.u32 %v13487_v45, %v12165_v42  ;;  %v12170_v56 = vor.u32 %v13483_v49, %v12167_v58  ;;  %v12070_v42 = vor.u32 %v13463_v44, %v12069_v11  ;;  %v13577_v45 = vld [vmem:[%s13973_s7 + $0x1fcc] sm:$0xf]  ;;  %v12074_v58 = vor.u32 %v13459_v9, %v12071_v10  ;;  %v12437_v31 = vld [vmem:[%s13973_s7 + $0x1f08] sm:$0xf] }
 0x79a   : > { %8003 = vmatpush.bf16.xpose.msra.mxu3 %v12058_v23  ;;  %v12125_v23 = vld [vmem:[%s13973_s7 + $0x1c90] sm:$0xf]  ;;  %v12535_v49 = vld [vmem:[%s13973_s7 + $0x1fe8] sm:$0xf0]  ;;  %v13557_v11 = vld [vmem:[%s13973_s7 + $0x1f24] sm:$0xf0] }
 0x79b   : > { %v13553_v44 = vld [vmem:[%s13973_s7 + $0x1f0c] sm:$0xf] }
 0x79c   : > { %v16181_v20 = vpop.f32.mrf.mxu0  ;;  %v16183_v46 = vpop.f32.mrf.mxu1  ;;  %v12439_v9 = vld [vmem:[%s13973_s7 + $0x1f28] sm:$0xf0] }
 0x79f   : > { %7965 = vmatmul.bf16.vlgmr.msra.gmra.mxu0 %v14089_v16  ;;  %7978 = vmatmul.bf16.vlgmr.msra.gmra.mxu1 %v14096_v21 }
 0x7a0   : > { %8009 = vmatpush.bf16.xpose.msrb.mxu0 %v12286_v55  ;;  %8022 = vmatpush.bf16.xpose.msrb.mxu1 %v12290_v59  ;;  %v13478_v55 = vld [vmem:[%s13973_s7 + $0x1cac] sm:$0xf0]  ;;  %v13474_v59 = vld [vmem:[%s13973_s7 + $0x1c94] sm:$0xf] }
 0x7a1   : > { %8035 = vmatpush.bf16.xpose.msrb.mxu2 %v12294_v1  ;;  %8004 = vmatmul.bf16.vlgmr.msra.gmra.mxu3 %v14091_v17  ;;  %v12127_v1 = vld [vmem:[%s13973_s7 + $0x1cb0] sm:$0xf0]  ;;  %v12126_v35 = vor.u32 %v13478_v55, %v12125_v23  ;;  %v12493_v23 = vld [vmem:[%s13973_s7 + $0x1f80] sm:$0xf] }
 0x7a2   : > { %8048 = vmatpush.bf16.xpose.msrb.mxu3 %v12298_v28  ;;  %7991 = vmatmul.bf16.vlgmr.msra.gmra.mxu2 %v14078_v3  ;;  %v12133_v28 = vld [vmem:[%s13973_s7 + $0x1c98] sm:$0xf]  ;;  %v12130_v32 = vor.u32 %v13474_v59, %v12127_v1  ;;  %v13572_v55 = vld [vmem:[%s13973_s7 + $0x1f9c] sm:$0xf0]  ;;  %v13568_v59 = vld [vmem:[%s13973_s7 + $0x1f84] sm:$0xf] }
 0x7a3   : > { %v12134_v43 = vor.u32 %v13479_v62, %v12133_v28  ;;  %v12495_v1 = vld [vmem:[%s13973_s7 + $0x1fa0] sm:$0xf0]  ;;  %v12501_v28 = vld [vmem:[%s13973_s7 + $0x1f88] sm:$0xf] }
 0x7a4   : > { %v16195_v6 = vpop.f32.mrf.mxu3  ;;  %v7864_v8 = vpop.f32.mrf.mxu0  ;;  %v13573_v62 = vld [vmem:[%s13973_s7 + $0x1fa4] sm:$0xf0] }
 0x7a5   : > { %v16185_v63 = vpop.f32.mrf.mxu2  ;;  %v12494_v8 = vor.u32 %v13572_v55, %v12493_v23  ;;  %v13549_v23 = vld [vmem:[%s13973_s7 + $0x1ee4] sm:$0xf0]  ;;  %v13545_v55 = vld [vmem:[%s13973_s7 + $0x1ecc] sm:$0xf] }
 0x7a8   : > { %8010 = vmatpush.bf16.xpose.msrb.mxu0 %v12254_v12  ;;  %8023 = vmatpush.bf16.xpose.msrb.mxu1 %v12258_v41  ;;  %v7877_v12 = vpop.f32.mrf.mxu1  ;;  %v12138_v41 = vor.u32 %v13475_v0, %v12135_v26  ;;  %v7876_v0 = vadd.f32 %v16183_v46, %v16181_v20  ;;  %v13569_v26 = vld [vmem:[%s13973_s7 + $0x1f8c] sm:$0xf]  ;;  %v12461_v46 = vld [vmem:[%s13973_s7 + $0x1f40] sm:$0xf] }
 0x7a9   : > { %8036 = vmatpush.bf16.xpose.msrb.mxu2 %v12262_v50 }
 0x7aa   : > { %8049 = vmatpush.bf16.xpose.msrb.mxu3 %v12266_v18  ;;  %v12093_v18 = vld [vmem:[%s13973_s7 + $0x1c50] sm:$0xf]  ;;  %v7889_v20 = vadd.f32 %v16185_v63, %v7876_v0 }
 0x7ab   : > { %v12094_v54 = vor.u32 %v13470_v24, %v12093_v18  ;;  %v12463_v18 = vld [vmem:[%s13973_s7 + $0x1f60] sm:$0xf0]  ;;  %v12469_v24 = vld [vmem:[%s13973_s7 + $0x1f48] sm:$0xf] }
 0x7ad   : > { %v7890_v50 = vpop.f32.mrf.mxu2 }
 0x7ae   : > { %v13560_v50 = vld [vmem:[%s13973_s7 + $0x1f44] sm:$0xf] }
 0x7b0   : > { %8011 = vmatpush.bf16.xpose.msrb.mxu0 %v12222_v4  ;;  %8024 = vmatpush.bf16.xpose.msrb.mxu1 %v12226_v25  ;;  %v7903_v4 = vpop.f32.mrf.mxu3  ;;  %v12098_v25 = vor.u32 %v13466_v53, %v12095_v47  ;;  %v13565_v53 = vld [vmem:[%s13973_s7 + $0x1f64] sm:$0xf0]  ;;  %v7902_v47 = vadd.f32 %v16195_v6, %v7889_v20  ;;  %v13552_v6 = vld [vmem:[%s13973_s7 + $0x1f04] sm:$0xf] }
 0x7b1   : > { %8037 = vmatpush.bf16.xpose.msrb.mxu2 %v12230_v7  ;;  %v12102_v7 = vor.u32 %v13471_v22, %v12101_v57  ;;  %v13561_v57 = vld [vmem:[%s13973_s7 + $0x1f4c] sm:$0xf]  ;;  %v12373_v20 = vld [vmem:[%s13973_s7 + $0x1e88] sm:$0xf] }
 0x7b2   : > { %8050 = vmatpush.bf16.xpose.msrb.mxu3 %v12234_v36  ;;  %v12106_v36 = vor.u32 %v13467_v29, %v12103_v60  ;;  %v12471_v22 = vld [vmem:[%s13973_s7 + $0x1f68] sm:$0xf0]  ;;  %v12466_v29 = vor.u32 %v13560_v50, %v12463_v18  ;;  %v12470_v60 = vor.u32 %v13565_v53, %v12469_v24 }
 0x7b3   : > { %v12375_v50 = vld [vmem:[%s13973_s7 + $0x1ea8] sm:$0xf0] }
 0x7b8   : > { %8012 = vmatpush.bf16.xpose.msrb.mxu0 %v12190_v5  ;;  %8025 = vmatpush.bf16.xpose.msrb.mxu1 %v12194_v33  ;;  %v12525_v5 = vld [vmem:[%s13973_s7 + $0x1fc0] sm:$0xf] }
 0x7b9   : > { %8038 = vmatpush.bf16.xpose.msrb.mxu2 %v12198_v37  ;;  %v13580_v33 = vld [vmem:[%s13973_s7 + $0x1fdc] sm:$0xf0]  ;;  %v13576_v37 = vld [vmem:[%s13973_s7 + $0x1fc4] sm:$0xf] }
 0x7ba   : > { %8051 = vmatpush.bf16.xpose.msrb.mxu3 %v12202_v15  ;;  %v12062_v15 = vor.u32 %v13462_v61, %v12061_v2  ;;  %v13556_v2 = vld [vmem:[%s13973_s7 + $0x1f1c] sm:$0xf0] }
 0x7c0   : > { %8013 = vmatpush.bf16.xpose.msrb.mxu0 %v12158_v19  ;;  %8026 = vmatpush.bf16.xpose.msrb.mxu1 %v12162_v48  ;;  %v12526_v19 = vor.u32 %v13580_v33, %v12525_v5  ;;  %v12530_v48 = vor.u32 %v13576_v37, %v12527_v51  ;;  %v12434_v33 = vor.u32 %v13552_v6, %v12431_v27  ;;  %v13524_v27 = vld [vmem:[%s13973_s7 + $0x1e1c] sm:$0xf0] }
 0x7c1   : > { %8039 = vmatpush.bf16.xpose.msrb.mxu2 %v12166_v52  ;;  %v12534_v52 = vor.u32 %v13581_v14, %v12533_v13  ;;  %v12438_v37 = vor.u32 %v13557_v11, %v12437_v31  ;;  %v12442_v51 = vor.u32 %v13553_v44, %v12439_v9  ;;  %v13520_v31 = vld [vmem:[%s13973_s7 + $0x1e04] sm:$0xf]  ;;  %v12309_v44 = vld [vmem:[%s13973_s7 + $0x1e08] sm:$0xf] }
 0x7c2   : > { %8052 = vmatpush.bf16.xpose.msrb.mxu3 %v12170_v56  ;;  %v12538_v56 = vor.u32 %v13577_v45, %v12535_v49  ;;  %v12397_v49 = vld [vmem:[%s13973_s7 + $0x1ec0] sm:$0xf]  ;;  %v12303_v11 = vld [vmem:[%s13973_s7 + $0x1e20] sm:$0xf0]  ;;  %v13525_v9 = vld [vmem:[%s13973_s7 + $0x1e24] sm:$0xf0] }
 0x7c8   : > { %8014 = vmatpush.bf16.xpose.msrb.mxu0 %v12126_v35  ;;  %8027 = vmatpush.bf16.xpose.msrb.mxu1 %v12130_v32  ;;  %v12503_v35 = vld [vmem:[%s13973_s7 + $0x1fa8] sm:$0xf0]  ;;  %v12498_v32 = vor.u32 %v13568_v59, %v12495_v1 }
 0x7c9   : > { %8040 = vmatpush.bf16.xpose.msrb.mxu2 %v12134_v43  ;;  %v12502_v43 = vor.u32 %v13573_v62, %v12501_v28  ;;  %v12506_v12 = vor.u32 %v13569_v26, %v12503_v35  ;;  %v12407_v59 = vld [vmem:[%s13973_s7 + $0x1ee8] sm:$0xf0] }
 0x7ca   : > { %8053 = vmatpush.bf16.xpose.msrb.mxu3 %v12138_v41  ;;  %v13564_v41 = vld [vmem:[%s13973_s7 + $0x1f5c] sm:$0xf0]  ;;  %v12410_v26 = vor.u32 %v13545_v55, %v12407_v59  ;;  %v12509_v55 = vld [vmem:[%s13973_s7 + $0x1f90] sm:$0xf] }
 0x7cb   : > { %v12462_v63 = vor.u32 %v13564_v41, %v12461_v46  ;;  %v13541_v46 = vld [vmem:[%s13973_s7 + $0x1ea4] sm:$0xf0]  ;;  %v13537_v41 = vld [vmem:[%s13973_s7 + $0x1e8c] sm:$0xf]  ;;  %v13574_v59 = vld [vmem:[%s13973_s7 + $0x1fac] sm:$0xf0] }
 0x7cc   : > { %v12374_v53 = vor.u32 %v13541_v46, %v12373_v20  ;;  %v12477_v20 = vld [vmem:[%s13973_s7 + $0x1f50] sm:$0xf] }
 0x7cd   : > { %v13566_v46 = vld [vmem:[%s13973_s7 + $0x1f6c] sm:$0xf0] }
 0x7d0   : > { %8015 = vmatpush.bf16.xpose.msrb.mxu0 %v12094_v54  ;;  %8028 = vmatpush.bf16.xpose.msrb.mxu1 %v12098_v25  ;;  %v12474_v54 = vor.u32 %v13561_v57, %v12471_v22  ;;  %v12333_v57 = vld [vmem:[%s13973_s7 + $0x1e40] sm:$0xf] }
 0x7d1   : > { %8041 = vmatpush.bf16.xpose.msrb.mxu2 %v12102_v7  ;;  %v13532_v22 = vld [vmem:[%s13973_s7 + $0x1e5c] sm:$0xf0] }
 0x7d2   : > { %8054 = vmatpush.bf16.xpose.msrb.mxu3 %v12106_v36  ;;  %v12429_v36 = vld [vmem:[%s13973_s7 + $0x1f00] sm:$0xf] }
 0x7d3   : > { %v12430_v10 = vor.u32 %v13556_v2, %v12429_v36 }
 0x7d8   : > { %8016 = vmatpush.bf16.xpose.msrb.mxu0 %v12062_v15  ;;  %8029 = vmatpush.bf16.xpose.msrb.mxu1 %v12066_v40  ;;  %v338_v40 = vld [vmem:[#allocation2 + $0x70] sm:$0xff] }
 0x7d9   : > { %8042 = vmatpush.bf16.xpose.msrb.mxu2 %v12070_v42 }
 0x7da   : > { %8055 = vmatpush.bf16.xpose.msrb.mxu3 %v12074_v58  ;;  %v13548_v58 = vld [vmem:[%s13973_s7 + $0x1edc] sm:$0xf0] }
 0x7db   : > { %v12398_v1 = vor.u32 %v13548_v58, %v12397_v49  ;;  %v13579_v49 = vld [vmem:[%s13973_s7 + $0x1fdc] sm:$0xf] }
 0x7dc   : > { %v7914_v4 = vpop.f32.mrf.mxu0  ;;  %v7927_v7 = vpop.f32.mrf.mxu1  ;;  %v12551_v58 = vld [vmem:[%s13973_s7 + $0x1ff8] sm:$0xf0] }
 0x7dd   : > { %v7915_v25 = vadd.f32 %v7914_v4, %v7902_v47  ;;  %v12378_v47 = vor.u32 %v13537_v41, %v12375_v50  ;;  %v13529_v4 = vld [vmem:[%s13973_s7 + $0x1e4c] sm:$0xf]  ;;  %v13562_v41 = vld [vmem:[%s13973_s7 + $0x1f54] sm:$0xf] }
 0x7de   : > { %v12479_v50 = vld [vmem:[%s13973_s7 + $0x1f70] sm:$0xf0] }
 0x7df   : > { %8017 = vmatmul.bf16.vlgmr.msrb.gmra.mxu0 %v14145_v30  ;;  %8030 = vmatmul.bf16.vlgmr.msrb.gmra.mxu1 %v14155_v38  ;;  %v7928_v61 = vadd.f32 %v7927_v7, %v7915_v25  ;;  %v12343_v25 = vld [vmem:[%s13973_s7 + $0x1e68] sm:$0xf0]  ;;  %v12334_v7 = vor.u32 %v13532_v22, %v12333_v57  ;;  %v12445_v57 = vld [vmem:[%s13973_s7 + $0x1f10] sm:$0xf] }
 0x7e0   : > { %8061 = vmatpush.bf16.xpose.msra.mxu0 %v12526_v19  ;;  %8074 = vmatpush.bf16.xpose.msra.mxu1 %v12530_v48  ;;  %v13544_v19 = vld [vmem:[%s13973_s7 + $0x1ec4] sm:$0xf]  ;;  %v12346_v6 = vor.u32 %v13529_v4, %v12343_v25  ;;  %v13558_v22 = vld [vmem:[%s13973_s7 + $0x1f2c] sm:$0xf0]  ;;  %v13555_v4 = vld [vmem:[%s13973_s7 + $0x1f1c] sm:$0xf] }
 0x7e1   : > { %8087 = vmatpush.bf16.xpose.msra.mxu2 %v12534_v52  ;;  %8056 = vmatmul.bf16.vlgmr.msrb.gmra.mxu3 %v14157_v39  ;;  %v12399_v52 = vld [vmem:[%s13973_s7 + $0x1ee0] sm:$0xf0]  ;;  %v12455_v25 = vld [vmem:[%s13973_s7 + $0x1f38] sm:$0xf0] }
 0x7e2   : > { %8100 = vmatpush.bf16.xpose.msra.mxu3 %v12538_v56  ;;  %8043 = vmatmul.bf16.vlgmr.msrb.gmra.mxu2 %v14150_v34  ;;  %v12405_v56 = vld [vmem:[%s13973_s7 + $0x1ec8] sm:$0xf]  ;;  %v12402_v28 = vor.u32 %v13544_v19, %v12399_v52 }
 0x7e3   : > { %v12406_v62 = vor.u32 %v13549_v23, %v12405_v56  ;;  %v12554_v23 = vor.u32 %v13579_v49, %v12551_v58 }
 0x7e4   : > { %v7953_v13 = vpop.f32.mrf.mxu3  ;;  %v7916_v14 = vpop.f32.mrf.mxu0 }
 0x7e5   : > { %v7940_v5 = vpop.f32.mrf.mxu2  ;;  %v7929_v42 = vpop.f32.mrf.mxu1  ;;  %v12549_v14 = vld [vmem:[%s13973_s7 + $0x1fd8] sm:$0xf] }
 0x7e6   : > { %v7941_v15 = vadd.f32 %v7940_v5, %v7928_v61  ;;  %v12301_v61 = vld [vmem:[%s13973_s7 + $0x1e00] sm:$0xf]  ;;  %v12311_v5 = vld [vmem:[%s13973_s7 + $0x1e28] sm:$0xf0]  ;;  %v12306_v42 = vor.u32 %v13520_v31, %v12303_v11  ;;  %v13546_v31 = vld [vmem:[%s13973_s7 + $0x1ed4] sm:$0xf] }
 0x7e7   : > { %v12415_v11 = vld [vmem:[%s13973_s7 + $0x1ef0] sm:$0xf0] }
 0x7e8   : > { %8062 = vmatpush.bf16.xpose.msra.mxu0 %v12494_v8  ;;  %8075 = vmatpush.bf16.xpose.msra.mxu1 %v12498_v32  ;;  %v7954_v45 = vadd.f32 %v7953_v13, %v7941_v15  ;;  %v12365_v8 = vld [vmem:[%s13973_s7 + $0x1e80] sm:$0xf]  ;;  %v13578_v15 = vld [vmem:[%s13973_s7 + $0x1fd4] sm:$0xf] }
 0x7e9   : > { %8088 = vmatpush.bf16.xpose.msra.mxu2 %v12502_v43  ;;  %v13540_v32 = vld [vmem:[%s13973_s7 + $0x1e9c] sm:$0xf0]  ;;  %v13536_v43 = vld [vmem:[%s13973_s7 + $0x1e84] sm:$0xf]  ;;  %v12543_v13 = vld [vmem:[%s13973_s7 + $0x1ff0] sm:$0xf0] }
 0x7ea   : > { %8101 = vmatpush.bf16.xpose.msra.mxu3 %v12506_v12  ;;  %v8178_v48 = vadd.f32 %v7954_v45, %v338_v40  ;;  %v12367_v12 = vld [vmem:[%s13973_s7 + $0x1ea0] sm:$0xf0]  ;;  %v12366_v18 = vor.u32 %v13540_v32, %v12365_v8  ;;  %v13583_v40 = vld [vmem:[%s13973_s7 + $0x1ff4] sm:$0xf0]  ;;  %v12310_v45 = vor.u32 %v13525_v9, %v12309_v44  ;;  %v12546_v52 = vor.u32 %v13578_v15, %v12543_v13 }
 0x7eb   : > { %v12370_v24 = vor.u32 %v13536_v43, %v12367_v12  ;;  %v12550_v56 = vor.u32 %v13583_v40, %v12549_v14  ;;  %v12510_v8 = vor.u32 %v13574_v59, %v12509_v55  ;;  %v12421_v44 = vld [vmem:[%s13973_s7 + $0x1ed8] sm:$0xf]  ;;  %v12381_v40 = vld [vmem:[%s13973_s7 + $0x1e90] sm:$0xf]  ;;  %v13539_v55 = vld [vmem:[%s13973_s7 + $0x1e9c] sm:$0xf] }
 0x7ec   : > { %8194 = vst [vmem:[#allocation2 + $0x70] sm:$0xff] %v8178_v48  ;;  %v7955_v35 = vpop.f32.mrf.mxu3  ;;  %v13551_v9 = vld [vmem:[%s13973_s7 + $0x1ef4] sm:$0xf0]  ;;  %v12391_v59 = vld [vmem:[%s13973_s7 + $0x1eb8] sm:$0xf0] }
 0x7ed   : > { %v7942_v0 = vpop.f32.mrf.mxu2  ;;  %v12519_v35 = vld [vmem:[%s13973_s7 + $0x1fb8] sm:$0xf0]  ;;  %v12422_v13 = vor.u32 %v13551_v9, %v12421_v44 }
 0x7ee   : > { %v13575_v0 = vld [vmem:[%s13973_s7 + $0x1fb4] sm:$0xf0] }
 0x7f0   : > { %8063 = vmatpush.bf16.xpose.msra.mxu0 %v12462_v63  ;;  %8076 = vmatpush.bf16.xpose.msra.mxu1 %v12466_v29  ;;  %v13528_v63 = vld [vmem:[%s13973_s7 + $0x1e44] sm:$0xf] }
 0x7f1   : > { %8089 = vmatpush.bf16.xpose.msra.mxu2 %v12470_v60  ;;  %v12335_v29 = vld [vmem:[%s13973_s7 + $0x1e60] sm:$0xf0]  ;;  %v12341_v60 = vld [vmem:[%s13973_s7 + $0x1e48] sm:$0xf] }
 0x7f2   : > { %8102 = vmatpush.bf16.xpose.msra.mxu3 %v12474_v54  ;;  %v13533_v54 = vld [vmem:[%s13973_s7 + $0x1e64] sm:$0xf0]  ;;  %v12338_v36 = vor.u32 %v13528_v63, %v12335_v29  ;;  %v13554_v63 = vld [vmem:[%s13973_s7 + $0x1f14] sm:$0xf] }
 0x7f3   : > { %v12342_v2 = vor.u32 %v13533_v54, %v12341_v60  ;;  %v12447_v29 = vld [vmem:[%s13973_s7 + $0x1f30] sm:$0xf0]  ;;  %v12453_v60 = vld [vmem:[%s13973_s7 + $0x1f18] sm:$0xf] }
 0x7f4   : > { %v13559_v54 = vld [vmem:[%s13973_s7 + $0x1f34] sm:$0xf0] }
 0x7f8   : > { %8064 = vmatpush.bf16.xpose.msra.mxu0 %v12430_v10  ;;  %8077 = vmatpush.bf16.xpose.msra.mxu1 %v12434_v33  ;;  %v13521_v10 = vld [vmem:[%s13973_s7 + $0x1e0c] sm:$0xf]  ;;  %v12541_v33 = vld [vmem:[%s13973_s7 + $0x1fd0] sm:$0xf] }
 0x7f9   : > { %8090 = vmatpush.bf16.xpose.msra.mxu2 %v12438_v37  ;;  %v13582_v37 = vld [vmem:[%s13973_s7 + $0x1fec] sm:$0xf0]  ;;  %v12314_v19 = vor.u32 %v13521_v10, %v12311_v5 }
 0x7fa   : > { %8103 = vmatpush.bf16.xpose.msra.mxu3 %v12442_v51  ;;  %v12302_v51 = vor.u32 %v13524_v27, %v12301_v61  ;;  %v12542_v48 = vor.u32 %v13582_v37, %v12541_v33  ;;  %v12413_v61 = vld [vmem:[%s13973_s7 + $0x1ed0] sm:$0xf]  ;;  %v13547_v33 = vld [vmem:[%s13973_s7 + $0x1edc] sm:$0xf] }
 0x7fb   : > { %v13550_v27 = vld [vmem:[%s13973_s7 + $0x1eec] sm:$0xf0]  ;;  %v12423_v37 = vld [vmem:[%s13973_s7 + $0x1ef8] sm:$0xf0] }
 0x7fc   : > { %v12414_v15 = vor.u32 %v13550_v27, %v12413_v61  ;;  %v12426_v14 = vor.u32 %v13547_v33, %v12423_v37  ;;  %v339_v37 = vld [vmem:[#allocation2 + $0x78] sm:$0xff] }
 0x800   : > { %8065 = vmatpush.bf16.xpose.msra.mxu0 %v12398_v1  ;;  %8078 = vmatpush.bf16.xpose.msra.mxu1 %v12402_v28  ;;  %v13570_v1 = vld [vmem:[%s13973_s7 + $0x1f94] sm:$0xf] }
 0x801   : > { %8091 = vmatpush.bf16.xpose.msra.mxu2 %v12406_v62  ;;  %v12511_v28 = vld [vmem:[%s13973_s7 + $0x1fb0] sm:$0xf0]  ;;  %v12517_v62 = vld [vmem:[%s13973_s7 + $0x1f98] sm:$0xf] }
 0x802   : > { %8104 = vmatpush.bf16.xpose.msra.mxu3 %v12410_v26  ;;  %v13571_v26 = vld [vmem:[%s13973_s7 + $0x1f9c] sm:$0xf]  ;;  %v12514_v32 = vor.u32 %v13570_v1, %v12511_v28  ;;  %v12518_v43 = vor.u32 %v13575_v0, %v12517_v62  ;;  %v12394_v0 = vor.u32 %v13539_v55, %v12391_v59 }
 0x803   : > { %v12522_v12 = vor.u32 %v13571_v26, %v12519_v35  ;;  %v12349_v26 = vld [vmem:[%s13973_s7 + $0x1e50] sm:$0xf] }
 0x804   : > { %v13534_v35 = vld [vmem:[%s13973_s7 + $0x1e6c] sm:$0xf0] }
 0x808   : > { %8066 = vmatpush.bf16.xpose.msra.mxu0 %v12366_v18  ;;  %8079 = vmatpush.bf16.xpose.msra.mxu1 %v12370_v24  ;;  %v13567_v18 = vld [vmem:[%s13973_s7 + $0x1f74] sm:$0xf0]  ;;  %v12482_v24 = vor.u32 %v13562_v41, %v12479_v50  ;;  %v13531_v41 = vld [vmem:[%s13973_s7 + $0x1e5c] sm:$0xf] }
 0x809   : > { %8092 = vmatpush.bf16.xpose.msra.mxu2 %v12374_v53  ;;  %v12359_v50 = vld [vmem:[%s13973_s7 + $0x1e78] sm:$0xf0] }
 0x80a   : > { %8105 = vmatpush.bf16.xpose.msra.mxu3 %v12378_v47 }
 0x810   : > { %8067 = vmatpush.bf16.xpose.msra.mxu0 %v12334_v7  ;;  %8080 = vmatpush.bf16.xpose.msra.mxu1 %v12338_v36  ;;  %v12446_v7 = vor.u32 %v13558_v22, %v12445_v57  ;;  %v12450_v36 = vor.u32 %v13554_v63, %v12447_v29  ;;  %v12325_v57 = vld [vmem:[%s13973_s7 + $0x1e18] sm:$0xf]  ;;  %v13523_v63 = vld [vmem:[%s13973_s7 + $0x1e1c] sm:$0xf] }
 0x811   : > { %8093 = vmatpush.bf16.xpose.msra.mxu2 %v12342_v2  ;;  %v12454_v2 = vor.u32 %v13559_v54, %v12453_v60  ;;  %v13527_v22 = vld [vmem:[%s13973_s7 + $0x1e34] sm:$0xf0]  ;;  %v12327_v29 = vld [vmem:[%s13973_s7 + $0x1e38] sm:$0xf0] }
 0x812   : > { %8106 = vmatpush.bf16.xpose.msra.mxu3 %v12346_v6  ;;  %v12458_v6 = vor.u32 %v13555_v4, %v12455_v25  ;;  %v12326_v4 = vor.u32 %v13527_v22, %v12325_v57  ;;  %v12330_v25 = vor.u32 %v13523_v63, %v12327_v29 }
 0x818   : > { %8068 = vmatpush.bf16.xpose.msra.mxu0 %v12302_v51  ;;  %8081 = vmatpush.bf16.xpose.msra.mxu1 %v12306_v42  ;;  %v12418_v51 = vor.u32 %v13546_v31, %v12415_v11  ;;  %v13542_v42 = vld [vmem:[%s13973_s7 + $0x1eac] sm:$0xf0] }
 0x819   : > { %8094 = vmatpush.bf16.xpose.msra.mxu2 %v12310_v45  ;;  %v13538_v45 = vld [vmem:[%s13973_s7 + $0x1e94] sm:$0xf]  ;;  %v12382_v1 = vor.u32 %v13542_v42, %v12381_v40 }
 0x81a   : > { %8107 = vmatpush.bf16.xpose.msra.mxu3 %v12314_v19  ;;  %v12383_v19 = vld [vmem:[%s13973_s7 + $0x1eb0] sm:$0xf0] }
 0x81b   : > { %v12386_v28 = vor.u32 %v13538_v45, %v12383_v19 }
 0x81c   : > { %v16327_v10 = vpop.f32.mrf.mxu0  ;;  %v16329_v5 = vpop.f32.mrf.mxu1 }
 0x81f   : > { %8069 = vmatmul.bf16.vlgmr.msra.gmra.mxu0 %v14089_v16  ;;  %8082 = vmatmul.bf16.vlgmr.msra.gmra.mxu1 %v14096_v21  ;;  %v12485_v16 = vld [vmem:[%s13973_s7 + $0x1f58] sm:$0xf]  ;;  %v12487_v21 = vld [vmem:[%s13973_s7 + $0x1f78] sm:$0xf0] }
 0x820   : > { %8113 = vmatpush.bf16.xpose.msrb.mxu0 %v12542_v48  ;;  %8126 = vmatpush.bf16.xpose.msrb.mxu1 %v12546_v52  ;;  %v12486_v53 = vor.u32 %v13567_v18, %v12485_v16  ;;  %v12389_v48 = vld [vmem:[%s13973_s7 + $0x1e98] sm:$0xf]  ;;  %v12350_v16 = vor.u32 %v13534_v35, %v12349_v26 }
 0x821   : > { %8139 = vmatpush.bf16.xpose.msrb.mxu2 %v12550_v56  ;;  %8108 = vmatmul.bf16.vlgmr.msra.gmra.mxu3 %v14091_v17  ;;  %v12478_v17 = vor.u32 %v13566_v46, %v12477_v20  ;;  %v13543_v52 = vld [vmem:[%s13973_s7 + $0x1eb4] sm:$0xf0] }
 0x822   : > { %8152 = vmatpush.bf16.xpose.msrb.mxu3 %v12554_v23  ;;  %8095 = vmatmul.bf16.vlgmr.msra.gmra.mxu2 %v14078_v3  ;;  %v13563_v3 = vld [vmem:[%s13973_s7 + $0x1f5c] sm:$0xf]  ;;  %v12390_v62 = vor.u32 %v13543_v52, %v12389_v48  ;;  %v12357_v20 = vld [vmem:[%s13973_s7 + $0x1e58] sm:$0xf] }
 0x823   : > { %v12490_v47 = vor.u32 %v13563_v3, %v12487_v21  ;;  %v13535_v46 = vld [vmem:[%s13973_s7 + $0x1e74] sm:$0xf0]  ;;  %v12362_v21 = vor.u32 %v13531_v41, %v12359_v50 }
 0x824   : > { %v8005_v58 = vpop.f32.mrf.mxu3  ;;  %v7968_v56 = vpop.f32.mrf.mxu0  ;;  %v12358_v3 = vor.u32 %v13535_v46, %v12357_v20 }
 0x825   : > { %v7992_v49 = vpop.f32.mrf.mxu2  ;;  %v7981_v23 = vpop.f32.mrf.mxu1 }
 0x828   : > { %8114 = vmatpush.bf16.xpose.msrb.mxu0 %v12510_v8  ;;  %8127 = vmatpush.bf16.xpose.msrb.mxu1 %v12514_v32  ;;  %v13530_v8 = vld [vmem:[%s13973_s7 + $0x1e54] sm:$0xf] }
 0x829   : > { %8140 = vmatpush.bf16.xpose.msrb.mxu2 %v12518_v43 }
 0x82a   : > { %8153 = vmatpush.bf16.xpose.msrb.mxu3 %v12522_v12  ;;  %v12351_v12 = vld [vmem:[%s13973_s7 + $0x1e70] sm:$0xf0] }
 0x82b   : > { %v12354_v18 = vor.u32 %v13530_v8, %v12351_v12 }
 0x82c   : > { %v8007_v43 = vpop.f32.mrf.mxu3 }
 0x82d   : > { %v7994_v32 = vpop.f32.mrf.mxu2 }
 0x830   : > { %8115 = vmatpush.bf16.xpose.msrb.mxu0 %v12478_v17  ;;  %8128 = vmatpush.bf16.xpose.msrb.mxu1 %v12482_v24  ;;  %v12317_v17 = vld [vmem:[%s13973_s7 + $0x1e10] sm:$0xf] }
 0x831   : > { %8141 = vmatpush.bf16.xpose.msrb.mxu2 %v12486_v53  ;;  %v13526_v24 = vld [vmem:[%s13973_s7 + $0x1e2c] sm:$0xf0]  ;;  %v13522_v53 = vld [vmem:[%s13973_s7 + $0x1e14] sm:$0xf] }
 0x832   : > { %8154 = vmatpush.bf16.xpose.msrb.mxu3 %v12490_v47  ;;  %v12319_v47 = vld [vmem:[%s13973_s7 + $0x1e30] sm:$0xf0]  ;;  %v12318_v60 = vor.u32 %v13526_v24, %v12317_v17 }
 0x833   : > { %v12322_v54 = vor.u32 %v13522_v53, %v12319_v47 }
 0x838   : > { %8116 = vmatpush.bf16.xpose.msrb.mxu0 %v12446_v7  ;;  %8129 = vmatpush.bf16.xpose.msrb.mxu1 %v12450_v36  ;;  %v7980_v7 = vadd.f32 %v16329_v5, %v16327_v10 }
 0x839   : > { %8142 = vmatpush.bf16.xpose.msrb.mxu2 %v12454_v2 }
 0x83a   : > { %8155 = vmatpush.bf16.xpose.msrb.mxu3 %v12458_v6  ;;  %v7993_v36 = vadd.f32 %v7992_v49, %v7980_v7 }
 0x83c   : > { %v8006_v2 = vadd.f32 %v8005_v58, %v7993_v36 }
 0x840   : > { %8117 = vmatpush.bf16.xpose.msrb.mxu0 %v12414_v15  ;;  %8130 = vmatpush.bf16.xpose.msrb.mxu1 %v12418_v51 }
 0x841   : > { %8143 = vmatpush.bf16.xpose.msrb.mxu2 %v12422_v13 }
 0x842   : > { %8156 = vmatpush.bf16.xpose.msrb.mxu3 %v12426_v14 }
 0x848   : > { %8118 = vmatpush.bf16.xpose.msrb.mxu0 %v12382_v1  ;;  %8131 = vmatpush.bf16.xpose.msrb.mxu1 %v12386_v28 }
 0x849   : > { %8144 = vmatpush.bf16.xpose.msrb.mxu2 %v12390_v62  ;;  %v340_v62 = vld [vmem:[#allocation2 + $0x28] sm:$0xff] }
 0x84a   : > { %8157 = vmatpush.bf16.xpose.msrb.mxu3 %v12394_v0 }
 0x850   : > { %8119 = vmatpush.bf16.xpose.msrb.mxu0 %v12350_v16  ;;  %8132 = vmatpush.bf16.xpose.msrb.mxu1 %v12354_v18 }
 0x851   : > { %8145 = vmatpush.bf16.xpose.msrb.mxu2 %v12358_v3 }
 0x852   : > { %8158 = vmatpush.bf16.xpose.msrb.mxu3 %v12362_v21 }
 0x858   : > { %8120 = vmatpush.bf16.xpose.msrb.mxu0 %v12318_v60  ;;  %8133 = vmatpush.bf16.xpose.msrb.mxu1 %v12322_v54 }
 0x859   : > { %8146 = vmatpush.bf16.xpose.msrb.mxu2 %v12326_v4 }
 0x85a   : > { %8159 = vmatpush.bf16.xpose.msrb.mxu3 %v12330_v25 }
 0x85c   : > { %v8018_v6 = vpop.f32.mrf.mxu0  ;;  %v8031_v27 = vpop.f32.mrf.mxu1 }
 0x85d   : > { %v8019_v61 = vadd.f32 %v8018_v6, %v8006_v2 }
 0x85f   : > { %8121 = vmatmul.bf16.vlgmr.msrb.gmra.mxu0 %v14145_v30  ;;  %8134 = vmatmul.bf16.vlgmr.msrb.gmra.mxu1 %v14155_v38  ;;  %v8032_v31 = vadd.f32 %v8031_v27, %v8019_v61 }
 0x860   : > { %8147 = vmatmul.bf16.vlgmr.msrb.gmra.mxu2 %v14150_v34 }
 0x861   : > { %8160 = vmatmul.bf16.vlgmr.msrb.gmra.mxu3 %v14157_v39 }
 0x864   : > { %v8057_v9 = vpop.f32.mrf.mxu3  ;;  %v8020_v33 = vpop.f32.mrf.mxu0 }
 0x865   : > { %v8044_v11 = vpop.f32.mrf.mxu2  ;;  %v8033_v10 = vpop.f32.mrf.mxu1 }
 0x866   : > { %v8045_v44 = vadd.f32 %v8044_v11, %v8032_v31 }
 0x868   : > { %v8058_v5 = vadd.f32 %v8057_v9, %v8045_v44 }
 0x86a   : > { %v8179_v30 = vadd.f32 %v8058_v5, %v339_v37 }
 0x86c   : > { %8195 = vst [vmem:[#allocation2 + $0x78] sm:$0xff] %v8179_v30  ;;  %v8059_v15 = vpop.f32.mrf.mxu3 }
 0x86d   : > { %v8046_v38 = vpop.f32.mrf.mxu2 }
 0x89c   : > { %v8070_v34 = vpop.f32.mrf.mxu0  ;;  %v8083_v51 = vpop.f32.mrf.mxu1 }
 0x89d   : > { %v8084_v49 = vadd.f32 %v8083_v51, %v8070_v34 }
 0x8a4   : > { %v8109_v13 = vpop.f32.mrf.mxu3  ;;  %v8072_v14 = vpop.f32.mrf.mxu0 }
 0x8a5   : > { %v8096_v39 = vpop.f32.mrf.mxu2  ;;  %v8085_v40 = vpop.f32.mrf.mxu1 }
 0x8a6   : > { %v8097_v58 = vadd.f32 %v8096_v39, %v8084_v49 }
 0x8a8   : > { %v8110_v19 = vadd.f32 %v8109_v13, %v8097_v58 }
 0x8ac   : > { %v8111_v45 = vpop.f32.mrf.mxu3 }
 0x8ad   : > { %v8098_v42 = vpop.f32.mrf.mxu2 }
 0x8dc   : > { %v8122_v48 = vpop.f32.mrf.mxu0  ;;  %v8135_v52 = vpop.f32.mrf.mxu1 }
 0x8dd   : > { %v8123_v56 = vadd.f32 %v8122_v48, %v8110_v19 }
 0x8df   : > { %v8136_v23 = vadd.f32 %v8135_v52, %v8123_v56 }
 0x8e3   : > { %v8148_v55 = vpop.f32.mrf.mxu2 }
 0x8e4   : > { %v8149_v59 = vadd.f32 %v8148_v55, %v8136_v23  ;;  %v8161_v1 = vpop.f32.mrf.mxu3  ;;  %v8124_v28 = vpop.f32.mrf.mxu0 }
 0x8e5   : > { %v8137_v0 = vpop.f32.mrf.mxu1 }
 0x8e6   : > { %v8162_v26 = vadd.f32 %v8161_v1, %v8149_v59 }
 0x8e8   : > { %v8180_v35 = vadd.f32 %v8162_v26, %v340_v62  ;;  %8200 = sbr.rel (%p12555_p1) target bundleno = 2443 (0x98b), region = 64 }
 0x8ea   : > { %8196 = vst [vmem:[#allocation2 + $0x28] sm:$0xff] %v8180_v35 }
 0x8eb   : > { %v8150_v8 = vpop.f32.mrf.mxu2 }
 0x8ec   : > { %v8163_v32 = vpop.f32.mrf.mxu3 }
 0x8ed   : > { %v8217_v43 = vld [vmem:[#allocation8] sm:$0xff]  ;;  %v8201_v46 = vld [vmem:[#allocation2 + $0x30] sm:$0xff]  ;;  %v8203_v16 = vld [vmem:[#allocation2 + $0x58] sm:$0xff]  ;;  %vm8359_vm0 = vcmask 7168  }
 0x8ee   : > { %v8221_v12 = vperm.slane %v8217_v43, 0  ;;  %v8222_v20 = vperm.slane %v8217_v43, 1  ;;  %v8202_v41 = vld [vmem:[#allocation2] sm:$0xff]  ;;  %v8223_v50 = vperm.slane %v8217_v43, 2  ;;  %v8224_v18 = vperm.slane %v8217_v43, 3  ;;  %v8204_v3 = vld [vmem:[#allocation2 + $0x18] sm:$0xff] }
 0x8ef   : > { %v16364_v24 = vld [vmem:[#allocation9] sm:$0xff]  ;;  %v8225_v53 = vperm.slane %v8217_v43, 4  ;;  %v8226_v22 = vperm.slane %v8217_v43, 5  ;;  %v8206_v29 = vld [vmem:[#allocation2 + $0x68] sm:$0xff]  ;;  %v8227_v36 = vperm.slane %v8217_v43, 6  ;;  %v8228_v31 = vperm.slane %v8217_v43, 7 }
 0x8f0   : > { %v8253_v21 = vadd.f32 %v8221_v12, %v8201_v46  ;;  %v8254_v17 = vadd.f32 %v8222_v20, %v8202_v41  ;;  %v8255_v47 = vadd.f32 %v8223_v50, %v8203_v16  ;;  %v8205_v57 = vld [vmem:[#allocation2 + $0x50] sm:$0xff]  ;;  %v8256_v63 = vadd.f32 %v8224_v18, %v8204_v3  ;;  %v8207_v27 = vld [vmem:[#allocation2 + $0x8] sm:$0xff]  ;;  %v8209_v30 = vld [vmem:[#allocation2 + $0x40] sm:$0xff] }
 0x8f1   : > { %v8289_v4 = vperm.slane %v16364_v24, 0  ;;  %v8290_v25 = vperm.slane %v16364_v24, 1  ;;  %v16368_v7 = vld [vmem:[#allocation8 + $0x8] sm:$0xff]  ;;  %v8257_v2 = vadd.f32 %v8225_v53, %v8205_v57  ;;  %v8291_v61 = vperm.slane %v16364_v24, 2  ;;  %v8210_v14 = vld [vmem:[#allocation2 + $0x20] sm:$0xff]  ;;  %v8212_v62 = vld [vmem:[#allocation2 + $0x38] sm:$0xff] }
 0x8f2   : > { %v8269_v60 = vmax.f32 %v8253_v21, 0.0  ;;  %v8270_v54 = vmax.f32 %v8254_v17, 0.0  ;;  %v8271_v6 = vmax.f32 %v8255_v47, 0.0  ;;  %v8258_v11 = vadd.f32 %v8226_v22, %v8206_v29  ;;  %v8208_v44 = vld [vmem:[#allocation2 + $0x48] sm:$0xff]  ;;  %v8211_v48 = vld [vmem:[#allocation2 + $0x10] sm:$0xff]  ;;  %v8286_v28 = vld [vmem:[#allocation9 + $0x8] sm:$0xff] }
 0x8f3   : > { %v8272_v9 = vmax.f32 %v8256_v63, 0.0  ;;  %v8292_v33 = vperm.slane %v16364_v24, 3  ;;  %v8229_v5 = vperm.slane %v16368_v7, 0  ;;  %v8259_v38 = vadd.f32 %v8227_v36, %v8207_v27  ;;  %v8213_v12 = vld [vmem:[#allocation2 + $0x60] sm:$0xff]  ;;  %v8214_v3 = vld [vmem:[#allocation2 + $0x70] sm:$0xff]  ;;  %v8215_v22 = vld [vmem:[#allocation2 + $0x78] sm:$0xff] }
 0x8f4   : > { %v8321_v37 = vmul.f32 %v8289_v4, %v8269_v60  ;;  %v8322_v10 = vmul.f32 %v8290_v25, %v8270_v54  ;;  %v8273_v15 = vmax.f32 %v8257_v2, 0.0  ;;  %v8293_v34 = vperm.slane %v16364_v24, 4  ;;  %v8216_v36 = vld [vmem:[#allocation2 + $0x28] sm:$0xff] }
 0x8f5   : > { %v8323_v51 = vmul.f32 %v8291_v61, %v8271_v6  ;;  %v8230_v39 = vperm.slane %v16368_v7, 1  ;;  %v8260_v13 = vadd.f32 %v8228_v31, %v8208_v44  ;;  %v8274_v40 = vmax.f32 %v8258_v11, 0.0 }
 0x8f6   : > { %v8294_v42 = vperm.slane %v16364_v24, 5  ;;  %v8324_v45 = vmul.f32 %v8292_v33, %v8272_v9  ;;  %v8337_v49 = vadd.f32 %v8322_v10, %v8321_v37  ;;  %v8231_v58 = vperm.slane %v16368_v7, 2 }
 0x8f7   : > { %v8261_v19 = vadd.f32 %v8229_v5, %v8209_v30  ;;  %v8275_v52 = vmax.f32 %v8259_v38, 0.0  ;;  %v8295_v56 = vperm.slane %v16364_v24, 6  ;;  %v8325_v23 = vmul.f32 %v8293_v34, %v8273_v15 }
 0x8f8   : > { %v8338_v55 = vadd.f32 %v8337_v49, %v8323_v51  ;;  %v8232_v59 = vperm.slane %v16368_v7, 3  ;;  %v8262_v1 = vadd.f32 %v8230_v39, %v8210_v14  ;;  %v8276_v0 = vmax.f32 %v8260_v13, 0.0 }
 0x8f9   : > { %v8296_v26 = vperm.slane %v16364_v24, 7  ;;  %v8326_v35 = vmul.f32 %v8294_v42, %v8274_v40  ;;  %v8233_v32 = vperm.slane %v16368_v7, 4  ;;  %v8263_v43 = vadd.f32 %v8231_v58, %v8211_v48 }
 0x8fa   : > { %v8339_v8 = vadd.f32 %v8338_v55, %v8324_v45  ;;  %v8277_v20 = vmax.f32 %v8261_v19, 0.0  ;;  %v8297_v46 = vperm.slane %v8286_v28, 0  ;;  %v8327_v41 = vmul.f32 %v8295_v56, %v8275_v52  ;;  %v13653_v52 = vld [vmem:[#allocation3] ss:$0 sm:$0xff] }
 0x8fb   : > { %v8234_v16 = vperm.slane %v16368_v7, 5  ;;  %v8264_v18 = vadd.f32 %v8232_v59, %v8212_v62  ;;  %v8278_v21 = vmax.f32 %v8262_v1, 0.0  ;;  %v8298_v17 = vperm.slane %v8286_v28, 1 }
 0x8fc   : > { %v8340_v50 = vadd.f32 %v8339_v8, %v8325_v23  ;;  %v8328_v53 = vmul.f32 %v8296_v26, %v8276_v0  ;;  %v8235_v24 = vperm.slane %v16368_v7, 6  ;;  %v8265_v57 = vadd.f32 %v8233_v32, %v8213_v12 }
 0x8fd   : > { %v8279_v63 = vmax.f32 %v8263_v43, 0.0  ;;  %v8299_v29 = vperm.slane %v8286_v28, 2  ;;  %v8329_v60 = vmul.f32 %v8297_v46, %v8277_v20  ;;  %v8236_v4 = vperm.slane %v16368_v7, 7 }
 0x8fe   : > { %v8341_v47 = vadd.f32 %v8340_v50, %v8326_v35  ;;  %v8266_v25 = vadd.f32 %v8234_v16, %v8214_v3  ;;  %v8280_v2 = vmax.f32 %v8264_v18, 0.0  ;;  %v8300_v6 = vperm.slane %v8286_v28, 3 }
 0x8ff   : > { %v8330_v61 = vmul.f32 %v8298_v17, %v8278_v21  ;;  %v8267_v31 = vadd.f32 %v8235_v24, %v8215_v22  ;;  %v8281_v11 = vmax.f32 %v8265_v57, 0.0  ;;  %v8301_v44 = vperm.slane %v8286_v28, 4 }
 0x900   : > { %v8342_v54 = vadd.f32 %v8341_v47, %v8327_v41  ;;  %v8331_v9 = vmul.f32 %v8299_v29, %v8279_v63  ;;  %v8268_v37 = vadd.f32 %v8236_v4, %v8216_v36  ;;  %v8282_v10 = vmax.f32 %v8266_v25, 0.0 }
 0x901   : > { %v8302_v5 = vperm.slane %v8286_v28, 5  ;;  %v8332_v30 = vmul.f32 %v8300_v6, %v8280_v2  ;;  %v8283_v15 = vmax.f32 %v8267_v31, 0.0  ;;  %v8303_v34 = vperm.slane %v8286_v28, 6 }
 0x902   : > { %v8343_v27 = vadd.f32 %v8342_v54, %v8328_v53  ;;  %v8333_v51 = vmul.f32 %v8301_v44, %v8281_v11  ;;  %v8284_v39 = vmax.f32 %v8268_v37, 0.0  ;;  %v8304_v13 = vperm.slane %v8286_v28, 7 }
 0x903   : > { %v8334_v14 = vmul.f32 %v8302_v5, %v8282_v10  ;;  %v8335_v42 = vmul.f32 %v8303_v34, %v8283_v15 }
 0x904   : > { %v8344_v33 = vadd.f32 %v8343_v27, %v8329_v60  ;;  %v8336_v49 = vmul.f32 %v8304_v13, %v8284_v39 }
 0x906   : > { %v8345_v38 = vadd.f32 %v8344_v33, %v8330_v61 }
 0x908   : > { %v8346_v7 = vadd.f32 %v8345_v38, %v8331_v9 }
 0x90a   : > { %v8347_v40 = vadd.f32 %v8346_v7, %v8332_v30 }
 0x90c   : > { %v8348_v45 = vadd.f32 %v8347_v40, %v8333_v51 }
 0x90e   : > { %v8349_v58 = vadd.f32 %v8348_v45, %v8334_v14 }
 0x910   : > { %v8350_v19 = vadd.f32 %v8349_v58, %v8335_v42 }
 0x912   : > { %v8351_v48 = vadd.f32 %v8350_v19, %v8336_v49 }
 0x914   : > { %8352 = vadd.xlane.f32.xlu0 %v8351_v48 }
 0x987   : > { %v8353_v56 = vpop.xlane.xlu0 %8352 }
 0x988   : > { %v8358_v23 = vadd.f32 %v13653_v52, %v8353_v56 }
 0x98a   : > { %8360 = vst.msk [vmem:[%s16405_s5] sm:$0xff] %vm8359_vm0, %v8358_v23 }
 0x98b PF: > { %p21_p4 = scmp.ge.s32.totalorder %s13908_s11, 4   ;;  %s16409_s20 = smov %s13812_s21 }
 0x98c   : > { %s16410_s21 = smov %s13816_s22  ;;  %s16411_s22 = smov %s13921_s15 }
 0x98d   : > { %s16412_s23 = smov %s13908_s11  ;;  %23 = sbr.rel (!%p21_p4) target bundleno = 9 (0x9), region = 105 }
 0x992   :  { %8372 = vsyncpa [#allocation5], 1 }
 0x993   :  { %8374 = vsyncpa [#allocation5 + $0x1], 1 }
 0x994   :  { %8375 = vsyncpa [#allocation7], 1 }
 0x995   :  { %8377 = vsyncpa [#allocation7 + $0x1], 1 }
 0x996   :  { %8378 = vsyncpa [#allocation10], 1 }

</bundles_post_ra>
